<compile_context>
chip_gen: v5e
topology: v5e:2x2
jax: 0.10.0
libtpu: 0.0.40
codegen_flags: <defaults>
</compile_context>

<pallas_src>
import functools

import jax
import jax.numpy as jnp
from jax.experimental import pallas as pl
from jax.experimental.pallas import tpu as pltpu

EPS = 1e-5
LANE = 128


def _round_up(x, m):
    return (x + m - 1) // m * m


# ---------------------------------------------------------------------------
# Pallas kernels
# ---------------------------------------------------------------------------
def conv3x3_bn_kernel(x_ref, w_ref, g_ref, b_ref, m_ref,
                      o_ref, sum_ref, sq_ref,
                      *, Wp, G, Mo, count, relu):
    """Fused 3x3 conv (stride 1, pad 1) + training-mode BatchNorm (+ ReLU)."""
    p = pl.program_id(0)   # phase: 0 = accumulate stats, 1 = normalize+write
    n = pl.program_id(1)   # image

    @pl.when((p == 0) & (n == 0))
    def _init():
        sum_ref[...] = jnp.zeros_like(sum_ref)
        sq_ref[...] = jnp.zeros_like(sq_ref)

    interior = m_ref[...] > 0.0                      # (Mo, 1): real pixels

    co = o_ref.shape[-1]
    acc = jnp.zeros((Mo, co), jnp.float32)
    # 3x3 conv as 9 shifted lane-dense matmuls over the guarded flat layout.
    for kh in range(3):
        for kw in range(3):
            s = (kh - 1) * Wp + (kw - 1)
            xs = x_ref[pl.ds(G + s, Mo), :]          # (Mo, Cin_p)
            acc += jnp.dot(xs, w_ref[kh * 3 + kw],
                           preferred_element_type=jnp.float32)
    y = jnp.where(interior, acc, 0.0)                # zero border / dead rows

    @pl.when(p == 0)
    def _stats():
        sum_ref[...] += jnp.sum(y, axis=0, keepdims=True)
        sq_ref[...] += jnp.sum(y * y, axis=0, keepdims=True)

    @pl.when(p == 1)
    def _normalize_and_write():
        inv = 1.0 / count
        mean = sum_ref[...] * inv                    # (1, C)
        var = sq_ref[...] * inv - mean * mean        # biased batch variance
        scale = g_ref[...] * jax.lax.rsqrt(var + EPS)
        shift = b_ref[...] - mean * scale
        out = y * scale + shift
        if relu:
            out = jnp.maximum(out, 0.0)
        out = jnp.where(interior, out, 0.0)
        zg = jnp.zeros((G, co), o_ref.dtype)
        o_ref[pl.ds(0, G), :] = zg                   # zero guard rows so the
        o_ref[pl.ds(G + Mo, G), :] = zg              # next layer reads zeros
        o_ref[pl.ds(G, Mo), :] = out.astype(o_ref.dtype)


def shortcut_bn_add_kernel(x_ref, w_ref, g_ref, b_ref, m_ref, h_ref,
                           o_ref, sum_ref, sq_ref,
                           *, G, Mo, count):
    """Fused shortcut: 1x1 conv + training-mode BN + residual add."""
    p = pl.program_id(0)
    n = pl.program_id(1)

    @pl.when((p == 0) & (n == 0))
    def _init():
        sum_ref[...] = jnp.zeros_like(sum_ref)
        sq_ref[...] = jnp.zeros_like(sq_ref)

    interior = m_ref[...] > 0.0
    co = o_ref.shape[-1]
    xs = x_ref[pl.ds(G, Mo), :]                      # center tap only
    y = jnp.dot(xs, w_ref[...], preferred_element_type=jnp.float32)
    y = jnp.where(interior, y, 0.0)

    @pl.when(p == 0)
    def _stats():
        sum_ref[...] += jnp.sum(y, axis=0, keepdims=True)
        sq_ref[...] += jnp.sum(y * y, axis=0, keepdims=True)

    @pl.when(p == 1)
    def _finalize():
        inv = 1.0 / count
        mean = sum_ref[...] * inv
        var = sq_ref[...] * inv - mean * mean
        scale = g_ref[...] * jax.lax.rsqrt(var + EPS)
        shift = b_ref[...] - mean * scale
        out = y * scale + shift + h_ref[pl.ds(G, Mo), :]
        out = jnp.where(interior, out, 0.0)
        zg = jnp.zeros((G, co), o_ref.dtype)
        o_ref[pl.ds(0, G), :] = zg
        o_ref[pl.ds(G + Mo, G), :] = zg
        o_ref[pl.ds(G, Mo), :] = out.astype(o_ref.dtype)


# ---------------------------------------------------------------------------
# Pallas wrappers
# ---------------------------------------------------------------------------
def conv3x3_bn_act(x, w, gamma, beta, mask, *, Wp, G, count, relu=True):
    N, Mtot, Cin_p = x.shape
    Co = w.shape[-1]
    Mo = Mtot - 2 * G
    kernel = functools.partial(conv3x3_bn_kernel, Wp=Wp, G=G, Mo=Mo,
                               count=count, relu=relu)
    return pl.pallas_call(
        kernel,
        out_shape=jax.ShapeDtypeStruct((N, Mtot, Co), jnp.float32),
        grid=(2, N),
        in_specs=[
            pl.BlockSpec((None, Mtot, Cin_p), lambda p, n: (n, 0, 0)),
            pl.BlockSpec((9, Cin_p, Co), lambda p, n: (0, 0, 0)),
            pl.BlockSpec((1, Co), lambda p, n: (0, 0)),
            pl.BlockSpec((1, Co), lambda p, n: (0, 0)),
            pl.BlockSpec((Mo, 1), lambda p, n: (0, 0)),
        ],
        # phase 0 never writes -> map all its steps to block 0 (no garbage
        # writebacks); phase 1 writes image n.
        out_specs=pl.BlockSpec((None, Mtot, Co), lambda p, n: (p * n, 0, 0)),
        scratch_shapes=[pltpu.VMEM((1, Co), jnp.float32),
                        pltpu.VMEM((1, Co), jnp.float32)],
        compiler_params=pltpu.CompilerParams(
            dimension_semantics=("arbitrary", "arbitrary")),
    )(x, w, gamma, beta, mask)


def shortcut_bn_add(x, w, gamma, beta, mask, h, *, G, count):
    N, Mtot, Cin_p = x.shape
    Co = w.shape[-1]
    Mo = Mtot - 2 * G
    kernel = functools.partial(shortcut_bn_add_kernel, G=G, Mo=Mo, count=count)
    return pl.pallas_call(
        kernel,
        out_shape=jax.ShapeDtypeStruct((N, Mtot, Co), jnp.float32),
        grid=(2, N),
        in_specs=[
            pl.BlockSpec((None, Mtot, Cin_p), lambda p, n: (n, 0, 0)),
            pl.BlockSpec((Cin_p, Co), lambda p, n: (0, 0)),
            pl.BlockSpec((1, Co), lambda p, n: (0, 0)),
            pl.BlockSpec((1, Co), lambda p, n: (0, 0)),
            pl.BlockSpec((Mo, 1), lambda p, n: (0, 0)),
            pl.BlockSpec((None, Mtot, Co), lambda p, n: (p * n, 0, 0)),
        ],
        out_specs=pl.BlockSpec((None, Mtot, Co), lambda p, n: (p * n, 0, 0)),
        scratch_shapes=[pltpu.VMEM((1, Co), jnp.float32),
                        pltpu.VMEM((1, Co), jnp.float32)],
        compiler_params=pltpu.CompilerParams(
            dimension_semantics=("arbitrary", "arbitrary")),
    )(x, w, gamma, beta, mask, h)


# ---------------------------------------------------------------------------
# Layout / parameter packing glue (cheap one-time XLA ops)
# ---------------------------------------------------------------------------
def _geometry(H, W):
    Wp = W + 2
    while ((H + 2) * Wp) % 8 != 0:      # keep Mo a multiple of 8
        Wp += 1
    Mo = (H + 2) * Wp
    G = _round_up(Wp + 1, 8)            # guards so every tap slice is in-bounds
    return Wp, Mo, G


def to_guarded_flat(x_nhwc, Cp, Wp, G):
    N, H, W, _ = x_nhwc.shape
    x = jnp.pad(x_nhwc, ((0, 0), (1, 1), (1, Wp - W - 1),
                         (0, Cp - x_nhwc.shape[-1])))
    x = x.reshape(N, (H + 2) * Wp, Cp)
    return jnp.pad(x, ((0, 0), (G, G), (0, 0)))


def from_guarded_flat(y, H, W, Cout, Wp, G):
    N = y.shape[0]
    Mo = (H + 2) * Wp
    y = y[:, G:G + Mo, :].reshape(N, H + 2, Wp, -1)
    y = y[:, 1:H + 1, 1:W + 1, :Cout]
    return jnp.transpose(y, (0, 3, 1, 2))            # back to NCHW


def interior_mask(H, W, Wp):
    m = jnp.zeros((H + 2, Wp), jnp.float32)
    m = m.at[1:H + 1, 1:W + 1].set(1.0)
    return m.reshape((H + 2) * Wp, 1)


def pack_w3x3(w, Cin_p, Cout_p):
    Cout, Cin, _, _ = w.shape
    wt = jnp.transpose(w, (2, 3, 1, 0)).reshape(9, Cin, Cout)
    return jnp.pad(wt, ((0, 0), (0, Cin_p - Cin), (0, Cout_p - Cout)))


def pack_w1x1(w, Cin_p, Cout_p):
    Cout, Cin, _, _ = w.shape
    wt = jnp.transpose(w, (2, 3, 1, 0)).reshape(Cin, Cout)
    return jnp.pad(wt, ((0, Cin_p - Cin), (0, Cout_p - Cout)))


def pack_vec(v, Cp):
    return jnp.pad(v, (0, Cp - v.shape[0]))[None, :]


def resblk1_forward(x_nchw, p):
    """Pallas implementation of ResBlk1.forward (training-mode BatchNorm)."""
    N, Cin, H, W = x_nchw.shape
    Cout = p["w1"].shape[0]
    Cin_p = _round_up(Cin, LANE)
    Cout_p = _round_up(Cout, LANE)
    Wp, Mo, G = _geometry(H, W)
    count = float(N * H * W)

    x_nhwc = jnp.transpose(x_nchw, (0, 2, 3, 1)).astype(jnp.float32)
    x0 = to_guarded_flat(x_nhwc, Cin_p, Wp, G)        # (N, Mtot, Cin_p)
    mask = interior_mask(H, W, Wp)                    # (Mo, 1)

    # NOTE: conv biases (b1/b2/bsc) are dropped on purpose — a per-channel bias
    # immediately followed by training-mode BN is cancelled by mean subtraction.
    w1 = pack_w3x3(p["w1"], Cin_p, Cout_p)
    w2 = pack_w3x3(p["w2"], Cout_p, Cout_p)
    wsc = pack_w1x1(p["wsc"], Cin_p, Cout_p)          # shortcut conv (ch_in != ch_out)

    # out = relu(bn1(conv1(x)))
    h = conv3x3_bn_act(x0, w1, pack_vec(p["g1"], Cout_p),
                       pack_vec(p["beta1"], Cout_p), mask,
                       Wp=Wp, G=G, count=count, relu=True)
    # out = relu(bn2(conv2(out)))
    h = conv3x3_bn_act(h, w2, pack_vec(p["g2"], Cout_p),
                       pack_vec(p["beta2"], Cout_p), mask,
                       Wp=Wp, G=G, count=count, relu=True)
    # out = extra(x) + out   (extra = 1x1 conv + bn)
    out = shortcut_bn_add(x0, wsc, pack_vec(p["gsc"], Cout_p),
                          pack_vec(p["betasc"], Cout_p), mask, h,
                          G=G, count=count)
    return from_guarded_flat(out, H, W, Cout, Wp, G)


# ---------------------------------------------------------------------------
# Pure-JAX reference (silent correctness check; keeps the conv biases)
# ---------------------------------------------------------------------------
def ref_resblk1(x, p):
    def conv(x, w, b, pad):
        y = jax.lax.conv_general_dilated(
            x, w, (1, 1), [(pad, pad), (pad, pad)],
            dimension_numbers=("NCHW", "OIHW", "NCHW"))
        return y + b[None, :, None, None]

    def bn(x, g, b):
        m = x.mean(axis=(0, 2, 3), keepdims=True)
        v = jnp.mean(jnp.square(x - m), axis=(0, 2, 3), keepdims=True)
        return (x - m) * jax.lax.rsqrt(v + EPS) * g[None, :, None, None] \
            + b[None, :, None, None]

    out = jax.nn.relu(bn(conv(x, p["w1"], p["b1"], 1), p["g1"], p["beta1"]))
    out = jax.nn.relu(bn(conv(out, p["w2"], p["b2"], 1), p["g2"], p["beta2"]))
    sc = bn(conv(x, p["wsc"], p["bsc"], 0), p["gsc"], p["betasc"])
    return sc + out


# ---------------------------------------------------------------------------
if __name__ == "__main__":
    key = jax.random.PRNGKey(0)
    N, Cin, Cout, H, W = 2, 8, 4, 16, 16
    ks = jax.random.split(key, 13)

    params = {
        # conv1: 3x3, Cin -> Cout
        "w1": 0.1 * jax.random.normal(ks[0], (Cout, Cin, 3, 3), jnp.float32),
        "b1": 0.1 * jax.random.normal(ks[1], (Cout,), jnp.float32),
        "g1": 1.0 + 0.1 * jax.random.normal(ks[2], (Cout,), jnp.float32),
        "beta1": 0.1 * jax.random.normal(ks[3], (Cout,), jnp.float32),
        # conv2: 3x3, Cout -> Cout
        "w2": 0.1 * jax.random.normal(ks[4], (Cout, Cout, 3, 3), jnp.float32),
        "b2": 0.1 * jax.random.normal(ks[5], (Cout,), jnp.float32),
        "g2": 1.0 + 0.1 * jax.random.normal(ks[6], (Cout,), jnp.float32),
        "beta2": 0.1 * jax.random.normal(ks[7], (Cout,), jnp.float32),
        # shortcut: 1x1 conv, Cin -> Cout (ch_in != ch_out)
        "wsc": 0.1 * jax.random.normal(ks[8], (Cout, Cin, 1, 1), jnp.float32),
        "bsc": 0.1 * jax.random.normal(ks[9], (Cout,), jnp.float32),
        "gsc": 1.0 + 0.1 * jax.random.normal(ks[10], (Cout,), jnp.float32),
        "betasc": 0.1 * jax.random.normal(ks[11], (Cout,), jnp.float32),
    }
    x = jax.random.normal(ks[12], (N, Cin, H, W), jnp.float32)

    out = jax.jit(resblk1_forward)(x, params)
    out = jax.block_until_ready(out)

    ref = ref_resblk1(x, params)
    assert out.shape == (N, Cout, H, W), out.shape
    assert jnp.allclose(out, ref, atol=2e-4, rtol=2e-4), float(
        jnp.max(jnp.abs(out - ref)))

    print("KERNEL_OK")
</pallas_src>

<mosaic_0001>
module attributes {stable_mosaic.version = 11 : i64} {
  func.func @conv3x3_bn_kernel(%arg0: i32, %arg1: i32, %arg2: memref<1x408x128xf32, #tpu.memory_space<vmem>>, %arg3: memref<9x128x128xf32, #tpu.memory_space<vmem>>, %arg4: memref<1x128xf32, #tpu.memory_space<vmem>>, %arg5: memref<1x128xf32, #tpu.memory_space<vmem>>, %arg6: memref<360x1xf32, #tpu.memory_space<vmem>>, %arg7: memref<1x408x128xf32, #tpu.memory_space<vmem>>, %arg8: memref<1x128xf32, #tpu.memory_space<vmem>>, %arg9: memref<1x128xf32, #tpu.memory_space<vmem>>) attributes {dimension_semantics = [#tpu.dimension_semantics<arbitrary>, #tpu.dimension_semantics<arbitrary>], iteration_bounds = array<i64: 2, 2>, scalar_prefetch = 0 : i64, scratch_operands = 2 : i64, tpu.core_type = #tpu.core_type<tc>, window_params = [{transform_indices = @transform_0, window_bounds = array<i64: 1, 408, 128>}, {pipeline_mode = #tpu.pipeline_mode<synchronous>, transform_indices = @transform_1, window_bounds = array<i64: 9, 128, 128>}, {pipeline_mode = #tpu.pipeline_mode<synchronous>, transform_indices = @transform_2, window_bounds = array<i64: 1, 128>}, {pipeline_mode = #tpu.pipeline_mode<synchronous>, transform_indices = @transform_3, window_bounds = array<i64: 1, 128>}, {pipeline_mode = #tpu.pipeline_mode<synchronous>, transform_indices = @transform_4, window_bounds = array<i64: 360, 1>}, {transform_indices = @transform_5, window_bounds = array<i64: 1, 408, 128>}]} {
    %c0_i32 = arith.constant 0 : i32
    %0 = arith.cmpi eq, %arg0, %c0_i32 : i32
    %c0_i32_0 = arith.constant 0 : i32
    %1 = arith.cmpi eq, %arg1, %c0_i32_0 : i32
    %2 = arith.andi %0, %1 : i1
    %3 = arith.extui %2 : i1 to i32
    %c0_i32_1 = arith.constant 0 : i32
    %4 = arith.cmpi ne, %3, %c0_i32_1 : i32
    scf.if %4 {
      %cst_57 = arith.constant 0.000000e+00 : f32
      %73 = vector.broadcast %cst_57 : f32 to vector<1x128xf32>
      %c0_58 = arith.constant 0 : index
      %c0_59 = arith.constant 0 : index
      %74 = vector.load %arg8[%c0_58, %c0_59] : memref<1x128xf32, #tpu.memory_space<vmem>>, vector<1x128xf32>
      tpu.vector_store %arg8[%c0_58, %c0_59], %73 {strides = array<i32>} : memref<1x128xf32, #tpu.memory_space<vmem>>, vector<1x128xf32>,
      %cst_60 = arith.constant 0.000000e+00 : f32
      %75 = vector.broadcast %cst_60 : f32 to vector<1x128xf32>
      %c0_61 = arith.constant 0 : index
      %c0_62 = arith.constant 0 : index
      %76 = vector.load %arg9[%c0_61, %c0_62] : memref<1x128xf32, #tpu.memory_space<vmem>>, vector<1x128xf32>
      tpu.vector_store %arg9[%c0_61, %c0_62], %75 {strides = array<i32>} : memref<1x128xf32, #tpu.memory_space<vmem>>, vector<1x128xf32>,
    } else {
    }
    %c0 = arith.constant 0 : index
    %c0_2 = arith.constant 0 : index
    %5 = vector.load %arg6[%c0, %c0_2] : memref<360x1xf32, #tpu.memory_space<vmem>>, vector<360x1xf32>
    %cst = arith.constant 0.000000e+00 : f32
    %6 = vector.broadcast %cst : f32 to vector<360x1xf32>
    %7 = arith.cmpf ogt, %5, %6 : vector<360x1xf32>
    %cst_3 = arith.constant 0.000000e+00 : f32
    %8 = vector.broadcast %cst_3 : f32 to vector<360x128xf32>
    %c0_4 = arith.constant 0 : index
    %c3 = arith.constant 3 : index
    %c0_5 = arith.constant 0 : index
    %9 = vector.load %arg2[%c0_4, %c3, %c0_5] : memref<1x408x128xf32, #tpu.memory_space<vmem>>, vector<1x360x128xf32>
    %10 = vector.shape_cast %9 : vector<1x360x128xf32> to vector<360x128xf32>
    %c0_6 = arith.constant 0 : index
    %c0_7 = arith.constant 0 : index
    %c0_8 = arith.constant 0 : index
    %11 = vector.load %arg3[%c0_6, %c0_7, %c0_8] : memref<9x128x128xf32, #tpu.memory_space<vmem>>, vector<1x128x128xf32>
    %12 = vector.shape_cast %11 : vector<1x128x128xf32> to vector<128x128xf32>
    %cst_9 = arith.constant dense<0.000000e+00> : vector<360x128xf32>
    %13 = tpu.matmul %10, %12, %cst_9 {dimension_numbers = #tpu.dot_dimension_numbers<[1], [0], [0], [1], [0, 0, 1, 1], [], []>} : vector<360x128xf32>, vector<128x128xf32>, vector<360x128xf32> -> vector<360x128xf32>
    %14 = arith.addf %8, %13 : vector<360x128xf32>
    %c0_10 = arith.constant 0 : index
    %c4 = arith.constant 4 : index
    %c0_11 = arith.constant 0 : index
    %15 = vector.load %arg2[%c0_10, %c4, %c0_11] : memref<1x408x128xf32, #tpu.memory_space<vmem>>, vector<1x360x128xf32>
    %16 = vector.shape_cast %15 : vector<1x360x128xf32> to vector<360x128xf32>
    %c1 = arith.constant 1 : index
    %c0_12 = arith.constant 0 : index
    %c0_13 = arith.constant 0 : index
    %17 = vector.load %arg3[%c1, %c0_12, %c0_13] : memref<9x128x128xf32, #tpu.memory_space<vmem>>, vector<1x128x128xf32>
    %18 = vector.shape_cast %17 : vector<1x128x128xf32> to vector<128x128xf32>
    %cst_14 = arith.constant dense<0.000000e+00> : vector<360x128xf32>
    %19 = tpu.matmul %16, %18, %cst_14 {dimension_numbers = #tpu.dot_dimension_numbers<[1], [0], [0], [1], [0, 0, 1, 1], [], []>} : vector<360x128xf32>, vector<128x128xf32>, vector<360x128xf32> -> vector<360x128xf32>
    %20 = arith.addf %14, %19 : vector<360x128xf32>
    %c0_15 = arith.constant 0 : index
    %c5 = arith.constant 5 : index
    %c0_16 = arith.constant 0 : index
    %21 = vector.load %arg2[%c0_15, %c5, %c0_16] : memref<1x408x128xf32, #tpu.memory_space<vmem>>, vector<1x360x128xf32>
    %22 = vector.shape_cast %21 : vector<1x360x128xf32> to vector<360x128xf32>
    %c2 = arith.constant 2 : index
    %c0_17 = arith.constant 0 : index
    %c0_18 = arith.constant 0 : index
    %23 = vector.load %arg3[%c2, %c0_17, %c0_18] : memref<9x128x128xf32, #tpu.memory_space<vmem>>, vector<1x128x128xf32>
    %24 = vector.shape_cast %23 : vector<1x128x128xf32> to vector<128x128xf32>
    %cst_19 = arith.constant dense<0.000000e+00> : vector<360x128xf32>
    %25 = tpu.matmul %22, %24, %cst_19 {dimension_numbers = #tpu.dot_dimension_numbers<[1], [0], [0], [1], [0, 0, 1, 1], [], []>} : vector<360x128xf32>, vector<128x128xf32>, vector<360x128xf32> -> vector<360x128xf32>
    %26 = arith.addf %20, %25 : vector<360x128xf32>
    %c0_20 = arith.constant 0 : index
    %c23 = arith.constant 23 : index
    %c0_21 = arith.constant 0 : index
    %27 = vector.load %arg2[%c0_20, %c23, %c0_21] : memref<1x408x128xf32, #tpu.memory_space<vmem>>, vector<1x360x128xf32>
    %28 = vector.shape_cast %27 : vector<1x360x128xf32> to vector<360x128xf32>
    %c3_22 = arith.constant 3 : index
    %c0_23 = arith.constant 0 : index
    %c0_24 = arith.constant 0 : index
    %29 = vector.load %arg3[%c3_22, %c0_23, %c0_24] : memref<9x128x128xf32, #tpu.memory_space<vmem>>, vector<1x128x128xf32>
    %30 = vector.shape_cast %29 : vector<1x128x128xf32> to vector<128x128xf32>
    %cst_25 = arith.constant dense<0.000000e+00> : vector<360x128xf32>
    %31 = tpu.matmul %28, %30, %cst_25 {dimension_numbers = #tpu.dot_dimension_numbers<[1], [0], [0], [1], [0, 0, 1, 1], [], []>} : vector<360x128xf32>, vector<128x128xf32>, vector<360x128xf32> -> vector<360x128xf32>
    %32 = arith.addf %26, %31 : vector<360x128xf32>
    %c0_26 = arith.constant 0 : index
    %c24 = arith.constant 24 : index
    %c0_27 = arith.constant 0 : index
    %33 = vector.load %arg2[%c0_26, %c24, %c0_27] : memref<1x408x128xf32, #tpu.memory_space<vmem>>, vector<1x360x128xf32>
    %34 = vector.shape_cast %33 : vector<1x360x128xf32> to vector<360x128xf32>
    %c4_28 = arith.constant 4 : index
    %c0_29 = arith.constant 0 : index
    %c0_30 = arith.constant 0 : index
    %35 = vector.load %arg3[%c4_28, %c0_29, %c0_30] : memref<9x128x128xf32, #tpu.memory_space<vmem>>, vector<1x128x128xf32>
    %36 = vector.shape_cast %35 : vector<1x128x128xf32> to vector<128x128xf32>
    %cst_31 = arith.constant dense<0.000000e+00> : vector<360x128xf32>
    %37 = tpu.matmul %34, %36, %cst_31 {dimension_numbers = #tpu.dot_dimension_numbers<[1], [0], [0], [1], [0, 0, 1, 1], [], []>} : vector<360x128xf32>, vector<128x128xf32>, vector<360x128xf32> -> vector<360x128xf32>
    %38 = arith.addf %32, %37 : vector<360x128xf32>
    %c0_32 = arith.constant 0 : index
    %c25 = arith.constant 25 : index
    %c0_33 = arith.constant 0 : index
    %39 = vector.load %arg2[%c0_32, %c25, %c0_33] : memref<1x408x128xf32, #tpu.memory_space<vmem>>, vector<1x360x128xf32>
    %40 = vector.shape_cast %39 : vector<1x360x128xf32> to vector<360x128xf32>
    %c5_34 = arith.constant 5 : index
    %c0_35 = arith.constant 0 : index
    %c0_36 = arith.constant 0 : index
    %41 = vector.load %arg3[%c5_34, %c0_35, %c0_36] : memref<9x128x128xf32, #tpu.memory_space<vmem>>, vector<1x128x128xf32>
    %42 = vector.shape_cast %41 : vector<1x128x128xf32> to vector<128x128xf32>
    %cst_37 = arith.constant dense<0.000000e+00> : vector<360x128xf32>
    %43 = tpu.matmul %40, %42, %cst_37 {dimension_numbers = #tpu.dot_dimension_numbers<[1], [0], [0], [1], [0, 0, 1, 1], [], []>} : vector<360x128xf32>, vector<128x128xf32>, vector<360x128xf32> -> vector<360x128xf32>
    %44 = arith.addf %38, %43 : vector<360x128xf32>
    %c0_38 = arith.constant 0 : index
    %c43 = arith.constant 43 : index
    %c0_39 = arith.constant 0 : index
    %45 = vector.load %arg2[%c0_38, %c43, %c0_39] : memref<1x408x128xf32, #tpu.memory_space<vmem>>, vector<1x360x128xf32>
    %46 = vector.shape_cast %45 : vector<1x360x128xf32> to vector<360x128xf32>
    %c6 = arith.constant 6 : index
    %c0_40 = arith.constant 0 : index
    %c0_41 = arith.constant 0 : index
    %47 = vector.load %arg3[%c6, %c0_40, %c0_41] : memref<9x128x128xf32, #tpu.memory_space<vmem>>, vector<1x128x128xf32>
    %48 = vector.shape_cast %47 : vector<1x128x128xf32> to vector<128x128xf32>
    %cst_42 = arith.constant dense<0.000000e+00> : vector<360x128xf32>
    %49 = tpu.matmul %46, %48, %cst_42 {dimension_numbers = #tpu.dot_dimension_numbers<[1], [0], [0], [1], [0, 0, 1, 1], [], []>} : vector<360x128xf32>, vector<128x128xf32>, vector<360x128xf32> -> vector<360x128xf32>
    %50 = arith.addf %44, %49 : vector<360x128xf32>
    %c0_43 = arith.constant 0 : index
    %c44 = arith.constant 44 : index
    %c0_44 = arith.constant 0 : index
    %51 = vector.load %arg2[%c0_43, %c44, %c0_44] : memref<1x408x128xf32, #tpu.memory_space<vmem>>, vector<1x360x128xf32>
    %52 = vector.shape_cast %51 : vector<1x360x128xf32> to vector<360x128xf32>
    %c7 = arith.constant 7 : index
    %c0_45 = arith.constant 0 : index
    %c0_46 = arith.constant 0 : index
    %53 = vector.load %arg3[%c7, %c0_45, %c0_46] : memref<9x128x128xf32, #tpu.memory_space<vmem>>, vector<1x128x128xf32>
    %54 = vector.shape_cast %53 : vector<1x128x128xf32> to vector<128x128xf32>
    %cst_47 = arith.constant dense<0.000000e+00> : vector<360x128xf32>
    %55 = tpu.matmul %52, %54, %cst_47 {dimension_numbers = #tpu.dot_dimension_numbers<[1], [0], [0], [1], [0, 0, 1, 1], [], []>} : vector<360x128xf32>, vector<128x128xf32>, vector<360x128xf32> -> vector<360x128xf32>
    %56 = arith.addf %50, %55 : vector<360x128xf32>
    %c0_48 = arith.constant 0 : index
    %c45 = arith.constant 45 : index
    %c0_49 = arith.constant 0 : index
    %57 = vector.load %arg2[%c0_48, %c45, %c0_49] : memref<1x408x128xf32, #tpu.memory_space<vmem>>, vector<1x360x128xf32>
    %58 = vector.shape_cast %57 : vector<1x360x128xf32> to vector<360x128xf32>
    %c8 = arith.constant 8 : index
    %c0_50 = arith.constant 0 : index
    %c0_51 = arith.constant 0 : index
    %59 = vector.load %arg3[%c8, %c0_50, %c0_51] : memref<9x128x128xf32, #tpu.memory_space<vmem>>, vector<1x128x128xf32>
    %60 = vector.shape_cast %59 : vector<1x128x128xf32> to vector<128x128xf32>
    %cst_52 = arith.constant dense<0.000000e+00> : vector<360x128xf32>
    %61 = tpu.matmul %58, %60, %cst_52 {dimension_numbers = #tpu.dot_dimension_numbers<[1], [0], [0], [1], [0, 0, 1, 1], [], []>} : vector<360x128xf32>, vector<128x128xf32>, vector<360x128xf32> -> vector<360x128xf32>
    %62 = arith.addf %56, %61 : vector<360x128xf32>
    %cst_53 = arith.constant 0.000000e+00 : f32
    %63 = vector.shape_cast %7 : vector<360x1xi1> to vector<360x1xi1>
    %64 = vector.broadcast %63 : vector<360x1xi1> to vector<360x128xi1>
    %65 = vector.broadcast %cst_53 : f32 to vector<360x128xf32>
    %66 = arith.select %64, %62, %65 : vector<360x128xi1>, vector<360x128xf32>
    %c0_i32_54 = arith.constant 0 : i32
    %67 = arith.cmpi eq, %arg0, %c0_i32_54 : i32
    %68 = arith.extui %67 : i1 to i32
    %c0_i32_55 = arith.constant 0 : i32
    %69 = arith.cmpi ne, %68, %c0_i32_55 : i32
    scf.if %69 {
      %c0_57 = arith.constant 0 : index
      %c0_58 = arith.constant 0 : index
      %73 = vector.load %arg8[%c0_57, %c0_58] : memref<1x128xf32, #tpu.memory_space<vmem>>, vector<1x128xf32>
      %cst_59 = arith.constant dense<0.000000e+00> : vector<128xf32>
      %74 = vector.multi_reduction <add>, %66, %cst_59 [0] : vector<360x128xf32> to vector<128xf32>
      %75 = vector.shape_cast %74 : vector<128xf32> to vector<1x128xf32>
      %76 = arith.addf %73, %75 : vector<1x128xf32>
      %c0_60 = arith.constant 0 : index
      %c0_61 = arith.constant 0 : index
      %77 = vector.load %arg8[%c0_60, %c0_61] : memref<1x128xf32, #tpu.memory_space<vmem>>, vector<1x128xf32>
      tpu.vector_store %arg8[%c0_60, %c0_61], %76 {strides = array<i32>} : memref<1x128xf32, #tpu.memory_space<vmem>>, vector<1x128xf32>,
      %c0_62 = arith.constant 0 : index
      %c0_63 = arith.constant 0 : index
      %78 = vector.load %arg9[%c0_62, %c0_63] : memref<1x128xf32, #tpu.memory_space<vmem>>, vector<1x128xf32>
      %79 = arith.mulf %66, %66 : vector<360x128xf32>
      %cst_64 = arith.constant dense<0.000000e+00> : vector<128xf32>
      %80 = vector.multi_reduction <add>, %79, %cst_64 [0] : vector<360x128xf32> to vector<128xf32>
      %81 = vector.shape_cast %80 : vector<128xf32> to vector<1x128xf32>
      %82 = arith.addf %78, %81 : vector<1x128xf32>
      %c0_65 = arith.constant 0 : index
      %c0_66 = arith.constant 0 : index
      %83 = vector.load %arg9[%c0_65, %c0_66] : memref<1x128xf32, #tpu.memory_space<vmem>>, vector<1x128xf32>
      tpu.vector_store %arg9[%c0_65, %c0_66], %82 {strides = array<i32>} : memref<1x128xf32, #tpu.memory_space<vmem>>, vector<1x128xf32>,
    } else {
    }
    %c1_i32 = arith.constant 1 : i32
    %70 = arith.cmpi eq, %arg0, %c1_i32 : i32
    %71 = arith.extui %70 : i1 to i32
    %c0_i32_56 = arith.constant 0 : i32
    %72 = arith.cmpi ne, %71, %c0_i32_56 : i32
    scf.if %72 {
      %c0_57 = arith.constant 0 : index
      %c0_58 = arith.constant 0 : index
      %73 = vector.load %arg8[%c0_57, %c0_58] : memref<1x128xf32, #tpu.memory_space<vmem>>, vector<1x128xf32>
      %cst_59 = arith.constant 0.001953125 : f32
      %74 = vector.broadcast %cst_59 : f32 to vector<1x128xf32>
      %75 = arith.mulf %73, %74 : vector<1x128xf32>
      %c0_60 = arith.constant 0 : index
      %c0_61 = arith.constant 0 : index
      %76 = vector.load %arg9[%c0_60, %c0_61] : memref<1x128xf32, #tpu.memory_space<vmem>>, vector<1x128xf32>
      %cst_62 = arith.constant 0.001953125 : f32
      %77 = vector.broadcast %cst_62 : f32 to vector<1x128xf32>
      %78 = arith.mulf %76, %77 : vector<1x128xf32>
      %79 = arith.mulf %75, %75 : vector<1x128xf32>
      %80 = arith.subf %78, %79 : vector<1x128xf32>
      %c0_63 = arith.constant 0 : index
      %c0_64 = arith.constant 0 : index
      %81 = vector.load %arg4[%c0_63, %c0_64] : memref<1x128xf32, #tpu.memory_space<vmem>>, vector<1x128xf32>
      %cst_65 = arith.constant 9.99999974E-6 : f32
      %82 = vector.broadcast %cst_65 : f32 to vector<1x128xf32>
      %83 = arith.addf %80, %82 : vector<1x128xf32>
      %84 = math.rsqrt %83 : vector<1x128xf32>
      %85 = arith.mulf %81, %84 : vector<1x128xf32>
      %c0_66 = arith.constant 0 : index
      %c0_67 = arith.constant 0 : index
      %86 = vector.load %arg5[%c0_66, %c0_67] : memref<1x128xf32, #tpu.memory_space<vmem>>, vector<1x128xf32>
      %87 = arith.mulf %75, %85 : vector<1x128xf32>
      %88 = arith.subf %86, %87 : vector<1x128xf32>
      %89 = vector.broadcast %85 : vector<1x128xf32> to vector<360x128xf32>
      %90 = arith.mulf %66, %89 : vector<360x128xf32>
      %91 = vector.broadcast %88 : vector<1x128xf32> to vector<360x128xf32>
      %92 = arith.addf %90, %91 : vector<360x128xf32>
      %cst_68 = arith.constant 0.000000e+00 : f32
      %93 = vector.broadcast %cst_68 : f32 to vector<360x128xf32>
      %94 = arith.maximumf %92, %93 : vector<360x128xf32>
      %cst_69 = arith.constant 0.000000e+00 : f32
      %95 = vector.shape_cast %7 : vector<360x1xi1> to vector<360x1xi1>
      %96 = vector.broadcast %95 : vector<360x1xi1> to vector<360x128xi1>
      %97 = vector.broadcast %cst_69 : f32 to vector<360x128xf32>
      %98 = arith.select %96, %94, %97 : vector<360x128xi1>, vector<360x128xf32>
      %cst_70 = arith.constant 0.000000e+00 : f32
      %99 = vector.broadcast %cst_70 : f32 to vector<24x128xf32>
      %c0_71 = arith.constant 0 : index
      %c0_72 = arith.constant 0 : index
      %c0_73 = arith.constant 0 : index
      %100 = vector.load %arg7[%c0_71, %c0_72, %c0_73] : memref<1x408x128xf32, #tpu.memory_space<vmem>>, vector<1x24x128xf32>
      %101 = vector.shape_cast %100 : vector<1x24x128xf32> to vector<24x128xf32>
      %102 = vector.shape_cast %99 : vector<24x128xf32> to vector<1x24x128xf32>
      tpu.vector_store %arg7[%c0_71, %c0_72, %c0_73], %102 {strides = array<i32>} : memref<1x408x128xf32, #tpu.memory_space<vmem>>, vector<1x24x128xf32>,
      %c0_74 = arith.constant 0 : index
      %c384 = arith.constant 384 : index
      %c0_75 = arith.constant 0 : index
      %103 = vector.load %arg7[%c0_74, %c384, %c0_75] : memref<1x408x128xf32, #tpu.memory_space<vmem>>, vector<1x24x128xf32>
      %104 = vector.shape_cast %103 : vector<1x24x128xf32> to vector<24x128xf32>
      %105 = vector.shape_cast %99 : vector<24x128xf32> to vector<1x24x128xf32>
      tpu.vector_store %arg7[%c0_74, %c384, %c0_75], %105 {strides = array<i32>} : memref<1x408x128xf32, #tpu.memory_space<vmem>>, vector<1x24x128xf32>,
      %c0_76 = arith.constant 0 : index
      %c24_77 = arith.constant 24 : index
      %c0_78 = arith.constant 0 : index
      %106 = vector.load %arg7[%c0_76, %c24_77, %c0_78] : memref<1x408x128xf32, #tpu.memory_space<vmem>>, vector<1x360x128xf32>
      %107 = vector.shape_cast %106 : vector<1x360x128xf32> to vector<360x128xf32>
      %108 = vector.shape_cast %98 : vector<360x128xf32> to vector<1x360x128xf32>
      tpu.vector_store %arg7[%c0_76, %c24_77, %c0_78], %108 {strides = array<i32>} : memref<1x408x128xf32, #tpu.memory_space<vmem>>, vector<1x360x128xf32>,
    } else {
    }
    return
  }
  func.func @transform_0(%arg0: i32, %arg1: i32) -> (i32, i32, i32) {
    %c0_i32 = arith.constant 0 : i32
    %c0_i32_0 = arith.constant 0 : i32
    %c0_i32_1 = arith.constant 0 : i32
    return %arg1, %c0_i32, %c0_i32_0 : i32, i32, i32
  }
  func.func @transform_1(%arg0: i32, %arg1: i32) -> (i32, i32, i32) {
    %c0_i32 = arith.constant 0 : i32
    %c0_i32_0 = arith.constant 0 : i32
    %c0_i32_1 = arith.constant 0 : i32
    %c0_i32_2 = arith.constant 0 : i32
    return %c0_i32, %c0_i32_0, %c0_i32_1 : i32, i32, i32
  }
  func.func @transform_2(%arg0: i32, %arg1: i32) -> (i32, i32) {
    %c0_i32 = arith.constant 0 : i32
    %c0_i32_0 = arith.constant 0 : i32
    %c0_i32_1 = arith.constant 0 : i32
    return %c0_i32, %c0_i32_0 : i32, i32
  }
  func.func @transform_3(%arg0: i32, %arg1: i32) -> (i32, i32) {
    %c0_i32 = arith.constant 0 : i32
    %c0_i32_0 = arith.constant 0 : i32
    %c0_i32_1 = arith.constant 0 : i32
    return %c0_i32, %c0_i32_0 : i32, i32
  }
  func.func @transform_4(%arg0: i32, %arg1: i32) -> (i32, i32) {
    %c0_i32 = arith.constant 0 : i32
    %c0_i32_0 = arith.constant 0 : i32
    %c0_i32_1 = arith.constant 0 : i32
    return %c0_i32, %c0_i32_0 : i32, i32
  }
  func.func @transform_5(%arg0: i32, %arg1: i32) -> (i32, i32, i32) {
    %0 = arith.muli %arg0, %arg1 : i32
    %c0_i32 = arith.constant 0 : i32
    %c0_i32_0 = arith.constant 0 : i32
    %c0_i32_1 = arith.constant 0 : i32
    return %0, %c0_i32, %c0_i32_0 : i32, i32, i32
  }
}

module attributes {stable_mosaic.version = 11 : i64} {
  func.func @shortcut_bn_add_kernel(%arg0: i32, %arg1: i32, %arg2: memref<1x408x128xf32, #tpu.memory_space<vmem>>, %arg3: memref<128x128xf32, #tpu.memory_space<vmem>>, %arg4: memref<1x128xf32, #tpu.memory_space<vmem>>, %arg5: memref<1x128xf32, #tpu.memory_space<vmem>>, %arg6: memref<360x1xf32, #tpu.memory_space<vmem>>, %arg7: memref<1x408x128xf32, #tpu.memory_space<vmem>>, %arg8: memref<1x408x128xf32, #tpu.memory_space<vmem>>, %arg9: memref<1x128xf32, #tpu.memory_space<vmem>>, %arg10: memref<1x128xf32, #tpu.memory_space<vmem>>) attributes {dimension_semantics = [#tpu.dimension_semantics<arbitrary>, #tpu.dimension_semantics<arbitrary>], iteration_bounds = array<i64: 2, 2>, scalar_prefetch = 0 : i64, scratch_operands = 2 : i64, tpu.core_type = #tpu.core_type<tc>, window_params = [{transform_indices = @transform_0, window_bounds = array<i64: 1, 408, 128>}, {pipeline_mode = #tpu.pipeline_mode<synchronous>, transform_indices = @transform_1, window_bounds = array<i64: 128, 128>}, {pipeline_mode = #tpu.pipeline_mode<synchronous>, transform_indices = @transform_2, window_bounds = array<i64: 1, 128>}, {pipeline_mode = #tpu.pipeline_mode<synchronous>, transform_indices = @transform_3, window_bounds = array<i64: 1, 128>}, {pipeline_mode = #tpu.pipeline_mode<synchronous>, transform_indices = @transform_4, window_bounds = array<i64: 360, 1>}, {transform_indices = @transform_5, window_bounds = array<i64: 1, 408, 128>}, {transform_indices = @transform_6, window_bounds = array<i64: 1, 408, 128>}]} {
    %c0_i32 = arith.constant 0 : i32
    %0 = arith.cmpi eq, %arg0, %c0_i32 : i32
    %c0_i32_0 = arith.constant 0 : i32
    %1 = arith.cmpi eq, %arg1, %c0_i32_0 : i32
    %2 = arith.andi %0, %1 : i1
    %3 = arith.extui %2 : i1 to i32
    %c0_i32_1 = arith.constant 0 : i32
    %4 = arith.cmpi ne, %3, %c0_i32_1 : i32
    scf.if %4 {
      %cst_12 = arith.constant 0.000000e+00 : f32
      %22 = vector.broadcast %cst_12 : f32 to vector<1x128xf32>
      %c0_13 = arith.constant 0 : index
      %c0_14 = arith.constant 0 : index
      %23 = vector.load %arg9[%c0_13, %c0_14] : memref<1x128xf32, #tpu.memory_space<vmem>>, vector<1x128xf32>
      tpu.vector_store %arg9[%c0_13, %c0_14], %22 {strides = array<i32>} : memref<1x128xf32, #tpu.memory_space<vmem>>, vector<1x128xf32>,
      %cst_15 = arith.constant 0.000000e+00 : f32
      %24 = vector.broadcast %cst_15 : f32 to vector<1x128xf32>
      %c0_16 = arith.constant 0 : index
      %c0_17 = arith.constant 0 : index
      %25 = vector.load %arg10[%c0_16, %c0_17] : memref<1x128xf32, #tpu.memory_space<vmem>>, vector<1x128xf32>
      tpu.vector_store %arg10[%c0_16, %c0_17], %24 {strides = array<i32>} : memref<1x128xf32, #tpu.memory_space<vmem>>, vector<1x128xf32>,
    } else {
    }
    %c0 = arith.constant 0 : index
    %c0_2 = arith.constant 0 : index
    %5 = vector.load %arg6[%c0, %c0_2] : memref<360x1xf32, #tpu.memory_space<vmem>>, vector<360x1xf32>
    %cst = arith.constant 0.000000e+00 : f32
    %6 = vector.broadcast %cst : f32 to vector<360x1xf32>
    %7 = arith.cmpf ogt, %5, %6 : vector<360x1xf32>
    %c0_3 = arith.constant 0 : index
    %c24 = arith.constant 24 : index
    %c0_4 = arith.constant 0 : index
    %8 = vector.load %arg2[%c0_3, %c24, %c0_4] : memref<1x408x128xf32, #tpu.memory_space<vmem>>, vector<1x360x128xf32>
    %9 = vector.shape_cast %8 : vector<1x360x128xf32> to vector<360x128xf32>
    %c0_5 = arith.constant 0 : index
    %c0_6 = arith.constant 0 : index
    %10 = vector.load %arg3[%c0_5, %c0_6] : memref<128x128xf32, #tpu.memory_space<vmem>>, vector<128x128xf32>
    %cst_7 = arith.constant dense<0.000000e+00> : vector<360x128xf32>
    %11 = tpu.matmul %9, %10, %cst_7 {dimension_numbers = #tpu.dot_dimension_numbers<[1], [0], [0], [1], [0, 0, 1, 1], [], []>} : vector<360x128xf32>, vector<128x128xf32>, vector<360x128xf32> -> vector<360x128xf32>
    %cst_8 = arith.constant 0.000000e+00 : f32
    %12 = vector.shape_cast %7 : vector<360x1xi1> to vector<360x1xi1>
    %13 = vector.broadcast %12 : vector<360x1xi1> to vector<360x128xi1>
    %14 = vector.broadcast %cst_8 : f32 to vector<360x128xf32>
    %15 = arith.select %13, %11, %14 : vector<360x128xi1>, vector<360x128xf32>
    %c0_i32_9 = arith.constant 0 : i32
    %16 = arith.cmpi eq, %arg0, %c0_i32_9 : i32
    %17 = arith.extui %16 : i1 to i32
    %c0_i32_10 = arith.constant 0 : i32
    %18 = arith.cmpi ne, %17, %c0_i32_10 : i32
    scf.if %18 {
      %c0_12 = arith.constant 0 : index
      %c0_13 = arith.constant 0 : index
      %22 = vector.load %arg9[%c0_12, %c0_13] : memref<1x128xf32, #tpu.memory_space<vmem>>, vector<1x128xf32>
      %cst_14 = arith.constant dense<0.000000e+00> : vector<128xf32>
      %23 = vector.multi_reduction <add>, %15, %cst_14 [0] : vector<360x128xf32> to vector<128xf32>
      %24 = vector.shape_cast %23 : vector<128xf32> to vector<1x128xf32>
      %25 = arith.addf %22, %24 : vector<1x128xf32>
      %c0_15 = arith.constant 0 : index
      %c0_16 = arith.constant 0 : index
      %26 = vector.load %arg9[%c0_15, %c0_16] : memref<1x128xf32, #tpu.memory_space<vmem>>, vector<1x128xf32>
      tpu.vector_store %arg9[%c0_15, %c0_16], %25 {strides = array<i32>} : memref<1x128xf32, #tpu.memory_space<vmem>>, vector<1x128xf32>,
      %c0_17 = arith.constant 0 : index
      %c0_18 = arith.constant 0 : index
      %27 = vector.load %arg10[%c0_17, %c0_18] : memref<1x128xf32, #tpu.memory_space<vmem>>, vector<1x128xf32>
      %28 = arith.mulf %15, %15 : vector<360x128xf32>
      %cst_19 = arith.constant dense<0.000000e+00> : vector<128xf32>
      %29 = vector.multi_reduction <add>, %28, %cst_19 [0] : vector<360x128xf32> to vector<128xf32>
      %30 = vector.shape_cast %29 : vector<128xf32> to vector<1x128xf32>
      %31 = arith.addf %27, %30 : vector<1x128xf32>
      %c0_20 = arith.constant 0 : index
      %c0_21 = arith.constant 0 : index
      %32 = vector.load %arg10[%c0_20, %c0_21] : memref<1x128xf32, #tpu.memory_space<vmem>>, vector<1x128xf32>
      tpu.vector_store %arg10[%c0_20, %c0_21], %31 {strides = array<i32>} : memref<1x128xf32, #tpu.memory_space<vmem>>, vector<1x128xf32>,
    } else {
    }
    %c1_i32 = arith.constant 1 : i32
    %19 = arith.cmpi eq, %arg0, %c1_i32 : i32
    %20 = arith.extui %19 : i1 to i32
    %c0_i32_11 = arith.constant 0 : i32
    %21 = arith.cmpi ne, %20, %c0_i32_11 : i32
    scf.if %21 {
      %c0_12 = arith.constant 0 : index
      %c0_13 = arith.constant 0 : index
      %22 = vector.load %arg9[%c0_12, %c0_13] : memref<1x128xf32, #tpu.memory_space<vmem>>, vector<1x128xf32>
      %cst_14 = arith.constant 0.001953125 : f32
      %23 = vector.broadcast %cst_14 : f32 to vector<1x128xf32>
      %24 = arith.mulf %22, %23 : vector<1x128xf32>
      %c0_15 = arith.constant 0 : index
      %c0_16 = arith.constant 0 : index
      %25 = vector.load %arg10[%c0_15, %c0_16] : memref<1x128xf32, #tpu.memory_space<vmem>>, vector<1x128xf32>
      %cst_17 = arith.constant 0.001953125 : f32
      %26 = vector.broadcast %cst_17 : f32 to vector<1x128xf32>
      %27 = arith.mulf %25, %26 : vector<1x128xf32>
      %28 = arith.mulf %24, %24 : vector<1x128xf32>
      %29 = arith.subf %27, %28 : vector<1x128xf32>
      %c0_18 = arith.constant 0 : index
      %c0_19 = arith.constant 0 : index
      %30 = vector.load %arg4[%c0_18, %c0_19] : memref<1x128xf32, #tpu.memory_space<vmem>>, vector<1x128xf32>
      %cst_20 = arith.constant 9.99999974E-6 : f32
      %31 = vector.broadcast %cst_20 : f32 to vector<1x128xf32>
      %32 = arith.addf %29, %31 : vector<1x128xf32>
      %33 = math.rsqrt %32 : vector<1x128xf32>
      %34 = arith.mulf %30, %33 : vector<1x128xf32>
      %c0_21 = arith.constant 0 : index
      %c0_22 = arith.constant 0 : index
      %35 = vector.load %arg5[%c0_21, %c0_22] : memref<1x128xf32, #tpu.memory_space<vmem>>, vector<1x128xf32>
      %36 = arith.mulf %24, %34 : vector<1x128xf32>
      %37 = arith.subf %35, %36 : vector<1x128xf32>
      %38 = vector.broadcast %34 : vector<1x128xf32> to vector<360x128xf32>
      %39 = arith.mulf %15, %38 : vector<360x128xf32>
      %40 = vector.broadcast %37 : vector<1x128xf32> to vector<360x128xf32>
      %41 = arith.addf %39, %40 : vector<360x128xf32>
      %c0_23 = arith.constant 0 : index
      %c24_24 = arith.constant 24 : index
      %c0_25 = arith.constant 0 : index
      %42 = vector.load %arg7[%c0_23, %c24_24, %c0_25] : memref<1x408x128xf32, #tpu.memory_space<vmem>>, vector<1x360x128xf32>
      %43 = vector.shape_cast %42 : vector<1x360x128xf32> to vector<360x128xf32>
      %44 = arith.addf %41, %43 : vector<360x128xf32>
      %cst_26 = arith.constant 0.000000e+00 : f32
      %45 = vector.shape_cast %7 : vector<360x1xi1> to vector<360x1xi1>
      %46 = vector.broadcast %45 : vector<360x1xi1> to vector<360x128xi1>
      %47 = vector.broadcast %cst_26 : f32 to vector<360x128xf32>
      %48 = arith.select %46, %44, %47 : vector<360x128xi1>, vector<360x128xf32>
      %cst_27 = arith.constant 0.000000e+00 : f32
      %49 = vector.broadcast %cst_27 : f32 to vector<24x128xf32>
      %c0_28 = arith.constant 0 : index
      %c0_29 = arith.constant 0 : index
      %c0_30 = arith.constant 0 : index
      %50 = vector.load %arg8[%c0_28, %c0_29, %c0_30] : memref<1x408x128xf32, #tpu.memory_space<vmem>>, vector<1x24x128xf32>
      %51 = vector.shape_cast %50 : vector<1x24x128xf32> to vector<24x128xf32>
      %52 = vector.shape_cast %49 : vector<24x128xf32> to vector<1x24x128xf32>
      tpu.vector_store %arg8[%c0_28, %c0_29, %c0_30], %52 {strides = array<i32>} : memref<1x408x128xf32, #tpu.memory_space<vmem>>, vector<1x24x128xf32>,
      %c0_31 = arith.constant 0 : index
      %c384 = arith.constant 384 : index
      %c0_32 = arith.constant 0 : index
      %53 = vector.load %arg8[%c0_31, %c384, %c0_32] : memref<1x408x128xf32, #tpu.memory_space<vmem>>, vector<1x24x128xf32>
      %54 = vector.shape_cast %53 : vector<1x24x128xf32> to vector<24x128xf32>
      %55 = vector.shape_cast %49 : vector<24x128xf32> to vector<1x24x128xf32>
      tpu.vector_store %arg8[%c0_31, %c384, %c0_32], %55 {strides = array<i32>} : memref<1x408x128xf32, #tpu.memory_space<vmem>>, vector<1x24x128xf32>,
      %c0_33 = arith.constant 0 : index
      %c24_34 = arith.constant 24 : index
      %c0_35 = arith.constant 0 : index
      %56 = vector.load %arg8[%c0_33, %c24_34, %c0_35] : memref<1x408x128xf32, #tpu.memory_space<vmem>>, vector<1x360x128xf32>
      %57 = vector.shape_cast %56 : vector<1x360x128xf32> to vector<360x128xf32>
      %58 = vector.shape_cast %48 : vector<360x128xf32> to vector<1x360x128xf32>
      tpu.vector_store %arg8[%c0_33, %c24_34, %c0_35], %58 {strides = array<i32>} : memref<1x408x128xf32, #tpu.memory_space<vmem>>, vector<1x360x128xf32>,
    } else {
    }
    return
  }
  func.func @transform_0(%arg0: i32, %arg1: i32) -> (i32, i32, i32) {
    %c0_i32 = arith.constant 0 : i32
    %c0_i32_0 = arith.constant 0 : i32
    %c0_i32_1 = arith.constant 0 : i32
    return %arg1, %c0_i32, %c0_i32_0 : i32, i32, i32
  }
  func.func @transform_1(%arg0: i32, %arg1: i32) -> (i32, i32) {
    %c0_i32 = arith.constant 0 : i32
    %c0_i32_0 = arith.constant 0 : i32
    %c0_i32_1 = arith.constant 0 : i32
    return %c0_i32, %c0_i32_0 : i32, i32
  }
  func.func @transform_2(%arg0: i32, %arg1: i32) -> (i32, i32) {
    %c0_i32 = arith.constant 0 : i32
    %c0_i32_0 = arith.constant 0 : i32
    %c0_i32_1 = arith.constant 0 : i32
    return %c0_i32, %c0_i32_0 : i32, i32
  }
  func.func @transform_3(%arg0: i32, %arg1: i32) -> (i32, i32) {
    %c0_i32 = arith.constant 0 : i32
    %c0_i32_0 = arith.constant 0 : i32
    %c0_i32_1 = arith.constant 0 : i32
    return %c0_i32, %c0_i32_0 : i32, i32
  }
  func.func @transform_4(%arg0: i32, %arg1: i32) -> (i32, i32) {
    %c0_i32 = arith.constant 0 : i32
    %c0_i32_0 = arith.constant 0 : i32
    %c0_i32_1 = arith.constant 0 : i32
    return %c0_i32, %c0_i32_0 : i32, i32
  }
  func.func @transform_5(%arg0: i32, %arg1: i32) -> (i32, i32, i32) {
    %0 = arith.muli %arg0, %arg1 : i32
    %c0_i32 = arith.constant 0 : i32
    %c0_i32_0 = arith.constant 0 : i32
    %c0_i32_1 = arith.constant 0 : i32
    return %0, %c0_i32, %c0_i32_0 : i32, i32, i32
  }
  func.func @transform_6(%arg0: i32, %arg1: i32) -> (i32, i32, i32) {
    %0 = arith.muli %arg0, %arg1 : i32
    %c0_i32 = arith.constant 0 : i32
    %c0_i32_0 = arith.constant 0 : i32
    %c0_i32_1 = arith.constant 0 : i32
    return %0, %c0_i32, %c0_i32_0 : i32, i32, i32
  }
}

</mosaic_0001>

<bundles_post_ra>
// kernel: resblk1_forward.5
= control target key start
LH: loop header
LB: loop body
LE: loop exit
PB: predicated region body
PF: predicated region fallthrough
CT: control target
= control target key end

     0   :  { %s1609_s21 = smov 0   ;;  %s1611_s22 = smov 0   ;;  %s2738_s0 = inlined_call_operand.vmem [shape: f32[2,408,128], index: 0, kind: input, shape index: {}]   ;;  %s2739_s1 = inlined_call_operand.vmem [shape: f32[128,128], index: 1, kind: input, shape index: {}]   ;;  %s2740_s2 = inlined_call_operand.vmem [shape: f32[1,128], index: 2, kind: input, shape index: {}]   ;;  %s2741_s3 = inlined_call_operand.vmem [shape: f32[1,128], index: 3, kind: input, shape index: {}]   ;;  %s2742_s4 = inlined_call_operand.vmem [shape: f32[360,1], index: 4, kind: input, shape index: {}]   ;;  %s2743_s5 = inlined_call_operand.vmem [shape: f32[2,408,128], index: 5, kind: input, shape index: {}]   ;;  %s2744_s6 = inlined_call_operand.vmem [shape: f32[2,408,128], index: 6, kind: output, shape index: {}]  }
   0x1   :  { %s1613_s23 = smov 0   ;;  %s1615_s24 = smov 0  }
   0x2   :  { %s1617_s25 = smov 0  }
   0x3 LB: > { %s25_s26 = sadd.s32 1, %s1561_s23  ;;  %s28_s27 = sadd.s32 1, %s1565_s24  ;;  %s1569_s25 = sphi %s1617_s25, %s16_s25   ;;  %s1565_s24 = sphi %s1615_s24, %s2962_s24   ;;  %s1561_s23 = sphi %s1613_s23, %s2961_s23   ;;  %s1557_s22 = sphi %s1611_s22, %s2960_s22   ;;  %s1553_s21 = sphi %s1609_s21, %s2959_s21  }
   0x4   : > { %p26_p0 = scmp.ge.s32.totalorder %s25_s26, 2  ;;  %p1425_p1 = scmp.ge.s32.totalorder %s1569_s25, 1 }
   0x5   : > { %p240_p2 = scmp.lt.s32.totalorder %s1569_s25, 5 }
   0x6   : > { %s2964_s26 = smov (%p26_p0, %s25_s26), 0  ;;  %s2966_s27 = smov (!%p26_p0, %s28_s27), %s1565_s24 }
   0x7   : > { %p241_p3 = pnand %p1425_p1, %p240_p2  ;;  %p30_p4 = scmp.ge.s32.totalorder %s2966_s27, 2 }
   0x9   : > { %s2968_s27 = smov (%p30_p4, %s2966_s27), 0  ;;  %244 = sbr.rel (%p241_p3) target bundleno = 493 (0x1ed), region = 44 }
   0xe   : > { %p277_p5 = scmp.lt.s32.totalorder %s1553_s21, 1  ;;  %s282_s28 = smul.u32 %s1553_s21, %s1557_s22 }
   0xf   : > { %p296_p6 = scmp.eq.s32.totalorder %s1557_s22, 0  ;;  %p297_p7 = scmp.eq.s32.totalorder %s1553_s21, 0 }
  0x10   : > { %s2970_s21 = smov (!%p277_p5, %s1553_s21), 1  ;;  %p283_p8 = scmp.lt.s32.totalorder %s282_s28, 1 }
  0x11   : > { %p298_p9 = pnand %p297_p7, %p296_p6  ;;  %s1481_s29 = smul.u32 408, %s2970_s21 }
  0x12   : > { %s2972_s28 = smov (!%p283_p8, %s282_s28), 1 }
  0x13   : > { %s1646_s8 = scalar_lea.vmem %s2738_s0, %s1481_s29  ;;  %s1482_s9 = smul.u32 408, %s2972_s28 }
  0x14   : > { %301 = sbr.rel (%p298_p9) target bundleno = 28 (0x1c), region = 48 }
  0x15   : > { %s1651_s12 = scalar_lea.vmem %s2743_s5, %s1482_s9  ;;  %s1656_s15 = scalar_lea.vmem %s2744_s6, %s1482_s9 }
  0x19   : > { %v1571_v0 = vmov 0.0  }
  0x1a   : > { %302 = vst [vmem:[#allocation2] sm:$0x1] %v1571_v0 }
  0x1b   : > { %303 = vst [vmem:[#allocation3] sm:$0x1] %v1571_v0 }
  0x1c PF: > { %v454_v1 = vld [vmem:[%s2739_s1 + $0x78] sm:$0xff]  ;;  %v308_v2 = vld [vmem:[%s2742_s4 + $0x20] sm:$0xff]  ;;  %v453_v3 = vld [vmem:[%s2739_s1 + $0x70] sm:$0xff]  ;;  %v1572_v6 = vmov 0   ;;  %p1429_p10 = scmp.ne.s32.totalorder %s1557_s22, 0 }
  0x1d   : > { %455 = vmatpush.msra.mxu0 %v454_v1  ;;  %1433 = vmatpush.msra.mxu1 %v454_v1  ;;  %vm353_vm0 = vcmp.gt.f32.partialorder %v308_v2, 0.0  ;;  %v306_v4 = vld [vmem:[%s2742_s4 + $0x10] sm:$0xff]  ;;  %v304_v5 = vld [vmem:[%s2742_s4] sm:$0xff]  ;;  %v452_v10 = vld [vmem:[%s2739_s1 + $0x68] sm:$0xff] }
  0x1e   : > { %1434 = vmatpush.msra.mxu2 %v454_v1  ;;  %1435 = vmatpush.msra.mxu3 %v454_v1  ;;  %vm351_vm1 = vcmp.gt.f32.partialorder %v306_v4, 0.0  ;;  %vm349_vm2 = vcmp.gt.f32.partialorder %v304_v5, 0.0  ;;  %v611_v7 = vsel %vm353_vm0, 1, %v1572_v6  ;;  %v451_v11 = vld [vmem:[%s2739_s1 + $0x60] sm:$0xff]  ;;  %v309_v12 = vld [vmem:[%s2742_s4 + $0x28] sm:$0xff]  ;;  %v307_v13 = vld [vmem:[%s2742_s4 + $0x18] sm:$0xff] }
  0x1f   : > { %1528 = vset.pattern.permute.xlu2 %v1572_v6  ;;  %1527 = vset.pattern.permute.xlu1 %v1572_v6  ;;  %v609_v8 = vsel %vm351_vm1, 1, %v1572_v6  ;;  %v607_v9 = vsel %vm349_vm2, 1, %v1572_v6  ;;  %v305_v14 = vld [vmem:[%s2742_s4 + $0x8] sm:$0xff]  ;;  %v450_v15 = vld [vmem:[%s2739_s1 + $0x58] sm:$0xff]  ;;  %vm354_vm3 = vcmp.gt.f32.partialorder %v309_v12, 0.0  ;;  %vm352_vm4 = vcmp.gt.f32.partialorder %v307_v13, 0.0 }
  0x20   : > { %1526 = vset.pattern.permute.xlu0 %v1572_v6  ;;  %456 = vmatpush.msra.mxu0 %v453_v3  ;;  %v449_v16 = vld [vmem:[%s2739_s1 + $0x50] sm:$0xff]  ;;  %vm350_vm5 = vcmp.gt.f32.partialorder %v305_v14, 0.0  ;;  %v612_v17 = vsel %vm354_vm3, 1, %v1572_v6  ;;  %v610_v18 = vsel %vm352_vm4, 1, %v1572_v6  ;;  %v448_v20 = vld [vmem:[%s2739_s1 + $0x48] sm:$0xff]  ;;  %v447_v21 = vld [vmem:[%s2739_s1 + $0x40] sm:$0xff] }
  0x21   : > { %1436 = vmatpush.msra.mxu1 %v453_v3  ;;  %1437 = vmatpush.msra.mxu2 %v453_v3  ;;  %v608_v19 = vsel %vm350_vm5, 1, %v1572_v6  ;;  %v312_v22 = vld [vmem:[%s2742_s4 + $0x40] sm:$0xff]  ;;  %v311_v23 = vld [vmem:[%s2742_s4 + $0x38] sm:$0xff]  ;;  %v310_v24 = vld [vmem:[%s2742_s4 + $0x30] sm:$0xff] }
  0x22   : > { %1438 = vmatpush.msra.mxu3 %v453_v3  ;;  %665 = vperm.xlu2 %1528, %v611_v7   ;;  %v446_v25 = vld [vmem:[%s2739_s1 + $0x38] sm:$0xff]  ;;  %vm357_vm6 = vcmp.gt.f32.partialorder %v312_v22, 0.0  ;;  %v445_v26 = vld [vmem:[%s2739_s1 + $0x30] sm:$0xff]  ;;  %vm356_vm7 = vcmp.gt.f32.partialorder %v311_v23, 0.0  ;;  %vm355_vm8 = vcmp.gt.f32.partialorder %v310_v24, 0.0  ;;  %v444_v30 = vld [vmem:[%s2739_s1 + $0x28] sm:$0xff] }
  0x23   : > { %659 = vperm.xlu1 %1527, %v609_v8   ;;  %653 = vperm.xlu0 %1526, %v607_v9   ;;  %v615_v27 = vsel %vm357_vm6, 1, %v1572_v6  ;;  %v614_v28 = vsel %vm356_vm7, 1, %v1572_v6  ;;  %v613_v29 = vsel %vm355_vm8, 1, %v1572_v6  ;;  %v443_v31 = vld [vmem:[%s2739_s1 + $0x20] sm:$0xff]  ;;  %v315_v32 = vld [vmem:[%s2742_s4 + $0x58] sm:$0xff]  ;;  %v314_v33 = vld [vmem:[%s2742_s4 + $0x50] sm:$0xff] }
  0x24   : > { %457 = vmatpush.msra.mxu0 %v452_v10  ;;  %1439 = vmatpush.msra.mxu1 %v452_v10  ;;  %v313_v34 = vld [vmem:[%s2742_s4 + $0x48] sm:$0xff]  ;;  %v442_v35 = vld [vmem:[%s2739_s1 + $0x18] sm:$0xff]  ;;  %vm360_vm9 = vcmp.gt.f32.partialorder %v315_v32, 0.0  ;;  %vm359_vm10 = vcmp.gt.f32.partialorder %v314_v33, 0.0  ;;  %v441_v36 = vld [vmem:[%s2739_s1 + $0x10] sm:$0xff] }
  0x25   : > { %1440 = vmatpush.msra.mxu2 %v452_v10  ;;  %1441 = vmatpush.msra.mxu3 %v452_v10  ;;  %vm358_vm11 = vcmp.gt.f32.partialorder %v313_v34, 0.0  ;;  %v618_v37 = vsel %vm360_vm9, 1, %v1572_v6  ;;  %v617_v38 = vsel %vm359_vm10, 1, %v1572_v6  ;;  %v440_v40 = vld [vmem:[%s2739_s1 + $0x8] sm:$0xff]  ;;  %v318_v41 = vld [vmem:[%s2742_s4 + $0x70] sm:$0xff]  ;;  %v439_v43 = vld [vmem:[%s2739_s1] sm:$0xff] }
  0x26   : > { %458 = vmatpush.msra.mxu0 %v451_v11  ;;  %1442 = vmatpush.msra.mxu1 %v451_v11  ;;  %v616_v39 = vsel %vm358_vm11, 1, %v1572_v6  ;;  %v317_v42 = vld [vmem:[%s2742_s4 + $0x68] sm:$0xff]  ;;  %v316_v44 = vld [vmem:[%s2742_s4 + $0x60] sm:$0xff]  ;;  %v394_v45 = vld [vmem:[%s1646_s8 + $0x18] sm:$0xff]  ;;  %vm363_vm12 = vcmp.gt.f32.partialorder %v318_v41, 0.0 }
  0x27   : > { %1443 = vmatpush.msra.mxu2 %v451_v11  ;;  %1444 = vmatpush.msra.mxu3 %v451_v11  ;;  %vm362_vm13 = vcmp.gt.f32.partialorder %v317_v42, 0.0  ;;  %v404_v46 = vld [vmem:[%s1646_s8 + $0x68] sm:$0xff]  ;;  %v415_v47 = vld [vmem:[%s1646_s8 + $0xc0] sm:$0xff]  ;;  %vm361_vm14 = vcmp.gt.f32.partialorder %v316_v44, 0.0  ;;  %v621_v49 = vsel %vm363_vm12, 1, %v1572_v6  ;;  %v319_v54 = vld [vmem:[%s2742_s4 + $0x78] sm:$0xff] }
  0x28   : > { %459 = vmatpush.msra.mxu0 %v450_v15  ;;  %1445 = vmatpush.msra.mxu1 %v450_v15  ;;  %v427_v48 = vld [vmem:[%s1646_s8 + $0x120] sm:$0xff]  ;;  %v620_v50 = vsel %vm362_vm13, 1, %v1572_v6  ;;  %v619_v51 = vsel %vm361_vm14, 1, %v1572_v6  ;;  %v321_v52 = vld [vmem:[%s2742_s4 + $0x88] sm:$0xff]  ;;  %v405_v56 = vld [vmem:[%s1646_s8 + $0x70] sm:$0xff]  ;;  %vm364_vm1 = vcmp.gt.f32.partialorder %v319_v54, 0.0 }
  0x29   : > { %1446 = vmatpush.msra.mxu2 %v450_v15  ;;  %1447 = vmatpush.msra.mxu3 %v450_v15  ;;  %v320_v53 = vld [vmem:[%s2742_s4 + $0x80] sm:$0xff]  ;;  %vm366_vm15 = vcmp.gt.f32.partialorder %v321_v52, 0.0  ;;  %v416_v57 = vld [vmem:[%s1646_s8 + $0xc8] sm:$0xff]  ;;  %v622_v61 = vsel %vm364_vm1, 1, %v1572_v6  ;;  %v323_v63 = vld [vmem:[%s2742_s4 + $0x98] sm:$0xff] }
  0x2a   : > { %460 = vmatpush.msra.mxu0 %v449_v16  ;;  %1448 = vmatpush.msra.mxu1 %v449_v16  ;;  %v395_v55 = vld [vmem:[%s1646_s8 + $0x20] sm:$0xff]  ;;  %vm365_vm0 = vcmp.gt.f32.partialorder %v320_v53, 0.0  ;;  %v428_v58 = vld [vmem:[%s1646_s8 + $0x128] sm:$0xff]  ;;  %v624_v59 = vsel %vm366_vm15, 1, %v1572_v6  ;;  %v322_v0 = vld [vmem:[%s2742_s4 + $0x90] sm:$0xff]  ;;  %vm368_vm3 = vcmp.gt.f32.partialorder %v323_v63, 0.0 }
  0x2b   : > { %1449 = vmatpush.msra.mxu2 %v449_v16  ;;  %1450 = vmatpush.msra.mxu3 %v449_v16  ;;  %v623_v60 = vsel %vm365_vm0, 1, %v1572_v6  ;;  %v324_v62 = vld [vmem:[%s2742_s4 + $0xa0] sm:$0xff]  ;;  %v396_v1 = vld [vmem:[%s1646_s8 + $0x28] sm:$0xff]  ;;  %v406_v2 = vld [vmem:[%s1646_s8 + $0x78] sm:$0xff]  ;;  %vm367_vm4 = vcmp.gt.f32.partialorder %v322_v0, 0.0  ;;  %v626_v7 = vsel %vm368_vm3, 1, %v1572_v6 }
  0x2c   : > { %668 = vperm.xlu2 %1528, %v612_v17   ;;  %662 = vperm.xlu1 %1527, %v610_v18   ;;  %vm369_vm2 = vcmp.gt.f32.partialorder %v324_v62, 0.0  ;;  %v417_v3 = vld [vmem:[%s1646_s8 + $0xd0] sm:$0xff]  ;;  %v625_v8 = vsel %vm367_vm4, 1, %v1572_v6  ;;  %v327_v9 = vld [vmem:[%s2742_s4 + $0xb8] sm:$0xff]  ;;  %v325_v11 = vld [vmem:[%s2742_s4 + $0xa8] sm:$0xff] }
  0x2d   : > { %656 = vperm.xlu0 %1526, %v608_v19   ;;  %461 = vmatpush.msra.mxu0 %v448_v20  ;;  %v429_v4 = vld [vmem:[%s1646_s8 + $0x130] sm:$0xff]  ;;  %v627_v5 = vsel %vm369_vm2, 1, %v1572_v6  ;;  %vm372_vm5 = vcmp.gt.f32.partialorder %v327_v9, 0.0  ;;  %v407_v13 = vld [vmem:[%s1646_s8 + $0x80] sm:$0xff]  ;;  %v418_v14 = vld [vmem:[%s1646_s8 + $0xd8] sm:$0xff]  ;;  %vm370_vm7 = vcmp.gt.f32.partialorder %v325_v11, 0.0 }
  0x2e   : > { %1451 = vmatpush.msra.mxu1 %v448_v20  ;;  %1452 = vmatpush.msra.mxu2 %v448_v20  ;;  %v326_v10 = vld [vmem:[%s2742_s4 + $0xb0] sm:$0xff]  ;;  %v430_v15 = vld [vmem:[%s1646_s8 + $0x138] sm:$0xff]  ;;  %v630_v16 = vsel %vm372_vm5, 1, %v1572_v6  ;;  %v628_v18 = vsel %vm370_vm7, 1, %v1572_v6  ;;  %v408_v23 = vld [vmem:[%s1646_s8 + $0x88] sm:$0xff] }
  0x2f   : > { %1453 = vmatpush.msra.mxu3 %v448_v20  ;;  %462 = vmatpush.msra.mxu0 %v447_v21  ;;  %v397_v12 = vld [vmem:[%s1646_s8 + $0x30] sm:$0xff]  ;;  %vm371_vm6 = vcmp.gt.f32.partialorder %v326_v10, 0.0  ;;  %v329_v20 = vld [vmem:[%s2742_s4 + $0xc8] sm:$0xff]  ;;  %v398_v22 = vld [vmem:[%s1646_s8 + $0x38] sm:$0xff] }
  0x30   : > { %1454 = vmatpush.msra.mxu1 %v447_v21  ;;  %1455 = vmatpush.msra.mxu2 %v447_v21  ;;  %v629_v17 = vsel %vm371_vm6, 1, %v1572_v6  ;;  %v330_v19 = vld [vmem:[%s2742_s4 + $0xd0] sm:$0xff]  ;;  %vm374_vm9 = vcmp.gt.f32.partialorder %v329_v20, 0.0  ;;  %v419_v24 = vld [vmem:[%s1646_s8 + $0xe0] sm:$0xff]  ;;  %v420_v34 = vld [vmem:[%s1646_s8 + $0xe8] sm:$0xff] }
  0x31   : > { %1456 = vmatpush.msra.mxu3 %v447_v21  ;;  %463 = vmatpush.msra.mxu0 %v446_v25  ;;  %v328_v21 = vld [vmem:[%s2742_s4 + $0xc0] sm:$0xff]  ;;  %vm375_vm8 = vcmp.gt.f32.partialorder %v330_v19, 0.0  ;;  %v409_v33 = vld [vmem:[%s1646_s8 + $0x90] sm:$0xff]  ;;  %v400_v42 = vld [vmem:[%s1646_s8 + $0x48] sm:$0xff] }
  0x32   : > { %1457 = vmatpush.msra.mxu1 %v446_v25  ;;  %1458 = vmatpush.msra.mxu2 %v446_v25  ;;  %vm373_vm10 = vcmp.gt.f32.partialorder %v328_v21, 0.0  ;;  %v399_v32 = vld [vmem:[%s1646_s8 + $0x40] sm:$0xff]  ;;  %v334_v41 = vld [vmem:[%s2742_s4 + $0xf0] sm:$0xff]  ;;  %v422_v54 = vld [vmem:[%s1646_s8 + $0xf8] sm:$0xff] }
  0x33   : > { %1459 = vmatpush.msra.mxu3 %v446_v25  ;;  %464 = vmatpush.msra.mxu0 %v445_v26  ;;  %v431_v25 = vld [vmem:[%s1646_s8 + $0x140] sm:$0xff]  ;;  %v421_v44 = vld [vmem:[%s1646_s8 + $0xf0] sm:$0xff]  ;;  %vm379_vm0 = vcmp.gt.f32.partialorder %v334_v41, 0.0  ;;  %v402_v63 = vld [vmem:[%s1646_s8 + $0x58] sm:$0xff] }
  0x34   : > { %1460 = vmatpush.msra.mxu1 %v445_v26  ;;  %1461 = vmatpush.msra.mxu2 %v445_v26  ;;  %v401_v52 = vld [vmem:[%s1646_s8 + $0x50] sm:$0xff]  ;;  %v411_v53 = vld [vmem:[%s1646_s8 + $0xa0] sm:$0xff]  ;;  %v412_v0 = vld [vmem:[%s1646_s8 + $0xa8] sm:$0xff] }
  0x35   : > { %1462 = vmatpush.msra.mxu3 %v445_v26  ;;  %677 = vperm.xlu2 %1528, %v615_v27   ;;  %v633_v26 = vsel %vm375_vm8, 1, %v1572_v6  ;;  %v632_v27 = vsel %vm374_vm9, 1, %v1572_v6  ;;  %v340_v62 = vld [vmem:[%s2742_s4 + $0x120] sm:$0xff]  ;;  %v343_v10 = vld [vmem:[%s2742_s4 + $0x138] sm:$0xff]  ;;  %v346_v21 = vld [vmem:[%s2742_s4 + $0x150] sm:$0xff] }
  0x36   : > { %674 = vperm.xlu1 %1527, %v614_v28   ;;  %671 = vperm.xlu0 %1526, %v613_v29   ;;  %v631_v28 = vsel %vm373_vm10, 1, %v1572_v6  ;;  %v333_v29 = vld [vmem:[%s2742_s4 + $0xe8] sm:$0xff]  ;;  %vm385_vm6 = vcmp.gt.f32.partialorder %v340_v62, 0.0  ;;  %v344_v9 = vld [vmem:[%s2742_s4 + $0x140] sm:$0xff]  ;;  %vm388_vm9 = vcmp.gt.f32.partialorder %v343_v10, 0.0  ;;  %v347_v19 = vld [vmem:[%s2742_s4 + $0x158] sm:$0xff] }
  0x37   : > { %465 = vmatpush.msra.mxu0 %v444_v30  ;;  %1463 = vmatpush.msra.mxu1 %v444_v30  ;;  %vm378_vm11 = vcmp.gt.f32.partialorder %v333_v29, 0.0  ;;  %v403_v11 = vld [vmem:[%s1646_s8 + $0x60] sm:$0xff]  ;;  %vm389_vm8 = vcmp.gt.f32.partialorder %v344_v9, 0.0 }
  0x38   : > { %1464 = vmatpush.msra.mxu2 %v444_v30  ;;  %1465 = vmatpush.msra.mxu3 %v444_v30  ;;  %v332_v30 = vld [vmem:[%s2742_s4 + $0xe0] sm:$0xff] }
  0x39   : > { %466 = vmatpush.msra.mxu0 %v443_v31  ;;  %1466 = vmatpush.msra.mxu1 %v443_v31  ;;  %vm377_vm12 = vcmp.gt.f32.partialorder %v332_v30, 0.0 }
  0x3a   : > { %1467 = vmatpush.msra.mxu2 %v443_v31  ;;  %1468 = vmatpush.msra.mxu3 %v443_v31  ;;  %v331_v31 = vld [vmem:[%s2742_s4 + $0xd8] sm:$0xff] }
  0x3b   : > { %467 = vmatpush.msra.mxu0 %v442_v35  ;;  %1469 = vmatpush.msra.mxu1 %v442_v35  ;;  %vm376_vm13 = vcmp.gt.f32.partialorder %v331_v31, 0.0  ;;  %v426_v31 = vld [vmem:[%s1646_s8 + $0x118] sm:$0xff] }
  0x3c   : > { %1470 = vmatpush.msra.mxu2 %v442_v35  ;;  %1471 = vmatpush.msra.mxu3 %v442_v35  ;;  %v432_v35 = vld [vmem:[%s1646_s8 + $0x148] sm:$0xff] }
  0x3d   : > { %468 = vmatpush.msra.mxu0 %v441_v36  ;;  %1472 = vmatpush.msra.mxu1 %v441_v36 }
  0x3e   : > { %1473 = vmatpush.msra.mxu2 %v441_v36  ;;  %1474 = vmatpush.msra.mxu3 %v441_v36  ;;  %v636_v36 = vsel %vm378_vm11, 1, %v1572_v6  ;;  %vm392_vm11 = vcmp.gt.f32.partialorder %v347_v19, 0.0 }
  0x3f   : > { %686 = vperm.xlu2 %1528, %v618_v37   ;;  %683 = vperm.xlu1 %1527, %v617_v38   ;;  %v635_v37 = vsel %vm377_vm12, 1, %v1572_v6  ;;  %v634_v38 = vsel %vm376_vm13, 1, %v1572_v6  ;;  %vm391_vm12 = vcmp.gt.f32.partialorder %v346_v21, 0.0 }
  0x40   : > { %680 = vperm.xlu0 %1526, %v616_v39   ;;  %469 = vmatpush.msra.mxu0 %v440_v40  ;;  %v336_v39 = vld [vmem:[%s2742_s4 + $0x100] sm:$0xff] }
  0x41   : > { %1475 = vmatpush.msra.mxu1 %v440_v40  ;;  %1476 = vmatpush.msra.mxu2 %v440_v40  ;;  %vm381_vm14 = vcmp.gt.f32.partialorder %v336_v39, 0.0 }
  0x42   : > { %1477 = vmatpush.msra.mxu3 %v440_v40  ;;  %470 = vmatpush.msra.mxu0 %v439_v43  ;;  %v335_v40 = vld [vmem:[%s2742_s4 + $0xf8] sm:$0xff] }
  0x43   : > { %1478 = vmatpush.msra.mxu1 %v439_v43  ;;  %1479 = vmatpush.msra.mxu2 %v439_v43  ;;  %vm380_vm15 = vcmp.gt.f32.partialorder %v335_v40, 0.0 }
  0x44   : > { %1480 = vmatpush.msra.mxu3 %v439_v43  ;;  %471 = vmatmul.f32.vlgmr.msra.gmra.mxu0 %v394_v45  ;;  %v410_v43 = vld [vmem:[%s1646_s8 + $0x98] sm:$0xff]  ;;  %v433_v45 = vld [vmem:[%s1646_s8 + $0x150] sm:$0xff] }
  0x45   : > { %501 = vmatmul.f32.vlgmr.msra.gmra.mxu1 %v404_v46  ;;  %534 = vmatmul.f32.vlgmr.msra.gmra.mxu2 %v415_v47  ;;  %v639_v46 = vsel %vm381_vm14, 1, %v1572_v6  ;;  %v638_v47 = vsel %vm380_vm15, 1, %v1572_v6 }
  0x46   : > { %570 = vmatmul.f32.vlgmr.msra.gmra.mxu3 %v427_v48  ;;  %v637_v48 = vsel %vm379_vm0, 1, %v1572_v6 }
  0x47   : > { %695 = vperm.xlu2 %1528, %v621_v49   ;;  %692 = vperm.xlu1 %1527, %v620_v50   ;;  %v339_v49 = vld [vmem:[%s2742_s4 + $0x118] sm:$0xff]  ;;  %v338_v50 = vld [vmem:[%s2742_s4 + $0x110] sm:$0xff] }
  0x48   : > { %689 = vperm.xlu0 %1526, %v619_v51   ;;  %v337_v51 = vld [vmem:[%s2742_s4 + $0x108] sm:$0xff]  ;;  %vm384_vm1 = vcmp.gt.f32.partialorder %v339_v49, 0.0  ;;  %vm383_vm2 = vcmp.gt.f32.partialorder %v338_v50, 0.0 }
  0x49   : > { %vm382_vm3 = vcmp.gt.f32.partialorder %v337_v51, 0.0 }
  0x4c   : > { %474 = vmatmul.f32.gmra.mxu0 %v395_v55  ;;  %v434_v55 = vld [vmem:[%s1646_s8 + $0x158] sm:$0xff] }
  0x4d   : > { %504 = vmatmul.f32.gmra.mxu1 %v405_v56  ;;  %537 = vmatmul.f32.gmra.mxu2 %v416_v57  ;;  %v642_v56 = vsel %vm384_vm1, 1, %v1572_v6  ;;  %v641_v57 = vsel %vm383_vm2, 1, %v1572_v6 }
  0x4e   : > { %573 = vmatmul.f32.gmra.mxu3 %v428_v58 }
  0x4f   : > { %704 = vperm.xlu2 %1528, %v624_v59   ;;  %701 = vperm.xlu1 %1527, %v623_v60   ;;  %v640_v59 = vsel %vm382_vm3, 1, %v1572_v6  ;;  %v342_v60 = vld [vmem:[%s2742_s4 + $0x130] sm:$0xff] }
  0x50   : > { %698 = vperm.xlu0 %1526, %v622_v61   ;;  %v341_v61 = vld [vmem:[%s2742_s4 + $0x128] sm:$0xff]  ;;  %vm387_vm4 = vcmp.gt.f32.partialorder %v342_v60, 0.0 }
  0x51   : > { %vm386_vm5 = vcmp.gt.f32.partialorder %v341_v61, 0.0 }
  0x54   : > { %477 = vmatmul.f32.gmra.mxu0 %v396_v1  ;;  %v423_v1 = vld [vmem:[%s1646_s8 + $0x100] sm:$0xff] }
  0x55   : > { %507 = vmatmul.f32.gmra.mxu1 %v406_v2  ;;  %540 = vmatmul.f32.gmra.mxu2 %v417_v3  ;;  %v435_v2 = vld [vmem:[%s1646_s8 + $0x160] sm:$0xff]  ;;  %v645_v3 = vsel %vm387_vm4, 1, %v1572_v6 }
  0x56   : > { %576 = vmatmul.f32.gmra.mxu3 %v429_v4  ;;  %v644_v4 = vsel %vm386_vm5, 1, %v1572_v6 }
  0x57   : > { %713 = vperm.xlu2 %1528, %v627_v5   ;;  %710 = vperm.xlu1 %1527, %v626_v7   ;;  %v643_v5 = vsel %vm385_vm6, 1, %v1572_v6 }
  0x58   : > { %707 = vperm.xlu0 %1526, %v625_v8   ;;  %v345_v8 = vld [vmem:[%s2742_s4 + $0x148] sm:$0xff] }
  0x59   : > { %vm390_vm7 = vcmp.gt.f32.partialorder %v345_v8, 0.0 }
  0x5c   : > { %480 = vmatmul.f32.gmra.mxu0 %v397_v12  ;;  %v413_v12 = vld [vmem:[%s1646_s8 + $0xb0] sm:$0xff] }
  0x5d   : > { %510 = vmatmul.f32.gmra.mxu1 %v407_v13  ;;  %543 = vmatmul.f32.gmra.mxu2 %v418_v14  ;;  %v424_v13 = vld [vmem:[%s1646_s8 + $0x108] sm:$0xff] }
  0x5e   : > { %579 = vmatmul.f32.gmra.mxu3 %v430_v15  ;;  %v436_v14 = vld [vmem:[%s1646_s8 + $0x168] sm:$0xff]  ;;  %v648_v15 = vsel %vm390_vm7, 1, %v1572_v6 }
  0x5f   : > { %722 = vperm.xlu2 %1528, %v630_v16   ;;  %719 = vperm.xlu1 %1527, %v629_v17   ;;  %v647_v16 = vsel %vm389_vm8, 1, %v1572_v6  ;;  %v646_v17 = vsel %vm388_vm9, 1, %v1572_v6 }
  0x60   : > { %716 = vperm.xlu0 %1526, %v628_v18   ;;  %v348_v18 = vld [vmem:[%s2742_s4 + $0x160] sm:$0xff] }
  0x61   : > { %vm393_vm10 = vcmp.gt.f32.partialorder %v348_v18, 0.0 }
  0x64   : > { %483 = vmatmul.f32.gmra.mxu0 %v398_v22  ;;  %v414_v22 = vld [vmem:[%s1646_s8 + $0xb8] sm:$0xff] }
  0x65   : > { %513 = vmatmul.f32.gmra.mxu1 %v408_v23  ;;  %546 = vmatmul.f32.gmra.mxu2 %v419_v24  ;;  %v425_v23 = vld [vmem:[%s1646_s8 + $0x110] sm:$0xff] }
  0x66   : > { %582 = vmatmul.f32.gmra.mxu3 %v431_v25  ;;  %v437_v24 = vld [vmem:[%s1646_s8 + $0x170] sm:$0xff]  ;;  %v651_v25 = vsel %vm393_vm10, 1, %v1572_v6 }
  0x67   : > { %731 = vperm.xlu2 %1528, %v633_v26   ;;  %728 = vperm.xlu1 %1527, %v632_v27   ;;  %v650_v26 = vsel %vm392_vm11, 1, %v1572_v6  ;;  %v649_v27 = vsel %vm391_vm12, 1, %v1572_v6 }
  0x68   : > { %725 = vperm.xlu0 %1526, %v631_v28  }
  0x6c   : > { %486 = vmatmul.f32.gmra.mxu0 %v399_v32  ;;  %v438_v32 = vld [vmem:[%s1646_s8 + $0x178] sm:$0xff] }
  0x6d   : > { %516 = vmatmul.f32.gmra.mxu1 %v409_v33  ;;  %549 = vmatmul.f32.gmra.mxu2 %v420_v34 }
  0x6e   : > { %585 = vmatmul.f32.gmra.mxu3 %v432_v35 }
  0x6f   : > { %740 = vperm.xlu2 %1528, %v636_v36   ;;  %737 = vperm.xlu1 %1527, %v635_v37  }
  0x70   : > { %734 = vperm.xlu0 %1526, %v634_v38  }
  0x74   : > { %489 = vmatmul.f32.gmra.mxu0 %v400_v42 }
  0x75   : > { %519 = vmatmul.f32.gmra.mxu1 %v410_v43  ;;  %552 = vmatmul.f32.gmra.mxu2 %v421_v44 }
  0x76   : > { %588 = vmatmul.f32.gmra.mxu3 %v433_v45 }
  0x77   : > { %749 = vperm.xlu2 %1528, %v639_v46   ;;  %746 = vperm.xlu1 %1527, %v638_v47  }
  0x78   : > { %743 = vperm.xlu0 %1526, %v637_v48  }
  0x7c   : > { %492 = vmatmul.f32.gmra.mxu0 %v401_v52  ;;  %v1884_v58 = vpop.permute.xlu2 %665 }
  0x7d   : > { %2827 = vst [vmem:[#allocation4_spill] sm:$0xff] %v1884_v58  ;;  %522 = vmatmul.f32.gmra.mxu1 %v411_v53  ;;  %555 = vmatmul.f32.gmra.mxu2 %v422_v54  ;;  %vm791_vm10 = vcmp.eq.s32.totalorder %v1884_v58, 1 }
  0x7e   : > { %591 = vmatmul.f32.gmra.mxu3 %v434_v55 }
  0x7f   : > { %758 = vperm.xlu2 %1528, %v642_v56   ;;  %755 = vperm.xlu1 %1527, %v641_v57  }
  0x80   : > { %752 = vperm.xlu0 %1526, %v640_v59  }
  0x84   : > { %495 = vmatmul.f32.gmra.mxu0 %v402_v63 }
  0x85   : > { %525 = vmatmul.f32.gmra.mxu1 %v412_v0  ;;  %558 = vmatmul.f32.gmra.mxu2 %v423_v1 }
  0x86   : > { %594 = vmatmul.f32.gmra.mxu3 %v435_v2  ;;  %v1903_v7 = vpop.permute.xlu2 %668 }
  0x87   : > { %2828 = vst [vmem:[#allocation5_spill] sm:$0xff] %v1903_v7  ;;  %767 = vperm.xlu2 %1528, %v645_v3   ;;  %764 = vperm.xlu1 %1527, %v644_v4  }
  0x88   : > { %761 = vperm.xlu0 %1526, %v643_v5  }
  0x8c   : > { %498 = vmatmul.f32.gmra.mxu0 %v403_v11 }
  0x8d   : > { %528 = vmatmul.f32.gmra.mxu1 %v413_v12  ;;  %561 = vmatmul.f32.gmra.mxu2 %v424_v13 }
  0x8e   : > { %597 = vmatmul.f32.gmra.mxu3 %v436_v14 }
  0x8f   : > { %776 = vperm.xlu2 %1528, %v648_v15   ;;  %773 = vperm.xlu1 %1527, %v647_v16   ;;  %v1927_v20 = vpop.permute.xlu2 %677 }
  0x90   : > { %2829 = vst [vmem:[#allocation6_spill] sm:$0xff] %v1927_v20  ;;  %770 = vperm.xlu0 %1526, %v646_v17  }
  0x95   : > { %531 = vmatmul.f32.gmra.mxu1 %v414_v22  ;;  %564 = vmatmul.f32.gmra.mxu2 %v425_v23  ;;  %v1938_v28 = vpop.permute.xlu1 %659  ;;  %v1940_v29 = vpop.permute.xlu0 %653 }
  0x96   : > { %600 = vmatmul.f32.gmra.mxu3 %v437_v24  ;;  %vm787_vm13 = vcmp.eq.s32.totalorder %v1940_v29, 1  ;;  %vm789_vm1 = vcmp.eq.s32.totalorder %v1938_v28, 1 }
  0x97   : > { %785 = vperm.xlu2 %1528, %v651_v25   ;;  %782 = vperm.xlu1 %1527, %v650_v26  }
  0x98   : > { %779 = vperm.xlu0 %1526, %v649_v27  }
  0x99   : > { %v1942_v30 = vpop.permute.xlu2 %686 }
  0x9a   : > { %2830 = vst [vmem:[#allocation7_spill] sm:$0xff] %v1942_v30  ;;  %vm798_vm0 = vcmp.eq.s32.totalorder %v1942_v30, 1 }
  0x9d   : > { %567 = vmatmul.f32.gmra.mxu2 %v426_v31 }
  0x9e   : > { %603 = vmatmul.f32.gmra.mxu3 %v438_v32  ;;  %v1946_v33 = vpop.permute.xlu1 %662 }
  0x9f   : > { %v1948_v34 = vpop.permute.xlu0 %656  ;;  %vm790_vm6 = vcmp.eq.s32.totalorder %v1946_v33, 1 }
  0xa0   : > { %vm788_vm15 = vcmp.eq.s32.totalorder %v1948_v34, 1 }
  0xa1   : > { %v1950_v35 = vpop.permute.xlu2 %695 }
  0xa2   : > { %2831 = vst [vmem:[#allocation8_spill] sm:$0xff] %v1950_v35  ;;  %vm2760_vm11 = vcmp.eq.s32.totalorder %v1950_v35, 1 }
  0xa8   : > { %v1952_v6 = vpop.permute.xlu1 %674  ;;  %v1954_v36 = vpop.permute.xlu0 %671 }
  0xa9   : > { %2832 = vst [vmem:[#allocation9_spill] sm:$0xff] %v1952_v6  ;;  %v1956_v37 = vpop.permute.xlu2 %704 }
  0xaa   : > { %2833 = vst [vmem:[#allocation10_spill] sm:$0xff] %v1954_v36 }
  0xab   : > { %2834 = vst [vmem:[#allocation11_spill] sm:$0xff] %v1956_v37 }
  0xb1   : > { %v1958_v38 = vpop.permute.xlu2 %713  ;;  %v1960_v39 = vpop.permute.xlu1 %683 }
  0xb2   : > { %2835 = vst [vmem:[#allocation12_spill] sm:$0xff] %v1958_v38  ;;  %v1962_v40 = vpop.permute.xlu0 %680  ;;  %vm797_vm14 = vcmp.eq.s32.totalorder %v1960_v39, 1 }
  0xb3   : > { %2836 = vst [vmem:[#allocation13_spill] sm:$0xff] %v1960_v39 }
  0xb4   : > { %2837 = vst [vmem:[#allocation14_spill] sm:$0xff] %v1962_v40 }
  0xb9   : > { %v1964_v41 = vpop.permute.xlu2 %722  ;;  %v1966_v42 = vpop.permute.xlu1 %692 }
  0xba   : > { %2838 = vst [vmem:[#allocation15_spill] sm:$0xff] %v1964_v41  ;;  %v1968_v43 = vpop.permute.xlu0 %689  ;;  %vm2748_vm5 = vcmp.eq.s32.totalorder %v1964_v41, 1  ;;  %vm2771_vm7 = vcmp.eq.s32.totalorder %v1966_v42, 1 }
  0xbb   : > { %2839 = vst [vmem:[#allocation16_spill] sm:$0xff] %v1966_v42  ;;  %vm2780_vm2 = vcmp.eq.s32.totalorder %v1968_v43, 1 }
  0xbc   : > { %2840 = vst [vmem:[#allocation17_spill] sm:$0xff] %v1968_v43 }
  0xc1   : > { %v472_v44 = vpop.f32.mrf.mxu0  ;;  %v1971_v45 = vpop.permute.xlu2 %731 }
  0xc2   : > { %2841 = vst [vmem:[#allocation18_spill] sm:$0xff] %v1971_v45  ;;  %v1976_v46 = vsel %vm787_vm13, %v472_v44, 0.0  ;;  %v502_v47 = vpop.f32.mrf.mxu1  ;;  %v1978_v48 = vpop.permute.xlu1 %701 }
  0xc3   : > { %2842 = vst [vmem:[#allocation19_spill] sm:$0xff] %v1978_v48  ;;  %v1982_v49 = vsel %vm797_vm14, %v502_v47, 0.0  ;;  %v1984_v50 = vpop.permute.xlu0 %698 }
  0xc4   : > { %2843 = vst [vmem:[#allocation20_spill] sm:$0xff] %v1984_v50 }
  0xc8   : > { %v535_v51 = vpop.f32.mrf.mxu2 }
  0xc9   : > { %v1987_v52 = vpop.f32.mrf.mxu3  ;;  %v475_v53 = vpop.f32.mrf.mxu0 }
  0xca   : > { %v1992_v54 = vsel %vm788_vm15, %v475_v53, 0.0  ;;  %v505_v55 = vpop.f32.mrf.mxu1  ;;  %v1994_v56 = vpop.permute.xlu2 %740 }
  0xcb   : > { %2844 = vst [vmem:[#allocation21_spill] sm:$0xff] %v1994_v56  ;;  %v1998_v57 = vsel %vm798_vm0, %v505_v55, 0.0  ;;  %v2000_v59 = vpop.permute.xlu1 %710  ;;  %v2002_v60 = vpop.permute.xlu0 %707 }
  0xcc   : > { %2845 = vst [vmem:[#allocation22_spill] sm:$0xff] %v2000_v59 }
  0xcd   : > { %2846 = vst [vmem:[#allocation23_spill] sm:$0xff] %v2002_v60 }
  0xd0   : > { %v538_v61 = vpop.f32.mrf.mxu2 }
  0xd1   : > { %v2005_v62 = vpop.f32.mrf.mxu3  ;;  %v478_v63 = vpop.f32.mrf.mxu0 }
  0xd2   : > { %v2010_v0 = vsel %vm789_vm1, %v478_v63, 0.0  ;;  %v508_v1 = vpop.f32.mrf.mxu1  ;;  %v2012_v2 = vpop.permute.xlu2 %749 }
  0xd3   : > { %2847 = vst [vmem:[#allocation24_spill] sm:$0xff] %v2012_v2  ;;  %v2016_v3 = vsel %vm2780_vm2, %v508_v1, 0.0  ;;  %v2018_v4 = vpop.permute.xlu1 %719  ;;  %v2020_v5 = vpop.permute.xlu0 %716 }
  0xd4   : > { %2848 = vst [vmem:[#allocation25_spill] sm:$0xff] %v2018_v4  ;;  %vm2749_vm3 = vcmp.eq.s32.totalorder %v2018_v4, 1  ;;  %vm2750_vm4 = vcmp.eq.s32.totalorder %v2020_v5, 1 }
  0xd5   : > { %2849 = vst [vmem:[#allocation26_spill] sm:$0xff] %v2020_v5  ;;  %v2026_v8 = vsel %vm2749_vm3, %v538_v61, 0.0  ;;  %v2030_v9 = vsel %vm2750_vm4, %v535_v51, 0.0  ;;  %vm2756_vm4 = vcmp.eq.s32.totalorder %v1978_v48, 1 }
  0xd8   : > { %v541_v10 = vpop.f32.mrf.mxu2 }
  0xd9   : > { %v2036_v11 = vsel %vm2748_vm5, %v541_v10, 0.0  ;;  %v577_v12 = vpop.f32.mrf.mxu3  ;;  %v481_v13 = vpop.f32.mrf.mxu0  ;;  %vm793_vm5 = vcmp.eq.s32.totalorder %v1954_v36, 1 }
  0xda   : > { %v2041_v14 = vsel %vm790_vm6, %v481_v13, 0.0  ;;  %v511_v15 = vpop.f32.mrf.mxu1  ;;  %v2043_v16 = vpop.permute.xlu2 %758 }
  0xdb   : > { %2850 = vst [vmem:[#allocation27_spill] sm:$0xff] %v2043_v16  ;;  %v2047_v17 = vsel %vm2771_vm7, %v511_v15, 0.0  ;;  %vm2745_vm8 = vcmp.eq.s32.totalorder %v2043_v16, 1  ;;  %v2050_v18 = vpop.permute.xlu1 %728  ;;  %v2052_v19 = vpop.permute.xlu0 %725  ;;  %vm2779_vm7 = vcmp.eq.s32.totalorder %v2002_v60, 1 }
  0xdc   : > { %2851 = vst [vmem:[#allocation28_spill] sm:$0xff] %v2050_v18  ;;  %v2056_v21 = vsel %vm2745_vm8, %v577_v12, 0.0  ;;  %vm2746_vm9 = vcmp.eq.s32.totalorder %v2052_v19, 1  ;;  %vm2747_vm12 = vcmp.eq.s32.totalorder %v2050_v18, 1  ;;  %vm792_vm8 = vcmp.eq.s32.totalorder %v1903_v7, 1 }
  0xdd   : > { %2852 = vst [vmem:[#allocation29_spill] sm:$0xff] %v2052_v19 }
  0xe0   : > { %v544_v22 = vpop.f32.mrf.mxu2 }
  0xe1   : > { %v2062_v23 = vsel %vm2746_vm9, %v544_v22, 0.0  ;;  %v580_v24 = vpop.f32.mrf.mxu3  ;;  %v484_v25 = vpop.f32.mrf.mxu0  ;;  %vm2754_vm9 = vcmp.eq.s32.totalorder %v1984_v50, 1 }
  0xe2   : > { %v2067_v26 = vsel %vm791_vm10, %v484_v25, 0.0  ;;  %v514_v27 = vpop.f32.mrf.mxu1  ;;  %v2096_v13 = vpop.permute.xlu2 %767 }
  0xe3   : > { %v2071_v31 = vsel %vm2760_vm11, %v514_v27, 0.0  ;;  %v2073_v32 = vpop.permute.xlu1 %737  ;;  %v2075_v44 = vpop.permute.xlu0 %734  ;;  %2857 = vst [vmem:[#allocation34_spill] sm:$0xff] %v2096_v13  ;;  %vm2755_vm3 = vcmp.eq.s32.totalorder %v2096_v13, 1  ;;  %vm2767_vm11 = vcmp.eq.s32.totalorder %v1956_v37, 1 }
  0xe4   : > { %2853 = vst [vmem:[#allocation30_spill] sm:$0xff] %v2073_v32 }
  0xe5   : > { %2854 = vst [vmem:[#allocation31_spill] sm:$0xff] %v2075_v44 }
  0xe8   : > { %v547_v47 = vpop.f32.mrf.mxu2 }
  0xe9   : > { %v2081_v51 = vsel %vm2747_vm12, %v547_v47, 0.0  ;;  %v583_v53 = vpop.f32.mrf.mxu3  ;;  %v487_v55 = vpop.f32.mrf.mxu0  ;;  %vm2753_vm12 = vcmp.eq.s32.totalorder %v1971_v45, 1 }
  0xea   : > { %v2086_v61 = vsel %vm792_vm8, %v487_v55, 0.0  ;;  %v517_v63 = vpop.f32.mrf.mxu1 }
  0xeb   : > { %v2090_v1 = vsel %vm2754_vm9, %v517_v63, 0.0  ;;  %v2092_v10 = vpop.permute.xlu1 %746  ;;  %v2094_v12 = vpop.permute.xlu0 %743 }
  0xec   : > { %2855 = vst [vmem:[#allocation32_spill] sm:$0xff] %v2092_v10 }
  0xed   : > { %2856 = vst [vmem:[#allocation33_spill] sm:$0xff] %v2094_v12 }
  0xf0   : > { %v550_v15 = vpop.f32.mrf.mxu2 }
  0xf1   : > { %v2103_v22 = vsel %vm2753_vm12, %v550_v15, 0.0  ;;  %v586_v25 = vpop.f32.mrf.mxu3  ;;  %v490_v27 = vpop.f32.mrf.mxu0 }
  0xf2   : > { %v2108_v47 = vsel %vm2755_vm3, %v586_v25, 0.0  ;;  %v2112_v55 = vsel %vm793_vm5, %v490_v27, 0.0  ;;  %v520_v63 = vpop.f32.mrf.mxu1  ;;  %vm2766_vm3 = vcmp.eq.s32.totalorder %v2075_v44, 1 }
  0xf3   : > { %2858 = vst [vmem:[#allocation35_spill] sm:$0xff] %v2108_v47  ;;  %v2116_v16 = vsel %vm2756_vm4, %v520_v63, 0.0  ;;  %v2118_v45 = vpop.permute.xlu1 %755  ;;  %v2120_v15 = vpop.permute.xlu0 %752  ;;  %vm794_vm4 = vcmp.eq.s32.totalorder %v1952_v6, 1 }
  0xf4   : > { %2859 = vst [vmem:[#allocation36_spill] sm:$0xff] %v2118_v45  ;;  %vm2764_vm12 = vcmp.eq.s32.totalorder %v2118_v45, 1  ;;  %vm2765_vm9 = vcmp.eq.s32.totalorder %v2120_v15, 1 }
  0xf5   : > { %2860 = vst [vmem:[#allocation37_spill] sm:$0xff] %v2120_v15  ;;  %v2127_v25 = vsel %vm2764_vm12, %v2005_v62, 0.0  ;;  %v2132_v27 = vsel %vm2765_vm9, %v1987_v52, 0.0 }
  0xf8   : > { %v553_v63 = vpop.f32.mrf.mxu2 }
  0xf9   : > { %v2138_v13 = vsel %vm2766_vm3, %v553_v63, 0.0  ;;  %v589_v18 = vpop.f32.mrf.mxu3  ;;  %v493_v19 = vpop.f32.mrf.mxu0  ;;  %vm2778_vm3 = vcmp.eq.s32.totalorder %v2073_v32, 1 }
  0xfa   : > { %v2143_v62 = vsel %vm794_vm4, %v493_v19, 0.0  ;;  %v523_v45 = vpop.f32.mrf.mxu1  ;;  %v2192_v32 = vpop.permute.xlu2 %776 }
  0xfb   : > { %v2147_v52 = vsel %vm2767_vm11, %v523_v45, 0.0  ;;  %v2149_v15 = vpop.permute.xlu1 %764  ;;  %v2151_v41 = vpop.permute.xlu0 %761  ;;  %vm795_vm11 = vcmp.eq.s32.totalorder %v1927_v20, 1  ;;  %2869 = vst [vmem:[#allocation46_spill] sm:$0xff] %v2192_v32  ;;  %vm2791_vm2 = vcmp.eq.s32.totalorder %v2192_v32, 1 }
  0xfc   : > { %2861 = vst [vmem:[#allocation38_spill] sm:$0xff] %v2149_v15  ;;  %vm2775_vm12 = vcmp.eq.s32.totalorder %v2149_v15, 1  ;;  %vm2776_vm9 = vcmp.eq.s32.totalorder %v2151_v41, 1 }
  0xfd   : > { %2862 = vst [vmem:[#allocation39_spill] sm:$0xff] %v2151_v41  ;;  %v2157_v63 = vsel %vm2775_vm12, %v583_v53, 0.0  ;;  %v2161_v19 = vsel %vm2776_vm9, %v580_v24, 0.0 }
  0xfe   : > { %2863 = vst [vmem:[#allocation40_spill] sm:$0xff] %v2157_v63 }
  0xff   : > { %2864 = vst [vmem:[#allocation41_spill] sm:$0xff] %v2161_v19 }
 0x100   : > { %v556_v45 = vpop.f32.mrf.mxu2 }
 0x101   : > { %v2167_v44 = vsel %vm2778_vm3, %v556_v45, 0.0  ;;  %v592_v4 = vpop.f32.mrf.mxu3  ;;  %v496_v5 = vpop.f32.mrf.mxu0  ;;  %vm2789_vm3 = vcmp.eq.s32.totalorder %v1994_v56, 1 }
 0x102   : > { %v2172_v53 = vsel %vm795_vm11, %v496_v5, 0.0  ;;  %v526_v15 = vpop.f32.mrf.mxu1 }
 0x103   : > { %v2176_v24 = vsel %vm2779_vm7, %v526_v15, 0.0  ;;  %v2178_v41 = vpop.permute.xlu1 %773  ;;  %v2180_v37 = vpop.permute.xlu0 %770  ;;  %vm796_vm7 = vcmp.eq.s32.totalorder %v1962_v40, 1 }
 0x104   : > { %2865 = vst [vmem:[#allocation42_spill] sm:$0xff] %v2178_v41  ;;  %vm2783_vm12 = vcmp.eq.s32.totalorder %v2178_v41, 1  ;;  %vm2788_vm9 = vcmp.eq.s32.totalorder %v2180_v37, 1 }
 0x105   : > { %2866 = vst [vmem:[#allocation43_spill] sm:$0xff] %v2180_v37  ;;  %v2186_v45 = vsel %vm2783_vm12, %v592_v4, 0.0  ;;  %v2190_v5 = vsel %vm2788_vm9, %v589_v18, 0.0  ;;  %vm2794_vm12 = vcmp.eq.s32.totalorder %v2000_v59, 1  ;;  %vm2796_vm9 = vcmp.eq.s32.totalorder %v2094_v12, 1 }
 0x106   : > { %2867 = vst [vmem:[#allocation44_spill] sm:$0xff] %v2186_v45 }
 0x107   : > { %2868 = vst [vmem:[#allocation45_spill] sm:$0xff] %v2190_v5 }
 0x108   : > { %v559_v15 = vpop.f32.mrf.mxu2 }
 0x109   : > { %v2199_v60 = vsel %vm2789_vm3, %v559_v15, 0.0  ;;  %v595_v41 = vpop.f32.mrf.mxu3  ;;  %v499_v4 = vpop.f32.mrf.mxu0 }
 0x10a   : > { %v2204_v18 = vsel %vm2791_vm2, %v595_v41, 0.0  ;;  %v2208_v37 = vsel %vm796_vm7, %v499_v4, 0.0  ;;  %v529_v48 = vpop.f32.mrf.mxu1  ;;  %vm2800_vm2 = vcmp.eq.s32.totalorder %v1958_v38, 1 }
 0x10b   : > { %2870 = vst [vmem:[#allocation47_spill] sm:$0xff] %v2204_v18  ;;  %v2212_v50 = vsel %vm2794_vm12, %v529_v48, 0.0  ;;  %v2214_v56 = vpop.permute.xlu0 %779  ;;  %v2231_v35 = vpop.permute.xlu1 %782  ;;  %vm818_vm12 = vcmp.eq.s32.totalorder %v2092_v10, 1 }
 0x10c   : > { %2871 = vst [vmem:[#allocation48_spill] sm:$0xff] %v2214_v56  ;;  %vm2799_vm3 = vcmp.eq.s32.totalorder %v2214_v56, 1  ;;  %v2243_v56 = vpop.permute.xlu2 %785 }
 0x10d   : > { %2873 = vst [vmem:[#allocation50_spill] sm:$0xff] %v2231_v35 }
 0x10e   : > { %2875 = vst [vmem:[#allocation52_spill] sm:$0xff] %v2243_v56 }
 0x110   : > { %v562_v15 = vpop.f32.mrf.mxu2 }
 0x111   : > { %v2220_v41 = vsel %vm2796_vm9, %v562_v15, 0.0  ;;  %v598_v32 = vpop.f32.mrf.mxu3  ;;  %vm2825_vm9 = vcmp.eq.s32.totalorder %v2231_v35, 1 }
 0x112   : > { %v2225_v4 = vsel %vm2799_vm3, %v598_v32, 0.0  ;;  %v532_v48 = vpop.f32.mrf.mxu1  ;;  %vm2826_vm3 = vcmp.eq.s32.totalorder %v2012_v2, 1 }
 0x113   : > { %2872 = vst [vmem:[#allocation49_spill] sm:$0xff] %v2225_v4  ;;  %v2229_v59 = vsel %vm2800_vm2, %v532_v48, 0.0  ;;  %vm2824_vm2 = vcmp.eq.s32.totalorder %v2243_v56, 1 }
 0x118   : > { %v565_v42 = vpop.f32.mrf.mxu2 }
 0x119   : > { %v2237_v15 = vsel %vm818_vm12, %v565_v42, 0.0  ;;  %v601_v12 = vpop.f32.mrf.mxu3 }
 0x11a   : > { %v2241_v32 = vsel %vm2825_vm9, %v601_v12, 0.0 }
 0x11b   : > { %2874 = vst [vmem:[#allocation51_spill] sm:$0xff] %v2241_v32 }
 0x11f   : > { %879 = sbr.rel (%p1429_p10) target bundleno = 397 (0x18d), region = 52 }
 0x120   : > { %v568_v48 = vpop.f32.mrf.mxu2 }
 0x121   : > { %v2249_v38 = vsel %vm2826_vm3, %v568_v48, 0.0  ;;  %v604_v43 = vpop.f32.mrf.mxu3 }
 0x122   : > { %v2253_v42 = vsel %vm2824_vm2, %v604_v43, 0.0 }
 0x123   : > { %2876 = vst [vmem:[#allocation53_spill] sm:$0xff] %v2253_v42 }
 0x124   : > { %v881_v12 = vadd.f32 %v1992_v54, %v1976_v46  ;;  %v934_v35 = vmul.f32 %v1976_v46, %v1976_v46  ;;  %v935_v10 = vmul.f32 %v1992_v54, %v1992_v54  ;;  %v936_v2 = vmul.f32 %v2010_v0, %v2010_v0 }
 0x125   : > { %v937_v56 = vmul.f32 %v2041_v14, %v2041_v14  ;;  %v938_v40 = vmul.f32 %v2067_v26, %v2067_v26 }
 0x126   : > { %v882_v48 = vadd.f32 %v881_v12, %v2010_v0  ;;  %v979_v30 = vadd.f32 %v935_v10, %v934_v35  ;;  %v939_v12 = vmul.f32 %v2086_v61, %v2086_v61  ;;  %v941_v10 = vmul.f32 %v2143_v62, %v2143_v62 }
 0x128   : > { %v883_v43 = vadd.f32 %v882_v48, %v2041_v14  ;;  %v980_v20 = vadd.f32 %v979_v30, %v936_v2  ;;  %v940_v48 = vmul.f32 %v2112_v55, %v2112_v55 }
 0x12a   : > { %v884_v39 = vadd.f32 %v883_v43, %v2067_v26  ;;  %v981_v36 = vadd.f32 %v980_v20, %v937_v56 }
 0x12c   : > { %v885_v6 = vadd.f32 %v884_v39, %v2086_v61  ;;  %v982_v58 = vadd.f32 %v981_v36, %v938_v40  ;;  %v942_v39 = vmul.f32 %v2172_v53, %v2172_v53 }
 0x12e   : > { %v886_v7 = vadd.f32 %v885_v6, %v2112_v55  ;;  %v983_v43 = vadd.f32 %v982_v58, %v939_v12  ;;  %v943_v6 = vmul.f32 %v2208_v37, %v2208_v37  ;;  %v945_v12 = vmul.f32 %v1998_v57, %v1998_v57 }
 0x130   : > { %v887_v35 = vadd.f32 %v886_v7, %v2143_v62  ;;  %v984_v2 = vadd.f32 %v983_v43, %v940_v48  ;;  %v944_v7 = vmul.f32 %v1982_v49, %v1982_v49  ;;  %v946_v43 = vmul.f32 %v2016_v3, %v2016_v3 }
 0x132   : > { %v888_v30 = vadd.f32 %v887_v35, %v2172_v53  ;;  %v985_v56 = vadd.f32 %v984_v2, %v941_v10  ;;  %v947_v2 = vmul.f32 %v2047_v17, %v2047_v17 }
 0x134   : > { %v889_v20 = vadd.f32 %v888_v30, %v2208_v37  ;;  %v986_v40 = vadd.f32 %v985_v56, %v942_v39  ;;  %v948_v56 = vmul.f32 %v2071_v31, %v2071_v31 }
 0x136   : > { %v890_v36 = vadd.f32 %v889_v20, %v1982_v49  ;;  %v987_v35 = vadd.f32 %v986_v40, %v943_v6  ;;  %v949_v40 = vmul.f32 %v2090_v1, %v2090_v1 }
 0x138   : > { %v891_v58 = vadd.f32 %v890_v36, %v1998_v57  ;;  %v988_v30 = vadd.f32 %v987_v35, %v944_v7  ;;  %v950_v35 = vmul.f32 %v2116_v16, %v2116_v16 }
 0x13a   : > { %v892_v48 = vadd.f32 %v891_v58, %v2016_v3  ;;  %v989_v20 = vadd.f32 %v988_v30, %v945_v12  ;;  %v951_v30 = vmul.f32 %v2147_v52, %v2147_v52 }
 0x13c   : > { %v893_v10 = vadd.f32 %v892_v48, %v2047_v17  ;;  %v990_v36 = vadd.f32 %v989_v20, %v946_v43  ;;  %v952_v20 = vmul.f32 %v2176_v24, %v2176_v24 }
 0x13e   : > { %v894_v39 = vadd.f32 %v893_v10, %v2071_v31  ;;  %v991_v58 = vadd.f32 %v990_v36, %v947_v2  ;;  %v953_v36 = vmul.f32 %v2212_v50, %v2212_v50 }
 0x140   : > { %v895_v6 = vadd.f32 %v894_v39, %v2090_v1  ;;  %v992_v48 = vadd.f32 %v991_v58, %v948_v56  ;;  %v954_v58 = vmul.f32 %v2229_v59, %v2229_v59 }
 0x142   : > { %v896_v7 = vadd.f32 %v895_v6, %v2116_v16  ;;  %v993_v10 = vadd.f32 %v992_v48, %v949_v40  ;;  %v955_v48 = vmul.f32 %v2030_v9, %v2030_v9 }
 0x144   : > { %v897_v12 = vadd.f32 %v896_v7, %v2147_v52  ;;  %v994_v39 = vadd.f32 %v993_v10, %v950_v35  ;;  %v956_v10 = vmul.f32 %v2026_v8, %v2026_v8 }
 0x146   : > { %v898_v43 = vadd.f32 %v897_v12, %v2176_v24  ;;  %v995_v6 = vadd.f32 %v994_v39, %v951_v30  ;;  %v957_v39 = vmul.f32 %v2036_v11, %v2036_v11 }
 0x148   : > { %v899_v2 = vadd.f32 %v898_v43, %v2212_v50  ;;  %v996_v7 = vadd.f32 %v995_v6, %v952_v20  ;;  %v958_v6 = vmul.f32 %v2062_v23, %v2062_v23 }
 0x14a   : > { %v900_v56 = vadd.f32 %v899_v2, %v2229_v59  ;;  %v997_v12 = vadd.f32 %v996_v7, %v953_v36  ;;  %v959_v7 = vmul.f32 %v2081_v51, %v2081_v51 }
 0x14c   : > { %v901_v40 = vadd.f32 %v900_v56, %v2030_v9  ;;  %v998_v43 = vadd.f32 %v997_v12, %v954_v58  ;;  %v960_v12 = vmul.f32 %v2103_v22, %v2103_v22 }
 0x14e   : > { %v902_v35 = vadd.f32 %v901_v40, %v2026_v8  ;;  %v999_v2 = vadd.f32 %v998_v43, %v955_v48  ;;  %v961_v43 = vmul.f32 %v2138_v13, %v2138_v13 }
 0x150   : > { %v903_v30 = vadd.f32 %v902_v35, %v2036_v11  ;;  %v1000_v56 = vadd.f32 %v999_v2, %v956_v10  ;;  %v962_v2 = vmul.f32 %v2167_v44, %v2167_v44 }
 0x152   : > { %v904_v20 = vadd.f32 %v903_v30, %v2062_v23  ;;  %v1001_v40 = vadd.f32 %v1000_v56, %v957_v39  ;;  %v963_v56 = vmul.f32 %v2199_v60, %v2199_v60 }
 0x154   : > { %v905_v36 = vadd.f32 %v904_v20, %v2081_v51  ;;  %v1002_v35 = vadd.f32 %v1001_v40, %v958_v6  ;;  %v964_v40 = vmul.f32 %v2220_v41, %v2220_v41 }
 0x156   : > { %v906_v58 = vadd.f32 %v905_v36, %v2103_v22  ;;  %v1003_v30 = vadd.f32 %v1002_v35, %v959_v7  ;;  %v965_v35 = vmul.f32 %v2237_v15, %v2237_v15 }
 0x158   : > { %v907_v48 = vadd.f32 %v906_v58, %v2138_v13  ;;  %v1004_v20 = vadd.f32 %v1003_v30, %v960_v12  ;;  %v966_v30 = vmul.f32 %v2249_v38, %v2249_v38 }
 0x15a   : > { %v908_v10 = vadd.f32 %v907_v48, %v2167_v44  ;;  %v1005_v36 = vadd.f32 %v1004_v20, %v961_v43  ;;  %v967_v20 = vmul.f32 %v2132_v27, %v2132_v27 }
 0x15c   : > { %v909_v39 = vadd.f32 %v908_v10, %v2199_v60  ;;  %v1006_v58 = vadd.f32 %v1005_v36, %v962_v2  ;;  %v968_v36 = vmul.f32 %v2127_v25, %v2127_v25 }
 0x15e   : > { %v910_v6 = vadd.f32 %v909_v39, %v2220_v41  ;;  %v1007_v48 = vadd.f32 %v1006_v58, %v963_v56  ;;  %v969_v58 = vmul.f32 %v2056_v21, %v2056_v21 }
 0x160   : > { %v911_v7 = vadd.f32 %v910_v6, %v2237_v15  ;;  %v1008_v10 = vadd.f32 %v1007_v48, %v964_v40  ;;  %v970_v48 = vmul.f32 %v2161_v19, %v2161_v19 }
 0x162   : > { %v912_v12 = vadd.f32 %v911_v7, %v2249_v38  ;;  %v1009_v39 = vadd.f32 %v1008_v10, %v965_v35  ;;  %v971_v10 = vmul.f32 %v2157_v63, %v2157_v63 }
 0x164   : > { %v913_v43 = vadd.f32 %v912_v12, %v2132_v27  ;;  %v1010_v6 = vadd.f32 %v1009_v39, %v966_v30  ;;  %v972_v39 = vmul.f32 %v2108_v47, %v2108_v47 }
 0x166   : > { %v914_v2 = vadd.f32 %v913_v43, %v2127_v25  ;;  %v1011_v7 = vadd.f32 %v1010_v6, %v967_v20  ;;  %v973_v6 = vmul.f32 %v2190_v5, %v2190_v5 }
 0x168   : > { %v915_v56 = vadd.f32 %v914_v2, %v2056_v21  ;;  %v1012_v12 = vadd.f32 %v1011_v7, %v968_v36  ;;  %v974_v7 = vmul.f32 %v2186_v45, %v2186_v45 }
 0x16a   : > { %v916_v40 = vadd.f32 %v915_v56, %v2161_v19  ;;  %v1013_v43 = vadd.f32 %v1012_v12, %v969_v58  ;;  %v975_v12 = vmul.f32 %v2204_v18, %v2204_v18 }
 0x16c   : > { %v917_v35 = vadd.f32 %v916_v40, %v2157_v63  ;;  %v1014_v2 = vadd.f32 %v1013_v43, %v970_v48  ;;  %v976_v43 = vmul.f32 %v2225_v4, %v2225_v4 }
 0x16e   : > { %v918_v30 = vadd.f32 %v917_v35, %v2108_v47  ;;  %v1015_v56 = vadd.f32 %v1014_v2, %v971_v10  ;;  %v977_v2 = vmul.f32 %v2241_v32, %v2241_v32 }
 0x170   : > { %v919_v20 = vadd.f32 %v918_v30, %v2190_v5  ;;  %v1016_v40 = vadd.f32 %v1015_v56, %v972_v39  ;;  %v978_v56 = vmul.f32 %v2253_v42, %v2253_v42 }
 0x172   : > { %v920_v36 = vadd.f32 %v919_v20, %v2186_v45  ;;  %v1017_v35 = vadd.f32 %v1016_v40, %v973_v6 }
 0x174   : > { %v921_v58 = vadd.f32 %v920_v36, %v2204_v18  ;;  %v1018_v30 = vadd.f32 %v1017_v35, %v974_v7 }
 0x176   : > { %v922_v48 = vadd.f32 %v921_v58, %v2225_v4  ;;  %v1019_v20 = vadd.f32 %v1018_v30, %v975_v12 }
 0x178   : > { %v923_v10 = vadd.f32 %v922_v48, %v2241_v32  ;;  %v1020_v36 = vadd.f32 %v1019_v20, %v976_v43  ;;  %v880_v48 = vld [vmem:[#allocation2] sm:$0x1] }
 0x17a   : > { %v924_v39 = vadd.f32 %v923_v10, %v2253_v42  ;;  %v1021_v6 = vadd.f32 %v1020_v36, %v977_v2  ;;  %v933_v10 = vld [vmem:[#allocation3] sm:$0x1] }
 0x17c   : > { %v925_v18 = vrot.slane %v924_v39, 4  ;;  %v1022_v58 = vadd.f32 %v1021_v6, %v978_v56 }
 0x17e   : > { %v926_v40 = vadd.f32 %v925_v18, %v924_v39  ;;  %v1023_v5 = vrot.slane %v1022_v58, 4 }
 0x180   : > { %v927_v45 = vrot.slane %v926_v40, 2  ;;  %v1024_v7 = vadd.f32 %v1023_v5, %v1022_v58 }
 0x182   : > { %v928_v4 = vadd.f32 %v927_v45, %v926_v40  ;;  %v1025_v47 = vrot.slane %v1024_v7, 2 }
 0x184   : > { %v929_v35 = vrot.slane %v928_v4, 1  ;;  %v1026_v32 = vadd.f32 %v1025_v47, %v1024_v7 }
 0x186   : > { %v930_v63 = vadd.f32 %v929_v35, %v928_v4  ;;  %v1027_v30 = vrot.slane %v1026_v32, 1 }
 0x188   : > { %v931_v12 = vadd.f32 %v930_v63, %v880_v48  ;;  %v1028_v19 = vadd.f32 %v1027_v30, %v1026_v32 }
 0x18a   : > { %932 = vst [vmem:[#allocation2] sm:$0x1] %v931_v12  ;;  %v1029_v42 = vadd.f32 %v1028_v19, %v933_v10 }
 0x18c   : > { %1030 = vst [vmem:[#allocation3] sm:$0x1] %v1029_v42 }
 0x18d PF: > { %p1430_p11 = scmp.ne.s32.totalorder %s1557_s22, 1 }
 0x18f   : > { %1034 = sbr.rel (%p1430_p11) target bundleno = 493 (0x1ed), region = 56 }
 0x194   : > { %v1035_v18 = vld [vmem:[#allocation2] sm:$0x1]  ;;  %v1037_v45 = vld [vmem:[#allocation3] sm:$0x1]  ;;  %v1573_v47 = vmov 0.0   ;;  %v1164_v33 = vld [vmem:[%s1651_s12 + $0x70] sm:$0xff] }
 0x195   : > { %1288 = vst [vmem:[%s1656_s15] sm:$0xff] %v1573_v47  ;;  %v1036_v63 = vmul.f32 0.001953125, %v1035_v18  ;;  %v1038_v5 = vmul.f32 0.001953125, %v1037_v45  ;;  %v1041_v56 = vld [vmem:[%s2740_s2] sm:$0x1]  ;;  %v1169_v29 = vld [vmem:[%s1651_s12 + $0x98] sm:$0xff] }
 0x196   : > { %1289 = vst [vmem:[%s1656_s15 + $0x8] sm:$0xff] %v1573_v47  ;;  %v1054_v58 = vld [vmem:[%s2741_s3] sm:$0x1] }
 0x197   : > { %1290 = vst [vmem:[%s1656_s15 + $0x10] sm:$0xff] %v1573_v47  ;;  %v1039_v19 = vmul.f32 %v1036_v63, %v1036_v63 }
 0x198   : > { %1291 = vst [vmem:[%s1656_s15 + $0x180] sm:$0xff] %v1573_v47 }
 0x199   : > { %1292 = vst [vmem:[%s1656_s15 + $0x188] sm:$0xff] %v1573_v47  ;;  %v1040_v4 = vsub.f32 %v1038_v5, %v1039_v19  ;;  %v1156_v19 = vld [vmem:[%s1651_s12 + $0x30] sm:$0xff] }
 0x19a   : > { %1293 = vst [vmem:[%s1656_s15 + $0x190] sm:$0xff] %v1573_v47 }
 0x19b   : > { %v1042_v32 = vadd.f32 1e-05, %v1040_v4  ;;  %v1157_v4 = vld [vmem:[%s1651_s12 + $0x38] sm:$0xff] }
 0x19d   : > { %1529 = vrsqrt.f32 %v1042_v32  ;;  %vm1049_vm2 = vweird.f32 %v1042_v32 }
 0x1a3   : > { %v1530_v42 = vpop.eup %1529 }
 0x1a4   : > { %v1044_v43 = vmul.f32 %v1530_v42, %v1042_v32  ;;  %vm1050_vm9 = vweird.f32 %v1530_v42 }
 0x1a5   : > { %vm1051_vm3 = vmor %vm1049_vm2, %vm1050_vm9 }
 0x1a6   : > { %v1045_v2 = vmul.f32 %v1530_v42, %v1044_v43 }
 0x1a8   : > { %v1046_v20 = vmul.f32 0.5, %v1045_v2 }
 0x1aa   : > { %v1047_v39 = vsub.f32 1.5, %v1046_v20  ;;  %v1158_v20 = vld [vmem:[%s1651_s12 + $0x40] sm:$0xff] }
 0x1ac   : > { %v1048_v36 = vmul.f32 %v1530_v42, %v1047_v39  ;;  %v1160_v39 = vld [vmem:[%s1651_s12 + $0x50] sm:$0xff] }
 0x1ae   : > { %v1052_v6 = vsel %vm1051_vm3, %v1530_v42, %v1048_v36 }
 0x1af   : > { %v1053_v40 = vmul.f32 %v1052_v6, %v1041_v56 }
 0x1b1   : > { %v1055_v7 = vmul.f32 %v1053_v40, %v1036_v63  ;;  %v2404_v35 = vperm.slane %v1053_v40, 0 }
 0x1b3   : > { %v1056_v48 = vsub.f32 %v1054_v58, %v1055_v7  ;;  %v1060_v12 = vmul.f32 %v2404_v35, %v1976_v46  ;;  %v1061_v30 = vmul.f32 %v2404_v35, %v1992_v54  ;;  %v1062_v10 = vmul.f32 %v2404_v35, %v2010_v0  ;;  %v1153_v46 = vld [vmem:[%s1651_s12 + $0x18] sm:$0xff]  ;;  %v1154_v54 = vld [vmem:[%s1651_s12 + $0x20] sm:$0xff] }
 0x1b4   : > { %v1063_v18 = vmul.f32 %v2404_v35, %v2041_v14  ;;  %v1064_v45 = vmul.f32 %v2404_v35, %v2067_v26  ;;  %v1065_v47 = vmul.f32 %v2404_v35, %v2086_v61  ;;  %v1066_v63 = vmul.f32 %v2404_v35, %v2112_v55  ;;  %v1155_v61 = vld [vmem:[%s1651_s12 + $0x28] sm:$0xff] }
 0x1b5   : > { %v2420_v5 = vperm.slane %v1056_v48, 0  ;;  %v1067_v0 = vmul.f32 %v2404_v35, %v2143_v62  ;;  %v1068_v14 = vmul.f32 %v2404_v35, %v2172_v53  ;;  %v1069_v26 = vmul.f32 %v2404_v35, %v2208_v37 }
 0x1b6   : > { %v1070_v55 = vmul.f32 %v2404_v35, %v1982_v49  ;;  %v1071_v32 = vmul.f32 %v2404_v35, %v1998_v57  ;;  %v1072_v42 = vmul.f32 %v2404_v35, %v2016_v3  ;;  %v1073_v62 = vmul.f32 %v2404_v35, %v2047_v17  ;;  %v1159_v49 = vld [vmem:[%s1651_s12 + $0x48] sm:$0xff] }
 0x1b7   : > { %v1108_v53 = vadd.f32 %v2420_v5, %v1060_v12  ;;  %v1109_v43 = vadd.f32 %v2420_v5, %v1061_v30  ;;  %v1110_v37 = vadd.f32 %v2420_v5, %v1062_v10  ;;  %v1111_v2 = vadd.f32 %v2420_v5, %v1063_v18  ;;  %v1161_v10 = vld [vmem:[%s1651_s12 + $0x58] sm:$0xff] }
 0x1b8   : > { %v1112_v57 = vadd.f32 %v2420_v5, %v1064_v45  ;;  %v1113_v56 = vadd.f32 %v2420_v5, %v1065_v47  ;;  %v1114_v3 = vadd.f32 %v2420_v5, %v1066_v63  ;;  %v1115_v17 = vadd.f32 %v2420_v5, %v1067_v0 }
 0x1b9   : > { %v1198_v36 = vadd.f32 %v1153_v46, %v1108_v53  ;;  %v1199_v6 = vadd.f32 %v1154_v54, %v1109_v43  ;;  %v1200_v40 = vadd.f32 %v1155_v61, %v1110_v37  ;;  %v1201_v58 = vadd.f32 %v1156_v19, %v1111_v2  ;;  %v1162_v46 = vld [vmem:[%s1651_s12 + $0x60] sm:$0xff]  ;;  %v1163_v54 = vld [vmem:[%s1651_s12 + $0x68] sm:$0xff] }
 0x1ba   : > { %v1202_v7 = vadd.f32 %v1157_v4, %v1112_v57  ;;  %v1203_v48 = vadd.f32 %v1158_v20, %v1113_v56  ;;  %v1204_v12 = vadd.f32 %v1159_v49, %v1114_v3  ;;  %v1205_v30 = vadd.f32 %v1160_v39, %v1115_v17  ;;  %v1165_v49 = vld [vmem:[%s1651_s12 + $0x78] sm:$0xff]  ;;  %v1166_v39 = vld [vmem:[%s1651_s12 + $0x80] sm:$0xff] }
 0x1bb   : > { %v1243_v18 = vsel %vm787_vm13, %v1198_v36, 0.0  ;;  %v1244_v45 = vsel %vm788_vm15, %v1199_v6, 0.0  ;;  %v1245_v47 = vsel %vm789_vm1, %v1200_v40, 0.0  ;;  %v1246_v63 = vsel %vm790_vm6, %v1201_v58, 0.0  ;;  %v1167_v36 = vld [vmem:[%s1651_s12 + $0x88] sm:$0xff]  ;;  %v1168_v6 = vld [vmem:[%s1651_s12 + $0x90] sm:$0xff] }
 0x1bc   : > { %1294 = vst [vmem:[%s1656_s15 + $0x18] sm:$0xff] %v1243_v18  ;;  %v1247_v61 = vsel %vm791_vm10, %v1202_v7, 0.0  ;;  %v1248_v19 = vsel %vm792_vm8, %v1203_v48, 0.0  ;;  %v1249_v28 = vsel %vm793_vm5, %v1204_v12, 0.0  ;;  %v1250_v53 = vsel %vm794_vm4, %v1205_v30, 0.0  ;;  %v2889_v4 = vld [vmem:[#allocation8_spill] sm:$0xff] }
 0x1bd   : > { %1295 = vst [vmem:[%s1656_s15 + $0x20] sm:$0xff] %v1244_v45  ;;  %v1116_v43 = vadd.f32 %v2420_v5, %v1068_v14  ;;  %v1117_v37 = vadd.f32 %v2420_v5, %v1069_v26  ;;  %v1118_v2 = vadd.f32 %v2420_v5, %v1070_v55  ;;  %v1119_v20 = vadd.f32 %v2420_v5, %v1071_v32  ;;  %v2885_v45 = vld [vmem:[#allocation17_spill] sm:$0xff]  ;;  %v2895_v58 = vld [vmem:[#allocation11_spill] sm:$0xff]  ;;  %v2899_v12 = vld [vmem:[#allocation22_spill] sm:$0xff] }
 0x1be   : > { %1296 = vst [vmem:[%s1656_s15 + $0x28] sm:$0xff] %v1245_v47  ;;  %v1120_v57 = vadd.f32 %v2420_v5, %v1072_v42  ;;  %v1121_v56 = vadd.f32 %v2420_v5, %v1073_v62  ;;  %v1074_v14 = vmul.f32 %v2404_v35, %v2071_v31  ;;  %v1075_v26 = vmul.f32 %v2404_v35, %v2090_v1  ;;  %v2897_v7 = vld [vmem:[#allocation23_spill] sm:$0xff] }
 0x1bf   : > { %1297 = vst [vmem:[%s1656_s15 + $0x30] sm:$0xff] %v1246_v63  ;;  %v1206_v3 = vadd.f32 %v1161_v10, %v1116_v43  ;;  %v1207_v55 = vadd.f32 %v1162_v46, %v1117_v37  ;;  %v1208_v17 = vadd.f32 %v1163_v54, %v1118_v2  ;;  %v1209_v32 = vadd.f32 %v1164_v33, %v1119_v20  ;;  %v2887_v63 = vld [vmem:[#allocation16_spill] sm:$0xff] }
 0x1c0   : > { %1298 = vst [vmem:[%s1656_s15 + $0x38] sm:$0xff] %v1247_v61  ;;  %v1210_v42 = vadd.f32 %v1165_v49, %v1120_v57  ;;  %v1211_v40 = vadd.f32 %v1166_v39, %v1121_v56  ;;  %v1122_v62 = vadd.f32 %v2420_v5, %v1074_v14  ;;  %v1123_v31 = vadd.f32 %v2420_v5, %v1075_v26  ;;  %v2891_v33 = vld [vmem:[#allocation20_spill] sm:$0xff]  ;;  %v1173_v57 = vld [vmem:[%s1651_s12 + $0xb8] sm:$0xff] }
 0x1c1   : > { %1299 = vst [vmem:[%s1656_s15 + $0x40] sm:$0xff] %v1248_v19  ;;  %v1251_v1 = vsel %vm795_vm11, %v1206_v3, 0.0  ;;  %v1252_v48 = vsel %vm796_vm7, %v1207_v55, 0.0  ;;  %v1253_v30 = vsel %vm797_vm14, %v1208_v17, 0.0  ;;  %v1254_v18 = vsel %vm798_vm0, %v1209_v32, 0.0  ;;  %v1170_v43 = vld [vmem:[%s1651_s12 + $0xa0] sm:$0xff] }
 0x1c2   : > { %1300 = vst [vmem:[%s1656_s15 + $0x48] sm:$0xff] %v1249_v28  ;;  %vm2886_vm13 = vcmp.eq.s32.totalorder %v2885_v45, 1  ;;  %vm2888_vm15 = vcmp.eq.s32.totalorder %v2887_v63, 1  ;;  %v1212_v54 = vadd.f32 %v1167_v36, %v1122_v62  ;;  %v1213_v0 = vadd.f32 %v1168_v6, %v1123_v31  ;;  %v1171_v37 = vld [vmem:[%s1651_s12 + $0xa8] sm:$0xff]  ;;  %v1174_v56 = vld [vmem:[%s1651_s12 + $0xc0] sm:$0xff]  ;;  %v1176_v6 = vld [vmem:[%s1651_s12 + $0xd0] sm:$0xff] }
 0x1c3   : > { %v1255_v47 = vsel %vm2886_vm13, %v1210_v42, 0.0  ;;  %v1256_v46 = vsel %vm2888_vm15, %v1211_v40, 0.0  ;;  %1301 = vst [vmem:[%s1656_s15 + $0x50] sm:$0xff] %v1250_v53  ;;  %v1076_v61 = vmul.f32 %v2404_v35, %v2116_v16  ;;  %v1077_v19 = vmul.f32 %v2404_v35, %v2147_v52  ;;  %v1172_v52 = vld [vmem:[%s1651_s12 + $0xb0] sm:$0xff]  ;;  %v1175_v36 = vld [vmem:[%s1651_s12 + $0xc8] sm:$0xff]  ;;  %v2893_v31 = vld [vmem:[#allocation19_spill] sm:$0xff] }
 0x1c4   : > { %v1078_v34 = vmul.f32 %v2404_v35, %v2176_v24  ;;  %v1079_v28 = vmul.f32 %v2404_v35, %v2212_v50  ;;  %1302 = vst [vmem:[%s1656_s15 + $0x58] sm:$0xff] %v1251_v1  ;;  %vm2890_vm14 = vcmp.eq.s32.totalorder %v2889_v4, 1  ;;  %vm2892_vm0 = vcmp.eq.s32.totalorder %v2891_v33, 1  ;;  %v2901_v10 = vld [vmem:[#allocation12_spill] sm:$0xff]  ;;  %v2903_v45 = vld [vmem:[#allocation26_spill] sm:$0xff]  ;;  %v2907_v4 = vld [vmem:[#allocation15_spill] sm:$0xff] }
 0x1c5   : > { %v1257_v53 = vsel %vm2890_vm14, %v1212_v54, 0.0  ;;  %v1258_v16 = vsel %vm2892_vm0, %v1213_v0, 0.0  ;;  %v1080_v2 = vmul.f32 %v2404_v35, %v2229_v59  ;;  %v1081_v24 = vmul.f32 %v2404_v35, %v2030_v9  ;;  %1303 = vst [vmem:[%s1656_s15 + $0x60] sm:$0xff] %v1252_v48  ;;  %v1177_v0 = vld [vmem:[%s1651_s12 + $0xd8] sm:$0xff]  ;;  %v1179_v33 = vld [vmem:[%s1651_s12 + $0xe8] sm:$0xff] }
 0x1c6   : > { %v1124_v50 = vadd.f32 %v2420_v5, %v1076_v61  ;;  %v1125_v20 = vadd.f32 %v2420_v5, %v1077_v19  ;;  %v1126_v49 = vadd.f32 %v2420_v5, %v1078_v34  ;;  %v1127_v39 = vadd.f32 %v2420_v5, %v1079_v28  ;;  %1304 = vst [vmem:[%s1656_s15 + $0x68] sm:$0xff] %v1253_v30  ;;  %v2905_v34 = vld [vmem:[#allocation25_spill] sm:$0xff] }
 0x1c7   : > { %v1128_v59 = vadd.f32 %v2420_v5, %v1080_v2  ;;  %v1129_v9 = vadd.f32 %v2420_v5, %v1081_v24  ;;  %v1082_v14 = vmul.f32 %v2404_v35, %v2026_v8  ;;  %v1083_v26 = vmul.f32 %v2404_v35, %v2036_v11  ;;  %1305 = vst [vmem:[%s1656_s15 + $0x70] sm:$0xff] %v1254_v18  ;;  %v1181_v2 = vld [vmem:[%s1651_s12 + $0xf8] sm:$0xff]  ;;  %v1182_v24 = vld [vmem:[%s1651_s12 + $0x100] sm:$0xff] }
 0x1c8   : > { %v1214_v3 = vadd.f32 %v1169_v29, %v1124_v50  ;;  %v1215_v55 = vadd.f32 %v1170_v43, %v1125_v20  ;;  %v1216_v17 = vadd.f32 %v1171_v37, %v1126_v49  ;;  %v1217_v32 = vadd.f32 %v1172_v52, %v1127_v39  ;;  %1306 = vst [vmem:[%s1656_s15 + $0x78] sm:$0xff] %v1255_v47 }
 0x1c9   : > { %v1218_v42 = vadd.f32 %v1173_v57, %v1128_v59  ;;  %v1219_v40 = vadd.f32 %v1174_v56, %v1129_v9  ;;  %v1130_v62 = vadd.f32 %v2420_v5, %v1082_v14  ;;  %v1131_v8 = vadd.f32 %v2420_v5, %v1083_v26  ;;  %1307 = vst [vmem:[%s1656_s15 + $0x80] sm:$0xff] %v1256_v46  ;;  %v1183_v59 = vld [vmem:[%s1651_s12 + $0x108] sm:$0xff]  ;;  %v1184_v9 = vld [vmem:[%s1651_s12 + $0x110] sm:$0xff] }
 0x1ca   : > { %vm2894_vm1 = vcmp.eq.s32.totalorder %v2893_v31, 1  ;;  %vm2896_vm2 = vcmp.eq.s32.totalorder %v2895_v58, 1  ;;  %vm2898_vm3 = vcmp.eq.s32.totalorder %v2897_v7, 1  ;;  %vm2900_vm4 = vcmp.eq.s32.totalorder %v2899_v12, 1  ;;  %1308 = vst [vmem:[%s1656_s15 + $0x88] sm:$0xff] %v1257_v53  ;;  %v1178_v53 = vld [vmem:[%s1651_s12 + $0xe0] sm:$0xff] }
 0x1cb   : > { %v1259_v11 = vsel %vm2894_vm1, %v1214_v3, 0.0  ;;  %v1260_v1 = vsel %vm2896_vm2, %v1215_v55, 0.0  ;;  %v1261_v48 = vsel %vm2898_vm3, %v1216_v17, 0.0  ;;  %v1262_v30 = vsel %vm2900_vm4, %v1217_v32, 0.0  ;;  %1309 = vst [vmem:[%s1656_s15 + $0x90] sm:$0xff] %v1258_v16  ;;  %v2909_v55 = vld [vmem:[#allocation29_spill] sm:$0xff] }
 0x1cc   : > { %vm2902_vm5 = vcmp.eq.s32.totalorder %v2901_v10, 1  ;;  %vm2904_vm6 = vcmp.eq.s32.totalorder %v2903_v45, 1  ;;  %v1220_v63 = vadd.f32 %v1175_v36, %v1130_v62  ;;  %v1221_v46 = vadd.f32 %v1176_v6, %v1131_v8  ;;  %1310 = vst [vmem:[%s1656_s15 + $0x98] sm:$0xff] %v1259_v11  ;;  %v2911_v17 = vld [vmem:[#allocation28_spill] sm:$0xff]  ;;  %v2913_v36 = vld [vmem:[#allocation18_spill] sm:$0xff]  ;;  %v2919_v12 = vld [vmem:[#allocation21_spill] sm:$0xff] }
 0x1cd   : > { %v1263_v18 = vsel %vm2902_vm5, %v1218_v42, 0.0  ;;  %v1264_v47 = vsel %vm2904_vm6, %v1219_v40, 0.0  ;;  %v1084_v54 = vmul.f32 %v2404_v35, %v2062_v23  ;;  %v1085_v61 = vmul.f32 %v2404_v35, %v2081_v51  ;;  %v1180_v51 = vld [vmem:[%s1651_s12 + $0xf0] sm:$0xff]  ;;  %1311 = vst [vmem:[%s1656_s15 + $0xa0] sm:$0xff] %v1260_v1  ;;  %v2915_v42 = vld [vmem:[#allocation31_spill] sm:$0xff] }
 0x1ce   : > { %v1086_v29 = vmul.f32 %v2404_v35, %v2103_v22  ;;  %v1087_v19 = vmul.f32 %v2404_v35, %v2138_v13  ;;  %vm2906_vm7 = vcmp.eq.s32.totalorder %v2905_v34, 1  ;;  %vm2908_vm8 = vcmp.eq.s32.totalorder %v2907_v4, 1  ;;  %1312 = vst [vmem:[%s1656_s15 + $0xa8] sm:$0xff] %v1261_v48  ;;  %v2917_v62 = vld [vmem:[#allocation30_spill] sm:$0xff]  ;;  %v2921_v10 = vld [vmem:[#allocation33_spill] sm:$0xff]  ;;  %v1186_v45 = vld [vmem:[%s1651_s12 + $0x120] sm:$0xff] }
 0x1cf   : > { %v1265_v28 = vsel %vm2906_vm7, %v1220_v63, 0.0  ;;  %v1266_v23 = vsel %vm2908_vm8, %v1221_v46, 0.0  ;;  %v1088_v16 = vmul.f32 %v2404_v35, %v2167_v44  ;;  %v1089_v22 = vmul.f32 %v2404_v35, %v2199_v60  ;;  %1313 = vst [vmem:[%s1656_s15 + $0xb0] sm:$0xff] %v1262_v30  ;;  %v2925_v4 = vld [vmem:[#allocation35_spill] sm:$0xff] }
 0x1d0   : > { %v1132_v13 = vadd.f32 %v2420_v5, %v1084_v54  ;;  %v1133_v43 = vadd.f32 %v2420_v5, %v1085_v61  ;;  %v1134_v37 = vadd.f32 %v2420_v5, %v1086_v29  ;;  %v1135_v52 = vadd.f32 %v2420_v5, %v1087_v19  ;;  %1314 = vst [vmem:[%s1656_s15 + $0xb8] sm:$0xff] %v1263_v18  ;;  %v1188_v29 = vld [vmem:[%s1651_s12 + $0x130] sm:$0xff]  ;;  %v1189_v19 = vld [vmem:[%s1651_s12 + $0x138] sm:$0xff] }
 0x1d1   : > { %v1136_v44 = vadd.f32 %v2420_v5, %v1088_v16  ;;  %v1137_v60 = vadd.f32 %v2420_v5, %v1089_v22  ;;  %v1090_v50 = vmul.f32 %v2404_v35, %v2220_v41  ;;  %v1091_v20 = vmul.f32 %v2404_v35, %v2237_v15  ;;  %1315 = vst [vmem:[%s1656_s15 + $0xc0] sm:$0xff] %v1264_v47  ;;  %v2923_v47 = vld [vmem:[#allocation41_spill] sm:$0xff] }
 0x1d2   : > { %v1222_v49 = vadd.f32 %v1177_v0, %v1132_v13  ;;  %v1223_v39 = vadd.f32 %v1178_v53, %v1133_v43  ;;  %v1224_v57 = vadd.f32 %v1179_v33, %v1134_v37  ;;  %v1225_v56 = vadd.f32 %v1180_v51, %v1135_v52  ;;  %1316 = vst [vmem:[%s1656_s15 + $0xc8] sm:$0xff] %v1265_v28  ;;  %v2926_v53 = vld [vmem:[#allocation45_spill] sm:$0xff]  ;;  %v1190_v37 = vld [vmem:[%s1651_s12 + $0x140] sm:$0xff] }
 0x1d3   : > { %v1226_v14 = vadd.f32 %v1181_v2, %v1136_v44  ;;  %v1227_v26 = vadd.f32 %v1182_v24, %v1137_v60  ;;  %v1138_v3 = vadd.f32 %v2420_v5, %v1090_v50  ;;  %v1139_v41 = vadd.f32 %v2420_v5, %v1091_v20  ;;  %1317 = vst [vmem:[%s1656_s15 + $0xd0] sm:$0xff] %v1266_v23  ;;  %v1191_v52 = vld [vmem:[%s1651_s12 + $0x148] sm:$0xff] }
 0x1d4   : > { %vm2910_vm9 = vcmp.eq.s32.totalorder %v2909_v55, 1  ;;  %vm2912_vm10 = vcmp.eq.s32.totalorder %v2911_v17, 1  ;;  %vm2914_vm11 = vcmp.eq.s32.totalorder %v2913_v36, 1  ;;  %vm2916_vm13 = vcmp.eq.s32.totalorder %v2915_v42, 1  ;;  %v2928_v50 = vld [vmem:[#allocation24_spill] sm:$0xff] }
 0x1d5   : > { %v1267_v15 = vsel %vm2910_vm9, %v1222_v49, 0.0  ;;  %v1268_v32 = vsel %vm2912_vm10, %v1223_v39, 0.0  ;;  %v1269_v6 = vsel %vm2914_vm11, %v1224_v57, 0.0  ;;  %v1270_v40 = vsel %vm2916_vm13, %v1225_v56, 0.0  ;;  %v1192_v49 = vld [vmem:[%s1651_s12 + $0x150] sm:$0xff]  ;;  %v2932_v56 = vld [vmem:[#allocation36_spill] sm:$0xff] }
 0x1d6   : > { %vm2918_vm15 = vcmp.eq.s32.totalorder %v2917_v62, 1  ;;  %v1228_v31 = vadd.f32 %v1183_v59, %v1138_v3  ;;  %v1229_v11 = vadd.f32 %v1184_v9, %v1139_v41  ;;  %v1092_v58 = vmul.f32 %v2404_v35, %v2249_v38  ;;  %1318 = vst [vmem:[%s1656_s15 + $0xd8] sm:$0xff] %v1267_v15  ;;  %v1185_v38 = vld [vmem:[%s1651_s12 + $0x118] sm:$0xff]  ;;  %v2930_v39 = vld [vmem:[#allocation37_spill] sm:$0xff]  ;;  %v2957_v51 = vld [vmem:[#allocation52_spill] sm:$0xff] }
 0x1d7   : > { %v1271_v8 = vsel %vm2918_vm15, %v1226_v14, 0.0  ;;  %v1093_v1 = vmul.f32 %v2404_v35, %v2132_v27  ;;  %v1094_v7 = vmul.f32 %v2404_v35, %v2127_v25  ;;  %v1095_v48 = vmul.f32 %v2404_v35, %v2056_v21  ;;  %v1187_v27 = vld [vmem:[%s1651_s12 + $0x128] sm:$0xff]  ;;  %1319 = vst [vmem:[%s1656_s15 + $0xe0] sm:$0xff] %v1268_v32  ;;  %v2935_v41 = vld [vmem:[#allocation47_spill] sm:$0xff] }
 0x1d8   : > { %vm2920_vm14 = vcmp.eq.s32.totalorder %v2919_v12, 1  ;;  %vm2922_vm0 = vcmp.eq.s32.totalorder %v2921_v10, 1  ;;  %v1096_v63 = vmul.f32 %v2404_v35, %v2923_v47  ;;  %v2924_v25 = vld [vmem:[#allocation40_spill] sm:$0xff]  ;;  %v1140_v21 = vadd.f32 %v2420_v5, %v1092_v58  ;;  %1320 = vst [vmem:[%s1656_s15 + $0xe8] sm:$0xff] %v1269_v6  ;;  %v2936_v15 = vld [vmem:[#allocation49_spill] sm:$0xff]  ;;  %v2937_v32 = vld [vmem:[#allocation51_spill] sm:$0xff] }
 0x1d9   : > { %v1272_v30 = vsel %vm2920_vm14, %v1227_v26, 0.0  ;;  %v1273_v18 = vsel %vm2922_vm0, %v1228_v31, 0.0  ;;  %v1097_v46 = vmul.f32 %v2404_v35, %v2924_v25  ;;  %v1141_v54 = vadd.f32 %v2420_v5, %v1093_v1  ;;  %1321 = vst [vmem:[%s1656_s15 + $0xf0] sm:$0xff] %v1270_v40  ;;  %v2934_v26 = vld [vmem:[#allocation44_spill] sm:$0xff]  ;;  %v2938_v6 = vld [vmem:[#allocation27_spill] sm:$0xff]  ;;  %v2942_v1 = vld [vmem:[#allocation53_spill] sm:$0xff] }
 0x1da   : > { %v1142_v0 = vadd.f32 %v2420_v5, %v1094_v7  ;;  %v1143_v61 = vadd.f32 %v2420_v5, %v1095_v48  ;;  %v1144_v34 = vadd.f32 %v2420_v5, %v1096_v63  ;;  %v1098_v23 = vmul.f32 %v2404_v35, %v2925_v4  ;;  %1322 = vst [vmem:[%s1656_s15 + $0xf8] sm:$0xff] %v1271_v8  ;;  %v2940_v40 = vld [vmem:[#allocation39_spill] sm:$0xff]  ;;  %v1195_v58 = vld [vmem:[%s1651_s12 + $0x168] sm:$0xff]  ;;  %v2945_v47 = vld [vmem:[#allocation34_spill] sm:$0xff] }
 0x1db   : > { %v1145_v28 = vadd.f32 %v2420_v5, %v1097_v46  ;;  %v1099_v33 = vmul.f32 %v2404_v35, %v2926_v53  ;;  %v1274_v16 = vsel %vm818_vm12, %v1229_v11, 0.0  ;;  %v1230_v22 = vadd.f32 %v1185_v38, %v1140_v21  ;;  %1323 = vst [vmem:[%s1656_s15 + $0x100] sm:$0xff] %v1272_v30  ;;  %v1193_v31 = vld [vmem:[%s1651_s12 + $0x158] sm:$0xff]  ;;  %v1194_v11 = vld [vmem:[%s1651_s12 + $0x160] sm:$0xff] }
 0x1dc   : > { %v1231_v13 = vadd.f32 %v1186_v45, %v1141_v54  ;;  %v1232_v43 = vadd.f32 %v1187_v27, %v1142_v0  ;;  %v1233_v2 = vadd.f32 %v1188_v29, %v1143_v61  ;;  %v1234_v24 = vadd.f32 %v1189_v19, %v1144_v34  ;;  %1324 = vst [vmem:[%s1656_s15 + $0x108] sm:$0xff] %v1273_v18  ;;  %v1196_v18 = vld [vmem:[%s1651_s12 + $0x170] sm:$0xff]  ;;  %v1197_v27 = vld [vmem:[%s1651_s12 + $0x178] sm:$0xff]  ;;  %v2953_v4 = vld [vmem:[#allocation48_spill] sm:$0xff] }
 0x1dd   : > { %v1146_v44 = vadd.f32 %v2420_v5, %v1098_v23  ;;  %v1147_v60 = vadd.f32 %v2420_v5, %v1099_v33  ;;  %vm2929_vm1 = vcmp.eq.s32.totalorder %v2928_v50, 1  ;;  %vm2931_vm12 = vcmp.eq.s32.totalorder %v2930_v39, 1  ;;  %1325 = vst [vmem:[%s1656_s15 + $0x110] sm:$0xff] %v1274_v16  ;;  %v2943_v38 = vld [vmem:[#allocation38_spill] sm:$0xff]  ;;  %v2947_v54 = vld [vmem:[#allocation43_spill] sm:$0xff] }
 0x1de   : > { %v1275_v20 = vsel %vm2929_vm1, %v1230_v22, 0.0  ;;  %v1276_v57 = vsel %vm2931_vm12, %v1231_v13, 0.0  ;;  %vm2933_vm2 = vcmp.eq.s32.totalorder %v2932_v56, 1  ;;  %v1235_v9 = vadd.f32 %v1190_v37, %v1145_v28  ;;  %v2951_v34 = vld [vmem:[#allocation46_spill] sm:$0xff] }
 0x1df   : > { %v1277_v59 = vsel %vm2933_vm2, %v1232_v43, 0.0  ;;  %v1236_v14 = vadd.f32 %v1191_v52, %v1146_v44  ;;  %v1100_v3 = vmul.f32 %v2404_v35, %v2934_v26  ;;  %v1101_v55 = vmul.f32 %v2404_v35, %v2935_v41  ;;  %1326 = vst [vmem:[%s1656_s15 + $0x118] sm:$0xff] %v1275_v20  ;;  %v2955_v53 = vld [vmem:[#allocation50_spill] sm:$0xff] }
 0x1e0   : > { %v1102_v17 = vmul.f32 %v2404_v35, %v2936_v15  ;;  %v1103_v36 = vmul.f32 %v2404_v35, %v2937_v32  ;;  %vm2939_vm3 = vcmp.eq.s32.totalorder %v2938_v6, 1  ;;  %vm2941_vm4 = vcmp.eq.s32.totalorder %v2940_v40, 1  ;;  %1327 = vst [vmem:[%s1656_s15 + $0x120] sm:$0xff] %v1276_v57 }
 0x1e1   : > { %v1278_v42 = vsel %vm2939_vm3, %v1233_v2, 0.0  ;;  %v1279_v62 = vsel %vm2941_vm4, %v1234_v24, 0.0  ;;  %v1237_v8 = vadd.f32 %v1192_v49, %v1147_v60  ;;  %v1104_v7 = vmul.f32 %v2404_v35, %v2942_v1  ;;  %1328 = vst [vmem:[%s1656_s15 + $0x128] sm:$0xff] %v1277_v59 }
 0x1e2   : > { %v1148_v48 = vadd.f32 %v2420_v5, %v1100_v3  ;;  %v1149_v12 = vadd.f32 %v2420_v5, %v1101_v55  ;;  %v1150_v30 = vadd.f32 %v2420_v5, %v1102_v17  ;;  %v1151_v10 = vadd.f32 %v2420_v5, %v1103_v36  ;;  %1329 = vst [vmem:[%s1656_s15 + $0x130] sm:$0xff] %v1278_v42 }
 0x1e3   : > { %vm2944_vm5 = vcmp.eq.s32.totalorder %v2943_v38, 1  ;;  %v1152_v35 = vadd.f32 %v2420_v5, %v1104_v7  ;;  %vm2946_vm6 = vcmp.eq.s32.totalorder %v2945_v47, 1  ;;  %1330 = vst [vmem:[%s1656_s15 + $0x138] sm:$0xff] %v1279_v62  ;;  %vm2948_vm7 = vcmp.eq.s32.totalorder %v2947_v54, 1  ;;  %v2949_v5 = vld [vmem:[#allocation42_spill] sm:$0xff] }
 0x1e4   : > { %v1280_v45 = vsel %vm2944_vm5, %v1235_v9, 0.0  ;;  %v1281_v63 = vsel %vm2946_vm6, %v1236_v14, 0.0  ;;  %v1238_v25 = vadd.f32 %v1193_v31, %v1148_v48  ;;  %v1239_v46 = vadd.f32 %v1194_v11, %v1149_v12 }
 0x1e5   : > { %v1240_v21 = vadd.f32 %v1195_v58, %v1150_v30  ;;  %v1282_v0 = vsel %vm2948_vm7, %v1237_v8, 0.0  ;;  %v1241_v61 = vadd.f32 %v1196_v18, %v1151_v10  ;;  %1331 = vst [vmem:[%s1656_s15 + $0x140] sm:$0xff] %v1280_v45  ;;  %vm2950_vm8 = vcmp.eq.s32.totalorder %v2949_v5, 1 }
 0x1e6   : > { %v1283_v29 = vsel %vm2950_vm8, %v1238_v25, 0.0  ;;  %v1242_v19 = vadd.f32 %v1197_v27, %v1152_v35  ;;  %1332 = vst [vmem:[%s1656_s15 + $0x148] sm:$0xff] %v1281_v63  ;;  %vm2952_vm9 = vcmp.eq.s32.totalorder %v2951_v34, 1  ;;  %vm2954_vm10 = vcmp.eq.s32.totalorder %v2953_v4, 1 }
 0x1e7   : > { %v1284_v28 = vsel %vm2952_vm9, %v1239_v46, 0.0  ;;  %1333 = vst [vmem:[%s1656_s15 + $0x150] sm:$0xff] %v1282_v0  ;;  %v1285_v23 = vsel %vm2954_vm10, %v1240_v21, 0.0  ;;  %vm2956_vm11 = vcmp.eq.s32.totalorder %v2955_v53, 1  ;;  %vm2958_vm13 = vcmp.eq.s32.totalorder %v2957_v51, 1 }
 0x1e8   : > { %1334 = vst [vmem:[%s1656_s15 + $0x158] sm:$0xff] %v1283_v29  ;;  %v1286_v33 = vsel %vm2956_vm11, %v1241_v61, 0.0  ;;  %v1287_v16 = vsel %vm2958_vm13, %v1242_v19, 0.0 }
 0x1e9   : > { %1335 = vst [vmem:[%s1656_s15 + $0x160] sm:$0xff] %v1284_v28 }
 0x1ea   : > { %1336 = vst [vmem:[%s1656_s15 + $0x168] sm:$0xff] %v1285_v23 }
 0x1eb   : > { %1337 = vst [vmem:[%s1656_s15 + $0x170] sm:$0xff] %v1286_v33 }
 0x1ec   : > { %1338 = vst [vmem:[%s1656_s15 + $0x178] sm:$0xff] %v1287_v16 }
 0x1ed PF: > { %s16_s25 = sadd.s32 1, %s1569_s25   ;;  %s2959_s21 = smov %s1561_s23 }
 0x1ee   : > { %p13_p12 = scmp.ge.s32.totalorder %s16_s25, 6   ;;  %s2960_s22 = smov %s1565_s24 }
 0x1ef   : > { %s2961_s23 = smov %s2964_s26  ;;  %s2962_s24 = smov %s2968_s27 }
 0x1f0   :  { %15 = sbr.rel (!%p13_p12) target bundleno = 3 (0x3), region = 89 }

// kernel: resblk1_forward.3
= control target key start
LH: loop header
LB: loop body
LE: loop exit
PB: predicated region body
PF: predicated region fallthrough
CT: control target
= control target key end

     0   :  { %s3647_s18 = smov 0   ;;  %s3649_s19 = smov 0   ;;  %s5761_s0 = inlined_call_operand.vmem [shape: f32[2,408,128], index: 0, kind: input, shape index: {}]   ;;  %s5762_s1 = inlined_call_operand.vmem [shape: f32[9,128,128], index: 1, kind: input, shape index: {}]   ;;  %s5763_s2 = inlined_call_operand.vmem [shape: f32[1,128], index: 2, kind: input, shape index: {}]   ;;  %s5764_s3 = inlined_call_operand.vmem [shape: f32[1,128], index: 3, kind: input, shape index: {}]   ;;  %s5765_s4 = inlined_call_operand.vmem [shape: f32[360,1], index: 4, kind: input, shape index: {}]   ;;  %s5766_s5 = inlined_call_operand.vmem [shape: f32[2,408,128], index: 5, kind: output, shape index: {}]  }
   0x1   :  { %s3651_s20 = smov 0   ;;  %s3653_s21 = smov 0  }
   0x2   :  { %s3655_s22 = smov 0  }
   0x3 LB: > { %s24_s23 = sadd.s32 1, %s3604_s20  ;;  %s27_s24 = sadd.s32 1, %s3608_s21  ;;  %s3612_s22 = sphi %s3655_s22, %s15_s22   ;;  %s3608_s21 = sphi %s3653_s21, %s5989_s21   ;;  %s3604_s20 = sphi %s3651_s20, %s5988_s20   ;;  %s3600_s19 = sphi %s3649_s19, %s5987_s19   ;;  %s3596_s18 = sphi %s3647_s18, %s5986_s18  }
   0x4   : > { %p25_p0 = scmp.ge.s32.totalorder %s24_s23, 2  ;;  %p3341_p1 = scmp.ge.s32.totalorder %s3612_s22, 1 }
   0x5   : > { %p201_p2 = scmp.lt.s32.totalorder %s3612_s22, 5 }
   0x6   : > { %s5991_s23 = smov (%p25_p0, %s24_s23), 0  ;;  %s5993_s24 = smov (!%p25_p0, %s27_s24), %s3608_s21 }
   0x7   : > { %p202_p3 = pnand %p3341_p1, %p201_p2  ;;  %p29_p4 = scmp.ge.s32.totalorder %s5993_s24, 2 }
   0x9   : > { %s5995_s24 = smov (%p29_p4, %s5993_s24), 0  ;;  %205 = sbr.rel (%p202_p3) target bundleno = 1209 (0x4b9), region = 40 }
   0xe   : > { %p230_p5 = scmp.lt.s32.totalorder %s3596_s18, 1  ;;  %s235_s25 = smul.u32 %s3596_s18, %s3600_s19 }
   0xf   : > { %p242_p6 = scmp.eq.s32.totalorder %s3600_s19, 0  ;;  %p243_p7 = scmp.eq.s32.totalorder %s3596_s18, 0 }
  0x10   : > { %s5997_s18 = smov (!%p230_p5, %s3596_s18), 1  ;;  %p236_p8 = scmp.lt.s32.totalorder %s235_s25, 1 }
  0x11   : > { %p244_p9 = pnand %p243_p7, %p242_p6  ;;  %s3524_s26 = smul.u32 408, %s5997_s18 }
  0x12   : > { %s5999_s25 = smov (!%p236_p8, %s235_s25), 1 }
  0x13   : > { %s3684_s29 = scalar_lea.vmem %s5761_s0, %s3524_s26  ;;  %s3525_s30 = smul.u32 408, %s5999_s25 }
  0x14   : > { %247 = sbr.rel (%p244_p9) target bundleno = 28 (0x1c), region = 44 }
  0x15   : > { %s3689_s8 = scalar_lea.vmem %s5766_s5, %s3525_s30 }
  0x19   : > { %v3614_v0 = vmov 0.0  }
  0x1a   : > { %248 = vst [vmem:[#allocation2] sm:$0x1] %v3614_v0 }
  0x1b   : > { %249 = vst [vmem:[#allocation3] sm:$0x1] %v3614_v0 }
  0x1c PF: > { %v3359_v1 = vld [vmem:[%s5762_s1 + $0xf8] sm:$0xff]  ;;  %v3358_v2 = vld [vmem:[%s5762_s1 + $0xf0] sm:$0xff]  ;;  %v3357_v3 = vld [vmem:[%s5762_s1 + $0xe8] sm:$0xff]  ;;  %p3472_p10 = scmp.ne.s32.totalorder %s3600_s19, 0 }
  0x1d   : > { %3476 = vmatpush.msra.mxu1 %v3359_v1  ;;  %3477 = vmatpush.msra.mxu2 %v3359_v1  ;;  %v3356_v4 = vld [vmem:[%s5762_s1 + $0xe0] sm:$0xff]  ;;  %v3355_v5 = vld [vmem:[%s5762_s1 + $0xd8] sm:$0xff]  ;;  %v3354_v6 = vld [vmem:[%s5762_s1 + $0xd0] sm:$0xff] }
  0x1e   : > { %463 = vmatpush.msra.mxu0 %v3359_v1  ;;  %3478 = vmatpush.msra.mxu3 %v3359_v1  ;;  %v3353_v7 = vld [vmem:[%s5762_s1 + $0xc8] sm:$0xff]  ;;  %v3352_v8 = vld [vmem:[%s5762_s1 + $0xc0] sm:$0xff]  ;;  %v3351_v9 = vld [vmem:[%s5762_s1 + $0xb8] sm:$0xff] }
  0x1f   : > { %3479 = vmatpush.msra.mxu1 %v3358_v2  ;;  %3480 = vmatpush.msra.mxu2 %v3358_v2  ;;  %v3350_v10 = vld [vmem:[%s5762_s1 + $0xb0] sm:$0xff]  ;;  %v3349_v11 = vld [vmem:[%s5762_s1 + $0xa8] sm:$0xff]  ;;  %v3348_v12 = vld [vmem:[%s5762_s1 + $0xa0] sm:$0xff] }
  0x20   : > { %464 = vmatpush.msra.mxu0 %v3358_v2  ;;  %3481 = vmatpush.msra.mxu3 %v3358_v2  ;;  %v3347_v13 = vld [vmem:[%s5762_s1 + $0x98] sm:$0xff]  ;;  %v3346_v14 = vld [vmem:[%s5762_s1 + $0x90] sm:$0xff]  ;;  %v3345_v15 = vld [vmem:[%s5762_s1 + $0x88] sm:$0xff] }
  0x21   : > { %3482 = vmatpush.msra.mxu1 %v3357_v3  ;;  %3483 = vmatpush.msra.mxu2 %v3357_v3  ;;  %v3344_v16 = vld [vmem:[%s5762_s1 + $0x80] sm:$0xff]  ;;  %v3375_v19 = vld [vmem:[%s5762_s1 + $0x178] sm:$0xff]  ;;  %v3374_v21 = vld [vmem:[%s5762_s1 + $0x170] sm:$0xff] }
  0x22   : > { %465 = vmatpush.msra.mxu0 %v3357_v3  ;;  %3484 = vmatpush.msra.mxu3 %v3357_v3  ;;  %v413_v17 = vld [vmem:[%s3684_s29 + $0x64] sm:$0xff]  ;;  %v400_v20 = vld [vmem:[%s5762_s1 + $0x78] sm:$0xff]  ;;  %v399_v23 = vld [vmem:[%s5762_s1 + $0x70] sm:$0xff] }
  0x23   : > { %3485 = vmatpush.msra.mxu1 %v3356_v4  ;;  %3486 = vmatpush.msra.mxu2 %v3356_v4  ;;  %v425_v18 = vld [vmem:[%s3684_s29 + $0xc4] sm:$0xff]  ;;  %v3407_v24 = vld [vmem:[%s5762_s1 + $0x278] sm:$0xff]  ;;  %v3406_v28 = vld [vmem:[%s5762_s1 + $0x270] sm:$0xff] }
  0x24   : > { %466 = vmatpush.msra.mxu0 %v3356_v4  ;;  %3487 = vmatpush.msra.mxu3 %v3356_v4  ;;  %v401_v22 = vld [vmem:[%s3684_s29 + $0x4] sm:$0xff]  ;;  %v3391_v30 = vld [vmem:[%s5762_s1 + $0x1f8] sm:$0xff]  ;;  %v414_v31 = vld [vmem:[%s3684_s29 + $0x6c] sm:$0xff] }
  0x25   : > { %3488 = vmatpush.msra.mxu1 %v3355_v5  ;;  %3489 = vmatpush.msra.mxu2 %v3355_v5  ;;  %v3373_v25 = vld [vmem:[%s5762_s1 + $0x168] sm:$0xff]  ;;  %v3372_v29 = vld [vmem:[%s5762_s1 + $0x160] sm:$0xff]  ;;  %v3371_v35 = vld [vmem:[%s5762_s1 + $0x158] sm:$0xff] }
  0x26   : > { %467 = vmatpush.msra.mxu0 %v3355_v5  ;;  %3490 = vmatpush.msra.mxu3 %v3355_v5  ;;  %v437_v26 = vld [vmem:[%s3684_s29 + $0x124] sm:$0xff]  ;;  %v426_v32 = vld [vmem:[%s3684_s29 + $0xcc] sm:$0xff]  ;;  %v396_v38 = vld [vmem:[%s5762_s1 + $0x58] sm:$0xff] }
  0x27   : > { %3491 = vmatpush.msra.mxu1 %v3354_v6  ;;  %3492 = vmatpush.msra.mxu2 %v3354_v6  ;;  %v398_v27 = vld [vmem:[%s5762_s1 + $0x68] sm:$0xff]  ;;  %v397_v33 = vld [vmem:[%s5762_s1 + $0x60] sm:$0xff]  ;;  %v3390_v36 = vld [vmem:[%s5762_s1 + $0x1f0] sm:$0xff] }
  0x28   : > { %468 = vmatpush.msra.mxu0 %v3354_v6  ;;  %3493 = vmatpush.msra.mxu3 %v3354_v6  ;;  %v3405_v34 = vld [vmem:[%s5762_s1 + $0x268] sm:$0xff]  ;;  %v3404_v39 = vld [vmem:[%s5762_s1 + $0x260] sm:$0xff]  ;;  %v3370_v40 = vld [vmem:[%s5762_s1 + $0x150] sm:$0xff] }
  0x29   : > { %3494 = vmatpush.msra.mxu1 %v3353_v7  ;;  %3495 = vmatpush.msra.mxu2 %v3353_v7  ;;  %v402_v37 = vld [vmem:[%s3684_s29 + $0xc] sm:$0xff]  ;;  %v3403_v43 = vld [vmem:[%s5762_s1 + $0x258] sm:$0xff]  ;;  %v3388_v49 = vld [vmem:[%s5762_s1 + $0x1e0] sm:$0xff] }
  0x2a   : > { %469 = vmatpush.msra.mxu0 %v3353_v7  ;;  %3496 = vmatpush.msra.mxu3 %v3353_v7  ;;  %v438_v41 = vld [vmem:[%s3684_s29 + $0x12c] sm:$0xff]  ;;  %v415_v47 = vld [vmem:[%s3684_s29 + $0x74] sm:$0xff]  ;;  %v3368_v51 = vld [vmem:[%s5762_s1 + $0x140] sm:$0xff] }
  0x2b   : > { %3497 = vmatpush.msra.mxu1 %v3352_v8  ;;  %3498 = vmatpush.msra.mxu2 %v3352_v8  ;;  %v395_v42 = vld [vmem:[%s5762_s1 + $0x50] sm:$0xff]  ;;  %v3389_v44 = vld [vmem:[%s5762_s1 + $0x1e8] sm:$0xff]  ;;  %v393_v52 = vld [vmem:[%s5762_s1 + $0x40] sm:$0xff] }
  0x2c   : > { %470 = vmatpush.msra.mxu0 %v3352_v8  ;;  %3499 = vmatpush.msra.mxu3 %v3352_v8  ;;  %v3369_v45 = vld [vmem:[%s5762_s1 + $0x148] sm:$0xff]  ;;  %v427_v48 = vld [vmem:[%s3684_s29 + $0xd4] sm:$0xff]  ;;  %v3400_v60 = vld [vmem:[%s5762_s1 + $0x240] sm:$0xff] }
  0x2d   : > { %3500 = vmatpush.msra.mxu1 %v3351_v9  ;;  %3501 = vmatpush.msra.mxu2 %v3351_v9  ;;  %v394_v46 = vld [vmem:[%s5762_s1 + $0x48] sm:$0xff]  ;;  %v3402_v50 = vld [vmem:[%s5762_s1 + $0x250] sm:$0xff]  ;;  %v3387_v54 = vld [vmem:[%s5762_s1 + $0x1d8] sm:$0xff] }
  0x2e   : > { %471 = vmatpush.msra.mxu0 %v3351_v9  ;;  %3502 = vmatpush.msra.mxu3 %v3351_v9  ;;  %v403_v53 = vld [vmem:[%s3684_s29 + $0x14] sm:$0xff]  ;;  %v3401_v55 = vld [vmem:[%s5762_s1 + $0x248] sm:$0xff]  ;;  %v416_v62 = vld [vmem:[%s3684_s29 + $0x7c] sm:$0xff] }
  0x2f   : > { %3503 = vmatpush.msra.mxu1 %v3350_v10  ;;  %3504 = vmatpush.msra.mxu2 %v3350_v10  ;;  %v3367_v56 = vld [vmem:[%s5762_s1 + $0x138] sm:$0xff]  ;;  %v3386_v59 = vld [vmem:[%s5762_s1 + $0x1d0] sm:$0xff]  ;;  %v3385_v0 = vld [vmem:[%s5762_s1 + $0x1c8] sm:$0xff] }
  0x30   : > { %472 = vmatpush.msra.mxu0 %v3350_v10  ;;  %3505 = vmatpush.msra.mxu3 %v3350_v10  ;;  %v439_v57 = vld [vmem:[%s3684_s29 + $0x134] sm:$0xff]  ;;  %v428_v63 = vld [vmem:[%s3684_s29 + $0xdc] sm:$0xff]  ;;  %v3365_v5 = vld [vmem:[%s5762_s1 + $0x128] sm:$0xff] }
  0x31   : > { %3506 = vmatpush.msra.mxu1 %v3349_v11  ;;  %3507 = vmatpush.msra.mxu2 %v3349_v11  ;;  %v392_v58 = vld [vmem:[%s5762_s1 + $0x38] sm:$0xff]  ;;  %v3366_v61 = vld [vmem:[%s5762_s1 + $0x130] sm:$0xff]  ;;  %v3384_v3 = vld [vmem:[%s5762_s1 + $0x1c0] sm:$0xff] }
  0x32   : > { %473 = vmatpush.msra.mxu0 %v3349_v11  ;;  %3508 = vmatpush.msra.mxu3 %v3349_v11  ;;  %v404_v1 = vld [vmem:[%s3684_s29 + $0x1c] sm:$0xff]  ;;  %v391_v2 = vld [vmem:[%s5762_s1 + $0x30] sm:$0xff]  ;;  %v417_v8 = vld [vmem:[%s3684_s29 + $0x84] sm:$0xff] }
  0x33   : > { %3509 = vmatpush.msra.mxu1 %v3348_v12  ;;  %3510 = vmatpush.msra.mxu2 %v3348_v12  ;;  %v3399_v4 = vld [vmem:[%s5762_s1 + $0x238] sm:$0xff]  ;;  %v429_v9 = vld [vmem:[%s3684_s29 + $0xe4] sm:$0xff] }
  0x34   : > { %474 = vmatpush.msra.mxu0 %v3348_v12  ;;  %3511 = vmatpush.msra.mxu3 %v3348_v12  ;;  %v440_v6 = vld [vmem:[%s3684_s29 + $0x13c] sm:$0xff]  ;;  %v405_v10 = vld [vmem:[%s3684_s29 + $0x24] sm:$0xff]  ;;  %v3398_v12 = vld [vmem:[%s5762_s1 + $0x230] sm:$0xff] }
  0x35   : > { %3512 = vmatpush.msra.mxu1 %v3347_v13  ;;  %3513 = vmatpush.msra.mxu2 %v3347_v13  ;;  %v3383_v7 = vld [vmem:[%s5762_s1 + $0x1b8] sm:$0xff]  ;;  %v390_v11 = vld [vmem:[%s5762_s1 + $0x28] sm:$0xff] }
  0x36   : > { %475 = vmatpush.msra.mxu0 %v3347_v13  ;;  %3514 = vmatpush.msra.mxu3 %v3347_v13  ;;  %v441_v13 = vld [vmem:[%s3684_s29 + $0x144] sm:$0xff] }
  0x37   : > { %3515 = vmatpush.msra.mxu1 %v3346_v14  ;;  %3516 = vmatpush.msra.mxu2 %v3346_v14 }
  0x38   : > { %476 = vmatpush.msra.mxu0 %v3346_v14  ;;  %3517 = vmatpush.msra.mxu3 %v3346_v14  ;;  %v3364_v14 = vld [vmem:[%s5762_s1 + $0x120] sm:$0xff] }
  0x39   : > { %3518 = vmatpush.msra.mxu1 %v3345_v15  ;;  %3519 = vmatpush.msra.mxu2 %v3345_v15 }
  0x3a   : > { %477 = vmatpush.msra.mxu0 %v3345_v15  ;;  %3520 = vmatpush.msra.mxu3 %v3345_v15  ;;  %v3382_v15 = vld [vmem:[%s5762_s1 + $0x1b0] sm:$0xff] }
  0x3b   : > { %3521 = vmatpush.msra.mxu1 %v3344_v16  ;;  %3522 = vmatpush.msra.mxu2 %v3344_v16 }
  0x3c   : > { %515 = vmatmul.f32.vlgmr.msra.gmra.mxu1 %v413_v17  ;;  %551 = vmatmul.f32.vlgmr.msra.gmra.mxu2 %v425_v18  ;;  %v3397_v17 = vld [vmem:[%s5762_s1 + $0x228] sm:$0xff] }
  0x3d   : > { %829 = vmatpush.msrb.mxu2 %v3375_v19  ;;  %615 = vmatpush.msrb.mxu1 %v400_v20  ;;  %v3381_v18 = vld [vmem:[%s5762_s1 + $0x1a8] sm:$0xff] }
  0x3e   : > { %478 = vmatpush.msra.mxu0 %v3344_v16  ;;  %3523 = vmatpush.msra.mxu3 %v3344_v16  ;;  %v389_v16 = vld [vmem:[%s5762_s1 + $0x20] sm:$0xff]  ;;  %v418_v19 = vld [vmem:[%s3684_s29 + $0x8c] sm:$0xff] }
  0x3f   : > { %830 = vmatpush.msrb.mxu2 %v3374_v21  ;;  %479 = vmatmul.f32.vlgmr.msra.gmra.mxu0 %v401_v22  ;;  %v430_v20 = vld [vmem:[%s3684_s29 + $0xec] sm:$0xff]  ;;  %v3363_v22 = vld [vmem:[%s5762_s1 + $0x118] sm:$0xff] }
  0x40   : > { %616 = vmatpush.msrb.mxu1 %v399_v23  ;;  %1347 = vmatpush.msrb.mxu0 %v3407_v24  ;;  %v406_v21 = vld [vmem:[%s3684_s29 + $0x2c] sm:$0xff]  ;;  %v388_v23 = vld [vmem:[%s5762_s1 + $0x18] sm:$0xff]  ;;  %v3380_v24 = vld [vmem:[%s5762_s1 + $0x1a0] sm:$0xff] }
  0x41   : > { %831 = vmatpush.msrb.mxu2 %v3373_v25  ;;  %587 = vmatmul.f32.vlgmr.msra.gmra.mxu3 %v437_v26  ;;  %v3396_v25 = vld [vmem:[%s5762_s1 + $0x220] sm:$0xff]  ;;  %v442_v26 = vld [vmem:[%s3684_s29 + $0x14c] sm:$0xff] }
  0x42   : > { %617 = vmatpush.msrb.mxu1 %v398_v27  ;;  %1348 = vmatpush.msrb.mxu0 %v3406_v28  ;;  %v3362_v27 = vld [vmem:[%s5762_s1 + $0x110] sm:$0xff] }
  0x43   : > { %832 = vmatpush.msrb.mxu2 %v3372_v29  ;;  %1088 = vmatpush.msrb.mxu3 %v3391_v30  ;;  %v419_v28 = vld [vmem:[%s3684_s29 + $0x94] sm:$0xff] }
  0x44   : > { %518 = vmatmul.f32.gmra.mxu1 %v414_v31  ;;  %554 = vmatmul.f32.gmra.mxu2 %v426_v32  ;;  %v431_v29 = vld [vmem:[%s3684_s29 + $0xf4] sm:$0xff] }
  0x45   : > { %618 = vmatpush.msrb.mxu1 %v397_v33  ;;  %1349 = vmatpush.msrb.mxu0 %v3405_v34  ;;  %v407_v30 = vld [vmem:[%s3684_s29 + $0x34] sm:$0xff]  ;;  %v3361_v34 = vld [vmem:[%s5762_s1 + $0x108] sm:$0xff] }
  0x46   : > { %833 = vmatpush.msrb.mxu2 %v3371_v35  ;;  %1089 = vmatpush.msrb.mxu3 %v3390_v36  ;;  %v3379_v31 = vld [vmem:[%s5762_s1 + $0x198] sm:$0xff]  ;;  %v387_v32 = vld [vmem:[%s5762_s1 + $0x10] sm:$0xff] }
  0x47   : > { %482 = vmatmul.f32.gmra.mxu0 %v402_v37  ;;  %619 = vmatpush.msrb.mxu1 %v396_v38  ;;  %v3395_v33 = vld [vmem:[%s5762_s1 + $0x218] sm:$0xff]  ;;  %v3378_v36 = vld [vmem:[%s5762_s1 + $0x190] sm:$0xff] }
  0x48   : > { %1350 = vmatpush.msrb.mxu0 %v3404_v39  ;;  %834 = vmatpush.msrb.mxu2 %v3370_v40  ;;  %v443_v35 = vld [vmem:[%s3684_s29 + $0x154] sm:$0xff]  ;;  %v420_v37 = vld [vmem:[%s3684_s29 + $0x9c] sm:$0xff]  ;;  %v386_v40 = vld [vmem:[%s5762_s1 + $0x8] sm:$0xff] }
  0x49   : > { %590 = vmatmul.f32.gmra.mxu3 %v438_v41  ;;  %620 = vmatpush.msrb.mxu1 %v395_v42  ;;  %v432_v38 = vld [vmem:[%s3684_s29 + $0xfc] sm:$0xff]  ;;  %v3394_v41 = vld [vmem:[%s5762_s1 + $0x210] sm:$0xff]  ;;  %v3377_v42 = vld [vmem:[%s5762_s1 + $0x188] sm:$0xff] }
  0x4a   : > { %1351 = vmatpush.msrb.mxu0 %v3403_v43  ;;  %1090 = vmatpush.msrb.mxu3 %v3389_v44  ;;  %v408_v39 = vld [vmem:[%s3684_s29 + $0x3c] sm:$0xff] }
  0x4b   : > { %835 = vmatpush.msrb.mxu2 %v3369_v45  ;;  %621 = vmatpush.msrb.mxu1 %v394_v46  ;;  %v444_v43 = vld [vmem:[%s3684_s29 + $0x15c] sm:$0xff] }
  0x4c   : > { %521 = vmatmul.f32.gmra.mxu1 %v415_v47  ;;  %557 = vmatmul.f32.gmra.mxu2 %v427_v48  ;;  %v3360_v44 = vld [vmem:[%s5762_s1 + $0x100] sm:$0xff]  ;;  %v3393_v47 = vld [vmem:[%s5762_s1 + $0x208] sm:$0xff] }
  0x4d   : > { %1091 = vmatpush.msrb.mxu3 %v3388_v49  ;;  %1352 = vmatpush.msrb.mxu0 %v3402_v50  ;;  %v385_v45 = vld [vmem:[%s5762_s1] sm:$0xff] }
  0x4e   : > { %836 = vmatpush.msrb.mxu2 %v3368_v51  ;;  %622 = vmatpush.msrb.mxu1 %v393_v52  ;;  %v3376_v46 = vld [vmem:[%s5762_s1 + $0x180] sm:$0xff]  ;;  %v3439_v51 = vld [vmem:[%s5762_s1 + $0x378] sm:$0xff] }
  0x4f   : > { %485 = vmatmul.f32.gmra.mxu0 %v403_v53  ;;  %1092 = vmatpush.msrb.mxu3 %v3387_v54  ;;  %v421_v48 = vld [vmem:[%s3684_s29 + $0xa4] sm:$0xff]  ;;  %v3455_v52 = vld [vmem:[%s5762_s1 + $0x3f8] sm:$0xff] }
  0x50   : > { %1353 = vmatpush.msrb.mxu0 %v3401_v55  ;;  %837 = vmatpush.msrb.mxu2 %v3367_v56  ;;  %v433_v49 = vld [vmem:[%s3684_s29 + $0x104] sm:$0xff]  ;;  %v3423_v54 = vld [vmem:[%s5762_s1 + $0x2f8] sm:$0xff]  ;;  %v422_v56 = vld [vmem:[%s3684_s29 + $0xac] sm:$0xff] }
  0x51   : > { %593 = vmatmul.f32.gmra.mxu3 %v439_v57  ;;  %623 = vmatpush.msrb.mxu1 %v392_v58  ;;  %v409_v50 = vld [vmem:[%s3684_s29 + $0x44] sm:$0xff]  ;;  %v434_v57 = vld [vmem:[%s3684_s29 + $0x10c] sm:$0xff] }
  0x52   : > { %1093 = vmatpush.msrb.mxu3 %v3386_v59  ;;  %1354 = vmatpush.msrb.mxu0 %v3400_v60  ;;  %v3392_v53 = vld [vmem:[%s5762_s1 + $0x200] sm:$0xff]  ;;  %v410_v58 = vld [vmem:[%s3684_s29 + $0x4c] sm:$0xff]  ;;  %v3471_v59 = vld [vmem:[%s5762_s1 + $0x478] sm:$0xff] }
  0x53   : > { %838 = vmatpush.msrb.mxu2 %v3366_v61  ;;  %624 = vmatpush.msrb.mxu1 %v391_v2  ;;  %v445_v55 = vld [vmem:[%s3684_s29 + $0x164] sm:$0xff]  ;;  %v1026_v60 = vld [vmem:[%s3684_s29 + $0x17] sm:$0xff] }
  0x54   : > { %524 = vmatmul.f32.gmra.mxu1 %v416_v62  ;;  %560 = vmatmul.f32.gmra.mxu2 %v428_v63  ;;  %v423_v61 = vld [vmem:[%s3684_s29 + $0xb4] sm:$0xff]  ;;  %v424_v2 = vld [vmem:[%s3684_s29 + $0xbc] sm:$0xff] }
  0x55   : > { %1094 = vmatpush.msrb.mxu3 %v3385_v0  ;;  %1355 = vmatpush.msrb.mxu0 %v3399_v4  ;;  %v435_v62 = vld [vmem:[%s3684_s29 + $0x114] sm:$0xff]  ;;  %v412_v4 = vld [vmem:[%s3684_s29 + $0x5c] sm:$0xff] }
  0x56   : > { %839 = vmatpush.msrb.mxu2 %v3365_v5  ;;  %625 = vmatpush.msrb.mxu1 %v390_v11  ;;  %v411_v63 = vld [vmem:[%s3684_s29 + $0x54] sm:$0xff] }
  0x57   : > { %488 = vmatmul.f32.gmra.mxu0 %v404_v1  ;;  %1095 = vmatpush.msrb.mxu3 %v3384_v3  ;;  %v3438_v0 = vld [vmem:[%s5762_s1 + $0x370] sm:$0xff]  ;;  %v1027_v1 = vld [vmem:[%s3684_s29 + $0x1f] sm:$0xff] }
  0x58   : > { %1356 = vmatpush.msrb.mxu0 %v3398_v12  ;;  %840 = vmatpush.msrb.mxu2 %v3364_v14  ;;  %v436_v3 = vld [vmem:[%s3684_s29 + $0x11c] sm:$0xff]  ;;  %v3454_v5 = vld [vmem:[%s5762_s1 + $0x3f0] sm:$0xff] }
  0x59   : > { %596 = vmatmul.f32.gmra.mxu3 %v440_v6  ;;  %626 = vmatpush.msrb.mxu1 %v389_v16  ;;  %v3422_v6 = vld [vmem:[%s5762_s1 + $0x2f0] sm:$0xff] }
  0x5a   : > { %1096 = vmatpush.msrb.mxu3 %v3383_v7  ;;  %1357 = vmatpush.msrb.mxu0 %v3397_v17  ;;  %v1028_v7 = vld [vmem:[%s3684_s29 + $0x27] sm:$0xff]  ;;  %v3470_v11 = vld [vmem:[%s5762_s1 + $0x470] sm:$0xff] }
  0x5b   : > { %841 = vmatpush.msrb.mxu2 %v3363_v22  ;;  %627 = vmatpush.msrb.mxu1 %v388_v23  ;;  %v1029_v12 = vld [vmem:[%s3684_s29 + $0x2f] sm:$0xff]  ;;  %v1030_v16 = vld [vmem:[%s3684_s29 + $0x37] sm:$0xff]  ;;  %v1031_v23 = vld [vmem:[%s3684_s29 + $0x3f] sm:$0xff] }
  0x5c   : > { %527 = vmatmul.f32.gmra.mxu1 %v417_v8  ;;  %563 = vmatmul.f32.gmra.mxu2 %v429_v9  ;;  %v340_v8 = vld [vmem:[%s3684_s29 + $0x3] sm:$0xff]  ;;  %v768_v14 = vld [vmem:[%s3684_s29 + $0xd] sm:$0xff] }
  0x5d   : > { %1097 = vmatpush.msrb.mxu3 %v3382_v15  ;;  %842 = vmatpush.msrb.mxu2 %v3362_v27  ;;  %v767_v9 = vld [vmem:[%s3684_s29 + $0x5] sm:$0xff]  ;;  %v342_v17 = vld [vmem:[%s3684_s29 + $0x13] sm:$0xff] }
  0x5e   : > { %1358 = vmatpush.msrb.mxu0 %v3396_v25  ;;  %628 = vmatpush.msrb.mxu1 %v387_v32  ;;  %v1286_v15 = vld [vmem:[%s3684_s29 + $0x20] sm:$0xff]  ;;  %v3421_v22 = vld [vmem:[%s5762_s1 + $0x2e8] sm:$0xff]  ;;  %v1288_v27 = vld [vmem:[%s3684_s29 + $0x30] sm:$0xff] }
  0x5f   : > { %491 = vmatmul.f32.gmra.mxu0 %v405_v10  ;;  %1098 = vmatpush.msrb.mxu3 %v3381_v18  ;;  %v1285_v10 = vld [vmem:[%s3684_s29 + $0x18] sm:$0xff] }
  0x60   : > { %1359 = vmatpush.msrb.mxu0 %v3395_v33  ;;  %843 = vmatpush.msrb.mxu2 %v3361_v34  ;;  %v769_v18 = vld [vmem:[%s3684_s29 + $0x15] sm:$0xff]  ;;  %v770_v25 = vld [vmem:[%s3684_s29 + $0x1d] sm:$0xff] }
  0x61   : > { %599 = vmatmul.f32.gmra.mxu3 %v441_v13  ;;  %629 = vmatpush.msrb.mxu1 %v386_v40  ;;  %v341_v13 = vld [vmem:[%s3684_s29 + $0xb] sm:$0xff]  ;;  %v1289_v33 = vld [vmem:[%s3684_s29 + $0x38] sm:$0xff]  ;;  %v3452_v40 = vld [vmem:[%s5762_s1 + $0x3e0] sm:$0xff] }
  0x62   : > { %1099 = vmatpush.msrb.mxu3 %v3380_v24  ;;  %1360 = vmatpush.msrb.mxu0 %v3394_v41  ;;  %v343_v24 = vld [vmem:[%s3684_s29 + $0x1b] sm:$0xff]  ;;  %v1033_v34 = vld [vmem:[%s3684_s29 + $0x4f] sm:$0xff] }
  0x63   : > { %844 = vmatpush.msrb.mxu2 %v3360_v44  ;;  %630 = vmatpush.msrb.mxu1 %v385_v45  ;;  %v3420_v44 = vld [vmem:[%s5762_s1 + $0x2e0] sm:$0xff]  ;;  %v1034_v45 = vld [vmem:[%s3684_s29 + $0x57] sm:$0xff] }
  0x64   : > { %530 = vmatmul.f32.gmra.mxu1 %v418_v19  ;;  %566 = vmatmul.f32.gmra.mxu2 %v430_v20  ;;  %v3437_v19 = vld [vmem:[%s5762_s1 + $0x368] sm:$0xff] }
  0x65   : > { %1100 = vmatpush.msrb.mxu3 %v3379_v31  ;;  %1361 = vmatpush.msrb.mxu0 %v3393_v47  ;;  %v3453_v20 = vld [vmem:[%s5762_s1 + $0x3e8] sm:$0xff] }
  0x66   : > { %1865 = vmatpush.msra.mxu2 %v3439_v51  ;;  %1606 = vmatpush.msra.mxu1 %v3423_v54  ;;  %v771_v31 = vld [vmem:[%s3684_s29 + $0x25] sm:$0xff] }
  0x67   : > { %494 = vmatmul.f32.gmra.mxu0 %v406_v21  ;;  %1101 = vmatpush.msrb.mxu3 %v3378_v36  ;;  %v1287_v21 = vld [vmem:[%s3684_s29 + $0x28] sm:$0xff]  ;;  %v3436_v36 = vld [vmem:[%s5762_s1 + $0x360] sm:$0xff] }
  0x68   : > { %1362 = vmatpush.msrb.mxu0 %v3392_v53  ;;  %1866 = vmatpush.msra.mxu2 %v3438_v0  ;;  %v1035_v54 = vld [vmem:[%s3684_s29 + $0x5f] sm:$0xff] }
  0x69   : > { %602 = vmatmul.f32.gmra.mxu3 %v442_v26  ;;  %1607 = vmatpush.msra.mxu1 %v3422_v6  ;;  %v3469_v26 = vld [vmem:[%s5762_s1 + $0x468] sm:$0xff] }
  0x6a   : > { %1102 = vmatpush.msrb.mxu3 %v3377_v42  ;;  %2383 = vmatpush.msra.mxu0 %v3471_v59  ;;  %v1290_v42 = vld [vmem:[%s3684_s29 + $0x40] sm:$0xff] }
  0x6b   : > { %1867 = vmatpush.msra.mxu2 %v3437_v19  ;;  %1608 = vmatpush.msra.mxu1 %v3421_v22  ;;  %v777_v22 = vld [vmem:[%s3684_s29 + $0x55] sm:$0xff] }
  0x6c   : > { %533 = vmatmul.f32.gmra.mxu1 %v419_v28  ;;  %569 = vmatmul.f32.gmra.mxu2 %v431_v29  ;;  %v1032_v28 = vld [vmem:[%s3684_s29 + $0x47] sm:$0xff] }
  0x6d   : > { %1103 = vmatpush.msrb.mxu3 %v3376_v46  ;;  %2384 = vmatpush.msra.mxu0 %v3470_v11  ;;  %v3467_v11 = vld [vmem:[%s5762_s1 + $0x458] sm:$0xff] }
  0x6e   : > { %1868 = vmatpush.msra.mxu2 %v3436_v36  ;;  %1609 = vmatpush.msra.mxu1 %v3420_v44  ;;  %v3418_v36 = vld [vmem:[%s5762_s1 + $0x2d0] sm:$0xff] }
  0x6f   : > { %497 = vmatmul.f32.gmra.mxu0 %v407_v30  ;;  %2124 = vmatpush.msra.mxu3 %v3455_v52  ;;  %v344_v30 = vld [vmem:[%s3684_s29 + $0x23] sm:$0xff] }
  0x70   : > { %2385 = vmatpush.msra.mxu0 %v3469_v26  ;;  %v1291_v52 = vld [vmem:[%s3684_s29 + $0x48] sm:$0xff]  ;;  %v3434_v26 = vld [vmem:[%s5762_s1 + $0x350] sm:$0xff] }
  0x71   : > { %605 = vmatmul.f32.gmra.mxu3 %v443_v35 }
  0x72   : > { %2125 = vmatpush.msra.mxu3 %v3454_v5  ;;  %v3419_v5 = vld [vmem:[%s5762_s1 + $0x2d8] sm:$0xff] }
  0x73   : > { %1610 = vmatpush.msra.mxu1 %v3419_v5 }
  0x74   : > { %536 = vmatmul.f32.gmra.mxu1 %v420_v37  ;;  %572 = vmatmul.f32.gmra.mxu2 %v432_v38  ;;  %v345_v38 = vld [vmem:[%s3684_s29 + $0x2b] sm:$0xff] }
  0x75   : > { %2126 = vmatpush.msra.mxu3 %v3453_v20  ;;  %1611 = vmatpush.msra.mxu1 %v3418_v36  ;;  %v355_v36 = vld [vmem:[%s3684_s29 + $0x7b] sm:$0xff] }
  0x77   : > { %500 = vmatmul.f32.gmra.mxu0 %v408_v39  ;;  %v772_v39 = vld [vmem:[%s3684_s29 + $0x2d] sm:$0xff]  ;;  %2127 = vmatpush.msra.mxu3 %v3452_v40 }
  0x79   : > { %608 = vmatmul.f32.gmra.mxu3 %v444_v43 }
  0x7c   : > { %539 = vmatmul.f32.gmra.mxu1 %v421_v48  ;;  %575 = vmatmul.f32.gmra.mxu2 %v433_v49  ;;  %v346_v48 = vld [vmem:[%s3684_s29 + $0x33] sm:$0xff] }
  0x7d   : > { %v773_v49 = vld [vmem:[%s3684_s29 + $0x35] sm:$0xff] }
  0x7f   : > { %503 = vmatmul.f32.gmra.mxu0 %v409_v50  ;;  %v3468_v50 = vld [vmem:[%s5762_s1 + $0x460] sm:$0xff] }
  0x80   : > { %2386 = vmatpush.msra.mxu0 %v3468_v50  ;;  %v779_v50 = vld [vmem:[%s3684_s29 + $0x65] sm:$0xff] }
  0x81   : > { %611 = vmatmul.f32.gmra.mxu3 %v445_v55 }
  0x82   : > { %2387 = vmatpush.msra.mxu0 %v3467_v11  ;;  %v1042_v11 = vld [vmem:[%s3684_s29 + $0x97] sm:$0xff] }
  0x84   : > { %542 = vmatmul.f32.gmra.mxu1 %v422_v56  ;;  %578 = vmatmul.f32.gmra.mxu2 %v434_v57  ;;  %v347_v57 = vld [vmem:[%s3684_s29 + $0x3b] sm:$0xff] }
  0x87   : > { %506 = vmatmul.f32.gmra.mxu0 %v410_v58  ;;  %v774_v58 = vld [vmem:[%s3684_s29 + $0x3d] sm:$0xff] }
  0x89   : > { %1104 = vmatmul.f32.vlgmr.msrb.gmra.mxu3 %v1026_v60  ;;  %v1292_v60 = vld [vmem:[%s3684_s29 + $0x50] sm:$0xff] }
  0x8c   : > { %545 = vmatmul.f32.gmra.mxu1 %v423_v61  ;;  %581 = vmatmul.f32.gmra.mxu2 %v435_v62  ;;  %v3435_v62 = vld [vmem:[%s5762_s1 + $0x358] sm:$0xff] }
  0x8d   : > { %1869 = vmatpush.msra.mxu2 %v3435_v62 }
  0x8f   : > { %509 = vmatmul.f32.gmra.mxu0 %v411_v63  ;;  %v1036_v63 = vld [vmem:[%s3684_s29 + $0x67] sm:$0xff]  ;;  %1870 = vmatpush.msra.mxu2 %v3434_v26 }
  0x91   : > { %1107 = vmatmul.f32.gmra.mxu3 %v1027_v1  ;;  %v3451_v1 = vld [vmem:[%s5762_s1 + $0x3d8] sm:$0xff] }
  0x92   : > { %2128 = vmatpush.msra.mxu3 %v3451_v1  ;;  %v780_v1 = vld [vmem:[%s3684_s29 + $0x6d] sm:$0xff] }
  0x94   : > { %548 = vmatmul.f32.gmra.mxu1 %v424_v2  ;;  %584 = vmatmul.f32.gmra.mxu2 %v436_v3  ;;  %v348_v3 = vld [vmem:[%s3684_s29 + $0x43] sm:$0xff] }
  0x97   : > { %512 = vmatmul.f32.gmra.mxu0 %v412_v4  ;;  %v775_v4 = vld [vmem:[%s3684_s29 + $0x45] sm:$0xff] }
  0x99   : > { %1110 = vmatmul.f32.gmra.mxu3 %v1028_v7  ;;  %v1293_v7 = vld [vmem:[%s3684_s29 + $0x58] sm:$0xff] }
  0x9c   : > { %631 = vmatmul.f32.vlgmr.msrb.gmra.mxu1 %v340_v8  ;;  %845 = vmatmul.f32.vlgmr.msrb.gmra.mxu2 %v767_v9  ;;  %v1037_v9 = vld [vmem:[%s3684_s29 + $0x6f] sm:$0xff] }
  0x9f   : > { %1363 = vmatmul.f32.vlgmr.msrb.gmra.mxu0 %v1285_v10 }
  0xa1   : > { %1113 = vmatmul.f32.gmra.mxu3 %v1029_v12 }
  0xa4   : > { %634 = vmatmul.f32.gmra.mxu1 %v341_v13  ;;  %848 = vmatmul.f32.gmra.mxu2 %v768_v14  ;;  %v349_v13 = vld [vmem:[%s3684_s29 + $0x4b] sm:$0xff] }
  0xa5   : > { %v776_v14 = vld [vmem:[%s3684_s29 + $0x4d] sm:$0xff] }
  0xa7   : > { %1366 = vmatmul.f32.gmra.mxu0 %v1286_v15 }
  0xa9   : > { %1116 = vmatmul.f32.gmra.mxu3 %v1030_v16  ;;  %v1294_v16 = vld [vmem:[%s3684_s29 + $0x60] sm:$0xff] }
  0xac   : > { %637 = vmatmul.f32.gmra.mxu1 %v342_v17  ;;  %851 = vmatmul.f32.gmra.mxu2 %v769_v18  ;;  %v1038_v18 = vld [vmem:[%s3684_s29 + $0x77] sm:$0xff] }
  0xaf   : > { %1369 = vmatmul.f32.gmra.mxu0 %v1287_v21  ;;  %v350_v21 = vld [vmem:[%s3684_s29 + $0x53] sm:$0xff] }
  0xb1   : > { %1119 = vmatmul.f32.gmra.mxu3 %v1031_v23 }
  0xb4   : > { %640 = vmatmul.f32.gmra.mxu1 %v343_v24  ;;  %854 = vmatmul.f32.gmra.mxu2 %v770_v25  ;;  %v1295_v24 = vld [vmem:[%s3684_s29 + $0x68] sm:$0xff] }
  0xb7   : > { %1372 = vmatmul.f32.gmra.mxu0 %v1288_v27  ;;  %v1039_v27 = vld [vmem:[%s3684_s29 + $0x7f] sm:$0xff] }
  0xb9   : > { %v4031_v29 = vpop.f32.mrf.mxu1  ;;  %1122 = vmatmul.f32.gmra.mxu3 %v1032_v28 }
  0xbc   : > { %643 = vmatmul.f32.gmra.mxu1 %v344_v30  ;;  %857 = vmatmul.f32.gmra.mxu2 %v771_v31  ;;  %v4035_v32 = vpop.f32.mrf.mxu0  ;;  %v3450_v30 = vld [vmem:[%s5762_s1 + $0x3d0] sm:$0xff] }
  0xbd   : > { %2129 = vmatpush.msra.mxu3 %v3450_v30  ;;  %v1043_v30 = vld [vmem:[%s3684_s29 + $0x9f] sm:$0xff] }
  0xbf   : > { %v4039_v35 = vpop.f32.mrf.mxu2  ;;  %1375 = vmatmul.f32.gmra.mxu0 %v1289_v33  ;;  %v351_v33 = vld [vmem:[%s3684_s29 + $0x5b] sm:$0xff] }
  0xc1   : > { %v4044_v37 = vpop.f32.mrf.mxu1  ;;  %1125 = vmatmul.f32.gmra.mxu3 %v1033_v34  ;;  %v778_v34 = vld [vmem:[%s3684_s29 + $0x5d] sm:$0xff] }
  0xc4   : > { %646 = vmatmul.f32.gmra.mxu1 %v345_v38  ;;  %860 = vmatmul.f32.gmra.mxu2 %v772_v39  ;;  %v4051_v41 = vpop.f32.mrf.mxu0  ;;  %v4054_v43 = vpop.f32.mrf.mxu3  ;;  %v1296_v39 = vld [vmem:[%s3684_s29 + $0x70] sm:$0xff] }
  0xc7   : > { %v4060_v46 = vpop.f32.mrf.mxu2  ;;  %1378 = vmatmul.f32.gmra.mxu0 %v1290_v42  ;;  %v1040_v42 = vld [vmem:[%s3684_s29 + $0x87] sm:$0xff] }
  0xc9   : > { %v4062_v47 = vpop.f32.mrf.mxu1  ;;  %1128 = vmatmul.f32.gmra.mxu3 %v1034_v45  ;;  %v3466_v45 = vld [vmem:[%s5762_s1 + $0x450] sm:$0xff] }
  0xca   : > { %2388 = vmatpush.msra.mxu0 %v3466_v45  ;;  %v1300_v45 = vld [vmem:[%s3684_s29 + $0x90] sm:$0xff] }
  0xcc   : > { %649 = vmatmul.f32.gmra.mxu1 %v346_v48  ;;  %863 = vmatmul.f32.gmra.mxu2 %v773_v49  ;;  %v4069_v51 = vpop.f32.mrf.mxu0  ;;  %v4072_v53 = vpop.f32.mrf.mxu3  ;;  %v352_v49 = vld [vmem:[%s3684_s29 + $0x63] sm:$0xff] }
  0xcf   : > { %v4075_v55 = vpop.f32.mrf.mxu2  ;;  %1381 = vmatmul.f32.gmra.mxu0 %v1291_v52 }
  0xd1   : > { %v4077_v56 = vpop.f32.mrf.mxu1  ;;  %1131 = vmatmul.f32.gmra.mxu3 %v1035_v54  ;;  %v1297_v54 = vld [vmem:[%s3684_s29 + $0x78] sm:$0xff] }
  0xd4   : > { %652 = vmatmul.f32.gmra.mxu1 %v347_v57  ;;  %866 = vmatmul.f32.gmra.mxu2 %v774_v58  ;;  %v4081_v59 = vpop.f32.mrf.mxu0  ;;  %v4084_v61 = vpop.f32.mrf.mxu3  ;;  %v1041_v58 = vld [vmem:[%s3684_s29 + $0x8f] sm:$0xff] }
  0xd7   : > { %v4090_v0 = vpop.f32.mrf.mxu2  ;;  %1384 = vmatmul.f32.gmra.mxu0 %v1292_v60 }
  0xd9   : > { %v4095_v2 = vpop.f32.mrf.mxu1  ;;  %1134 = vmatmul.f32.gmra.mxu3 %v1036_v63  ;;  %v353_v63 = vld [vmem:[%s3684_s29 + $0x6b] sm:$0xff] }
  0xdc   : > { %655 = vmatmul.f32.gmra.mxu1 %v348_v3  ;;  %869 = vmatmul.f32.gmra.mxu2 %v775_v4  ;;  %v4102_v6 = vpop.f32.mrf.mxu0  ;;  %v4105_v8 = vpop.f32.mrf.mxu3  ;;  %v1298_v4 = vld [vmem:[%s3684_s29 + $0x80] sm:$0xff] }
  0xdf   : > { %v4108_v10 = vpop.f32.mrf.mxu2  ;;  %1387 = vmatmul.f32.gmra.mxu0 %v1293_v7  ;;  %v3433_v7 = vld [vmem:[%s5762_s1 + $0x348] sm:$0xff] }
  0xe0   : > { %1871 = vmatpush.msra.mxu2 %v3433_v7 }
  0xe1   : > { %v4113_v12 = vpop.f32.mrf.mxu1  ;;  %1137 = vmatmul.f32.gmra.mxu3 %v1037_v9  ;;  %v3449_v9 = vld [vmem:[%s5762_s1 + $0x3c8] sm:$0xff] }
  0xe2   : > { %2130 = vmatpush.msra.mxu3 %v3449_v9  ;;  %v1301_v9 = vld [vmem:[%s3684_s29 + $0x98] sm:$0xff] }
  0xe4   : > { %658 = vmatmul.f32.gmra.mxu1 %v349_v13  ;;  %872 = vmatmul.f32.gmra.mxu2 %v776_v14  ;;  %v4117_v15 = vpop.f32.mrf.mxu0  ;;  %v4120_v17 = vpop.f32.mrf.mxu3  ;;  %v3417_v14 = vld [vmem:[%s5762_s1 + $0x2c8] sm:$0xff] }
  0xe5   : > { %1612 = vmatpush.msra.mxu1 %v3417_v14  ;;  %v3448_v14 = vld [vmem:[%s5762_s1 + $0x3c0] sm:$0xff] }
  0xe6   : > { %2131 = vmatpush.msra.mxu3 %v3448_v14  ;;  %v1046_v14 = vld [vmem:[%s3684_s29 + $0xb7] sm:$0xff] }
  0xe7   : > { %v4123_v19 = vpop.f32.mrf.mxu2  ;;  %1390 = vmatmul.f32.gmra.mxu0 %v1294_v16 }
  0xe9   : > { %v4125_v20 = vpop.f32.mrf.mxu1  ;;  %1140 = vmatmul.f32.gmra.mxu3 %v1038_v18  ;;  %v354_v18 = vld [vmem:[%s3684_s29 + $0x73] sm:$0xff] }
  0xec   : > { %661 = vmatmul.f32.gmra.mxu1 %v350_v21  ;;  %875 = vmatmul.f32.gmra.mxu2 %v777_v22  ;;  %v4129_v23 = vpop.f32.mrf.mxu0  ;;  %v4132_v25 = vpop.f32.mrf.mxu3  ;;  %v781_v21 = vld [vmem:[%s3684_s29 + $0x75] sm:$0xff] }
  0xef   : > { %v4138_v28 = vpop.f32.mrf.mxu2  ;;  %1393 = vmatmul.f32.gmra.mxu0 %v1295_v24  ;;  %v1299_v24 = vld [vmem:[%s3684_s29 + $0x88] sm:$0xff] }
  0xf1   : > { %v4143_v31 = vpop.f32.mrf.mxu1  ;;  %1143 = vmatmul.f32.gmra.mxu3 %v1039_v27  ;;  %v3465_v27 = vld [vmem:[%s5762_s1 + $0x448] sm:$0xff] }
  0xf2   : > { %2389 = vmatpush.msra.mxu0 %v3465_v27 }
  0xf4   : > { %664 = vmatmul.f32.gmra.mxu1 %v351_v33  ;;  %878 = vmatmul.f32.gmra.mxu2 %v778_v34  ;;  %v4150_v38 = vpop.f32.mrf.mxu0  ;;  %v4153_v40 = vpop.f32.mrf.mxu3 }
  0xf7   : > { %v4156_v44 = vpop.f32.mrf.mxu2  ;;  %1396 = vmatmul.f32.gmra.mxu0 %v1296_v39  ;;  %v782_v39 = vld [vmem:[%s3684_s29 + $0x7d] sm:$0xff] }
  0xf9   : > { %v4161_v48 = vpop.f32.mrf.mxu1  ;;  %1146 = vmatmul.f32.gmra.mxu3 %v1040_v42 }
  0xfc   : > { %667 = vmatmul.f32.gmra.mxu1 %v352_v49  ;;  %881 = vmatmul.f32.gmra.mxu2 %v779_v50  ;;  %v4165_v52 = vpop.f32.mrf.mxu0  ;;  %v4168_v57 = vpop.f32.mrf.mxu3  ;;  %v1044_v50 = vld [vmem:[%s3684_s29 + $0xa7] sm:$0xff] }
  0xff   : > { %v4171_v60 = vpop.f32.mrf.mxu2  ;;  %1399 = vmatmul.f32.gmra.mxu0 %v1297_v54 }
 0x101   : > { %v4173_v62 = vpop.f32.mrf.mxu1  ;;  %1149 = vmatmul.f32.gmra.mxu3 %v1041_v58 }
 0x104   : > { %670 = vmatmul.f32.gmra.mxu1 %v353_v63  ;;  %884 = vmatmul.f32.gmra.mxu2 %v780_v1  ;;  %v4177_v3 = vpop.f32.mrf.mxu0  ;;  %v4180_v5 = vpop.f32.mrf.mxu3  ;;  %v356_v63 = vld [vmem:[%s3684_s29 + $0x83] sm:$0xff] }
 0x105   : > { %v783_v1 = vld [vmem:[%s3684_s29 + $0x85] sm:$0xff] }
 0x107   : > { %v4189_v13 = vpop.f32.mrf.mxu2  ;;  %1402 = vmatmul.f32.gmra.mxu0 %v1298_v4  ;;  %v3432_v4 = vld [vmem:[%s5762_s1 + $0x340] sm:$0xff] }
 0x108   : > { %1872 = vmatpush.msra.mxu2 %v3432_v4  ;;  %v1302_v4 = vld [vmem:[%s3684_s29 + $0xa0] sm:$0xff] }
 0x109   : > { %v4194_v16 = vpop.f32.mrf.mxu1  ;;  %1152 = vmatmul.f32.gmra.mxu3 %v1042_v11 }
 0x10c   : > { %673 = vmatmul.f32.gmra.mxu1 %v354_v18  ;;  %887 = vmatmul.f32.gmra.mxu2 %v781_v21  ;;  %v4198_v22 = vpop.f32.mrf.mxu0  ;;  %v1105_v26 = vpop.f32.mrf.mxu3  ;;  %v3416_v18 = vld [vmem:[%s5762_s1 + $0x2c0] sm:$0xff] }
 0x10d   : > { %1613 = vmatpush.msra.mxu1 %v3416_v18 }
 0x10f   : > { %v4205_v33 = vpop.f32.mrf.mxu2  ;;  %1405 = vmatmul.f32.gmra.mxu0 %v1299_v24  ;;  %v1045_v24 = vld [vmem:[%s3684_s29 + $0xaf] sm:$0xff] }
 0x111   : > { %v4207_v34 = vpop.f32.mrf.mxu1  ;;  %1155 = vmatmul.f32.gmra.mxu3 %v1043_v30 }
 0x114   : > { %676 = vmatmul.f32.gmra.mxu1 %v355_v36  ;;  %890 = vmatmul.f32.gmra.mxu2 %v782_v39  ;;  %v4211_v42 = vpop.f32.mrf.mxu0  ;;  %v1108_v49 = vpop.f32.mrf.mxu3  ;;  %v357_v39 = vld [vmem:[%s3684_s29 + $0x8b] sm:$0xff] }
 0x117   : > { %v4215_v54 = vpop.f32.mrf.mxu2  ;;  %1408 = vmatmul.f32.gmra.mxu0 %v1300_v45  ;;  %v784_v45 = vld [vmem:[%s3684_s29 + $0x8d] sm:$0xff] }
 0x119   : > { %v632_v58 = vpop.f32.mrf.mxu1  ;;  %1158 = vmatmul.f32.gmra.mxu3 %v1044_v50 }
 0x11a   : > { %v633_v21 = vadd.f32 %v632_v58, %v4035_v32  ;;  %v3464_v58 = vld [vmem:[%s5762_s1 + $0x440] sm:$0xff] }
 0x11b   : > { %2390 = vmatpush.msra.mxu0 %v3464_v58 }
 0x11c   : > { %679 = vmatmul.f32.gmra.mxu1 %v356_v63  ;;  %893 = vmatmul.f32.gmra.mxu2 %v783_v1  ;;  %v1364_v7 = vpop.f32.mrf.mxu0  ;;  %v1111_v11 = vpop.f32.mrf.mxu3 }
 0x11f   : > { %v846_v27 = vpop.f32.mrf.mxu2  ;;  %1411 = vmatmul.f32.gmra.mxu0 %v1301_v9 }
 0x120   : > { %v981_v30 = vadd.f32 %v846_v27, %v633_v21  ;;  %v358_v21 = vld [vmem:[%s3684_s29 + $0x93] sm:$0xff] }
 0x121   : > { %v635_v36 = vpop.f32.mrf.mxu1  ;;  %1161 = vmatmul.f32.gmra.mxu3 %v1045_v24  ;;  %v785_v24 = vld [vmem:[%s3684_s29 + $0x95] sm:$0xff] }
 0x122   : > { %v1240_v50 = vadd.f32 %v1105_v26, %v981_v30  ;;  %v636_v9 = vadd.f32 %v635_v36, %v4051_v41  ;;  %v1047_v36 = vld [vmem:[%s3684_s29 + $0xbf] sm:$0xff] }
 0x124   : > { %v4233_v63 = vadd.f32 %v1364_v7, %v1240_v50  ;;  %682 = vmatmul.f32.gmra.mxu1 %v357_v39  ;;  %896 = vmatmul.f32.gmra.mxu2 %v784_v45  ;;  %v1367_v1 = vpop.f32.mrf.mxu0  ;;  %v1114_v32 = vpop.f32.mrf.mxu3  ;;  %v1303_v45 = vld [vmem:[%s3684_s29 + $0xa8] sm:$0xff] }
 0x127   : > { %v849_v18 = vpop.f32.mrf.mxu2  ;;  %1414 = vmatmul.f32.gmra.mxu0 %v1302_v4 }
 0x128   : > { %v982_v26 = vadd.f32 %v849_v18, %v636_v9  ;;  %v3431_v9 = vld [vmem:[%s5762_s1 + $0x338] sm:$0xff] }
 0x129   : > { %v638_v7 = vpop.f32.mrf.mxu1  ;;  %1164 = vmatmul.f32.gmra.mxu3 %v1046_v14  ;;  %1873 = vmatpush.msra.mxu2 %v3431_v9 }
 0x12a   : > { %v1241_v27 = vadd.f32 %v1108_v49, %v982_v26  ;;  %v639_v41 = vadd.f32 %v638_v7, %v4069_v51  ;;  %v359_v49 = vld [vmem:[%s3684_s29 + $0x9b] sm:$0xff] }
 0x12b   : > { %v3447_v51 = vld [vmem:[%s5762_s1 + $0x3b8] sm:$0xff] }
 0x12c   : > { %v4243_v30 = vadd.f32 %v1367_v1, %v1241_v27  ;;  %685 = vmatmul.f32.gmra.mxu1 %v358_v21  ;;  %899 = vmatmul.f32.gmra.mxu2 %v785_v24  ;;  %v1370_v39 = vpop.f32.mrf.mxu0  ;;  %v1117_v50 = vpop.f32.mrf.mxu3  ;;  %v786_v1 = vld [vmem:[%s3684_s29 + $0x9d] sm:$0xff]  ;;  %v1304_v21 = vld [vmem:[%s3684_s29 + $0xb0] sm:$0xff] }
 0x12d   : > { %2132 = vmatpush.msra.mxu3 %v3447_v51  ;;  %v3415_v27 = vld [vmem:[%s5762_s1 + $0x2b8] sm:$0xff] }
 0x12e   : > { %1614 = vmatpush.msra.mxu1 %v3415_v27 }
 0x12f   : > { %v852_v58 = vpop.f32.mrf.mxu2  ;;  %1417 = vmatmul.f32.gmra.mxu0 %v1303_v45  ;;  %v1048_v45 = vld [vmem:[%s3684_s29 + $0xc7] sm:$0xff] }
 0x130   : > { %v983_v4 = vadd.f32 %v852_v58, %v639_v41  ;;  %v360_v58 = vld [vmem:[%s3684_s29 + $0xa3] sm:$0xff] }
 0x131   : > { %v641_v14 = vpop.f32.mrf.mxu1  ;;  %1167 = vmatmul.f32.gmra.mxu3 %v1047_v36 }
 0x132   : > { %v1242_v18 = vadd.f32 %v1111_v11, %v983_v4  ;;  %v642_v11 = vadd.f32 %v641_v14, %v4081_v59  ;;  %v787_v4 = vld [vmem:[%s3684_s29 + $0xa5] sm:$0xff]  ;;  %v1305_v14 = vld [vmem:[%s3684_s29 + $0xb8] sm:$0xff] }
 0x134   : > { %v4256_v26 = vadd.f32 %v1370_v39, %v1242_v18  ;;  %688 = vmatmul.f32.gmra.mxu1 %v359_v49  ;;  %902 = vmatmul.f32.gmra.mxu2 %v786_v1  ;;  %v1373_v7 = vpop.f32.mrf.mxu0  ;;  %v1120_v24 = vpop.f32.mrf.mxu3  ;;  %v3463_v49 = vld [vmem:[%s5762_s1 + $0x438] sm:$0xff] }
 0x135   : > { %2391 = vmatpush.msra.mxu0 %v3463_v49 }
 0x137   : > { %v855_v41 = vpop.f32.mrf.mxu2  ;;  %1420 = vmatmul.f32.gmra.mxu0 %v1304_v21  ;;  %v1049_v21 = vld [vmem:[%s3684_s29 + $0xcf] sm:$0xff] }
 0x138   : > { %v984_v36 = vadd.f32 %v855_v41, %v642_v11  ;;  %v788_v41 = vld [vmem:[%s3684_s29 + $0xad] sm:$0xff] }
 0x139   : > { %v644_v39 = vpop.f32.mrf.mxu1  ;;  %1170 = vmatmul.f32.gmra.mxu3 %v1048_v45  ;;  %v361_v45 = vld [vmem:[%s3684_s29 + $0xab] sm:$0xff] }
 0x13a   : > { %v1243_v9 = vadd.f32 %v1114_v32, %v984_v36  ;;  %v645_v51 = vadd.f32 %v644_v39, %v4102_v6  ;;  %v1050_v39 = vld [vmem:[%s3684_s29 + $0xd7] sm:$0xff] }
 0x13c   : > { %v4269_v1 = vadd.f32 %v1373_v7, %v1243_v9  ;;  %691 = vmatmul.f32.gmra.mxu1 %v360_v58  ;;  %905 = vmatmul.f32.gmra.mxu2 %v787_v4  ;;  %v1376_v59 = vpop.f32.mrf.mxu0  ;;  %v1123_v18 = vpop.f32.mrf.mxu3  ;;  %v1306_v4 = vld [vmem:[%s3684_s29 + $0xc0] sm:$0xff] }
 0x13f   : > { %v858_v27 = vpop.f32.mrf.mxu2  ;;  %1423 = vmatmul.f32.gmra.mxu0 %v1305_v14 }
 0x140   : > { %v985_v32 = vadd.f32 %v858_v27, %v645_v51  ;;  %v3430_v51 = vld [vmem:[%s5762_s1 + $0x330] sm:$0xff] }
 0x141   : > { %v647_v11 = vpop.f32.mrf.mxu1  ;;  %1173 = vmatmul.f32.gmra.mxu3 %v1049_v21  ;;  %1874 = vmatpush.msra.mxu2 %v3430_v51 }
 0x142   : > { %v1244_v7 = vadd.f32 %v1117_v50, %v985_v32  ;;  %v648_v6 = vadd.f32 %v647_v11, %v4117_v15  ;;  %v362_v50 = vld [vmem:[%s3684_s29 + $0xb3] sm:$0xff] }
 0x143   : > { %v3446_v15 = vld [vmem:[%s5762_s1 + $0x3b0] sm:$0xff] }
 0x144   : > { %v4276_v36 = vadd.f32 %v1376_v59, %v1244_v7  ;;  %694 = vmatmul.f32.gmra.mxu1 %v361_v45  ;;  %908 = vmatmul.f32.gmra.mxu2 %v788_v41  ;;  %v1379_v58 = vpop.f32.mrf.mxu0  ;;  %v1126_v9 = vpop.f32.mrf.mxu3  ;;  %v789_v59 = vld [vmem:[%s3684_s29 + $0xb5] sm:$0xff]  ;;  %v1307_v45 = vld [vmem:[%s3684_s29 + $0xc8] sm:$0xff] }
 0x145   : > { %2133 = vmatpush.msra.mxu3 %v3446_v15  ;;  %v3414_v7 = vld [vmem:[%s5762_s1 + $0x2b0] sm:$0xff] }
 0x146   : > { %1615 = vmatpush.msra.mxu1 %v3414_v7 }
 0x147   : > { %v861_v49 = vpop.f32.mrf.mxu2  ;;  %1426 = vmatmul.f32.gmra.mxu0 %v1306_v4  ;;  %v1051_v4 = vld [vmem:[%s3684_s29 + $0xdf] sm:$0xff] }
 0x148   : > { %v986_v14 = vadd.f32 %v861_v49, %v648_v6  ;;  %v363_v49 = vld [vmem:[%s3684_s29 + $0xbb] sm:$0xff] }
 0x149   : > { %v650_v21 = vpop.f32.mrf.mxu1  ;;  %1176 = vmatmul.f32.gmra.mxu3 %v1050_v39 }
 0x14a   : > { %v1245_v27 = vadd.f32 %v1120_v24, %v986_v14  ;;  %v651_v24 = vadd.f32 %v650_v21, %v4129_v23  ;;  %v790_v14 = vld [vmem:[%s3684_s29 + $0xbd] sm:$0xff]  ;;  %v1308_v21 = vld [vmem:[%s3684_s29 + $0xd0] sm:$0xff] }
 0x14c   : > { %v4289_v32 = vadd.f32 %v1379_v58, %v1245_v27  ;;  %697 = vmatmul.f32.gmra.mxu1 %v362_v50  ;;  %911 = vmatmul.f32.gmra.mxu2 %v789_v59  ;;  %v1382_v11 = vpop.f32.mrf.mxu0  ;;  %v1129_v41 = vpop.f32.mrf.mxu3  ;;  %v3462_v50 = vld [vmem:[%s5762_s1 + $0x430] sm:$0xff] }
 0x14d   : > { %2392 = vmatpush.msra.mxu0 %v3462_v50  ;;  %v1053_v50 = vld [vmem:[%s3684_s29 + $0xef] sm:$0xff] }
 0x14f   : > { %v864_v6 = vpop.f32.mrf.mxu2  ;;  %1429 = vmatmul.f32.gmra.mxu0 %v1307_v45  ;;  %v1052_v45 = vld [vmem:[%s3684_s29 + $0xe7] sm:$0xff] }
 0x150   : > { %v987_v39 = vadd.f32 %v864_v6, %v651_v24  ;;  %v791_v6 = vld [vmem:[%s3684_s29 + $0xc5] sm:$0xff] }
 0x151   : > { %v653_v58 = vpop.f32.mrf.mxu1  ;;  %1179 = vmatmul.f32.gmra.mxu3 %v1051_v4  ;;  %v364_v4 = vld [vmem:[%s3684_s29 + $0xc3] sm:$0xff] }
 0x152   : > { %v1246_v51 = vadd.f32 %v1123_v18, %v987_v39  ;;  %v654_v15 = vadd.f32 %v653_v58, %v4150_v38  ;;  %v3429_v38 = vld [vmem:[%s5762_s1 + $0x328] sm:$0xff] }
 0x153   : > { %1875 = vmatpush.msra.mxu2 %v3429_v38  ;;  %v1054_v38 = vld [vmem:[%s3684_s29 + $0xf7] sm:$0xff] }
 0x154   : > { %v4302_v59 = vadd.f32 %v1382_v11, %v1246_v51  ;;  %700 = vmatmul.f32.gmra.mxu1 %v363_v49  ;;  %914 = vmatmul.f32.gmra.mxu2 %v790_v14  ;;  %v1385_v23 = vpop.f32.mrf.mxu0  ;;  %v1132_v27 = vpop.f32.mrf.mxu3  ;;  %v1309_v14 = vld [vmem:[%s3684_s29 + $0xd8] sm:$0xff] }
 0x157   : > { %v867_v7 = vpop.f32.mrf.mxu2  ;;  %1432 = vmatmul.f32.gmra.mxu0 %v1308_v21 }
 0x158   : > { %v988_v18 = vadd.f32 %v867_v7, %v654_v15  ;;  %v792_v7 = vld [vmem:[%s3684_s29 + $0xcd] sm:$0xff] }
 0x159   : > { %v656_v24 = vpop.f32.mrf.mxu1  ;;  %1182 = vmatmul.f32.gmra.mxu3 %v1052_v45  ;;  %v365_v45 = vld [vmem:[%s3684_s29 + $0xcb] sm:$0xff] }
 0x15a   : > { %v1247_v39 = vadd.f32 %v1126_v9, %v988_v18  ;;  %v657_v58 = vadd.f32 %v656_v24, %v4165_v52  ;;  %v3413_v52 = vld [vmem:[%s5762_s1 + $0x2a8] sm:$0xff] }
 0x15b   : > { %1616 = vmatpush.msra.mxu1 %v3413_v52  ;;  %v1055_v52 = vld [vmem:[%s3684_s29 + $0xff] sm:$0xff] }
 0x15c   : > { %v4309_v11 = vadd.f32 %v1385_v23, %v1247_v39  ;;  %703 = vmatmul.f32.gmra.mxu1 %v364_v4  ;;  %917 = vmatmul.f32.gmra.mxu2 %v791_v6  ;;  %v1388_v49 = vpop.f32.mrf.mxu0  ;;  %v1135_v51 = vpop.f32.mrf.mxu3  ;;  %v3445_v23 = vld [vmem:[%s5762_s1 + $0x3a8] sm:$0xff]  ;;  %v1310_v6 = vld [vmem:[%s3684_s29 + $0xe0] sm:$0xff] }
 0x15d   : > { %2134 = vmatpush.msra.mxu3 %v3445_v23 }
 0x15f   : > { %v870_v21 = vpop.f32.mrf.mxu2  ;;  %1435 = vmatmul.f32.gmra.mxu0 %v1309_v14 }
 0x160   : > { %v989_v9 = vadd.f32 %v870_v21, %v657_v58 }
 0x161   : > { %v659_v15 = vpop.f32.mrf.mxu1  ;;  %1185 = vmatmul.f32.gmra.mxu3 %v1053_v50  ;;  %v3461_v50 = vld [vmem:[%s5762_s1 + $0x428] sm:$0xff] }
 0x162   : > { %v1248_v18 = vadd.f32 %v1129_v41, %v989_v9  ;;  %v660_v14 = vadd.f32 %v659_v15, %v4177_v3  ;;  %v793_v9 = vld [vmem:[%s3684_s29 + $0xd5] sm:$0xff]  ;;  %2393 = vmatpush.msra.mxu0 %v3461_v50  ;;  %v1311_v15 = vld [vmem:[%s3684_s29 + $0xe8] sm:$0xff] }
 0x163   : > { %v1312_v50 = vld [vmem:[%s3684_s29 + $0xf0] sm:$0xff] }
 0x164   : > { %v4325_v24 = vadd.f32 %v1388_v49, %v1248_v18  ;;  %706 = vmatmul.f32.gmra.mxu1 %v365_v45  ;;  %920 = vmatmul.f32.gmra.mxu2 %v792_v7  ;;  %v1391_v4 = vpop.f32.mrf.mxu0  ;;  %v1138_v39 = vpop.f32.mrf.mxu3  ;;  %v366_v49 = vld [vmem:[%s3684_s29 + $0xd3] sm:$0xff] }
 0x166   : > { %5851 = vst [vmem:[#allocation4_spill] sm:$0xff] %v4325_v24  ;;  %v794_v24 = vld [vmem:[%s3684_s29 + $0xdd] sm:$0xff] }
 0x167   : > { %v873_v41 = vpop.f32.mrf.mxu2  ;;  %1438 = vmatmul.f32.gmra.mxu0 %v1310_v6 }
 0x168   : > { %v990_v58 = vadd.f32 %v873_v41, %v660_v14 }
 0x169   : > { %v662_v21 = vpop.f32.mrf.mxu1  ;;  %1188 = vmatmul.f32.gmra.mxu3 %v1054_v38  ;;  %v367_v38 = vld [vmem:[%s3684_s29 + $0xdb] sm:$0xff] }
 0x16a   : > { %v1249_v23 = vadd.f32 %v1132_v27, %v990_v58  ;;  %v663_v18 = vadd.f32 %v662_v21, %v4198_v22  ;;  %v3428_v22 = vld [vmem:[%s5762_s1 + $0x320] sm:$0xff] }
 0x16b   : > { %1876 = vmatpush.msra.mxu2 %v3428_v22  ;;  %v3444_v21 = vld [vmem:[%s5762_s1 + $0x3a0] sm:$0xff]  ;;  %v1057_v22 = vld [vmem:[%s3684_s29 + $0x10f] sm:$0xff] }
 0x16c   : > { %v4335_v45 = vadd.f32 %v1391_v4, %v1249_v23  ;;  %709 = vmatmul.f32.gmra.mxu1 %v366_v49  ;;  %923 = vmatmul.f32.gmra.mxu2 %v793_v9  ;;  %v1394_v3 = vpop.f32.mrf.mxu0  ;;  %v1141_v7 = vpop.f32.mrf.mxu3  ;;  %v1056_v9 = vld [vmem:[%s3684_s29 + $0x107] sm:$0xff] }
 0x16d   : > { %2135 = vmatpush.msra.mxu3 %v3444_v21 }
 0x16f   : > { %v876_v6 = vpop.f32.mrf.mxu2  ;;  %1441 = vmatmul.f32.gmra.mxu0 %v1311_v15 }
 0x170   : > { %v991_v14 = vadd.f32 %v876_v6, %v663_v18  ;;  %v368_v18 = vld [vmem:[%s3684_s29 + $0xe3] sm:$0xff] }
 0x171   : > { %v665_v41 = vpop.f32.mrf.mxu1  ;;  %1191 = vmatmul.f32.gmra.mxu3 %v1055_v52  ;;  %v795_v52 = vld [vmem:[%s3684_s29 + $0xe5] sm:$0xff] }
 0x172   : > { %v1250_v27 = vadd.f32 %v1135_v51, %v991_v14  ;;  %v666_v51 = vadd.f32 %v665_v41, %v4211_v42  ;;  %v1313_v41 = vld [vmem:[%s3684_s29 + $0xf8] sm:$0xff] }
 0x174   : > { %v4342_v4 = vadd.f32 %v1394_v3, %v1250_v27  ;;  %712 = vmatmul.f32.gmra.mxu1 %v367_v38  ;;  %926 = vmatmul.f32.gmra.mxu2 %v794_v24  ;;  %v1397_v58 = vpop.f32.mrf.mxu0  ;;  %v1144_v49 = vpop.f32.mrf.mxu3  ;;  %v3412_v3 = vld [vmem:[%s5762_s1 + $0x2a0] sm:$0xff] }
 0x175   : > { %1617 = vmatpush.msra.mxu1 %v3412_v3  ;;  %v3460_v27 = vld [vmem:[%s5762_s1 + $0x420] sm:$0xff] }
 0x176   : > { %2394 = vmatpush.msra.mxu0 %v3460_v27 }
 0x177   : > { %v879_v23 = vpop.f32.mrf.mxu2  ;;  %1444 = vmatmul.f32.gmra.mxu0 %v1312_v50 }
 0x178   : > { %v992_v24 = vadd.f32 %v879_v23, %v666_v51  ;;  %v369_v51 = vld [vmem:[%s3684_s29 + $0xeb] sm:$0xff] }
 0x179   : > { %v668_v15 = vpop.f32.mrf.mxu1  ;;  %1194 = vmatmul.f32.gmra.mxu3 %v1056_v9  ;;  %v796_v9 = vld [vmem:[%s3684_s29 + $0xed] sm:$0xff] }
 0x17a   : > { %v1251_v6 = vadd.f32 %v1138_v39, %v992_v24  ;;  %v669_v50 = vadd.f32 %v668_v15, %v4031_v29  ;;  %v1058_v15 = vld [vmem:[%s3684_s29 + $0x117] sm:$0xff] }
 0x17c   : > { %v4358_v42 = vadd.f32 %v1397_v58, %v1251_v6  ;;  %715 = vmatmul.f32.gmra.mxu1 %v368_v18  ;;  %929 = vmatmul.f32.gmra.mxu2 %v795_v52  ;;  %v1400_v14 = vpop.f32.mrf.mxu0  ;;  %v1147_v38 = vpop.f32.mrf.mxu3  ;;  %v1314_v18 = vld [vmem:[%s3684_s29 + $0x100] sm:$0xff] }
 0x17f   : > { %v882_v21 = vpop.f32.mrf.mxu2  ;;  %1447 = vmatmul.f32.gmra.mxu0 %v1313_v41 }
 0x180   : > { %v993_v39 = vadd.f32 %v882_v21, %v669_v50  ;;  %v370_v50 = vld [vmem:[%s3684_s29 + $0xf3] sm:$0xff] }
 0x181   : > { %v671_v58 = vpop.f32.mrf.mxu1  ;;  %1197 = vmatmul.f32.gmra.mxu3 %v1057_v22  ;;  %v797_v21 = vld [vmem:[%s3684_s29 + $0xf5] sm:$0xff] }
 0x182   : > { %v1252_v23 = vadd.f32 %v1141_v7, %v993_v39  ;;  %v672_v29 = vadd.f32 %v671_v58, %v4044_v37  ;;  %v1315_v39 = vld [vmem:[%s3684_s29 + $0x108] sm:$0xff] }
 0x184   : > { %v4368_v24 = vadd.f32 %v1400_v14, %v1252_v23  ;;  %718 = vmatmul.f32.gmra.mxu1 %v369_v51  ;;  %932 = vmatmul.f32.gmra.mxu2 %v796_v9  ;;  %v1403_v3 = vpop.f32.mrf.mxu0  ;;  %v1150_v52 = vpop.f32.mrf.mxu3  ;;  %v3427_v14 = vld [vmem:[%s5762_s1 + $0x318] sm:$0xff] }
 0x185   : > { %1877 = vmatpush.msra.mxu2 %v3427_v14  ;;  %v3443_v51 = vld [vmem:[%s5762_s1 + $0x398] sm:$0xff] }
 0x186   : > { %2136 = vmatpush.msra.mxu3 %v3443_v51  ;;  %v1059_v23 = vld [vmem:[%s3684_s29 + $0x11f] sm:$0xff] }
 0x187   : > { %v885_v6 = vpop.f32.mrf.mxu2  ;;  %1450 = vmatmul.f32.gmra.mxu0 %v1314_v18 }
 0x188   : > { %v994_v41 = vadd.f32 %v885_v6, %v672_v29  ;;  %v798_v6 = vld [vmem:[%s3684_s29 + $0xfd] sm:$0xff] }
 0x189   : > { %v674_v27 = vpop.f32.mrf.mxu1  ;;  %1200 = vmatmul.f32.gmra.mxu3 %v1058_v15  ;;  %v371_v15 = vld [vmem:[%s3684_s29 + $0xfb] sm:$0xff] }
 0x18a   : > { %v1253_v7 = vadd.f32 %v1144_v49, %v994_v41  ;;  %v3411_v49 = vld [vmem:[%s5762_s1 + $0x298] sm:$0xff]  ;;  %v675_v9 = vadd.f32 %v674_v27, %v4062_v47 }
 0x18b   : > { %1618 = vmatpush.msra.mxu1 %v3411_v49  ;;  %v3459_v27 = vld [vmem:[%s5762_s1 + $0x418] sm:$0xff]  ;;  %v372_v49 = vld [vmem:[%s3684_s29 + $0x103] sm:$0xff] }
 0x18c   : > { %v4378_v22 = vadd.f32 %v1403_v3, %v1253_v7  ;;  %721 = vmatmul.f32.gmra.mxu1 %v370_v50  ;;  %935 = vmatmul.f32.gmra.mxu2 %v797_v21  ;;  %v1406_v37 = vpop.f32.mrf.mxu0  ;;  %v1153_v58 = vpop.f32.mrf.mxu3  ;;  %v1316_v7 = vld [vmem:[%s3684_s29 + $0x110] sm:$0xff] }
 0x18d   : > { %2395 = vmatpush.msra.mxu0 %v3459_v27 }
 0x18f   : > { %v888_v3 = vpop.f32.mrf.mxu2  ;;  %1453 = vmatmul.f32.gmra.mxu0 %v1315_v39  ;;  %v1060_v39 = vld [vmem:[%s3684_s29 + $0x127] sm:$0xff] }
 0x190   : > { %v995_v18 = vadd.f32 %v888_v3, %v675_v9  ;;  %v799_v9 = vld [vmem:[%s3684_s29 + $0x105] sm:$0xff] }
 0x191   : > { %v677_v29 = vpop.f32.mrf.mxu1  ;;  %1203 = vmatmul.f32.gmra.mxu3 %v1059_v23 }
 0x192   : > { %v1254_v41 = vadd.f32 %v1147_v38, %v995_v18  ;;  %v678_v14 = vadd.f32 %v677_v29, %v4077_v56  ;;  %v1061_v29 = vld [vmem:[%s3684_s29 + $0x12f] sm:$0xff] }
 0x194   : > { %v4391_v50 = vadd.f32 %v1406_v37, %v1254_v41  ;;  %724 = vmatmul.f32.gmra.mxu1 %v371_v15  ;;  %938 = vmatmul.f32.gmra.mxu2 %v798_v6  ;;  %v1409_v21 = vpop.f32.mrf.mxu0  ;;  %v1156_v47 = vpop.f32.mrf.mxu3  ;;  %v1317_v15 = vld [vmem:[%s3684_s29 + $0x118] sm:$0xff] }
 0x197   : > { %v891_v51 = vpop.f32.mrf.mxu2  ;;  %1456 = vmatmul.f32.gmra.mxu0 %v1316_v7 }
 0x198   : > { %v996_v38 = vadd.f32 %v891_v51, %v678_v14  ;;  %v373_v14 = vld [vmem:[%s3684_s29 + $0x10b] sm:$0xff] }
 0x199   : > { %v680_v37 = vpop.f32.mrf.mxu1  ;;  %1206 = vmatmul.f32.gmra.mxu3 %v1060_v39  ;;  %v800_v51 = vld [vmem:[%s3684_s29 + $0x10d] sm:$0xff] }
 0x19a   : > { %v1255_v23 = vadd.f32 %v1150_v52, %v996_v38  ;;  %v681_v56 = vadd.f32 %v680_v37, %v4095_v2  ;;  %v1318_v38 = vld [vmem:[%s3684_s29 + $0x120] sm:$0xff] }
 0x19c   : > { %v4401_v3 = vadd.f32 %v1409_v21, %v1255_v23  ;;  %727 = vmatmul.f32.gmra.mxu1 %v372_v49  ;;  %941 = vmatmul.f32.gmra.mxu2 %v799_v9  ;;  %v1412_v18 = vpop.f32.mrf.mxu0  ;;  %v1159_v6 = vpop.f32.mrf.mxu3  ;;  %v3426_v21 = vld [vmem:[%s5762_s1 + $0x310] sm:$0xff] }
 0x19d   : > { %1878 = vmatpush.msra.mxu2 %v3426_v21  ;;  %v3442_v49 = vld [vmem:[%s5762_s1 + $0x390] sm:$0xff] }
 0x19e   : > { %2137 = vmatpush.msra.mxu3 %v3442_v49  ;;  %v1062_v23 = vld [vmem:[%s3684_s29 + $0x137] sm:$0xff] }
 0x19f   : > { %v894_v41 = vpop.f32.mrf.mxu2  ;;  %1459 = vmatmul.f32.gmra.mxu0 %v1317_v15 }
 0x1a0   : > { %v997_v7 = vadd.f32 %v894_v41, %v681_v56  ;;  %v801_v41 = vld [vmem:[%s3684_s29 + $0x115] sm:$0xff] }
 0x1a1   : > { %v683_v27 = vpop.f32.mrf.mxu1  ;;  %1209 = vmatmul.f32.gmra.mxu3 %v1061_v29  ;;  %v374_v29 = vld [vmem:[%s3684_s29 + $0x113] sm:$0xff] }
 0x1a2   : > { %v1256_v52 = vadd.f32 %v1153_v58, %v997_v7  ;;  %v3410_v58 = vld [vmem:[%s5762_s1 + $0x290] sm:$0xff]  ;;  %v684_v9 = vadd.f32 %v683_v27, %v4113_v12 }
 0x1a3   : > { %1619 = vmatpush.msra.mxu1 %v3410_v58  ;;  %v3458_v12 = vld [vmem:[%s5762_s1 + $0x410] sm:$0xff]  ;;  %v375_v58 = vld [vmem:[%s3684_s29 + $0x11b] sm:$0xff] }
 0x1a4   : > { %v4411_v39 = vadd.f32 %v1412_v18, %v1256_v52  ;;  %730 = vmatmul.f32.gmra.mxu1 %v373_v14  ;;  %944 = vmatmul.f32.gmra.mxu2 %v800_v51  ;;  %v1415_v2 = vpop.f32.mrf.mxu0  ;;  %v1162_v37 = vpop.f32.mrf.mxu3  ;;  %v1319_v52 = vld [vmem:[%s3684_s29 + $0x128] sm:$0xff] }
 0x1a5   : > { %2396 = vmatpush.msra.mxu0 %v3458_v12  ;;  %v3425_v12 = vld [vmem:[%s5762_s1 + $0x308] sm:$0xff] }
 0x1a6   : > { %1879 = vmatpush.msra.mxu2 %v3425_v12  ;;  %v3457_v12 = vld [vmem:[%s5762_s1 + $0x408] sm:$0xff] }
 0x1a7   : > { %v897_v18 = vpop.f32.mrf.mxu2  ;;  %1462 = vmatmul.f32.gmra.mxu0 %v1318_v38  ;;  %v1063_v38 = vld [vmem:[%s3684_s29 + $0x13f] sm:$0xff] }
 0x1a8   : > { %v998_v15 = vadd.f32 %v897_v18, %v684_v9  ;;  %v802_v9 = vld [vmem:[%s3684_s29 + $0x11d] sm:$0xff]  ;;  %2397 = vmatpush.msra.mxu0 %v3457_v12 }
 0x1a9   : > { %v686_v56 = vpop.f32.mrf.mxu1  ;;  %1212 = vmatmul.f32.gmra.mxu3 %v1062_v23 }
 0x1aa   : > { %v1257_v7 = vadd.f32 %v1156_v47, %v998_v15  ;;  %v687_v27 = vadd.f32 %v686_v56, %v4125_v20  ;;  %v1064_v56 = vld [vmem:[%s3684_s29 + $0x147] sm:$0xff] }
 0x1ac   : > { %v4424_v14 = vadd.f32 %v1415_v2, %v1257_v7  ;;  %733 = vmatmul.f32.gmra.mxu1 %v374_v29  ;;  %947 = vmatmul.f32.gmra.mxu2 %v801_v41  ;;  %v1418_v51 = vpop.f32.mrf.mxu0  ;;  %v1165_v21 = vpop.f32.mrf.mxu3  ;;  %v1320_v29 = vld [vmem:[%s3684_s29 + $0x130] sm:$0xff] }
 0x1af   : > { %v900_v49 = vpop.f32.mrf.mxu2  ;;  %1465 = vmatmul.f32.gmra.mxu0 %v1319_v52 }
 0x1b0   : > { %v999_v47 = vadd.f32 %v900_v49, %v687_v27 }
 0x1b1   : > { %v689_v2 = vpop.f32.mrf.mxu1  ;;  %1215 = vmatmul.f32.gmra.mxu3 %v1063_v38 }
 0x1b2   : > { %v1258_v23 = vadd.f32 %v1159_v6, %v999_v47  ;;  %v690_v20 = vadd.f32 %v689_v2, %v4143_v31  ;;  %v376_v6 = vld [vmem:[%s3684_s29 + $0x123] sm:$0xff]  ;;  %v1321_v2 = vld [vmem:[%s3684_s29 + $0x138] sm:$0xff] }
 0x1b3   : > { %v3441_v31 = vld [vmem:[%s5762_s1 + $0x388] sm:$0xff] }
 0x1b4   : > { %v4434_v18 = vadd.f32 %v1418_v51, %v1258_v23  ;;  %736 = vmatmul.f32.gmra.mxu1 %v375_v58  ;;  %950 = vmatmul.f32.gmra.mxu2 %v802_v9  ;;  %v1421_v15 = vpop.f32.mrf.mxu0  ;;  %v1168_v41 = vpop.f32.mrf.mxu3  ;;  %v803_v51 = vld [vmem:[%s3684_s29 + $0x125] sm:$0xff]  ;;  %v1065_v23 = vld [vmem:[%s3684_s29 + $0x14f] sm:$0xff] }
 0x1b5   : > { %2138 = vmatpush.msra.mxu3 %v3441_v31  ;;  %v3409_v9 = vld [vmem:[%s5762_s1 + $0x288] sm:$0xff]  ;;  %v1066_v31 = vld [vmem:[%s3684_s29 + $0x157] sm:$0xff] }
 0x1b6   : > { %1620 = vmatpush.msra.mxu1 %v3409_v9 }
 0x1b7   : > { %v903_v7 = vpop.f32.mrf.mxu2  ;;  %1468 = vmatmul.f32.gmra.mxu0 %v1320_v29 }
 0x1b8   : > { %v1000_v52 = vadd.f32 %v903_v7, %v690_v20  ;;  %v804_v7 = vld [vmem:[%s3684_s29 + $0x12d] sm:$0xff] }
 0x1b9   : > { %v692_v27 = vpop.f32.mrf.mxu1  ;;  %1218 = vmatmul.f32.gmra.mxu3 %v1064_v56  ;;  %v377_v56 = vld [vmem:[%s3684_s29 + $0x12b] sm:$0xff] }
 0x1ba   : > { %v1259_v38 = vadd.f32 %v1162_v37, %v1000_v52  ;;  %v693_v37 = vadd.f32 %v692_v27, %v4161_v48  ;;  %v1322_v27 = vld [vmem:[%s3684_s29 + $0x140] sm:$0xff] }
 0x1bc   : > { %v4447_v49 = vadd.f32 %v1421_v15, %v1259_v38  ;;  %739 = vmatmul.f32.gmra.mxu1 %v376_v6  ;;  %953 = vmatmul.f32.gmra.mxu2 %v803_v51  ;;  %v1424_v47 = vpop.f32.mrf.mxu0  ;;  %v1171_v58 = vpop.f32.mrf.mxu3 }
 0x1bf   : > { %v906_v29 = vpop.f32.mrf.mxu2  ;;  %1471 = vmatmul.f32.gmra.mxu0 %v1321_v2 }
 0x1c0   : > { %v1001_v20 = vadd.f32 %v906_v29, %v693_v37  ;;  %v378_v37 = vld [vmem:[%s3684_s29 + $0x133] sm:$0xff] }
 0x1c1   : > { %v695_v15 = vpop.f32.mrf.mxu1  ;;  %1221 = vmatmul.f32.gmra.mxu3 %v1065_v23  ;;  %v805_v23 = vld [vmem:[%s3684_s29 + $0x135] sm:$0xff] }
 0x1c2   : > { %v1260_v52 = vadd.f32 %v1165_v21, %v1001_v20  ;;  %v696_v38 = vadd.f32 %v695_v15, %v4173_v62  ;;  %v3424_v62 = vld [vmem:[%s5762_s1 + $0x300] sm:$0xff] }
 0x1c3   : > { %1880 = vmatpush.msra.mxu2 %v3424_v62 }
 0x1c4   : > { %v4460_v6 = vadd.f32 %v1424_v47, %v1260_v52  ;;  %742 = vmatmul.f32.gmra.mxu1 %v377_v56  ;;  %956 = vmatmul.f32.gmra.mxu2 %v804_v7  ;;  %v1427_v48 = vpop.f32.mrf.mxu0  ;;  %v1174_v51 = vpop.f32.mrf.mxu3  ;;  %v1323_v56 = vld [vmem:[%s3684_s29 + $0x148] sm:$0xff]  ;;  %v1067_v52 = vld [vmem:[%s3684_s29 + $0x15f] sm:$0xff] }
 0x1c7   : > { %v909_v2 = vpop.f32.mrf.mxu2  ;;  %1474 = vmatmul.f32.gmra.mxu0 %v1322_v27 }
 0x1c8   : > { %v1002_v21 = vadd.f32 %v909_v2, %v696_v38  ;;  %v379_v38 = vld [vmem:[%s3684_s29 + $0x13b] sm:$0xff] }
 0x1c9   : > { %v698_v9 = vpop.f32.mrf.mxu1  ;;  %1224 = vmatmul.f32.gmra.mxu3 %v1066_v31  ;;  %v806_v31 = vld [vmem:[%s3684_s29 + $0x13d] sm:$0xff] }
 0x1ca   : > { %v1261_v29 = vadd.f32 %v1168_v41, %v1002_v21  ;;  %v699_v15 = vadd.f32 %v698_v9, %v4194_v16  ;;  %v3408_v16 = vld [vmem:[%s5762_s1 + $0x280] sm:$0xff] }
 0x1cb   : > { %1621 = vmatpush.msra.mxu1 %v3408_v16 }
 0x1cc   : > { %v4467_v47 = vadd.f32 %v1427_v48, %v1261_v29  ;;  %745 = vmatmul.f32.gmra.mxu1 %v378_v37  ;;  %959 = vmatmul.f32.gmra.mxu2 %v805_v23  ;;  %v1430_v20 = vpop.f32.mrf.mxu0  ;;  %v1177_v7 = vpop.f32.mrf.mxu3  ;;  %v3440_v48 = vld [vmem:[%s5762_s1 + $0x380] sm:$0xff]  ;;  %v1324_v37 = vld [vmem:[%s3684_s29 + $0x150] sm:$0xff] }
 0x1cd   : > { %2139 = vmatpush.msra.mxu3 %v3440_v48 }
 0x1cf   : > { %v912_v12 = vpop.f32.mrf.mxu2  ;;  %1477 = vmatmul.f32.gmra.mxu0 %v1323_v56  ;;  %v1068_v56 = vld [vmem:[%s3684_s29 + $0x167] sm:$0xff] }
 0x1d0   : > { %v1003_v41 = vadd.f32 %v912_v12, %v699_v15  ;;  %v3456_v15 = vld [vmem:[%s5762_s1 + $0x400] sm:$0xff] }
 0x1d1   : > { %v701_v27 = vpop.f32.mrf.mxu1  ;;  %1227 = vmatmul.f32.gmra.mxu3 %v1067_v52  ;;  %v807_v12 = vld [vmem:[%s3684_s29 + $0x145] sm:$0xff]  ;;  %2398 = vmatpush.msra.mxu0 %v3456_v15 }
 0x1d2   : > { %v1262_v2 = vadd.f32 %v1171_v58, %v1003_v41  ;;  %v702_v29 = vadd.f32 %v701_v27, %v4207_v34  ;;  %v1325_v27 = vld [vmem:[%s3684_s29 + $0x158] sm:$0xff]  ;;  %v1326_v15 = vld [vmem:[%s3684_s29 + $0x160] sm:$0xff] }
 0x1d4   : > { %v4483_v21 = vadd.f32 %v1430_v20, %v1262_v2  ;;  %748 = vmatmul.f32.gmra.mxu1 %v379_v38  ;;  %962 = vmatmul.f32.gmra.mxu2 %v806_v31  ;;  %v1433_v9 = vpop.f32.mrf.mxu0  ;;  %v1180_v23 = vpop.f32.mrf.mxu3  ;;  %v380_v20 = vld [vmem:[%s3684_s29 + $0x143] sm:$0xff]  ;;  %v1069_v2 = vld [vmem:[%s3684_s29 + $0x16f] sm:$0xff] }
 0x1d7   : > { %v915_v58 = vpop.f32.mrf.mxu2  ;;  %1480 = vmatmul.f32.gmra.mxu0 %v1324_v37 }
 0x1d8   : > { %v1004_v62 = vadd.f32 %v915_v58, %v702_v29  ;;  %v808_v58 = vld [vmem:[%s3684_s29 + $0x14d] sm:$0xff] }
 0x1d9   : > { %v704_v52 = vpop.f32.mrf.mxu1  ;;  %1230 = vmatmul.f32.gmra.mxu3 %v1068_v56  ;;  %v381_v56 = vld [vmem:[%s3684_s29 + $0x14b] sm:$0xff] }
 0x1da   : > { %v1263_v41 = vadd.f32 %v1174_v51, %v1004_v62  ;;  %v705_v31 = vadd.f32 %v704_v52, %v4039_v35 }
 0x1dc   : > { %v4493_v48 = vadd.f32 %v1433_v9, %v1263_v41  ;;  %751 = vmatmul.f32.gmra.mxu1 %v380_v20  ;;  %965 = vmatmul.f32.gmra.mxu2 %v807_v12  ;;  %v1436_v34 = vpop.f32.mrf.mxu0  ;;  %v1183_v38 = vpop.f32.mrf.mxu3  ;;  %v1070_v20 = vld [vmem:[%s3684_s29 + $0x177] sm:$0xff] }
 0x1df   : > { %v918_v16 = vpop.f32.mrf.mxu2  ;;  %1483 = vmatmul.f32.gmra.mxu0 %v1325_v27 }
 0x1e0   : > { %v1005_v37 = vadd.f32 %v918_v16, %v705_v31  ;;  %v382_v31 = vld [vmem:[%s3684_s29 + $0x153] sm:$0xff] }
 0x1e1   : > { %v707_v29 = vpop.f32.mrf.mxu1  ;;  %1233 = vmatmul.f32.gmra.mxu3 %v1069_v2  ;;  %v809_v2 = vld [vmem:[%s3684_s29 + $0x155] sm:$0xff] }
 0x1e2   : > { %v1264_v51 = vadd.f32 %v1177_v7, %v1005_v37  ;;  %v708_v52 = vadd.f32 %v707_v29, %v4060_v46  ;;  %v1327_v37 = vld [vmem:[%s3684_s29 + $0x168] sm:$0xff] }
 0x1e4   : > { %v4500_v9 = vadd.f32 %v1436_v34, %v1264_v51  ;;  %754 = vmatmul.f32.gmra.mxu1 %v381_v56  ;;  %968 = vmatmul.f32.gmra.mxu2 %v808_v58  ;;  %v1439_v62 = vpop.f32.mrf.mxu0  ;;  %v1186_v35 = vpop.f32.mrf.mxu3  ;;  %v2062_v56 = vld [vmem:[%s3684_s29 + $0x2c] sm:$0xff] }
 0x1e7   : > { %v921_v12 = vpop.f32.mrf.mxu2  ;;  %1486 = vmatmul.f32.gmra.mxu0 %v1326_v15 }
 0x1e8   : > { %v1006_v41 = vadd.f32 %v921_v12, %v708_v52  ;;  %v383_v52 = vld [vmem:[%s3684_s29 + $0x15b] sm:$0xff] }
 0x1e9   : > { %v710_v27 = vpop.f32.mrf.mxu1  ;;  %1236 = vmatmul.f32.gmra.mxu3 %v1070_v20  ;;  %v810_v12 = vld [vmem:[%s3684_s29 + $0x15d] sm:$0xff] }
 0x1ea   : > { %v1265_v7 = vadd.f32 %v1180_v23, %v1006_v41  ;;  %v711_v29 = vadd.f32 %v710_v27, %v4075_v55  ;;  %v1328_v41 = vld [vmem:[%s3684_s29 + $0x170] sm:$0xff] }
 0x1eb   : > { %v2063_v27 = vld [vmem:[%s3684_s29 + $0x34] sm:$0xff] }
 0x1ec   : > { %v4507_v34 = vadd.f32 %v1439_v62, %v1265_v7  ;;  %757 = vmatmul.f32.gmra.mxu1 %v382_v31  ;;  %971 = vmatmul.f32.gmra.mxu2 %v809_v2  ;;  %v1442_v16 = vpop.f32.mrf.mxu0  ;;  %v1189_v46 = vpop.f32.mrf.mxu3  ;;  %v250_v7 = vld [vmem:[%s5765_s4] sm:$0xff] }
 0x1ed   : > { %vm295_vm0 = vcmp.gt.f32.partialorder %v250_v7, 0.0  ;;  %v1803_v7 = vld [vmem:[%s3684_s29 + $0x2b] sm:$0xff] }
 0x1ef   : > { %v924_v58 = vpop.f32.mrf.mxu2  ;;  %1489 = vmatmul.f32.gmra.mxu0 %v1327_v37 }
 0x1f0   : > { %v1007_v51 = vadd.f32 %v924_v58, %v711_v29  ;;  %v811_v29 = vld [vmem:[%s3684_s29 + $0x165] sm:$0xff] }
 0x1f1   : > { %v713_v15 = vpop.f32.mrf.mxu1  ;;  %2140 = vmatmul.f32.vlgmr.msra.gmra.mxu3 %v2062_v56  ;;  %v5767_v56 = vmov 0  }
 0x1f2   : > { %v1266_v23 = vadd.f32 %v1183_v38, %v1007_v51  ;;  %v714_v55 = vadd.f32 %v713_v15, %v4090_v0  ;;  %3569 = vset.pattern.permute.xlu0 %v5767_v56  ;;  %v2580_v0 = vsel %vm295_vm0, 1, %v5767_v56  ;;  %3570 = vset.pattern.permute.xlu1 %v5767_v56 }
 0x1f3   : > { %2626 = vperm.xlu0 %3569, %v2580_v0   ;;  %3571 = vset.pattern.permute.xlu2 %v5767_v56 }
 0x1f4   : > { %v4514_v62 = vadd.f32 %v1442_v16, %v1266_v23  ;;  %760 = vmatmul.f32.gmra.mxu1 %v383_v52  ;;  %974 = vmatmul.f32.gmra.mxu2 %v810_v12  ;;  %v1445_v20 = vpop.f32.mrf.mxu0  ;;  %v1192_v31 = vpop.f32.mrf.mxu3  ;;  %v384_v16 = vld [vmem:[%s3684_s29 + $0x163] sm:$0xff]  ;;  %v1329_v52 = vld [vmem:[%s3684_s29 + $0x178] sm:$0xff] }
 0x1f7   : > { %v927_v2 = vpop.f32.mrf.mxu2  ;;  %1492 = vmatmul.f32.gmra.mxu0 %v1328_v41  ;;  %v2064_v41 = vld [vmem:[%s3684_s29 + $0x3c] sm:$0xff] }
 0x1f8   : > { %v1008_v37 = vadd.f32 %v927_v2, %v714_v55  ;;  %v1544_v2 = vld [vmem:[%s3684_s29 + $0x19] sm:$0xff] }
 0x1f9   : > { %v716_v38 = vpop.f32.mrf.mxu1  ;;  %2143 = vmatmul.f32.gmra.mxu3 %v2063_v27 }
 0x1fa   : > { %v1267_v58 = vadd.f32 %v1186_v35, %v1008_v37  ;;  %v717_v23 = vadd.f32 %v716_v38, %v4108_v10  ;;  %v251_v35 = vld [vmem:[%s5765_s4 + $0x8] sm:$0xff] }
 0x1fb   : > { %vm296_vm1 = vcmp.gt.f32.partialorder %v251_v35, 0.0  ;;  %v1804_v35 = vld [vmem:[%s3684_s29 + $0x33] sm:$0xff] }
 0x1fc   : > { %v4528_v51 = vadd.f32 %v1445_v20, %v1267_v58  ;;  %763 = vmatmul.f32.gmra.mxu1 %v384_v16  ;;  %977 = vmatmul.f32.gmra.mxu2 %v811_v29  ;;  %v1448_v15 = vpop.f32.mrf.mxu0  ;;  %v1195_v12 = vpop.f32.mrf.mxu3  ;;  %v2581_v37 = vsel %vm296_vm1, 1, %v5767_v56  ;;  %v2321_v29 = vld [vmem:[%s3684_s29 + $0x2d] sm:$0xff] }
 0x1fd   : > { %2629 = vperm.xlu0 %3569, %v2581_v37  }
 0x1ff   : > { %v930_v55 = vpop.f32.mrf.mxu2  ;;  %1495 = vmatmul.f32.gmra.mxu0 %v1329_v52  ;;  %v2065_v52 = vld [vmem:[%s3684_s29 + $0x44] sm:$0xff] }
 0x200   : > { %v1009_v27 = vadd.f32 %v930_v55, %v717_v23  ;;  %v1545_v55 = vld [vmem:[%s3684_s29 + $0x21] sm:$0xff] }
 0x201   : > { %v719_v20 = vpop.f32.mrf.mxu1  ;;  %2146 = vmatmul.f32.gmra.mxu3 %v2064_v41 }
 0x202   : > { %v1268_v16 = vadd.f32 %v1189_v46, %v1009_v27  ;;  %v720_v58 = vadd.f32 %v719_v20, %v4123_v19  ;;  %v252_v46 = vld [vmem:[%s5765_s4 + $0x10] sm:$0xff] }
 0x203   : > { %vm297_vm2 = vcmp.gt.f32.partialorder %v252_v46, 0.0  ;;  %v1805_v46 = vld [vmem:[%s3684_s29 + $0x3b] sm:$0xff] }
 0x204   : > { %v4539_v10 = vadd.f32 %v1448_v15, %v1268_v16  ;;  %1622 = vmatmul.f32.vlgmr.msra.gmra.mxu1 %v1544_v2  ;;  %1881 = vmatmul.f32.vlgmr.msra.gmra.mxu2 %v1803_v7  ;;  %v1451_v38 = vpop.f32.mrf.mxu0  ;;  %v1198_v0 = vpop.f32.mrf.mxu3  ;;  %v2582_v27 = vsel %vm297_vm2, 1, %v5767_v56  ;;  %v2322_v7 = vld [vmem:[%s3684_s29 + $0x35] sm:$0xff] }
 0x205   : > { %2632 = vperm.xlu1 %3570, %v2582_v27  }
 0x207   : > { %v933_v23 = vpop.f32.mrf.mxu2  ;;  %2399 = vmatmul.f32.vlgmr.msra.gmra.mxu0 %v2321_v29  ;;  %v2066_v29 = vld [vmem:[%s3684_s29 + $0x4c] sm:$0xff] }
 0x208   : > { %v1010_v41 = vadd.f32 %v933_v23, %v720_v58  ;;  %v1546_v23 = vld [vmem:[%s3684_s29 + $0x29] sm:$0xff] }
 0x209   : > { %v722_v15 = vpop.f32.mrf.mxu1  ;;  %2149 = vmatmul.f32.gmra.mxu3 %v2065_v52 }
 0x20a   : > { %v1269_v2 = vadd.f32 %v1192_v31, %v1010_v41  ;;  %v723_v16 = vadd.f32 %v722_v15, %v4138_v28  ;;  %v253_v31 = vld [vmem:[%s5765_s4 + $0x18] sm:$0xff] }
 0x20b   : > { %vm298_vm3 = vcmp.gt.f32.partialorder %v253_v31, 0.0  ;;  %v1547_v31 = vld [vmem:[%s3684_s29 + $0x31] sm:$0xff] }
 0x20c   : > { %v4550_v19 = vadd.f32 %v1451_v38, %v1269_v2  ;;  %1625 = vmatmul.f32.gmra.mxu1 %v1545_v55  ;;  %1884 = vmatmul.f32.gmra.mxu2 %v1804_v35  ;;  %v1454_v20 = vpop.f32.mrf.mxu0  ;;  %v1201_v37 = vpop.f32.mrf.mxu3  ;;  %v2583_v41 = vsel %vm298_vm3, 1, %v5767_v56  ;;  %v2323_v35 = vld [vmem:[%s3684_s29 + $0x3d] sm:$0xff]  ;;  %v1807_v56 = vld [vmem:[%s3684_s29 + $0x4b] sm:$0xff] }
 0x20d   : > { %2635 = vperm.xlu1 %3570, %v2583_v41   ;;  %v2068_v41 = vld [vmem:[%s3684_s29 + $0x5c] sm:$0xff] }
 0x20f   : > { %v936_v58 = vpop.f32.mrf.mxu2  ;;  %2402 = vmatmul.f32.gmra.mxu0 %v2322_v7  ;;  %v2067_v7 = vld [vmem:[%s3684_s29 + $0x54] sm:$0xff] }
 0x210   : > { %v1011_v52 = vadd.f32 %v936_v58, %v723_v16 }
 0x211   : > { %v725_v38 = vpop.f32.mrf.mxu1  ;;  %2152 = vmatmul.f32.gmra.mxu3 %v2066_v29 }
 0x212   : > { %v1270_v28 = vadd.f32 %v1195_v12, %v1011_v52  ;;  %v726_v2 = vadd.f32 %v725_v38, %v4156_v44  ;;  %v1806_v12 = vld [vmem:[%s3684_s29 + $0x43] sm:$0xff] }
 0x214   : > { %v4561_v15 = vadd.f32 %v1454_v20, %v1270_v28  ;;  %1628 = vmatmul.f32.gmra.mxu1 %v1546_v23  ;;  %1887 = vmatmul.f32.gmra.mxu2 %v1805_v46  ;;  %v1457_v55 = vpop.f32.mrf.mxu0  ;;  %v1204_v27 = vpop.f32.mrf.mxu3  ;;  %v2324_v46 = vld [vmem:[%s3684_s29 + $0x45] sm:$0xff] }
 0x217   : > { %v939_v16 = vpop.f32.mrf.mxu2  ;;  %2405 = vmatmul.f32.gmra.mxu0 %v2323_v35 }
 0x218   : > { %v1012_v29 = vadd.f32 %v939_v16, %v726_v2  ;;  %v1548_v16 = vld [vmem:[%s3684_s29 + $0x39] sm:$0xff] }
 0x219   : > { %v728_v58 = vpop.f32.mrf.mxu1  ;;  %2155 = vmatmul.f32.gmra.mxu3 %v2067_v7 }
 0x21a   : > { %v1271_v20 = vadd.f32 %v1198_v0, %v1012_v29  ;;  %v729_v38 = vadd.f32 %v728_v58, %v4171_v60  ;;  %v2325_v29 = vld [vmem:[%s3684_s29 + $0x4d] sm:$0xff]  ;;  %v2069_v58 = vld [vmem:[%s3684_s29 + $0x64] sm:$0xff] }
 0x21c   : > { %v4568_v52 = vadd.f32 %v1457_v55, %v1271_v20  ;;  %1631 = vmatmul.f32.gmra.mxu1 %v1547_v31  ;;  %1890 = vmatmul.f32.gmra.mxu2 %v1806_v12  ;;  %v1460_v23 = vpop.f32.mrf.mxu0  ;;  %v1207_v44 = vpop.f32.mrf.mxu3  ;;  %v256_v20 = vld [vmem:[%s5765_s4 + $0x30] sm:$0xff] }
 0x21d   : > { %vm301_vm4 = vcmp.gt.f32.partialorder %v256_v20, 0.0  ;;  %v1550_v20 = vld [vmem:[%s3684_s29 + $0x49] sm:$0xff] }
 0x21f   : > { %v942_v28 = vpop.f32.mrf.mxu2  ;;  %2408 = vmatmul.f32.gmra.mxu0 %v2324_v46 }
 0x220   : > { %v1013_v35 = vadd.f32 %v942_v28, %v729_v38  ;;  %v1808_v38 = vld [vmem:[%s3684_s29 + $0x53] sm:$0xff] }
 0x221   : > { %v731_v2 = vpop.f32.mrf.mxu1  ;;  %2158 = vmatmul.f32.gmra.mxu3 %v2068_v41 }
 0x222   : > { %v1272_v0 = vadd.f32 %v1201_v37, %v1013_v35  ;;  %v732_v60 = vadd.f32 %v731_v2, %v4189_v13  ;;  %v2326_v2 = vld [vmem:[%s3684_s29 + $0x55] sm:$0xff] }
 0x224   : > { %v4575_v55 = vadd.f32 %v1460_v23, %v1272_v0  ;;  %1634 = vmatmul.f32.gmra.mxu1 %v1548_v16  ;;  %1893 = vmatmul.f32.gmra.mxu2 %v1807_v56  ;;  %v1463_v7 = vpop.f32.mrf.mxu0  ;;  %v1210_v31 = vpop.f32.mrf.mxu3  ;;  %v1549_v23 = vld [vmem:[%s3684_s29 + $0x41] sm:$0xff]  ;;  %v5852_v56 = vmov 0  }
 0x225   : > { %v2586_v41 = vsel %vm301_vm4, 1, %v5852_v56 }
 0x226   : > { %2644 = vperm.xlu0 %3569, %v2586_v41  }
 0x227   : > { %v945_v12 = vpop.f32.mrf.mxu2  ;;  %2411 = vmatmul.f32.gmra.mxu0 %v2325_v29  ;;  %v2070_v29 = vld [vmem:[%s3684_s29 + $0x6c] sm:$0xff] }
 0x228   : > { %v1014_v46 = vadd.f32 %v945_v12, %v732_v60 }
 0x229   : > { %v734_v37 = vpop.f32.mrf.mxu1  ;;  %2161 = vmatmul.f32.gmra.mxu3 %v2069_v58  ;;  %v254_v58 = vld [vmem:[%s5765_s4 + $0x20] sm:$0xff] }
 0x22a   : > { %v1273_v28 = vadd.f32 %v1204_v27, %v1014_v46  ;;  %v735_v0 = vadd.f32 %v734_v37, %v4205_v33  ;;  %v257_v27 = vld [vmem:[%s5765_s4 + $0x38] sm:$0xff]  ;;  %vm299_vm5 = vcmp.gt.f32.partialorder %v254_v58, 0.0 }
 0x22b   : > { %vm302_vm6 = vcmp.gt.f32.partialorder %v257_v27, 0.0  ;;  %v1809_v46 = vld [vmem:[%s3684_s29 + $0x5b] sm:$0xff]  ;;  %v2584_v33 = vsel %vm299_vm5, 1, %v5852_v56  ;;  %v1551_v27 = vld [vmem:[%s3684_s29 + $0x51] sm:$0xff] }
 0x22c   : > { %v4586_v13 = vadd.f32 %v1463_v7, %v1273_v28  ;;  %1637 = vmatmul.f32.gmra.mxu1 %v1549_v23  ;;  %1896 = vmatmul.f32.gmra.mxu2 %v1808_v38  ;;  %v1466_v35 = vpop.f32.mrf.mxu0  ;;  %v1213_v16 = vpop.f32.mrf.mxu3  ;;  %v2587_v37 = vsel %vm302_vm6, 1, %v5852_v56  ;;  %v2327_v28 = vld [vmem:[%s3684_s29 + $0x5d] sm:$0xff] }
 0x22d   : > { %2638 = vperm.xlu2 %3571, %v2584_v33   ;;  %2647 = vperm.xlu1 %3570, %v2587_v37   ;;  %v2328_v33 = vld [vmem:[%s3684_s29 + $0x65] sm:$0xff] }
 0x22f   : > { %v948_v60 = vpop.f32.mrf.mxu2  ;;  %2414 = vmatmul.f32.gmra.mxu0 %v2326_v2 }
 0x230   : > { %v1015_v7 = vadd.f32 %v948_v60, %v735_v0  ;;  %v2071_v60 = vld [vmem:[%s3684_s29 + $0x74] sm:$0xff] }
 0x231   : > { %v737_v12 = vpop.f32.mrf.mxu1  ;;  %2164 = vmatmul.f32.gmra.mxu3 %v2070_v29 }
 0x232   : > { %v1274_v23 = vadd.f32 %v1207_v44, %v1015_v7  ;;  %v738_v0 = vadd.f32 %v737_v12, %v4215_v54  ;;  %v255_v44 = vld [vmem:[%s5765_s4 + $0x28] sm:$0xff] }
 0x233   : > { %vm300_vm7 = vcmp.gt.f32.partialorder %v255_v44, 0.0  ;;  %v1810_v7 = vld [vmem:[%s3684_s29 + $0x63] sm:$0xff]  ;;  %v1811_v44 = vld [vmem:[%s3684_s29 + $0x6b] sm:$0xff] }
 0x234   : > { %v4601_v38 = vadd.f32 %v1466_v35, %v1274_v23  ;;  %1640 = vmatmul.f32.gmra.mxu1 %v1550_v20  ;;  %1899 = vmatmul.f32.gmra.mxu2 %v1809_v46  ;;  %v1469_v41 = vpop.f32.mrf.mxu0  ;;  %v1216_v2 = vpop.f32.mrf.mxu3  ;;  %v2585_v20 = vsel %vm300_vm7, 1, %v5852_v56 }
 0x235   : > { %2641 = vperm.xlu2 %3571, %v2585_v20  }
 0x237   : > { %v951_v29 = vpop.f32.mrf.mxu2  ;;  %2417 = vmatmul.f32.gmra.mxu0 %v2327_v28  ;;  %v2072_v28 = vld [vmem:[%s3684_s29 + $0x7c] sm:$0xff] }
 0x238   : > { %v1016_v58 = vadd.f32 %v951_v29, %v738_v0  ;;  %v1552_v29 = vld [vmem:[%s3684_s29 + $0x59] sm:$0xff] }
 0x239   : > { %v740_v35 = vpop.f32.mrf.mxu1  ;;  %2167 = vmatmul.f32.gmra.mxu3 %v2071_v60 }
 0x23a   : > { %v1275_v46 = vadd.f32 %v1210_v31, %v1016_v58  ;;  %v741_v23 = vadd.f32 %v740_v35, %v4054_v43  ;;  %v259_v31 = vld [vmem:[%s5765_s4 + $0x48] sm:$0xff] }
 0x23b   : > { %vm304_vm8 = vcmp.gt.f32.partialorder %v259_v31, 0.0  ;;  %v1812_v31 = vld [vmem:[%s3684_s29 + $0x73] sm:$0xff] }
 0x23c   : > { %v4612_v54 = vadd.f32 %v1469_v41, %v1275_v46  ;;  %1643 = vmatmul.f32.gmra.mxu1 %v1551_v27  ;;  %1902 = vmatmul.f32.gmra.mxu2 %v1810_v7  ;;  %v1472_v12 = vpop.f32.mrf.mxu0  ;;  %v1219_v37 = vpop.f32.mrf.mxu3  ;;  %v2589_v58 = vsel %vm304_vm8, 1, %v5852_v56  ;;  %v2329_v7 = vld [vmem:[%s3684_s29 + $0x6d] sm:$0xff] }
 0x23d   : > { %2653 = vperm.xlu0 %3569, %v2589_v58  }
 0x23f   : > { %v954_v0 = vpop.f32.mrf.mxu2  ;;  %2420 = vmatmul.f32.gmra.mxu0 %v2328_v33  ;;  %v2073_v33 = vld [vmem:[%s3684_s29 + $0x84] sm:$0xff] }
 0x240   : > { %v1017_v60 = vadd.f32 %v954_v0, %v741_v23  ;;  %v1553_v0 = vld [vmem:[%s3684_s29 + $0x61] sm:$0xff] }
 0x241   : > { %v743_v41 = vpop.f32.mrf.mxu1  ;;  %2170 = vmatmul.f32.gmra.mxu3 %v2072_v28 }
 0x242   : > { %v1276_v27 = vadd.f32 %v1213_v16, %v1017_v60  ;;  %v744_v46 = vadd.f32 %v743_v41, %v4072_v53  ;;  %v260_v16 = vld [vmem:[%s5765_s4 + $0x50] sm:$0xff] }
 0x243   : > { %vm305_vm9 = vcmp.gt.f32.partialorder %v260_v16, 0.0  ;;  %v1813_v16 = vld [vmem:[%s3684_s29 + $0x7b] sm:$0xff] }
 0x244   : > { %v4623_v43 = vadd.f32 %v1472_v12, %v1276_v27  ;;  %1646 = vmatmul.f32.gmra.mxu1 %v1552_v29  ;;  %1905 = vmatmul.f32.gmra.mxu2 %v1811_v44  ;;  %v1475_v35 = vpop.f32.mrf.mxu0  ;;  %v1222_v20 = vpop.f32.mrf.mxu3  ;;  %v2590_v60 = vsel %vm305_vm9, 1, %v5852_v56  ;;  %v2330_v44 = vld [vmem:[%s3684_s29 + $0x75] sm:$0xff] }
 0x245   : > { %2656 = vperm.xlu1 %3570, %v2590_v60  }
 0x247   : > { %v957_v23 = vpop.f32.mrf.mxu2  ;;  %2423 = vmatmul.f32.gmra.mxu0 %v2329_v7  ;;  %v2074_v7 = vld [vmem:[%s3684_s29 + $0x8c] sm:$0xff] }
 0x248   : > { %v1018_v28 = vadd.f32 %v957_v23, %v744_v46  ;;  %v1554_v23 = vld [vmem:[%s3684_s29 + $0x69] sm:$0xff] }
 0x249   : > { %v746_v12 = vpop.f32.mrf.mxu1  ;;  %2173 = vmatmul.f32.gmra.mxu3 %v2073_v33 }
 0x24a   : > { %v1277_v29 = vadd.f32 %v1216_v2, %v1018_v28  ;;  %v747_v27 = vadd.f32 %v746_v12, %v4084_v61  ;;  %v258_v2 = vld [vmem:[%s5765_s4 + $0x40] sm:$0xff] }
 0x24b   : > { %vm303_vm10 = vcmp.gt.f32.partialorder %v258_v2, 0.0  ;;  %v1814_v2 = vld [vmem:[%s3684_s29 + $0x83] sm:$0xff] }
 0x24c   : > { %v4634_v53 = vadd.f32 %v1475_v35, %v1277_v29  ;;  %1649 = vmatmul.f32.gmra.mxu1 %v1553_v0  ;;  %1908 = vmatmul.f32.gmra.mxu2 %v1812_v31  ;;  %v1478_v41 = vpop.f32.mrf.mxu0  ;;  %v1225_v58 = vpop.f32.mrf.mxu3  ;;  %v2588_v28 = vsel %vm303_vm10, 1, %v5852_v56  ;;  %v2331_v31 = vld [vmem:[%s3684_s29 + $0x7d] sm:$0xff] }
 0x24d   : > { %2650 = vperm.xlu2 %3571, %v2588_v28  }
 0x24f   : > { %v960_v46 = vpop.f32.mrf.mxu2  ;;  %2426 = vmatmul.f32.gmra.mxu0 %v2330_v44  ;;  %v2075_v44 = vld [vmem:[%s3684_s29 + $0x94] sm:$0xff] }
 0x250   : > { %v1019_v33 = vadd.f32 %v960_v46, %v747_v27  ;;  %v1555_v46 = vld [vmem:[%s3684_s29 + $0x71] sm:$0xff] }
 0x251   : > { %v749_v35 = vpop.f32.mrf.mxu1  ;;  %2176 = vmatmul.f32.gmra.mxu3 %v2074_v7 }
 0x252   : > { %v1278_v0 = vadd.f32 %v1219_v37, %v1019_v33  ;;  %v750_v29 = vadd.f32 %v749_v35, %v4105_v8  ;;  %v262_v37 = vld [vmem:[%s5765_s4 + $0x60] sm:$0xff] }
 0x253   : > { %vm307_vm11 = vcmp.gt.f32.partialorder %v262_v37, 0.0  ;;  %v1815_v37 = vld [vmem:[%s3684_s29 + $0x8b] sm:$0xff] }
 0x254   : > { %v4645_v61 = vadd.f32 %v1478_v41, %v1278_v0  ;;  %1652 = vmatmul.f32.gmra.mxu1 %v1554_v23  ;;  %1911 = vmatmul.f32.gmra.mxu2 %v1813_v16  ;;  %v1481_v12 = vpop.f32.mrf.mxu0  ;;  %v1228_v60 = vpop.f32.mrf.mxu3  ;;  %v2592_v33 = vsel %vm307_vm11, 1, %v5852_v56  ;;  %v2332_v16 = vld [vmem:[%s3684_s29 + $0x85] sm:$0xff] }
 0x255   : > { %2662 = vperm.xlu0 %3569, %v2592_v33  }
 0x257   : > { %v963_v27 = vpop.f32.mrf.mxu2  ;;  %2429 = vmatmul.f32.gmra.mxu0 %v2331_v31  ;;  %v2076_v31 = vld [vmem:[%s3684_s29 + $0x9c] sm:$0xff] }
 0x258   : > { %v1020_v7 = vadd.f32 %v963_v27, %v750_v29  ;;  %v1556_v27 = vld [vmem:[%s3684_s29 + $0x79] sm:$0xff] }
 0x259   : > { %v752_v41 = vpop.f32.mrf.mxu1  ;;  %2179 = vmatmul.f32.gmra.mxu3 %v2075_v44 }
 0x25a   : > { %v1279_v23 = vadd.f32 %v1222_v20, %v1020_v7  ;;  %v753_v0 = vadd.f32 %v752_v41, %v4120_v17  ;;  %v263_v20 = vld [vmem:[%s5765_s4 + $0x68] sm:$0xff] }
 0x25b   : > { %vm308_vm12 = vcmp.gt.f32.partialorder %v263_v20, 0.0  ;;  %v1816_v20 = vld [vmem:[%s3684_s29 + $0x93] sm:$0xff] }
 0x25c   : > { %v4656_v8 = vadd.f32 %v1481_v12, %v1279_v23  ;;  %1655 = vmatmul.f32.gmra.mxu1 %v1555_v46  ;;  %1914 = vmatmul.f32.gmra.mxu2 %v1814_v2  ;;  %v1484_v35 = vpop.f32.mrf.mxu0  ;;  %v1231_v28 = vpop.f32.mrf.mxu3  ;;  %v2593_v7 = vsel %vm308_vm12, 1, %v5852_v56  ;;  %v2333_v2 = vld [vmem:[%s3684_s29 + $0x8d] sm:$0xff] }
 0x25d   : > { %2665 = vperm.xlu1 %3570, %v2593_v7  }
 0x25f   : > { %v966_v29 = vpop.f32.mrf.mxu2  ;;  %2432 = vmatmul.f32.gmra.mxu0 %v2332_v16  ;;  %v2077_v16 = vld [vmem:[%s3684_s29 + $0xa4] sm:$0xff] }
 0x260   : > { %v1021_v44 = vadd.f32 %v966_v29, %v753_v0  ;;  %v1557_v29 = vld [vmem:[%s3684_s29 + $0x81] sm:$0xff] }
 0x261   : > { %v755_v12 = vpop.f32.mrf.mxu1  ;;  %2182 = vmatmul.f32.gmra.mxu3 %v2076_v31 }
 0x262   : > { %v1280_v46 = vadd.f32 %v1225_v58, %v1021_v44  ;;  %v756_v23 = vadd.f32 %v755_v12, %v4132_v25  ;;  %v261_v58 = vld [vmem:[%s5765_s4 + $0x58] sm:$0xff] }
 0x263   : > { %vm306_vm13 = vcmp.gt.f32.partialorder %v261_v58, 0.0  ;;  %v1817_v58 = vld [vmem:[%s3684_s29 + $0x9b] sm:$0xff] }
 0x264   : > { %v4667_v17 = vadd.f32 %v1484_v35, %v1280_v46  ;;  %1658 = vmatmul.f32.gmra.mxu1 %v1556_v27  ;;  %1917 = vmatmul.f32.gmra.mxu2 %v1815_v37  ;;  %v1487_v41 = vpop.f32.mrf.mxu0  ;;  %v1234_v33 = vpop.f32.mrf.mxu3  ;;  %v2591_v44 = vsel %vm306_vm13, 1, %v5852_v56  ;;  %v2334_v37 = vld [vmem:[%s3684_s29 + $0x95] sm:$0xff] }
 0x265   : > { %2659 = vperm.xlu2 %3571, %v2591_v44  }
 0x267   : > { %v969_v0 = vpop.f32.mrf.mxu2  ;;  %2435 = vmatmul.f32.gmra.mxu0 %v2333_v2  ;;  %v2078_v2 = vld [vmem:[%s3684_s29 + $0xac] sm:$0xff] }
 0x268   : > { %v1022_v31 = vadd.f32 %v969_v0, %v756_v23  ;;  %v1558_v0 = vld [vmem:[%s3684_s29 + $0x89] sm:$0xff] }
 0x269   : > { %v758_v35 = vpop.f32.mrf.mxu1  ;;  %2185 = vmatmul.f32.gmra.mxu3 %v2077_v16 }
 0x26a   : > { %v1281_v27 = vadd.f32 %v1228_v60, %v1022_v31  ;;  %v759_v46 = vadd.f32 %v758_v35, %v4153_v40  ;;  %v265_v60 = vld [vmem:[%s5765_s4 + $0x78] sm:$0xff] }
 0x26b   : > { %vm310_vm14 = vcmp.gt.f32.partialorder %v265_v60, 0.0  ;;  %v1818_v60 = vld [vmem:[%s3684_s29 + $0xa3] sm:$0xff] }
 0x26c   : > { %v4678_v25 = vadd.f32 %v1487_v41, %v1281_v27  ;;  %1661 = vmatmul.f32.gmra.mxu1 %v1557_v29  ;;  %1920 = vmatmul.f32.gmra.mxu2 %v1816_v20  ;;  %v1490_v12 = vpop.f32.mrf.mxu0  ;;  %v1237_v7 = vpop.f32.mrf.mxu3  ;;  %v2595_v31 = vsel %vm310_vm14, 1, %v5852_v56  ;;  %v2335_v20 = vld [vmem:[%s3684_s29 + $0x9d] sm:$0xff] }
 0x26d   : > { %2671 = vperm.xlu0 %3569, %v2595_v31  }
 0x26f   : > { %v972_v23 = vpop.f32.mrf.mxu2  ;;  %2438 = vmatmul.f32.gmra.mxu0 %v2334_v37  ;;  %v2079_v37 = vld [vmem:[%s3684_s29 + $0xb4] sm:$0xff] }
 0x270   : > { %v1023_v16 = vadd.f32 %v972_v23, %v759_v46  ;;  %v1559_v23 = vld [vmem:[%s3684_s29 + $0x91] sm:$0xff] }
 0x271   : > { %v761_v41 = vpop.f32.mrf.mxu1  ;;  %2188 = vmatmul.f32.gmra.mxu3 %v2078_v2 }
 0x272   : > { %v1282_v29 = vadd.f32 %v1231_v28, %v1023_v16  ;;  %v762_v27 = vadd.f32 %v761_v41, %v4168_v57  ;;  %v266_v28 = vld [vmem:[%s5765_s4 + $0x80] sm:$0xff] }
 0x273   : > { %vm311_vm15 = vcmp.gt.f32.partialorder %v266_v28, 0.0  ;;  %v1819_v28 = vld [vmem:[%s3684_s29 + $0xab] sm:$0xff] }
 0x274   : > { %v4689_v40 = vadd.f32 %v1490_v12, %v1282_v29  ;;  %1664 = vmatmul.f32.gmra.mxu1 %v1558_v0  ;;  %1923 = vmatmul.f32.gmra.mxu2 %v1817_v58  ;;  %v1493_v35 = vpop.f32.mrf.mxu0  ;;  %v2141_v44 = vpop.f32.mrf.mxu3  ;;  %v2596_v16 = vsel %vm311_vm15, 1, %v5852_v56  ;;  %v2336_v58 = vld [vmem:[%s3684_s29 + $0xa5] sm:$0xff] }
 0x275   : > { %2674 = vperm.xlu1 %3570, %v2596_v16  }
 0x277   : > { %v975_v46 = vpop.f32.mrf.mxu2  ;;  %2441 = vmatmul.f32.gmra.mxu0 %v2335_v20  ;;  %v2080_v20 = vld [vmem:[%s3684_s29 + $0xbc] sm:$0xff] }
 0x278   : > { %v1024_v2 = vadd.f32 %v975_v46, %v762_v27  ;;  %v1560_v46 = vld [vmem:[%s3684_s29 + $0x99] sm:$0xff] }
 0x279   : > { %v764_v12 = vpop.f32.mrf.mxu1  ;;  %2191 = vmatmul.f32.gmra.mxu3 %v2079_v37 }
 0x27a   : > { %v1283_v0 = vadd.f32 %v1234_v33, %v1024_v2  ;;  %v765_v29 = vadd.f32 %v764_v12, %v4180_v5  ;;  %v264_v33 = vld [vmem:[%s5765_s4 + $0x70] sm:$0xff] }
 0x27b   : > { %vm309_vm0 = vcmp.gt.f32.partialorder %v264_v33, 0.0  ;;  %v1561_v33 = vld [vmem:[%s3684_s29 + $0xa1] sm:$0xff] }
 0x27c   : > { %v4700_v57 = vadd.f32 %v1493_v35, %v1283_v0  ;;  %1667 = vmatmul.f32.gmra.mxu1 %v1559_v23  ;;  %1926 = vmatmul.f32.gmra.mxu2 %v1818_v60  ;;  %v1496_v41 = vpop.f32.mrf.mxu0  ;;  %v2144_v31 = vpop.f32.mrf.mxu3  ;;  %v2594_v2 = vsel %vm309_vm0, 1, %v5852_v56  ;;  %v2337_v60 = vld [vmem:[%s3684_s29 + $0xad] sm:$0xff] }
 0x27d   : > { %2668 = vperm.xlu2 %3571, %v2594_v2   ;;  %v2338_v2 = vld [vmem:[%s3684_s29 + $0xb5] sm:$0xff] }
 0x27f   : > { %v978_v27 = vpop.f32.mrf.mxu2  ;;  %2444 = vmatmul.f32.gmra.mxu0 %v2336_v58  ;;  %v4715_v58 = vpop.permute.xlu0 %2626 }
 0x280   : > { %v1025_v37 = vadd.f32 %v978_v27, %v765_v29  ;;  %5853 = vst [vmem:[#allocation5_spill] sm:$0xff] %v4715_v58  ;;  %v2081_v29 = vld [vmem:[%s3684_s29 + $0xc4] sm:$0xff]  ;;  %vm2760_vm2 = vcmp.eq.s32.totalorder %v4715_v58, 1 }
 0x281   : > { %v1623_v35 = vpop.f32.mrf.mxu1  ;;  %2194 = vmatmul.f32.gmra.mxu3 %v2080_v20 }
 0x282   : > { %v1284_v23 = vadd.f32 %v1237_v7, %v1025_v37  ;;  %v1758_v0 = vadd.f32 %v1623_v35, %v4233_v63  ;;  %v268_v7 = vld [vmem:[%s5765_s4 + $0x90] sm:$0xff] }
 0x283   : > { %vm313_vm1 = vcmp.gt.f32.partialorder %v268_v7, 0.0  ;;  %v1820_v37 = vld [vmem:[%s3684_s29 + $0xb3] sm:$0xff] }
 0x284   : > { %v4711_v5 = vadd.f32 %v1496_v41, %v1284_v23  ;;  %1670 = vmatmul.f32.gmra.mxu1 %v1560_v46  ;;  %1929 = vmatmul.f32.gmra.mxu2 %v1819_v28  ;;  %v2400_v12 = vpop.f32.mrf.mxu0  ;;  %v2147_v16 = vpop.f32.mrf.mxu3  ;;  %v2598_v46 = vsel %vm313_vm1, 1, %v5852_v56 }
 0x285   : > { %2680 = vperm.xlu0 %3569, %v2598_v46  }
 0x287   : > { %v1882_v27 = vpop.f32.mrf.mxu2  ;;  %2447 = vmatmul.f32.gmra.mxu0 %v2337_v60  ;;  %v4735_v7 = vpop.permute.xlu0 %2629 }
 0x288   : > { %v2017_v41 = vadd.f32 %v1882_v27, %v1758_v0  ;;  %5854 = vst [vmem:[#allocation6_spill] sm:$0xff] %v4735_v7  ;;  %vm2761_vm4 = vcmp.eq.s32.totalorder %v4735_v7, 1 }
 0x289   : > { %v1626_v20 = vpop.f32.mrf.mxu1  ;;  %2197 = vmatmul.f32.gmra.mxu3 %v2081_v29  ;;  %v2082_v29 = vld [vmem:[%s3684_s29 + $0xcc] sm:$0xff] }
 0x28a   : > { %v2276_v63 = vadd.f32 %v2141_v44, %v2017_v41  ;;  %v1759_v60 = vadd.f32 %v1626_v20, %v4243_v30  ;;  %v269_v44 = vld [vmem:[%s5765_s4 + $0x98] sm:$0xff] }
 0x28b   : > { %vm314_vm3 = vcmp.gt.f32.partialorder %v269_v44, 0.0  ;;  %v1821_v30 = vld [vmem:[%s3684_s29 + $0xbb] sm:$0xff] }
 0x28c   : > { %v2535_v35 = vadd.f32 %v2400_v12, %v2276_v63  ;;  %1673 = vmatmul.f32.gmra.mxu1 %v1561_v33  ;;  %1932 = vmatmul.f32.gmra.mxu2 %v1820_v37  ;;  %v2403_v28 = vpop.f32.mrf.mxu0  ;;  %v2150_v23 = vpop.f32.mrf.mxu3  ;;  %v1562_v33 = vld [vmem:[%s3684_s29 + $0xa9] sm:$0xff]  ;;  %v2599_v20 = vsel %vm314_vm3, 1, %v5852_v56 }
 0x28d   : > { %2683 = vperm.xlu1 %3570, %v2599_v20  }
 0x28e   : > { %v4729_v0 = vsel %vm2760_vm2, %v2535_v35, 0.0  ;;  %v2339_v35 = vld [vmem:[%s3684_s29 + $0xbd] sm:$0xff] }
 0x28f   : > { %v1885_v27 = vpop.f32.mrf.mxu2  ;;  %2450 = vmatmul.f32.gmra.mxu0 %v2338_v2 }
 0x290   : > { %v2018_v12 = vadd.f32 %v1885_v27, %v1759_v60 }
 0x291   : > { %v1629_v41 = vpop.f32.mrf.mxu1  ;;  %2200 = vmatmul.f32.gmra.mxu3 %v2082_v29  ;;  %v4747_v29 = vpop.permute.xlu1 %2632 }
 0x292   : > { %v2277_v37 = vadd.f32 %v2144_v31, %v2018_v12  ;;  %v1760_v60 = vadd.f32 %v1629_v41, %v4256_v26  ;;  %5855 = vst [vmem:[#allocation7_spill] sm:$0xff] %v4747_v29  ;;  %v2083_v31 = vld [vmem:[%s3684_s29 + $0xd4] sm:$0xff]  ;;  %v1822_v26 = vld [vmem:[%s3684_s29 + $0xc3] sm:$0xff]  ;;  %vm2762_vm6 = vcmp.eq.s32.totalorder %v4747_v29, 1 }
 0x294   : > { %v2536_v46 = vadd.f32 %v2403_v28, %v2277_v37  ;;  %1676 = vmatmul.f32.gmra.mxu1 %v1562_v33  ;;  %1935 = vmatmul.f32.gmra.mxu2 %v1821_v30  ;;  %v2406_v63 = vpop.f32.mrf.mxu0  ;;  %v2153_v2 = vpop.f32.mrf.mxu3  ;;  %v267_v28 = vld [vmem:[%s5765_s4 + $0x88] sm:$0xff]  ;;  %v1563_v30 = vld [vmem:[%s3684_s29 + $0xb1] sm:$0xff] }
 0x295   : > { %vm312_vm5 = vcmp.gt.f32.partialorder %v267_v28, 0.0 }
 0x296   : > { %v4745_v27 = vsel %vm2761_vm4, %v2536_v46, 0.0  ;;  %v2597_v41 = vsel %vm312_vm5, 1, %v5852_v56 }
 0x297   : > { %v1888_v44 = vpop.f32.mrf.mxu2  ;;  %2453 = vmatmul.f32.gmra.mxu0 %v2339_v35  ;;  %2677 = vperm.xlu2 %3571, %v2597_v41   ;;  %v2340_v35 = vld [vmem:[%s3684_s29 + $0xc5] sm:$0xff] }
 0x298   : > { %v2019_v12 = vadd.f32 %v1888_v44, %v1760_v60 }
 0x299   : > { %v1632_v33 = vpop.f32.mrf.mxu1  ;;  %2203 = vmatmul.f32.gmra.mxu3 %v2083_v31  ;;  %v2084_v31 = vld [vmem:[%s3684_s29 + $0xdc] sm:$0xff] }
 0x29a   : > { %v2278_v20 = vadd.f32 %v2147_v16, %v2019_v12  ;;  %v1761_v44 = vadd.f32 %v1632_v33, %v4269_v1  ;;  %v271_v16 = vld [vmem:[%s5765_s4 + $0xa8] sm:$0xff]  ;;  %v4767_v12 = vpop.permute.xlu1 %2635 }
 0x29b   : > { %5856 = vst [vmem:[#allocation8_spill] sm:$0xff] %v4767_v12  ;;  %vm316_vm7 = vcmp.gt.f32.partialorder %v271_v16, 0.0  ;;  %v1823_v1 = vld [vmem:[%s3684_s29 + $0xcb] sm:$0xff]  ;;  %vm2763_vm8 = vcmp.eq.s32.totalorder %v4767_v12, 1  ;;  %v4781_v16 = vpop.permute.xlu2 %2638  ;;  %v2342_v12 = vld [vmem:[%s3684_s29 + $0xd5] sm:$0xff] }
 0x29c   : > { %v2537_v37 = vadd.f32 %v2406_v63, %v2278_v20  ;;  %1679 = vmatmul.f32.gmra.mxu1 %v1563_v30  ;;  %1938 = vmatmul.f32.gmra.mxu2 %v1822_v26  ;;  %v2409_v46 = vpop.f32.mrf.mxu0  ;;  %v2156_v60 = vpop.f32.mrf.mxu3  ;;  %v1564_v26 = vld [vmem:[%s3684_s29 + $0xb9] sm:$0xff]  ;;  %v2601_v33 = vsel %vm316_vm7, 1, %v5852_v56  ;;  %5857 = vst [vmem:[#allocation9_spill] sm:$0xff] %v4781_v16  ;;  %vm2764_vm10 = vcmp.eq.s32.totalorder %v4781_v16, 1 }
 0x29d   : > { %2689 = vperm.xlu0 %3569, %v2601_v33   ;;  %v1565_v33 = vld [vmem:[%s3684_s29 + $0xc1] sm:$0xff]  ;;  %v2087_v16 = vld [vmem:[%s3684_s29 + $0xf4] sm:$0xff] }
 0x29e   : > { %v4761_v28 = vsel %vm2762_vm6, %v2537_v37, 0.0  ;;  %v2341_v37 = vld [vmem:[%s3684_s29 + $0xcd] sm:$0xff] }
 0x29f   : > { %v1891_v7 = vpop.f32.mrf.mxu2  ;;  %2456 = vmatmul.f32.gmra.mxu0 %v2340_v35 }
 0x2a0   : > { %v2020_v63 = vadd.f32 %v1891_v7, %v1761_v44 }
 0x2a1   : > { %v1635_v30 = vpop.f32.mrf.mxu1  ;;  %2206 = vmatmul.f32.gmra.mxu3 %v2084_v31 }
 0x2a2   : > { %v2279_v41 = vadd.f32 %v2150_v23, %v2020_v63  ;;  %v1762_v44 = vadd.f32 %v1635_v30, %v4276_v36  ;;  %v2085_v23 = vld [vmem:[%s3684_s29 + $0xe4] sm:$0xff]  ;;  %v1824_v36 = vld [vmem:[%s3684_s29 + $0xd3] sm:$0xff] }
 0x2a4   : > { %v2538_v20 = vadd.f32 %v2409_v46, %v2279_v41  ;;  %1682 = vmatmul.f32.gmra.mxu1 %v1564_v26  ;;  %1941 = vmatmul.f32.gmra.mxu2 %v1823_v1  ;;  %v2412_v7 = vpop.f32.mrf.mxu0  ;;  %v4774_v35 = vpop.f32.mrf.mxu3  ;;  %v272_v46 = vld [vmem:[%s5765_s4 + $0xb0] sm:$0xff] }
 0x2a5   : > { %vm317_vm9 = vcmp.gt.f32.partialorder %v272_v46, 0.0  ;;  %v2086_v46 = vld [vmem:[%s3684_s29 + $0xec] sm:$0xff] }
 0x2a6   : > { %v4779_v31 = vsel %vm2763_vm8, %v2538_v20, 0.0  ;;  %v2602_v30 = vsel %vm317_vm9, 1, %v5852_v56 }
 0x2a7   : > { %v1894_v63 = vpop.f32.mrf.mxu2  ;;  %2459 = vmatmul.f32.gmra.mxu0 %v2341_v37  ;;  %2692 = vperm.xlu1 %3570, %v2602_v30   ;;  %v1566_v30 = vld [vmem:[%s3684_s29 + $0xc9] sm:$0xff] }
 0x2a8   : > { %v2021_v26 = vadd.f32 %v1894_v63, %v1762_v44 }
 0x2a9   : > { %v1638_v1 = vpop.f32.mrf.mxu1  ;;  %2209 = vmatmul.f32.gmra.mxu3 %v2085_v23 }
 0x2aa   : > { %v2280_v41 = vadd.f32 %v2153_v2, %v2021_v26  ;;  %v1763_v63 = vadd.f32 %v1638_v1, %v4289_v32  ;;  %v1825_v32 = vld [vmem:[%s3684_s29 + $0xdb] sm:$0xff] }
 0x2ac   : > { %v2539_v20 = vadd.f32 %v2412_v7, %v2280_v41  ;;  %1685 = vmatmul.f32.gmra.mxu1 %v1565_v33  ;;  %1944 = vmatmul.f32.gmra.mxu2 %v1824_v36  ;;  %v2415_v37 = vpop.f32.mrf.mxu0  ;;  %v4792_v44 = vpop.f32.mrf.mxu3  ;;  %v270_v7 = vld [vmem:[%s5765_s4 + $0xa0] sm:$0xff] }
 0x2ad   : > { %v4803_v33 = vpop.permute.xlu2 %2641  ;;  %vm315_vm11 = vcmp.gt.f32.partialorder %v270_v7, 0.0 }
 0x2ae   : > { %v4797_v23 = vsel %vm2764_vm10, %v2539_v20, 0.0  ;;  %5858 = vst [vmem:[#allocation10_spill] sm:$0xff] %v4803_v33  ;;  %v2600_v1 = vsel %vm315_vm11, 1, %v5852_v56  ;;  %vm2765_vm12 = vcmp.eq.s32.totalorder %v4803_v33, 1 }
 0x2af   : > { %v1897_v2 = vpop.f32.mrf.mxu2  ;;  %2462 = vmatmul.f32.gmra.mxu0 %v2342_v12  ;;  %2686 = vperm.xlu2 %3571, %v2600_v1   ;;  %v1826_v1 = vld [vmem:[%s3684_s29 + $0xe3] sm:$0xff] }
 0x2b0   : > { %v2022_v26 = vadd.f32 %v1897_v2, %v1763_v63  ;;  %v2343_v63 = vld [vmem:[%s3684_s29 + $0xdd] sm:$0xff] }
 0x2b1   : > { %v1641_v36 = vpop.f32.mrf.mxu1  ;;  %2212 = vmatmul.f32.gmra.mxu3 %v2086_v46 }
 0x2b2   : > { %v2281_v41 = vadd.f32 %v2156_v60, %v2022_v26  ;;  %v1764_v7 = vadd.f32 %v1641_v36, %v4302_v59  ;;  %v274_v26 = vld [vmem:[%s5765_s4 + $0xc0] sm:$0xff]  ;;  %v1567_v36 = vld [vmem:[%s3684_s29 + $0xd1] sm:$0xff] }
 0x2b3   : > { %vm319_vm14 = vcmp.gt.f32.partialorder %v274_v26, 0.0 }
 0x2b4   : > { %v2540_v12 = vadd.f32 %v2415_v37, %v2281_v41  ;;  %1688 = vmatmul.f32.gmra.mxu1 %v1566_v30  ;;  %1947 = vmatmul.f32.gmra.mxu2 %v1825_v32  ;;  %v2418_v20 = vpop.f32.mrf.mxu0  ;;  %v4810_v2 = vpop.f32.mrf.mxu3  ;;  %v275_v37 = vld [vmem:[%s5765_s4 + $0xc8] sm:$0xff] }
 0x2b5   : > { %v4824_v32 = vpop.permute.xlu0 %2644  ;;  %vm320_vm13 = vcmp.gt.f32.partialorder %v275_v37, 0.0  ;;  %v2344_v37 = vld [vmem:[%s3684_s29 + $0xe5] sm:$0xff] }
 0x2b6   : > { %v4815_v46 = vsel %vm2765_vm12, %v2540_v12, 0.0  ;;  %5859 = vst [vmem:[#allocation11_spill] sm:$0xff] %v4824_v32  ;;  %v2605_v41 = vsel %vm320_vm13, 1, %v5852_v56  ;;  %v2604_v12 = vsel %vm319_vm14, 1, %v5852_v56  ;;  %vm2766_vm15 = vcmp.eq.s32.totalorder %v4824_v32, 1  ;;  %v5861_v32 = vld [vmem:[#allocation4_spill] sm:$0xff] }
 0x2b7   : > { %v1900_v60 = vpop.f32.mrf.mxu2  ;;  %2465 = vmatmul.f32.gmra.mxu0 %v2343_v63  ;;  %2701 = vperm.xlu1 %3570, %v2605_v41   ;;  %v4847_v41 = vpop.permute.xlu1 %2647 }
 0x2b8   : > { %v2023_v30 = vadd.f32 %v1900_v60, %v1764_v7  ;;  %2698 = vperm.xlu0 %3569, %v2604_v12   ;;  %5860 = vst [vmem:[#allocation12_spill] sm:$0xff] %v4847_v41  ;;  %v1827_v12 = vld [vmem:[%s3684_s29 + $0xeb] sm:$0xff]  ;;  %vm2767_vm3 = vcmp.eq.s32.totalorder %v4847_v41, 1 }
 0x2b9   : > { %v1644_v59 = vpop.f32.mrf.mxu1  ;;  %2215 = vmatmul.f32.gmra.mxu3 %v2087_v16 }
 0x2ba   : > { %v2282_v63 = vadd.f32 %v4774_v35, %v2023_v30  ;;  %v1765_v16 = vadd.f32 %v1644_v59, %v4309_v11  ;;  %v2088_v35 = vld [vmem:[%s3684_s29 + $0xfc] sm:$0xff] }
 0x2bb   : > { %v1568_v59 = vld [vmem:[%s3684_s29 + $0xd9] sm:$0xff] }
 0x2bc   : > { %v2541_v7 = vadd.f32 %v2418_v20, %v2282_v63  ;;  %1691 = vmatmul.f32.gmra.mxu1 %v1567_v36  ;;  %1950 = vmatmul.f32.gmra.mxu2 %v1826_v1  ;;  %v2421_v60 = vpop.f32.mrf.mxu0  ;;  %v4833_v26 = vpop.f32.mrf.mxu3  ;;  %v278_v20 = vld [vmem:[%s5765_s4 + $0xe0] sm:$0xff]  ;;  %v277_v36 = vld [vmem:[%s5765_s4 + $0xd8] sm:$0xff] }
 0x2bd   : > { %vm323_vm0 = vcmp.gt.f32.partialorder %v278_v20, 0.0  ;;  %vm322_vm1 = vcmp.gt.f32.partialorder %v277_v36, 0.0  ;;  %v2345_v20 = vld [vmem:[%s3684_s29 + $0xed] sm:$0xff] }
 0x2be   : > { %v4838_v33 = vsel %vm2766_vm15, %v2541_v7, 0.0  ;;  %v2608_v63 = vsel %vm323_vm0, 1, %v5852_v56  ;;  %v2607_v7 = vsel %vm322_vm1, 1, %v5852_v56 }
 0x2bf   : > { %v1903_v30 = vpop.f32.mrf.mxu2  ;;  %2468 = vmatmul.f32.gmra.mxu0 %v2344_v37  ;;  %2710 = vperm.xlu1 %3570, %v2608_v63  }
 0x2c0   : > { %v2024_v1 = vadd.f32 %v1903_v30, %v1765_v16  ;;  %2707 = vperm.xlu0 %3569, %v2607_v7   ;;  %v1569_v7 = vld [vmem:[%s3684_s29 + $0xe1] sm:$0xff] }
 0x2c1   : > { %v1647_v11 = vpop.f32.mrf.mxu1  ;;  %2218 = vmatmul.f32.gmra.mxu3 %v2088_v35 }
 0x2c2   : > { %v2283_v37 = vadd.f32 %v4792_v44, %v2024_v1  ;;  %v1766_v35 = vadd.f32 %v1647_v11, %v5861_v32  ;;  %v2089_v44 = vld [vmem:[%s3684_s29 + $0x104] sm:$0xff]  ;;  %v4873_v11 = vpop.permute.xlu2 %2650 }
 0x2c3   : > { %5862 = vst [vmem:[#allocation4_spill] sm:$0xff] %v4873_v11  ;;  %vm2768_vm11 = vcmp.eq.s32.totalorder %v4873_v11, 1 }
 0x2c4   : > { %v2542_v16 = vadd.f32 %v2421_v60, %v2283_v37  ;;  %1694 = vmatmul.f32.gmra.mxu1 %v1568_v59  ;;  %1953 = vmatmul.f32.gmra.mxu2 %v1827_v12  ;;  %v2424_v30 = vpop.f32.mrf.mxu0  ;;  %v4856_v36 = vpop.f32.mrf.mxu3  ;;  %v273_v60 = vld [vmem:[%s5765_s4 + $0xb8] sm:$0xff]  ;;  %v280_v12 = vld [vmem:[%s5765_s4 + $0xf0] sm:$0xff] }
 0x2c5   : > { %v281_v59 = vld [vmem:[%s5765_s4 + $0xf8] sm:$0xff]  ;;  %vm318_vm5 = vcmp.gt.f32.partialorder %v273_v60, 0.0  ;;  %vm325_vm9 = vcmp.gt.f32.partialorder %v280_v12, 0.0 }
 0x2c6   : > { %v4861_v29 = vsel %vm2767_vm3, %v2542_v16, 0.0  ;;  %vm326_vm7 = vcmp.gt.f32.partialorder %v281_v59, 0.0  ;;  %v1828_v37 = vld [vmem:[%s3684_s29 + $0xf3] sm:$0xff]  ;;  %v2603_v16 = vsel %vm318_vm5, 1, %v5852_v56  ;;  %v2610_v41 = vsel %vm325_vm9, 1, %v5852_v56 }
 0x2c7   : > { %v1906_v1 = vpop.f32.mrf.mxu2  ;;  %2471 = vmatmul.f32.gmra.mxu0 %v2345_v20  ;;  %v2611_v20 = vsel %vm326_vm7, 1, %v5852_v56  ;;  %2695 = vperm.xlu2 %3571, %v2603_v16   ;;  %v2346_v60 = vld [vmem:[%s3684_s29 + $0xf5] sm:$0xff] }
 0x2c8   : > { %v2025_v32 = vadd.f32 %v1906_v1, %v1766_v35  ;;  %2719 = vperm.xlu1 %3570, %v2611_v20   ;;  %2716 = vperm.xlu0 %3569, %v2610_v41   ;;  %v284_v41 = vld [vmem:[%s5765_s4 + $0x110] sm:$0xff]  ;;  %v1829_v16 = vld [vmem:[%s3684_s29 + $0xfb] sm:$0xff] }
 0x2c9   : > { %v1650_v63 = vpop.f32.mrf.mxu1  ;;  %2221 = vmatmul.f32.gmra.mxu3 %v2089_v44  ;;  %vm329_vm14 = vcmp.gt.f32.partialorder %v284_v41, 0.0 }
 0x2ca   : > { %v2284_v58 = vadd.f32 %v4810_v2, %v2025_v32  ;;  %v1767_v59 = vadd.f32 %v1650_v63, %v4335_v45  ;;  %v2090_v2 = vld [vmem:[%s3684_s29 + $0x10c] sm:$0xff]  ;;  %v4900_v63 = vpop.permute.xlu0 %2653 }
 0x2cb   : > { %5863 = vst [vmem:[#allocation13_spill] sm:$0xff] %v4900_v63  ;;  %vm2769_vm1 = vcmp.eq.s32.totalorder %v4900_v63, 1 }
 0x2cc   : > { %v2543_v35 = vadd.f32 %v2424_v30, %v2284_v58  ;;  %1697 = vmatmul.f32.gmra.mxu1 %v1569_v7  ;;  %1956 = vmatmul.f32.gmra.mxu2 %v1828_v37  ;;  %v2427_v1 = vpop.f32.mrf.mxu0  ;;  %v4883_v44 = vpop.f32.mrf.mxu3  ;;  %v276_v58 = vld [vmem:[%s5765_s4 + $0xd0] sm:$0xff]  ;;  %v283_v30 = vld [vmem:[%s5765_s4 + $0x108] sm:$0xff] }
 0x2cd   : > { %vm321_vm13 = vcmp.gt.f32.partialorder %v276_v58, 0.0  ;;  %vm328_vm0 = vcmp.gt.f32.partialorder %v283_v30, 0.0  ;;  %v1570_v37 = vld [vmem:[%s3684_s29 + $0xe9] sm:$0xff]  ;;  %v2347_v58 = vld [vmem:[%s3684_s29 + $0xfd] sm:$0xff] }
 0x2ce   : > { %v4888_v12 = vsel %vm2768_vm11, %v2543_v35, 0.0  ;;  %v2606_v20 = vsel %vm321_vm13, 1, %v5852_v56  ;;  %v2614_v35 = vsel %vm329_vm14, 1, %v5852_v56 }
 0x2cf   : > { %v1909_v32 = vpop.f32.mrf.mxu2  ;;  %2474 = vmatmul.f32.gmra.mxu0 %v2346_v60  ;;  %v2613_v60 = vsel %vm328_vm0, 1, %v5852_v56  ;;  %2704 = vperm.xlu2 %3571, %v2606_v20   ;;  %v1571_v20 = vld [vmem:[%s3684_s29 + $0xf1] sm:$0xff] }
 0x2d0   : > { %v2026_v45 = vadd.f32 %v1909_v32, %v1767_v59  ;;  %2728 = vperm.xlu1 %3570, %v2614_v35   ;;  %2725 = vperm.xlu0 %3569, %v2613_v60   ;;  %v1830_v35 = vld [vmem:[%s3684_s29 + $0x103] sm:$0xff] }
 0x2d1   : > { %v1653_v7 = vpop.f32.mrf.mxu1  ;;  %2224 = vmatmul.f32.gmra.mxu3 %v2090_v2 }
 0x2d2   : > { %v2285_v11 = vadd.f32 %v4833_v26, %v2026_v45  ;;  %v1768_v41 = vadd.f32 %v1653_v7, %v4342_v4  ;;  %v2091_v26 = vld [vmem:[%s3684_s29 + $0x114] sm:$0xff]  ;;  %v4927_v7 = vpop.permute.xlu1 %2656 }
 0x2d3   : > { %5864 = vst [vmem:[#allocation14_spill] sm:$0xff] %v4927_v7  ;;  %vm2770_vm13 = vcmp.eq.s32.totalorder %v4927_v7, 1 }
 0x2d4   : > { %v2544_v59 = vadd.f32 %v2427_v1, %v2285_v11  ;;  %1700 = vmatmul.f32.gmra.mxu1 %v1570_v37  ;;  %1959 = vmatmul.f32.gmra.mxu2 %v1829_v16  ;;  %v2430_v32 = vpop.f32.mrf.mxu0  ;;  %v4910_v2 = vpop.f32.mrf.mxu3  ;;  %v279_v11 = vld [vmem:[%s5765_s4 + $0xe8] sm:$0xff]  ;;  %v286_v37 = vld [vmem:[%s5765_s4 + $0x120] sm:$0xff] }
 0x2d5   : > { %v287_v1 = vld [vmem:[%s5765_s4 + $0x128] sm:$0xff]  ;;  %vm324_vm5 = vcmp.gt.f32.partialorder %v279_v11, 0.0  ;;  %vm331_vm9 = vcmp.gt.f32.partialorder %v286_v37, 0.0 }
 0x2d6   : > { %v4915_v30 = vsel %vm2769_vm1, %v2544_v59, 0.0  ;;  %vm332_vm7 = vcmp.gt.f32.partialorder %v287_v1, 0.0  ;;  %v2609_v60 = vsel %vm324_vm5, 1, %v5852_v56  ;;  %v2348_v11 = vld [vmem:[%s3684_s29 + $0x105] sm:$0xff] }
 0x2d7   : > { %v1912_v45 = vpop.f32.mrf.mxu2  ;;  %2477 = vmatmul.f32.gmra.mxu0 %v2347_v58  ;;  %v2617_v59 = vsel %vm332_vm7, 1, %v5852_v56  ;;  %v2616_v58 = vsel %vm331_vm9, 1, %v5852_v56  ;;  %2713 = vperm.xlu2 %3571, %v2609_v60   ;;  %v1572_v60 = vld [vmem:[%s3684_s29 + $0xf9] sm:$0xff] }
 0x2d8   : > { %v2027_v4 = vadd.f32 %v1912_v45, %v1768_v41  ;;  %2737 = vperm.xlu1 %3570, %v2617_v59   ;;  %2734 = vperm.xlu0 %3569, %v2616_v58   ;;  %v1831_v59 = vld [vmem:[%s3684_s29 + $0x10b] sm:$0xff] }
 0x2d9   : > { %v1656_v16 = vpop.f32.mrf.mxu1  ;;  %2227 = vmatmul.f32.gmra.mxu3 %v2091_v26 }
 0x2da   : > { %v2286_v63 = vadd.f32 %v4856_v36, %v2027_v4  ;;  %v1769_v1 = vadd.f32 %v1656_v16, %v4358_v42  ;;  %v2092_v36 = vld [vmem:[%s3684_s29 + $0x11c] sm:$0xff]  ;;  %v4954_v16 = vpop.permute.xlu2 %2659 }
 0x2db   : > { %5865 = vst [vmem:[#allocation15_spill] sm:$0xff] %v4954_v16  ;;  %vm2771_vm7 = vcmp.eq.s32.totalorder %v4954_v16, 1 }
 0x2dc   : > { %v2545_v41 = vadd.f32 %v2430_v32, %v2286_v63  ;;  %1703 = vmatmul.f32.gmra.mxu1 %v1571_v20  ;;  %1962 = vmatmul.f32.gmra.mxu2 %v1830_v35  ;;  %v2433_v45 = vpop.f32.mrf.mxu0  ;;  %v4937_v26 = vpop.f32.mrf.mxu3  ;;  %v282_v63 = vld [vmem:[%s5765_s4 + $0x100] sm:$0xff]  ;;  %v289_v20 = vld [vmem:[%s5765_s4 + $0x138] sm:$0xff] }
 0x2dd   : > { %v290_v32 = vld [vmem:[%s5765_s4 + $0x140] sm:$0xff]  ;;  %vm327_vm14 = vcmp.gt.f32.partialorder %v282_v63, 0.0  ;;  %vm334_vm5 = vcmp.gt.f32.partialorder %v289_v20, 0.0  ;;  %v2349_v63 = vld [vmem:[%s3684_s29 + $0x10d] sm:$0xff] }
 0x2de   : > { %v4942_v37 = vsel %vm2770_vm13, %v2545_v41, 0.0  ;;  %vm335_vm0 = vcmp.gt.f32.partialorder %v290_v32, 0.0  ;;  %v2612_v58 = vsel %vm327_vm14, 1, %v5852_v56 }
 0x2df   : > { %v1915_v4 = vpop.f32.mrf.mxu2  ;;  %2480 = vmatmul.f32.gmra.mxu0 %v2348_v11  ;;  %v2620_v41 = vsel %vm335_vm0, 1, %v5852_v56  ;;  %v2619_v11 = vsel %vm334_vm5, 1, %v5852_v56  ;;  %2722 = vperm.xlu2 %3571, %v2612_v58   ;;  %v1573_v58 = vld [vmem:[%s3684_s29 + $0x101] sm:$0xff] }
 0x2e0   : > { %v2028_v42 = vadd.f32 %v1915_v4, %v1769_v1  ;;  %2746 = vperm.xlu1 %3570, %v2620_v41   ;;  %2743 = vperm.xlu0 %3569, %v2619_v11   ;;  %v1832_v41 = vld [vmem:[%s3684_s29 + $0x113] sm:$0xff] }
 0x2e1   : > { %v1659_v35 = vpop.f32.mrf.mxu1  ;;  %2230 = vmatmul.f32.gmra.mxu3 %v2092_v36 }
 0x2e2   : > { %v2287_v7 = vadd.f32 %v4883_v44, %v2028_v42  ;;  %v1770_v32 = vadd.f32 %v1659_v35, %v4368_v24  ;;  %v2093_v44 = vld [vmem:[%s3684_s29 + $0x124] sm:$0xff]  ;;  %v4981_v35 = vpop.permute.xlu0 %2662 }
 0x2e3   : > { %5866 = vst [vmem:[#allocation16_spill] sm:$0xff] %v4981_v35  ;;  %vm2772_vm5 = vcmp.eq.s32.totalorder %v4981_v35, 1 }
 0x2e4   : > { %v2546_v1 = vadd.f32 %v2433_v45, %v2287_v7  ;;  %1706 = vmatmul.f32.gmra.mxu1 %v1572_v60  ;;  %1965 = vmatmul.f32.gmra.mxu2 %v1831_v59  ;;  %v2436_v4 = vpop.f32.mrf.mxu0  ;;  %v4964_v36 = vpop.f32.mrf.mxu3  ;;  %v285_v7 = vld [vmem:[%s5765_s4 + $0x118] sm:$0xff]  ;;  %v292_v60 = vld [vmem:[%s5765_s4 + $0x150] sm:$0xff] }
 0x2e5   : > { %v293_v45 = vld [vmem:[%s5765_s4 + $0x158] sm:$0xff]  ;;  %vm330_vm9 = vcmp.gt.f32.partialorder %v285_v7, 0.0  ;;  %vm337_vm0 = vcmp.gt.f32.partialorder %v292_v60, 0.0 }
 0x2e6   : > { %v4969_v20 = vsel %vm2771_vm7, %v2546_v1, 0.0  ;;  %vm338_vm14 = vcmp.gt.f32.partialorder %v293_v45, 0.0  ;;  %v2615_v11 = vsel %vm330_vm9, 1, %v5852_v56 }
 0x2e7   : > { %v1918_v42 = vpop.f32.mrf.mxu2  ;;  %2483 = vmatmul.f32.gmra.mxu0 %v2349_v63  ;;  %v2623_v1 = vsel %vm338_vm14, 1, %v5852_v56  ;;  %v2622_v63 = vsel %vm337_vm0, 1, %v5852_v56  ;;  %2731 = vperm.xlu2 %3571, %v2615_v11   ;;  %v1574_v11 = vld [vmem:[%s3684_s29 + $0x109] sm:$0xff] }
 0x2e8   : > { %v2029_v24 = vadd.f32 %v1918_v42, %v1770_v32  ;;  %2755 = vperm.xlu1 %3570, %v2623_v1   ;;  %2752 = vperm.xlu0 %3569, %v2622_v63   ;;  %v2350_v42 = vld [vmem:[%s3684_s29 + $0x115] sm:$0xff] }
 0x2e9   : > { %v1662_v59 = vpop.f32.mrf.mxu1  ;;  %2233 = vmatmul.f32.gmra.mxu3 %v2093_v44 }
 0x2ea   : > { %v2288_v16 = vadd.f32 %v4910_v2, %v2029_v24  ;;  %v1771_v45 = vadd.f32 %v1662_v59, %v4378_v22  ;;  %v2094_v2 = vld [vmem:[%s3684_s29 + $0x12c] sm:$0xff]  ;;  %v1833_v22 = vld [vmem:[%s3684_s29 + $0x11b] sm:$0xff] }
 0x2ec   : > { %v2547_v32 = vadd.f32 %v2436_v4, %v2288_v16  ;;  %1709 = vmatmul.f32.gmra.mxu1 %v1573_v58  ;;  %1968 = vmatmul.f32.gmra.mxu2 %v1832_v41  ;;  %v2439_v44 = vpop.f32.mrf.mxu0  ;;  %v2186_v7 = vpop.f32.mrf.mxu3  ;;  %v288_v16 = vld [vmem:[%s5765_s4 + $0x130] sm:$0xff] }
 0x2ed   : > { %v5000_v58 = vpop.permute.xlu1 %2665  ;;  %vm333_vm9 = vcmp.gt.f32.partialorder %v288_v16, 0.0  ;;  %v2095_v16 = vld [vmem:[%s3684_s29 + $0x134] sm:$0xff] }
 0x2ee   : > { %v4994_v60 = vsel %vm2772_vm5, %v2547_v32, 0.0  ;;  %5867 = vst [vmem:[#allocation17_spill] sm:$0xff] %v5000_v58  ;;  %v2618_v59 = vsel %vm333_vm9, 1, %v5852_v56  ;;  %vm5850_vm14 = vcmp.eq.s32.totalorder %v5000_v58, 1 }
 0x2ef   : > { %v1921_v24 = vpop.f32.mrf.mxu2  ;;  %2486 = vmatmul.f32.gmra.mxu0 %v2350_v42  ;;  %2740 = vperm.xlu2 %3571, %v2618_v59   ;;  %v2351_v42 = vld [vmem:[%s3684_s29 + $0x11d] sm:$0xff] }
 0x2f0   : > { %v2030_v4 = vadd.f32 %v1921_v24, %v1771_v45 }
 0x2f1   : > { %v1665_v41 = vpop.f32.mrf.mxu1  ;;  %2236 = vmatmul.f32.gmra.mxu3 %v2094_v2 }
 0x2f2   : > { %v2289_v1 = vadd.f32 %v4937_v26, %v2030_v4  ;;  %v1772_v24 = vadd.f32 %v1665_v41, %v4391_v50  ;;  %v291_v26 = vld [vmem:[%s5765_s4 + $0x148] sm:$0xff]  ;;  %v5017_v4 = vpop.permute.xlu2 %2668 }
 0x2f3   : > { %5868 = vst [vmem:[#allocation18_spill] sm:$0xff] %v5017_v4  ;;  %vm336_vm0 = vcmp.gt.f32.partialorder %v291_v26, 0.0  ;;  %v1834_v50 = vld [vmem:[%s3684_s29 + $0x123] sm:$0xff]  ;;  %vm5783_vm9 = vcmp.eq.s32.totalorder %v5017_v4, 1  ;;  %v1587_v4 = vld [vmem:[%s3684_s29 + $0x171] sm:$0xff] }
 0x2f4   : > { %v2548_v63 = vadd.f32 %v2439_v44, %v2289_v1  ;;  %1712 = vmatmul.f32.gmra.mxu1 %v1574_v11  ;;  %1971 = vmatmul.f32.gmra.mxu2 %v1833_v22  ;;  %v2442_v32 = vpop.f32.mrf.mxu0  ;;  %v2189_v45 = vpop.f32.mrf.mxu3  ;;  %v1575_v22 = vld [vmem:[%s3684_s29 + $0x111] sm:$0xff]  ;;  %v2621_v41 = vsel %vm336_vm0, 1, %v5852_v56  ;;  %v2096_v26 = vld [vmem:[%s3684_s29 + $0x13c] sm:$0xff] }
 0x2f6   : > { %v5011_v2 = vsel %vm5850_vm14, %v2548_v63, 0.0  ;;  %v2352_v63 = vld [vmem:[%s3684_s29 + $0x125] sm:$0xff] }
 0x2f7   : > { %v1924_v35 = vpop.f32.mrf.mxu2  ;;  %2489 = vmatmul.f32.gmra.mxu0 %v2351_v42  ;;  %2749 = vperm.xlu2 %3571, %v2621_v41  }
 0x2f8   : > { %v2031_v44 = vadd.f32 %v1924_v35, %v1772_v24 }
 0x2f9   : > { %v1668_v11 = vpop.f32.mrf.mxu1  ;;  %2239 = vmatmul.f32.gmra.mxu3 %v2095_v16 }
 0x2fa   : > { %v2290_v59 = vadd.f32 %v4964_v36, %v2031_v44  ;;  %v1773_v24 = vadd.f32 %v1668_v11, %v4401_v3  ;;  %v294_v36 = vld [vmem:[%s5765_s4 + $0x160] sm:$0xff]  ;;  %v5034_v44 = vpop.permute.xlu0 %2671  ;;  %v1835_v3 = vld [vmem:[%s3684_s29 + $0x12b] sm:$0xff] }
 0x2fb   : > { %5869 = vst [vmem:[#allocation19_spill] sm:$0xff] %v5034_v44  ;;  %vm339_vm0 = vcmp.gt.f32.partialorder %v294_v36, 0.0 }
 0x2fc   : > { %v2549_v1 = vadd.f32 %v2442_v32, %v2290_v59  ;;  %1715 = vmatmul.f32.gmra.mxu1 %v1575_v22  ;;  %1974 = vmatmul.f32.gmra.mxu2 %v1834_v50  ;;  %v2445_v35 = vpop.f32.mrf.mxu0  ;;  %v2192_v42 = vpop.f32.mrf.mxu3  ;;  %v1576_v50 = vld [vmem:[%s3684_s29 + $0x119] sm:$0xff]  ;;  %v2624_v11 = vsel %vm339_vm0, 1, %v5852_v56  ;;  %v2097_v56 = vld [vmem:[%s3684_s29 + $0x144] sm:$0xff] }
 0x2fe   : > { %v5028_v16 = vsel %vm5783_vm9, %v2549_v1, 0.0  ;;  %vm5784_vm9 = vcmp.eq.s32.totalorder %v5034_v44, 1  ;;  %v2353_v1 = vld [vmem:[%s3684_s29 + $0x12d] sm:$0xff] }
 0x2ff   : > { %v1927_v58 = vpop.f32.mrf.mxu2  ;;  %2492 = vmatmul.f32.gmra.mxu0 %v2352_v63  ;;  %2758 = vperm.xlu2 %3571, %v2624_v11  }
 0x300   : > { %v2032_v32 = vadd.f32 %v1927_v58, %v1773_v24 }
 0x301   : > { %v1671_v22 = vpop.f32.mrf.mxu1  ;;  %2242 = vmatmul.f32.gmra.mxu3 %v2096_v26 }
 0x302   : > { %v2291_v41 = vadd.f32 %v2186_v7, %v2032_v32  ;;  %v1774_v24 = vadd.f32 %v1671_v22, %v4411_v39  ;;  %v5047_v32 = vpop.permute.xlu1 %2674 }
 0x303   : > { %5870 = vst [vmem:[#allocation20_spill] sm:$0xff] %v5047_v32  ;;  %vm5786_vm0 = vcmp.eq.s32.totalorder %v5047_v32, 1 }
 0x304   : > { %v2550_v59 = vadd.f32 %v2445_v35, %v2291_v41  ;;  %1718 = vmatmul.f32.gmra.mxu1 %v1576_v50  ;;  %1977 = vmatmul.f32.gmra.mxu2 %v1835_v3  ;;  %v2448_v58 = vpop.f32.mrf.mxu0  ;;  %v2195_v63 = vpop.f32.mrf.mxu3  ;;  %v1577_v50 = vld [vmem:[%s3684_s29 + $0x121] sm:$0xff]  ;;  %v1836_v3 = vld [vmem:[%s3684_s29 + $0x133] sm:$0xff] }
 0x305   : > { %v2354_v41 = vld [vmem:[%s3684_s29 + $0x135] sm:$0xff] }
 0x306   : > { %v5044_v36 = vsel %vm5784_vm9, %v2550_v59, 0.0 }
 0x307   : > { %v1930_v7 = vpop.f32.mrf.mxu2  ;;  %2495 = vmatmul.f32.gmra.mxu0 %v2353_v1 }
 0x308   : > { %v2033_v26 = vadd.f32 %v1930_v7, %v1774_v24  ;;  %v2098_v7 = vld [vmem:[%s3684_s29 + $0x14c] sm:$0xff] }
 0x309   : > { %v1674_v35 = vpop.f32.mrf.mxu1  ;;  %2245 = vmatmul.f32.gmra.mxu3 %v2097_v56 }
 0x30a   : > { %v2292_v11 = vadd.f32 %v2189_v45, %v2033_v26  ;;  %v1775_v1 = vadd.f32 %v1674_v35, %v4424_v14  ;;  %v5059_v26 = vpop.permute.xlu2 %2677 }
 0x30b   : > { %5871 = vst [vmem:[#allocation21_spill] sm:$0xff] %v5059_v26  ;;  %vm5788_vm9 = vcmp.eq.s32.totalorder %v5059_v26, 1 }
 0x30c   : > { %v2551_v39 = vadd.f32 %v2448_v58, %v2292_v11  ;;  %1721 = vmatmul.f32.gmra.mxu1 %v1577_v50  ;;  %1980 = vmatmul.f32.gmra.mxu2 %v1836_v3  ;;  %v2451_v22 = vpop.f32.mrf.mxu0  ;;  %v2198_v59 = vpop.f32.mrf.mxu3  ;;  %v1578_v50 = vld [vmem:[%s3684_s29 + $0x129] sm:$0xff]  ;;  %v1837_v3 = vld [vmem:[%s3684_s29 + $0x13b] sm:$0xff] }
 0x30e   : > { %v5056_v24 = vsel %vm5786_vm0, %v2551_v39, 0.0  ;;  %v2355_v39 = vld [vmem:[%s3684_s29 + $0x13d] sm:$0xff] }
 0x30f   : > { %v1933_v56 = vpop.f32.mrf.mxu2  ;;  %2498 = vmatmul.f32.gmra.mxu0 %v2354_v41 }
 0x310   : > { %v2034_v45 = vadd.f32 %v1933_v56, %v1775_v1  ;;  %v2099_v56 = vld [vmem:[%s3684_s29 + $0x154] sm:$0xff] }
 0x311   : > { %v1677_v58 = vpop.f32.mrf.mxu1  ;;  %2248 = vmatmul.f32.gmra.mxu3 %v2098_v7 }
 0x312   : > { %v2293_v11 = vadd.f32 %v2192_v42, %v2034_v45  ;;  %v1776_v41 = vadd.f32 %v1677_v58, %v4434_v18  ;;  %v5071_v45 = vpop.permute.xlu0 %2680 }
 0x313   : > { %5872 = vst [vmem:[#allocation22_spill] sm:$0xff] %v5071_v45  ;;  %vm5801_vm0 = vcmp.eq.s32.totalorder %v5071_v45, 1 }
 0x314   : > { %v2552_v14 = vadd.f32 %v2451_v22, %v2293_v11  ;;  %1724 = vmatmul.f32.gmra.mxu1 %v1578_v50  ;;  %1983 = vmatmul.f32.gmra.mxu2 %v1837_v3  ;;  %v2454_v35 = vpop.f32.mrf.mxu0  ;;  %v2201_v32 = vpop.f32.mrf.mxu3  ;;  %v1579_v50 = vld [vmem:[%s3684_s29 + $0x131] sm:$0xff]  ;;  %v1838_v3 = vld [vmem:[%s3684_s29 + $0x143] sm:$0xff] }
 0x316   : > { %v5068_v1 = vsel %vm5788_vm9, %v2552_v14, 0.0  ;;  %v2356_v14 = vld [vmem:[%s3684_s29 + $0x145] sm:$0xff] }
 0x317   : > { %v1936_v7 = vpop.f32.mrf.mxu2  ;;  %2501 = vmatmul.f32.gmra.mxu0 %v2355_v39 }
 0x318   : > { %v2035_v42 = vadd.f32 %v1936_v7, %v1776_v41  ;;  %v2100_v7 = vld [vmem:[%s3684_s29 + $0x15c] sm:$0xff] }
 0x319   : > { %v1680_v22 = vpop.f32.mrf.mxu1  ;;  %2251 = vmatmul.f32.gmra.mxu3 %v2099_v56 }
 0x31a   : > { %v2294_v11 = vadd.f32 %v2195_v63, %v2035_v42  ;;  %v1777_v39 = vadd.f32 %v1680_v22, %v4447_v49  ;;  %v5083_v42 = vpop.permute.xlu1 %2683 }
 0x31b   : > { %5873 = vst [vmem:[#allocation23_spill] sm:$0xff] %v5083_v42  ;;  %vm5790_vm9 = vcmp.eq.s32.totalorder %v5083_v42, 1  ;;  %v2102_v42 = vld [vmem:[%s3684_s29 + $0x16c] sm:$0xff] }
 0x31c   : > { %v2553_v18 = vadd.f32 %v2454_v35, %v2294_v11  ;;  %1727 = vmatmul.f32.gmra.mxu1 %v1579_v50  ;;  %1986 = vmatmul.f32.gmra.mxu2 %v1838_v3  ;;  %v2457_v58 = vpop.f32.mrf.mxu0  ;;  %v2204_v26 = vpop.f32.mrf.mxu3  ;;  %v1580_v50 = vld [vmem:[%s3684_s29 + $0x139] sm:$0xff]  ;;  %v1839_v3 = vld [vmem:[%s3684_s29 + $0x14b] sm:$0xff] }
 0x31e   : > { %v5080_v41 = vsel %vm5801_vm0, %v2553_v18, 0.0  ;;  %v2357_v18 = vld [vmem:[%s3684_s29 + $0x14d] sm:$0xff] }
 0x31f   : > { %v1939_v56 = vpop.f32.mrf.mxu2  ;;  %2504 = vmatmul.f32.gmra.mxu0 %v2356_v14 }
 0x320   : > { %v2036_v63 = vadd.f32 %v1939_v56, %v1777_v39  ;;  %v2101_v56 = vld [vmem:[%s3684_s29 + $0x164] sm:$0xff] }
 0x321   : > { %v1683_v35 = vpop.f32.mrf.mxu1  ;;  %2254 = vmatmul.f32.gmra.mxu3 %v2100_v7 }
 0x322   : > { %v2295_v11 = vadd.f32 %v2198_v59, %v2036_v63  ;;  %v1778_v14 = vadd.f32 %v1683_v35, %v4460_v6  ;;  %v5095_v63 = vpop.permute.xlu2 %2686 }
 0x323   : > { %5874 = vst [vmem:[#allocation24_spill] sm:$0xff] %v5095_v63 }
 0x324   : > { %v2554_v49 = vadd.f32 %v2457_v58, %v2295_v11  ;;  %1730 = vmatmul.f32.gmra.mxu1 %v1580_v50  ;;  %1989 = vmatmul.f32.gmra.mxu2 %v1839_v3  ;;  %v2460_v22 = vpop.f32.mrf.mxu0  ;;  %v2207_v45 = vpop.f32.mrf.mxu3  ;;  %v1581_v50 = vld [vmem:[%s3684_s29 + $0x141] sm:$0xff]  ;;  %v1840_v3 = vld [vmem:[%s3684_s29 + $0x153] sm:$0xff] }
 0x326   : > { %v5092_v39 = vsel %vm5790_vm9, %v2554_v49, 0.0  ;;  %vm5792_vm9 = vcmp.eq.s32.totalorder %v5095_v63, 1  ;;  %v2103_v63 = vld [vmem:[%s3684_s29 + $0x174] sm:$0xff] }
 0x327   : > { %v1942_v7 = vpop.f32.mrf.mxu2  ;;  %2507 = vmatmul.f32.gmra.mxu0 %v2357_v18  ;;  %v2358_v18 = vld [vmem:[%s3684_s29 + $0x155] sm:$0xff] }
 0x328   : > { %v2037_v59 = vadd.f32 %v1942_v7, %v1778_v14 }
 0x329   : > { %v1686_v58 = vpop.f32.mrf.mxu1  ;;  %2257 = vmatmul.f32.gmra.mxu3 %v2101_v56 }
 0x32a   : > { %v1779_v11 = vadd.f32 %v1686_v58, %v4467_v47  ;;  %v2296_v6 = vadd.f32 %v2201_v32, %v2037_v59  ;;  %v5107_v32 = vpop.permute.xlu0 %2689  ;;  %v1582_v58 = vld [vmem:[%s3684_s29 + $0x149] sm:$0xff] }
 0x32b   : > { %5875 = vst [vmem:[#allocation25_spill] sm:$0xff] %v5107_v32 }
 0x32c   : > { %v2555_v35 = vadd.f32 %v2460_v22, %v2296_v6  ;;  %1733 = vmatmul.f32.gmra.mxu1 %v1581_v50  ;;  %1992 = vmatmul.f32.gmra.mxu2 %v1840_v3  ;;  %v2463_v49 = vpop.f32.mrf.mxu0  ;;  %v2210_v14 = vpop.f32.mrf.mxu3  ;;  %v1841_v22 = vld [vmem:[%s3684_s29 + $0x15b] sm:$0xff] }
 0x32e   : > { %v5104_v7 = vsel %vm5792_vm9, %v2555_v35, 0.0  ;;  %vm5794_vm9 = vcmp.eq.s32.totalorder %v5107_v32, 1  ;;  %v2104_v32 = vld [vmem:[%s3684_s29 + $0x17c] sm:$0xff] }
 0x32f   : > { %v1945_v56 = vpop.f32.mrf.mxu2  ;;  %2510 = vmatmul.f32.gmra.mxu0 %v2358_v18  ;;  %v2359_v18 = vld [vmem:[%s3684_s29 + $0x15d] sm:$0xff] }
 0x330   : > { %v2038_v47 = vadd.f32 %v1945_v56, %v1779_v11 }
 0x331   : > { %v1689_v59 = vpop.f32.mrf.mxu1  ;;  %2260 = vmatmul.f32.gmra.mxu3 %v2102_v42 }
 0x332   : > { %v1780_v50 = vadd.f32 %v1689_v59, %v4483_v21  ;;  %v2297_v3 = vadd.f32 %v2204_v26, %v2038_v47  ;;  %v5119_v26 = vpop.permute.xlu1 %2692  ;;  %v1583_v59 = vld [vmem:[%s3684_s29 + $0x151] sm:$0xff] }
 0x333   : > { %5876 = vst [vmem:[#allocation26_spill] sm:$0xff] %v5119_v26 }
 0x334   : > { %v2556_v6 = vadd.f32 %v2463_v49, %v2297_v3  ;;  %1736 = vmatmul.f32.gmra.mxu1 %v1582_v58  ;;  %1995 = vmatmul.f32.gmra.mxu2 %v1841_v22  ;;  %v2466_v35 = vpop.f32.mrf.mxu0  ;;  %v2213_v11 = vpop.f32.mrf.mxu3  ;;  %v1842_v49 = vld [vmem:[%s3684_s29 + $0x163] sm:$0xff] }
 0x336   : > { %v5116_v56 = vsel %vm5794_vm9, %v2556_v6, 0.0  ;;  %vm5796_vm9 = vcmp.eq.s32.totalorder %v5119_v26, 1  ;;  %v2105_v26 = vld [vmem:[%s3684_s29 + $0x184] sm:$0xff] }
 0x337   : > { %v1948_v42 = vpop.f32.mrf.mxu2  ;;  %2513 = vmatmul.f32.gmra.mxu0 %v2359_v18  ;;  %v2360_v18 = vld [vmem:[%s3684_s29 + $0x165] sm:$0xff] }
 0x338   : > { %v2039_v21 = vadd.f32 %v1948_v42, %v1780_v50 }
 0x339   : > { %v1692_v47 = vpop.f32.mrf.mxu1  ;;  %2263 = vmatmul.f32.gmra.mxu3 %v2103_v63 }
 0x33a   : > { %v1781_v58 = vadd.f32 %v1692_v47, %v4493_v48  ;;  %v2298_v22 = vadd.f32 %v2207_v45, %v2039_v21  ;;  %v5131_v45 = vpop.permute.xlu2 %2695  ;;  %v1584_v47 = vld [vmem:[%s3684_s29 + $0x159] sm:$0xff] }
 0x33b   : > { %5877 = vst [vmem:[#allocation27_spill] sm:$0xff] %v5131_v45 }
 0x33c   : > { %v2557_v3 = vadd.f32 %v2466_v35, %v2298_v22  ;;  %1739 = vmatmul.f32.gmra.mxu1 %v1583_v59  ;;  %1998 = vmatmul.f32.gmra.mxu2 %v1842_v49  ;;  %v2469_v6 = vpop.f32.mrf.mxu0  ;;  %v2216_v50 = vpop.f32.mrf.mxu3  ;;  %v1843_v35 = vld [vmem:[%s3684_s29 + $0x16b] sm:$0xff] }
 0x33e   : > { %v5128_v42 = vsel %vm5796_vm9, %v2557_v3, 0.0  ;;  %vm5798_vm9 = vcmp.eq.s32.totalorder %v5131_v45, 1  ;;  %v2106_v45 = vld [vmem:[%s3684_s29 + $0x18c] sm:$0xff] }
 0x33f   : > { %v1951_v63 = vpop.f32.mrf.mxu2  ;;  %2516 = vmatmul.f32.gmra.mxu0 %v2360_v18  ;;  %v2361_v18 = vld [vmem:[%s3684_s29 + $0x16d] sm:$0xff] }
 0x340   : > { %v2040_v48 = vadd.f32 %v1951_v63, %v1781_v58 }
 0x341   : > { %v1695_v21 = vpop.f32.mrf.mxu1  ;;  %2266 = vmatmul.f32.gmra.mxu3 %v2104_v32 }
 0x342   : > { %v1782_v59 = vadd.f32 %v1695_v21, %v4500_v9  ;;  %v2299_v49 = vadd.f32 %v2210_v14, %v2040_v48  ;;  %v5143_v14 = vpop.permute.xlu0 %2698  ;;  %v1585_v21 = vld [vmem:[%s3684_s29 + $0x161] sm:$0xff] }
 0x343   : > { %5878 = vst [vmem:[#allocation28_spill] sm:$0xff] %v5143_v14 }
 0x344   : > { %v2558_v22 = vadd.f32 %v2469_v6, %v2299_v49  ;;  %1742 = vmatmul.f32.gmra.mxu1 %v1584_v47  ;;  %2001 = vmatmul.f32.gmra.mxu2 %v1843_v35  ;;  %v2472_v3 = vpop.f32.mrf.mxu0  ;;  %v2219_v58 = vpop.f32.mrf.mxu3  ;;  %v1844_v6 = vld [vmem:[%s3684_s29 + $0x173] sm:$0xff] }
 0x346   : > { %v5140_v63 = vsel %vm5798_vm9, %v2558_v22, 0.0  ;;  %vm5804_vm9 = vcmp.eq.s32.totalorder %v5143_v14, 1 }
 0x347   : > { %v1954_v32 = vpop.f32.mrf.mxu2  ;;  %2519 = vmatmul.f32.gmra.mxu0 %v2361_v18  ;;  %v2362_v18 = vld [vmem:[%s3684_s29 + $0x175] sm:$0xff] }
 0x348   : > { %v2041_v9 = vadd.f32 %v1954_v32, %v1782_v59 }
 0x349   : > { %v1698_v48 = vpop.f32.mrf.mxu1  ;;  %2269 = vmatmul.f32.gmra.mxu3 %v2105_v26 }
 0x34a   : > { %v1783_v47 = vadd.f32 %v1698_v48, %v4507_v34  ;;  %v2300_v35 = vadd.f32 %v2213_v11, %v2041_v9  ;;  %v1586_v48 = vld [vmem:[%s3684_s29 + $0x169] sm:$0xff]  ;;  %v1845_v11 = vld [vmem:[%s3684_s29 + $0x17b] sm:$0xff] }
 0x34c   : > { %v2559_v49 = vadd.f32 %v2472_v3, %v2300_v35  ;;  %1745 = vmatmul.f32.gmra.mxu1 %v1585_v21  ;;  %2004 = vmatmul.f32.gmra.mxu2 %v1844_v6  ;;  %v2475_v22 = vpop.f32.mrf.mxu0  ;;  %v2222_v59 = vpop.f32.mrf.mxu3 }
 0x34d   : > { %v5157_v3 = vpop.permute.xlu1 %2701 }
 0x34e   : > { %v5152_v32 = vsel %vm5804_vm9, %v2559_v49, 0.0  ;;  %5879 = vst [vmem:[#allocation29_spill] sm:$0xff] %v5157_v3  ;;  %vm5806_vm0 = vcmp.eq.s32.totalorder %v5157_v3, 1  ;;  %v2363_v49 = vld [vmem:[%s3684_s29 + $0x17d] sm:$0xff] }
 0x34f   : > { %v1957_v26 = vpop.f32.mrf.mxu2  ;;  %2522 = vmatmul.f32.gmra.mxu0 %v2362_v18  ;;  %v1588_v3 = vld [vmem:[%s3684_s29 + $0x179] sm:$0xff] }
 0x350   : > { %v2042_v44 = vadd.f32 %v1957_v26, %v1783_v47 }
 0x351   : > { %v1701_v34 = vpop.f32.mrf.mxu1  ;;  %2272 = vmatmul.f32.gmra.mxu3 %v2106_v45 }
 0x352   : > { %v1784_v9 = vadd.f32 %v1701_v34, %v4514_v62  ;;  %v2301_v21 = vadd.f32 %v2216_v50, %v2042_v44  ;;  %v1846_v62 = vld [vmem:[%s3684_s29 + $0x183] sm:$0xff]  ;;  %v5168_v44 = vpop.permute.xlu2 %2704 }
 0x353   : > { %5880 = vst [vmem:[#allocation30_spill] sm:$0xff] %v5168_v44  ;;  %vm5808_vm9 = vcmp.eq.s32.totalorder %v5168_v44, 1 }
 0x354   : > { %v2560_v6 = vadd.f32 %v2475_v22, %v2301_v21  ;;  %1748 = vmatmul.f32.gmra.mxu1 %v1586_v48  ;;  %2007 = vmatmul.f32.gmra.mxu2 %v1845_v11  ;;  %v2478_v35 = vpop.f32.mrf.mxu0  ;;  %v2225_v18 = vpop.f32.mrf.mxu3  ;;  %v2364_v11 = vld [vmem:[%s3684_s29 + $0x185] sm:$0xff] }
 0x355   : > { %v5188_v44 = vpop.permute.xlu1 %2710 }
 0x356   : > { %v5164_v47 = vsel %vm5806_vm0, %v2560_v6, 0.0  ;;  %5882 = vst [vmem:[#allocation32_spill] sm:$0xff] %v5188_v44 }
 0x357   : > { %v1960_v45 = vpop.f32.mrf.mxu2  ;;  %2525 = vmatmul.f32.gmra.mxu0 %v2363_v49 }
 0x358   : > { %v2043_v26 = vadd.f32 %v1960_v45, %v1784_v9 }
 0x359   : > { %v1704_v14 = vpop.f32.mrf.mxu1 }
 0x35a   : > { %v1785_v50 = vadd.f32 %v1704_v14, %v4528_v51  ;;  %v2302_v22 = vadd.f32 %v2219_v58, %v2043_v26  ;;  %v1847_v51 = vld [vmem:[%s3684_s29 + $0x18b] sm:$0xff]  ;;  %v5179_v58 = vpop.permute.xlu0 %2707 }
 0x35b   : > { %5881 = vst [vmem:[#allocation31_spill] sm:$0xff] %v5179_v58  ;;  %vm5809_vm0 = vcmp.eq.s32.totalorder %v5179_v58, 1 }
 0x35c   : > { %v2561_v34 = vadd.f32 %v2478_v35, %v2302_v22  ;;  %1751 = vmatmul.f32.gmra.mxu1 %v1587_v4  ;;  %2010 = vmatmul.f32.gmra.mxu2 %v1846_v62  ;;  %v2481_v48 = vpop.f32.mrf.mxu0  ;;  %v2228_v21 = vpop.f32.mrf.mxu3  ;;  %v2365_v62 = vld [vmem:[%s3684_s29 + $0x18d] sm:$0xff] }
 0x35e   : > { %v5175_v9 = vsel %vm5808_vm9, %v2561_v34, 0.0  ;;  %vm5811_vm9 = vcmp.eq.s32.totalorder %v5188_v44, 1 }
 0x35f   : > { %v1963_v6 = vpop.f32.mrf.mxu2  ;;  %2528 = vmatmul.f32.gmra.mxu0 %v2364_v11 }
 0x360   : > { %v2044_v49 = vadd.f32 %v1963_v6, %v1785_v50 }
 0x361   : > { %v1707_v45 = vpop.f32.mrf.mxu1 }
 0x362   : > { %v1786_v14 = vadd.f32 %v1707_v45, %v4539_v10  ;;  %v2303_v4 = vadd.f32 %v2222_v59, %v2044_v49  ;;  %v5204_v44 = vpop.permute.xlu0 %2716 }
 0x364   : > { %v2562_v35 = vadd.f32 %v2481_v48, %v2303_v4  ;;  %1754 = vmatmul.f32.gmra.mxu1 %v1588_v3  ;;  %2013 = vmatmul.f32.gmra.mxu2 %v1847_v51  ;;  %v2484_v26 = vpop.f32.mrf.mxu0  ;;  %v2231_v22 = vpop.f32.mrf.mxu3 }
 0x366   : > { %v5186_v34 = vsel %vm5809_vm0, %v2562_v35, 0.0 }
 0x367   : > { %v1966_v50 = vpop.f32.mrf.mxu2  ;;  %2531 = vmatmul.f32.gmra.mxu0 %v2365_v62  ;;  %v5196_v62 = vpop.permute.xlu2 %2713 }
 0x368   : > { %v2045_v11 = vadd.f32 %v1966_v50, %v1786_v14  ;;  %5883 = vst [vmem:[#allocation33_spill] sm:$0xff] %v5196_v62  ;;  %vm5814_vm0 = vcmp.eq.s32.totalorder %v5196_v62, 1  ;;  %v5213_v62 = vpop.permute.xlu1 %2719 }
 0x369   : > { %v1710_v6 = vpop.f32.mrf.mxu1  ;;  %5884 = vst [vmem:[#allocation34_spill] sm:$0xff] %v5213_v62 }
 0x36a   : > { %v1787_v10 = vadd.f32 %v1710_v6, %v4550_v19  ;;  %v2304_v59 = vadd.f32 %v2225_v18, %v2045_v11 }
 0x36c   : > { %v2563_v3 = vadd.f32 %v2484_v26, %v2304_v59  ;;  %v2487_v48 = vpop.f32.mrf.mxu0  ;;  %v2234_v49 = vpop.f32.mrf.mxu3 }
 0x36e   : > { %v5194_v45 = vsel %vm5811_vm9, %v2563_v3, 0.0  ;;  %vm5815_vm9 = vcmp.eq.s32.totalorder %v5204_v44, 1 }
 0x36f   : > { %v1969_v51 = vpop.f32.mrf.mxu2 }
 0x370   : > { %v2046_v4 = vadd.f32 %v1969_v51, %v1787_v10 }
 0x371   : > { %v1713_v35 = vpop.f32.mrf.mxu1 }
 0x372   : > { %v1788_v14 = vadd.f32 %v1713_v35, %v4561_v15  ;;  %v2305_v50 = vadd.f32 %v2228_v21, %v2046_v4 }
 0x374   : > { %v2564_v19 = vadd.f32 %v2487_v48, %v2305_v50  ;;  %v2490_v18 = vpop.f32.mrf.mxu0  ;;  %v2237_v11 = vpop.f32.mrf.mxu3 }
 0x376   : > { %v5202_v26 = vsel %vm5814_vm0, %v2564_v19, 0.0  ;;  %vm5817_vm0 = vcmp.eq.s32.totalorder %v5213_v62, 1  ;;  %v5229_v62 = vpop.permute.xlu0 %2725 }
 0x377   : > { %v1972_v6 = vpop.f32.mrf.mxu2  ;;  %5886 = vst [vmem:[#allocation36_spill] sm:$0xff] %v5229_v62 }
 0x378   : > { %v2047_v59 = vadd.f32 %v1972_v6, %v1788_v14 }
 0x379   : > { %v1716_v3 = vpop.f32.mrf.mxu1 }
 0x37a   : > { %v1789_v10 = vadd.f32 %v1716_v3, %v4568_v52  ;;  %v2306_v51 = vadd.f32 %v2231_v22, %v2047_v59 }
 0x37c   : > { %v2565_v15 = vadd.f32 %v2490_v18, %v2306_v51  ;;  %v2493_v21 = vpop.f32.mrf.mxu0  ;;  %v2240_v4 = vpop.f32.mrf.mxu3 }
 0x37e   : > { %v5210_v48 = vsel %vm5815_vm9, %v2565_v15, 0.0 }
 0x37f   : > { %v1975_v35 = vpop.f32.mrf.mxu2 }
 0x380   : > { %v2048_v50 = vadd.f32 %v1975_v35, %v1789_v10  ;;  %v5221_v35 = vpop.permute.xlu2 %2722 }
 0x381   : > { %v1719_v19 = vpop.f32.mrf.mxu1  ;;  %5885 = vst [vmem:[#allocation35_spill] sm:$0xff] %v5221_v35  ;;  %vm5819_vm9 = vcmp.eq.s32.totalorder %v5221_v35, 1  ;;  %v5237_v35 = vpop.permute.xlu1 %2728 }
 0x382   : > { %v1790_v14 = vadd.f32 %v1719_v19, %v4575_v55  ;;  %v2307_v6 = vadd.f32 %v2234_v49, %v2048_v50  ;;  %5887 = vst [vmem:[#allocation37_spill] sm:$0xff] %v5237_v35 }
 0x384   : > { %v2566_v58 = vadd.f32 %v2493_v21, %v2307_v6  ;;  %v2496_v52 = vpop.f32.mrf.mxu0  ;;  %v2243_v22 = vpop.f32.mrf.mxu3 }
 0x386   : > { %v5218_v18 = vsel %vm5817_vm0, %v2566_v58, 0.0  ;;  %vm5821_vm0 = vcmp.eq.s32.totalorder %v5229_v62, 1 }
 0x387   : > { %v1978_v59 = vpop.f32.mrf.mxu2 }
 0x388   : > { %v2049_v3 = vadd.f32 %v1978_v59, %v1790_v14  ;;  %v5245_v62 = vpop.permute.xlu2 %2731 }
 0x389   : > { %v1722_v51 = vpop.f32.mrf.mxu1  ;;  %5888 = vst [vmem:[#allocation38_spill] sm:$0xff] %v5245_v62 }
 0x38a   : > { %v1791_v10 = vadd.f32 %v1722_v51, %v4586_v13  ;;  %v2308_v15 = vadd.f32 %v2237_v11, %v2049_v3 }
 0x38c   : > { %v2567_v55 = vadd.f32 %v2496_v52, %v2308_v15  ;;  %v2499_v49 = vpop.f32.mrf.mxu0  ;;  %v2246_v21 = vpop.f32.mrf.mxu3 }
 0x38e   : > { %v5226_v50 = vsel %vm5819_vm9, %v2567_v55, 0.0  ;;  %vm5823_vm9 = vcmp.eq.s32.totalorder %v5237_v35, 1 }
 0x38f   : > { %v1981_v19 = vpop.f32.mrf.mxu2 }
 0x390   : > { %v2050_v58 = vadd.f32 %v1981_v19, %v1791_v10 }
 0x391   : > { %v1725_v6 = vpop.f32.mrf.mxu1 }
 0x392   : > { %v1792_v14 = vadd.f32 %v1725_v6, %v4601_v38  ;;  %v2309_v59 = vadd.f32 %v2240_v4, %v2050_v58 }
 0x394   : > { %v2568_v13 = vadd.f32 %v2499_v49, %v2309_v59  ;;  %v2502_v11 = vpop.f32.mrf.mxu0  ;;  %v2249_v51 = vpop.f32.mrf.mxu3 }
 0x396   : > { %v5234_v52 = vsel %vm5821_vm0, %v2568_v13, 0.0  ;;  %vm5824_vm0 = vcmp.eq.s32.totalorder %v5245_v62, 1 }
 0x397   : > { %v1984_v3 = vpop.f32.mrf.mxu2 }
 0x398   : > { %v2051_v15 = vadd.f32 %v1984_v3, %v1792_v14 }
 0x399   : > { %v1728_v55 = vpop.f32.mrf.mxu1 }
 0x39a   : > { %v1793_v10 = vadd.f32 %v1728_v55, %v4612_v54  ;;  %v2310_v19 = vadd.f32 %v2243_v22, %v2051_v15 }
 0x39c   : > { %v2569_v38 = vadd.f32 %v2502_v11, %v2310_v19  ;;  %v2505_v4 = vpop.f32.mrf.mxu0  ;;  %v2252_v13 = vpop.f32.mrf.mxu3 }
 0x39e   : > { %v5242_v49 = vsel %vm5823_vm9, %v2569_v38, 0.0 }
 0x39f   : > { %v1987_v58 = vpop.f32.mrf.mxu2 }
 0x3a0   : > { %v2052_v6 = vadd.f32 %v1987_v58, %v1793_v10  ;;  %v5252_v58 = vpop.permute.xlu0 %2734 }
 0x3a1   : > { %v1731_v59 = vpop.f32.mrf.mxu1  ;;  %5889 = vst [vmem:[#allocation39_spill] sm:$0xff] %v5252_v58  ;;  %vm5826_vm9 = vcmp.eq.s32.totalorder %v5252_v58, 1 }
 0x3a2   : > { %v1794_v14 = vadd.f32 %v1731_v59, %v4623_v43  ;;  %v2311_v3 = vadd.f32 %v2246_v21, %v2052_v6 }
 0x3a4   : > { %v2570_v54 = vadd.f32 %v2505_v4, %v2311_v3  ;;  %v2508_v22 = vpop.f32.mrf.mxu0  ;;  %v2255_v10 = vpop.f32.mrf.mxu3 }
 0x3a6   : > { %v5250_v11 = vsel %vm5824_vm0, %v2570_v54, 0.0 }
 0x3a7   : > { %v1990_v15 = vpop.f32.mrf.mxu2 }
 0x3a8   : > { %v2053_v55 = vadd.f32 %v1990_v15, %v1794_v14  ;;  %v5260_v14 = vpop.permute.xlu1 %2737 }
 0x3a9   : > { %v1734_v19 = vpop.f32.mrf.mxu1  ;;  %5890 = vst [vmem:[#allocation40_spill] sm:$0xff] %v5260_v14  ;;  %vm5828_vm0 = vcmp.eq.s32.totalorder %v5260_v14, 1 }
 0x3aa   : > { %v2312_v38 = vadd.f32 %v2249_v51, %v2053_v55  ;;  %v1795_v21 = vadd.f32 %v1734_v19, %v4634_v53 }
 0x3ac   : > { %v2571_v35 = vadd.f32 %v2508_v22, %v2312_v38  ;;  %v2511_v43 = vpop.f32.mrf.mxu0  ;;  %v2258_v22 = vpop.f32.mrf.mxu3 }
 0x3ae   : > { %v5258_v4 = vsel %vm5826_vm9, %v2571_v35, 0.0 }
 0x3af   : > { %v1993_v6 = vpop.f32.mrf.mxu2 }
 0x3b0   : > { %v2054_v59 = vadd.f32 %v1993_v6, %v1795_v21  ;;  %v5268_v21 = vpop.permute.xlu2 %2740 }
 0x3b1   : > { %v1737_v3 = vpop.f32.mrf.mxu1  ;;  %5891 = vst [vmem:[#allocation41_spill] sm:$0xff] %v5268_v21  ;;  %vm5830_vm9 = vcmp.eq.s32.totalorder %v5268_v21, 1 }
 0x3b2   : > { %v2313_v54 = vadd.f32 %v2252_v13, %v2054_v59  ;;  %v1796_v55 = vadd.f32 %v1737_v3, %v4645_v61 }
 0x3b4   : > { %v2572_v51 = vadd.f32 %v2511_v43, %v2313_v54  ;;  %v2514_v15 = vpop.f32.mrf.mxu0  ;;  %v2261_v3 = vpop.f32.mrf.mxu3 }
 0x3b6   : > { %v5266_v53 = vsel %vm5828_vm0, %v2572_v51, 0.0 }
 0x3b7   : > { %v1996_v19 = vpop.f32.mrf.mxu2 }
 0x3b8   : > { %v2055_v35 = vadd.f32 %v1996_v19, %v1796_v55  ;;  %v5276_v55 = vpop.permute.xlu0 %2743 }
 0x3b9   : > { %v1740_v38 = vpop.f32.mrf.mxu1  ;;  %5892 = vst [vmem:[#allocation42_spill] sm:$0xff] %v5276_v55  ;;  %vm5831_vm0 = vcmp.eq.s32.totalorder %v5276_v55, 1 }
 0x3ba   : > { %v2314_v58 = vadd.f32 %v2255_v10, %v2055_v35  ;;  %v1797_v43 = vadd.f32 %v1740_v38, %v4656_v8 }
 0x3bc   : > { %v2573_v13 = vadd.f32 %v2514_v15, %v2314_v58  ;;  %v2517_v6 = vpop.f32.mrf.mxu0 }
 0x3be   : > { %v5274_v59 = vsel %vm5830_vm9, %v2573_v13, 0.0  ;;  %v2264_v13 = vpop.f32.mrf.mxu3 }
 0x3bf   : > { %v1999_v61 = vpop.f32.mrf.mxu2 }
 0x3c0   : > { %v2056_v54 = vadd.f32 %v1999_v61, %v1797_v43  ;;  %v5284_v43 = vpop.permute.xlu1 %2746 }
 0x3c1   : > { %v1743_v51 = vpop.f32.mrf.mxu1  ;;  %5894 = vst [vmem:[#allocation44_spill] sm:$0xff] %v5284_v43  ;;  %vm5833_vm9 = vcmp.eq.s32.totalorder %v5284_v43, 1  ;;  %v5300_v43 = vpop.permute.xlu0 %2752 }
 0x3c2   : > { %v2315_v14 = vadd.f32 %v2258_v22, %v2056_v54  ;;  %v1798_v58 = vadd.f32 %v1743_v51, %v4667_v17  ;;  %5898 = vst [vmem:[#allocation48_spill] sm:$0xff] %v5300_v43 }
 0x3c4   : > { %v2574_v10 = vadd.f32 %v2517_v6, %v2315_v14  ;;  %v2520_v19 = vpop.f32.mrf.mxu0 }
 0x3c6   : > { %v5282_v8 = vsel %vm5831_vm0, %v2574_v10, 0.0 }
 0x3c7   : > { %5893 = vst [vmem:[#allocation43_spill] sm:$0xff] %v5282_v8  ;;  %v2002_v15 = vpop.f32.mrf.mxu2 }
 0x3c8   : > { %v2057_v35 = vadd.f32 %v2002_v15, %v1798_v58  ;;  %v2267_v58 = vpop.f32.mrf.mxu3  ;;  %v5292_v15 = vpop.permute.xlu2 %2749 }
 0x3c9   : > { %v1746_v38 = vpop.f32.mrf.mxu1  ;;  %5896 = vst [vmem:[#allocation46_spill] sm:$0xff] %v5292_v15  ;;  %vm5835_vm0 = vcmp.eq.s32.totalorder %v5292_v15, 1 }
 0x3ca   : > { %v2316_v21 = vadd.f32 %v2261_v3, %v2057_v35  ;;  %v1799_v14 = vadd.f32 %v1746_v38, %v4678_v25 }
 0x3cc   : > { %v2575_v22 = vadd.f32 %v2520_v19, %v2316_v21  ;;  %v2523_v61 = vpop.f32.mrf.mxu0 }
 0x3ce   : > { %v5290_v17 = vsel %vm5833_vm9, %v2575_v22, 0.0  ;;  %vm5836_vm9 = vcmp.eq.s32.totalorder %v5300_v43, 1 }
 0x3cf   : > { %5895 = vst [vmem:[#allocation45_spill] sm:$0xff] %v5290_v17  ;;  %v2005_v6 = vpop.f32.mrf.mxu2 }
 0x3d0   : > { %v2058_v54 = vadd.f32 %v2005_v6, %v1799_v14  ;;  %v2270_v6 = vpop.f32.mrf.mxu3 }
 0x3d1   : > { %v1749_v51 = vpop.f32.mrf.mxu1 }
 0x3d2   : > { %v2317_v10 = vadd.f32 %v2264_v13, %v2058_v54  ;;  %v1800_v19 = vadd.f32 %v1749_v51, %v4689_v40 }
 0x3d4   : > { %v2576_v3 = vadd.f32 %v2523_v61, %v2317_v10  ;;  %v2526_v21 = vpop.f32.mrf.mxu0 }
 0x3d6   : > { %v5298_v25 = vsel %vm5835_vm0, %v2576_v3, 0.0  ;;  %v5308_v3 = vpop.permute.xlu1 %2755 }
 0x3d7   : > { %5897 = vst [vmem:[#allocation47_spill] sm:$0xff] %v5298_v25  ;;  %v2008_v35 = vpop.f32.mrf.mxu2  ;;  %vm5849_vm0 = vcmp.eq.s32.totalorder %v5308_v3, 1 }
 0x3d8   : > { %v2059_v38 = vadd.f32 %v2008_v35, %v1800_v19  ;;  %5900 = vst [vmem:[#allocation50_spill] sm:$0xff] %v5308_v3 }
 0x3d9   : > { %v1752_v22 = vpop.f32.mrf.mxu1 }
 0x3da   : > { %v2318_v14 = vadd.f32 %v2267_v58, %v2059_v38  ;;  %v1801_v61 = vadd.f32 %v1752_v22, %v4700_v57  ;;  %v2273_v38 = vpop.f32.mrf.mxu3 }
 0x3dc   : > { %v2577_v13 = vadd.f32 %v2526_v21, %v2318_v14  ;;  %v2529_v51 = vpop.f32.mrf.mxu0 }
 0x3de   : > { %v5306_v54 = vsel %vm5836_vm9, %v2577_v13, 0.0  ;;  %v5316_v13 = vpop.permute.xlu2 %2758 }
 0x3df   : > { %5899 = vst [vmem:[#allocation49_spill] sm:$0xff] %v5306_v54  ;;  %v2011_v40 = vpop.f32.mrf.mxu2  ;;  %vm5848_vm9 = vcmp.eq.s32.totalorder %v5316_v13, 1 }
 0x3e0   : > { %v2060_v10 = vadd.f32 %v2011_v40, %v1801_v61  ;;  %5902 = vst [vmem:[#allocation52_spill] sm:$0xff] %v5316_v13 }
 0x3e1   : > { %v1755_v35 = vpop.f32.mrf.mxu1 }
 0x3e2   : > { %v2319_v19 = vadd.f32 %v2270_v6, %v2060_v10  ;;  %v1802_v58 = vadd.f32 %v1755_v35, %v4711_v5 }
 0x3e4   : > { %v2578_v15 = vadd.f32 %v2529_v51, %v2319_v19  ;;  %v2532_v14 = vpop.f32.mrf.mxu0 }
 0x3e6   : > { %v5314_v21 = vsel %vm5849_vm0, %v2578_v15, 0.0 }
 0x3e7   : > { %5901 = vst [vmem:[#allocation51_spill] sm:$0xff] %v5314_v21  ;;  %v2014_v57 = vpop.f32.mrf.mxu2 }
 0x3e8   : > { %v2061_v22 = vadd.f32 %v2014_v57, %v1802_v58 }
 0x3ea   : > { %v2320_v61 = vadd.f32 %v2273_v38, %v2061_v22 }
 0x3eb   : > { %2852 = sbr.rel (%p3472_p10) target bundleno = 1113 (0x459), region = 48 }
 0x3ec   : > { %v2579_v40 = vadd.f32 %v2532_v14, %v2320_v61 }
 0x3ee   : > { %v5321_v6 = vsel %vm5848_vm9, %v2579_v40, 0.0 }
 0x3ef   : > { %5903 = vst [vmem:[#allocation53_spill] sm:$0xff] %v5321_v6 }
 0x3f0   : > { %v2854_v5 = vadd.f32 %v4745_v27, %v4729_v0  ;;  %v2907_v15 = vmul.f32 %v4729_v0, %v4729_v0  ;;  %v2908_v51 = vmul.f32 %v4745_v27, %v4745_v27  ;;  %v2909_v19 = vmul.f32 %v4761_v28, %v4761_v28 }
 0x3f1   : > { %v2910_v58 = vmul.f32 %v4779_v31, %v4779_v31  ;;  %v2911_v22 = vmul.f32 %v4797_v23, %v4797_v23  ;;  %v2912_v40 = vmul.f32 %v4815_v46, %v4815_v46 }
 0x3f2   : > { %v2855_v10 = vadd.f32 %v2854_v5, %v4761_v28  ;;  %v2952_v57 = vadd.f32 %v2908_v51, %v2907_v15  ;;  %v2914_v51 = vmul.f32 %v4861_v29, %v4861_v29 }
 0x3f4   : > { %v2856_v35 = vadd.f32 %v2855_v10, %v4779_v31  ;;  %v2953_v14 = vadd.f32 %v2952_v57, %v2909_v19  ;;  %v2913_v10 = vmul.f32 %v4838_v33, %v4838_v33  ;;  %v2915_v57 = vmul.f32 %v4888_v12, %v4888_v12 }
 0x3f6   : > { %v2857_v38 = vadd.f32 %v2856_v35, %v4797_v23  ;;  %v2954_v5 = vadd.f32 %v2953_v14, %v2910_v58  ;;  %v2916_v14 = vmul.f32 %v4915_v30, %v4915_v30 }
 0x3f8   : > { %v2858_v61 = vadd.f32 %v2857_v38, %v4815_v46  ;;  %v2955_v3 = vadd.f32 %v2954_v5, %v2911_v22 }
 0x3fa   : > { %v2859_v13 = vadd.f32 %v2858_v61, %v4838_v33  ;;  %v2956_v35 = vadd.f32 %v2955_v3, %v2912_v40  ;;  %v2918_v40 = vmul.f32 %v4969_v20, %v4969_v20 }
 0x3fc   : > { %v2860_v15 = vadd.f32 %v2859_v13, %v4861_v29  ;;  %v2957_v38 = vadd.f32 %v2956_v35, %v2913_v10  ;;  %v2917_v13 = vmul.f32 %v4942_v37, %v4942_v37  ;;  %v2919_v35 = vmul.f32 %v4994_v60, %v4994_v60 }
 0x3fe   : > { %v2861_v19 = vadd.f32 %v2860_v15, %v4888_v12  ;;  %v2958_v61 = vadd.f32 %v2957_v38, %v2914_v51  ;;  %v2920_v38 = vmul.f32 %v5011_v2, %v5011_v2 }
 0x400   : > { %v2862_v58 = vadd.f32 %v2861_v19, %v4915_v30  ;;  %v2959_v5 = vadd.f32 %v2958_v61, %v2915_v57  ;;  %v2921_v61 = vmul.f32 %v5028_v16, %v5028_v16 }
 0x402   : > { %v2863_v22 = vadd.f32 %v2862_v58, %v4942_v37  ;;  %v2960_v15 = vadd.f32 %v2959_v5, %v2916_v14  ;;  %v2922_v5 = vmul.f32 %v5044_v36, %v5044_v36 }
 0x404   : > { %v2864_v3 = vadd.f32 %v2863_v22, %v4969_v20  ;;  %v2961_v19 = vadd.f32 %v2960_v15, %v2917_v13  ;;  %v2923_v15 = vmul.f32 %v5056_v24, %v5056_v24 }
 0x406   : > { %v2865_v10 = vadd.f32 %v2864_v3, %v4994_v60  ;;  %v2962_v58 = vadd.f32 %v2961_v19, %v2918_v40  ;;  %v2924_v19 = vmul.f32 %v5068_v1, %v5068_v1 }
 0x408   : > { %v2866_v51 = vadd.f32 %v2865_v10, %v5011_v2  ;;  %v2963_v22 = vadd.f32 %v2962_v58, %v2919_v35  ;;  %v2925_v58 = vmul.f32 %v5080_v41, %v5080_v41 }
 0x40a   : > { %v2867_v57 = vadd.f32 %v2866_v51, %v5028_v16  ;;  %v2964_v3 = vadd.f32 %v2963_v22, %v2920_v38  ;;  %v2926_v22 = vmul.f32 %v5092_v39, %v5092_v39 }
 0x40c   : > { %v2868_v14 = vadd.f32 %v2867_v57, %v5044_v36  ;;  %v2965_v10 = vadd.f32 %v2964_v3, %v2921_v61  ;;  %v2927_v3 = vmul.f32 %v5104_v7, %v5104_v7 }
 0x40e   : > { %v2869_v13 = vadd.f32 %v2868_v14, %v5056_v24  ;;  %v2966_v51 = vadd.f32 %v2965_v10, %v2922_v5  ;;  %v2928_v10 = vmul.f32 %v5116_v56, %v5116_v56 }
 0x410   : > { %v2870_v40 = vadd.f32 %v2869_v13, %v5068_v1  ;;  %v2967_v57 = vadd.f32 %v2966_v51, %v2923_v15  ;;  %v2929_v51 = vmul.f32 %v5128_v42, %v5128_v42 }
 0x412   : > { %v2871_v35 = vadd.f32 %v2870_v40, %v5080_v41  ;;  %v2968_v14 = vadd.f32 %v2967_v57, %v2924_v19  ;;  %v2930_v57 = vmul.f32 %v5140_v63, %v5140_v63 }
 0x414   : > { %v2872_v38 = vadd.f32 %v2871_v35, %v5092_v39  ;;  %v2969_v13 = vadd.f32 %v2968_v14, %v2925_v58  ;;  %v2931_v14 = vmul.f32 %v5152_v32, %v5152_v32 }
 0x416   : > { %v2873_v61 = vadd.f32 %v2872_v38, %v5104_v7  ;;  %v2970_v40 = vadd.f32 %v2969_v13, %v2926_v22  ;;  %v2932_v13 = vmul.f32 %v5164_v47, %v5164_v47 }
 0x418   : > { %v2874_v5 = vadd.f32 %v2873_v61, %v5116_v56  ;;  %v2971_v35 = vadd.f32 %v2970_v40, %v2927_v3  ;;  %v2933_v40 = vmul.f32 %v5175_v9, %v5175_v9 }
 0x41a   : > { %v2875_v15 = vadd.f32 %v2874_v5, %v5128_v42  ;;  %v2972_v38 = vadd.f32 %v2971_v35, %v2928_v10  ;;  %v2934_v35 = vmul.f32 %v5186_v34, %v5186_v34 }
 0x41c   : > { %v2876_v19 = vadd.f32 %v2875_v15, %v5140_v63  ;;  %v2973_v61 = vadd.f32 %v2972_v38, %v2929_v51  ;;  %v2935_v38 = vmul.f32 %v5194_v45, %v5194_v45 }
 0x41e   : > { %v2877_v58 = vadd.f32 %v2876_v19, %v5152_v32  ;;  %v2974_v5 = vadd.f32 %v2973_v61, %v2930_v57  ;;  %v2936_v61 = vmul.f32 %v5202_v26, %v5202_v26 }
 0x420   : > { %v2878_v22 = vadd.f32 %v2877_v58, %v5164_v47  ;;  %v2975_v15 = vadd.f32 %v2974_v5, %v2931_v14  ;;  %v2937_v5 = vmul.f32 %v5210_v48, %v5210_v48 }
 0x422   : > { %v2879_v3 = vadd.f32 %v2878_v22, %v5175_v9  ;;  %v2976_v19 = vadd.f32 %v2975_v15, %v2932_v13  ;;  %v2938_v15 = vmul.f32 %v5218_v18, %v5218_v18 }
 0x424   : > { %v2880_v10 = vadd.f32 %v2879_v3, %v5186_v34  ;;  %v2977_v58 = vadd.f32 %v2976_v19, %v2933_v40  ;;  %v2939_v19 = vmul.f32 %v5226_v50, %v5226_v50 }
 0x426   : > { %v2881_v51 = vadd.f32 %v2880_v10, %v5194_v45  ;;  %v2978_v22 = vadd.f32 %v2977_v58, %v2934_v35  ;;  %v2940_v58 = vmul.f32 %v5234_v52, %v5234_v52 }
 0x428   : > { %v2882_v57 = vadd.f32 %v2881_v51, %v5202_v26  ;;  %v2979_v3 = vadd.f32 %v2978_v22, %v2935_v38  ;;  %v2941_v22 = vmul.f32 %v5242_v49, %v5242_v49 }
 0x42a   : > { %v2883_v14 = vadd.f32 %v2882_v57, %v5210_v48  ;;  %v2980_v10 = vadd.f32 %v2979_v3, %v2936_v61  ;;  %v2942_v3 = vmul.f32 %v5250_v11, %v5250_v11 }
 0x42c   : > { %v2884_v13 = vadd.f32 %v2883_v14, %v5218_v18  ;;  %v2981_v51 = vadd.f32 %v2980_v10, %v2937_v5  ;;  %v2943_v10 = vmul.f32 %v5258_v4, %v5258_v4 }
 0x42e   : > { %v2885_v40 = vadd.f32 %v2884_v13, %v5226_v50  ;;  %v2982_v57 = vadd.f32 %v2981_v51, %v2938_v15  ;;  %v2944_v51 = vmul.f32 %v5266_v53, %v5266_v53 }
 0x430   : > { %v2886_v35 = vadd.f32 %v2885_v40, %v5234_v52  ;;  %v2983_v14 = vadd.f32 %v2982_v57, %v2939_v19  ;;  %v2945_v57 = vmul.f32 %v5274_v59, %v5274_v59 }
 0x432   : > { %v2887_v38 = vadd.f32 %v2886_v35, %v5242_v49  ;;  %v2984_v13 = vadd.f32 %v2983_v14, %v2940_v58  ;;  %v2946_v14 = vmul.f32 %v5282_v8, %v5282_v8 }
 0x434   : > { %v2888_v61 = vadd.f32 %v2887_v38, %v5250_v11  ;;  %v2985_v40 = vadd.f32 %v2984_v13, %v2941_v22  ;;  %v2947_v13 = vmul.f32 %v5290_v17, %v5290_v17 }
 0x436   : > { %v2889_v5 = vadd.f32 %v2888_v61, %v5258_v4  ;;  %v2986_v35 = vadd.f32 %v2985_v40, %v2942_v3  ;;  %v2948_v40 = vmul.f32 %v5298_v25, %v5298_v25 }
 0x438   : > { %v2890_v15 = vadd.f32 %v2889_v5, %v5266_v53  ;;  %v2987_v38 = vadd.f32 %v2986_v35, %v2943_v10  ;;  %v2949_v35 = vmul.f32 %v5306_v54, %v5306_v54 }
 0x43a   : > { %v2891_v19 = vadd.f32 %v2890_v15, %v5274_v59  ;;  %v2988_v61 = vadd.f32 %v2987_v38, %v2944_v51  ;;  %v2950_v38 = vmul.f32 %v5314_v21, %v5314_v21 }
 0x43c   : > { %v2892_v58 = vadd.f32 %v2891_v19, %v5282_v8  ;;  %v2989_v5 = vadd.f32 %v2988_v61, %v2945_v57  ;;  %v2951_v61 = vmul.f32 %v5321_v6, %v5321_v6 }
 0x43e   : > { %v2893_v22 = vadd.f32 %v2892_v58, %v5290_v17  ;;  %v2990_v15 = vadd.f32 %v2989_v5, %v2946_v14 }
 0x440   : > { %v2894_v3 = vadd.f32 %v2893_v22, %v5298_v25  ;;  %v2991_v19 = vadd.f32 %v2990_v15, %v2947_v13 }
 0x442   : > { %v2895_v10 = vadd.f32 %v2894_v3, %v5306_v54  ;;  %v2992_v58 = vadd.f32 %v2991_v19, %v2948_v40 }
 0x444   : > { %v2896_v51 = vadd.f32 %v2895_v10, %v5314_v21  ;;  %v2993_v22 = vadd.f32 %v2992_v58, %v2949_v35  ;;  %v2853_v10 = vld [vmem:[#allocation2] sm:$0x1] }
 0x446   : > { %v2897_v57 = vadd.f32 %v2896_v51, %v5321_v6  ;;  %v2994_v14 = vadd.f32 %v2993_v22, %v2950_v38  ;;  %v2906_v51 = vld [vmem:[#allocation3] sm:$0x1] }
 0x448   : > { %v2898_v43 = vrot.slane %v2897_v57, 4  ;;  %v2995_v3 = vadd.f32 %v2994_v14, %v2951_v61 }
 0x44a   : > { %v2899_v5 = vadd.f32 %v2898_v43, %v2897_v57  ;;  %v2996_v62 = vrot.slane %v2995_v3, 4 }
 0x44c   : > { %v2900_v55 = vrot.slane %v2899_v5, 2  ;;  %v2997_v13 = vadd.f32 %v2996_v62, %v2995_v3 }
 0x44e   : > { %v2901_v54 = vadd.f32 %v2900_v55, %v2899_v5  ;;  %v2998_v25 = vrot.slane %v2997_v13, 2 }
 0x450   : > { %v2902_v15 = vrot.slane %v2901_v54, 1  ;;  %v2999_v21 = vadd.f32 %v2998_v25, %v2997_v13 }
 0x452   : > { %v2903_v17 = vadd.f32 %v2902_v15, %v2901_v54  ;;  %v3000_v19 = vrot.slane %v2999_v21, 1 }
 0x454   : > { %v2904_v40 = vadd.f32 %v2903_v17, %v2853_v10  ;;  %v3001_v8 = vadd.f32 %v3000_v19, %v2999_v21 }
 0x456   : > { %2905 = vst [vmem:[#allocation2] sm:$0x1] %v2904_v40  ;;  %v3002_v6 = vadd.f32 %v3001_v8, %v2906_v51 }
 0x458   : > { %3003 = vst [vmem:[#allocation3] sm:$0x1] %v3002_v6 }
 0x459 PF: > { %p3473_p11 = scmp.ne.s32.totalorder %s3600_s19, 1 }
 0x45b   : > { %3007 = sbr.rel (%p3473_p11) target bundleno = 1209 (0x4b9), region = 52 }
 0x460   : > { %v3008_v43 = vld [vmem:[#allocation2] sm:$0x1]  ;;  %v3010_v62 = vld [vmem:[#allocation3] sm:$0x1]  ;;  %v3616_v55 = vmov 0.0  }
 0x461   : > { %3216 = vst [vmem:[%s3689_s8] sm:$0xff] %v3616_v55  ;;  %v3009_v17 = vmul.f32 0.001953125, %v3008_v43  ;;  %v3011_v25 = vmul.f32 0.001953125, %v3010_v62  ;;  %v3014_v61 = vld [vmem:[%s5763_s2] sm:$0x1] }
 0x462   : > { %3217 = vst [vmem:[%s3689_s8 + $0x8] sm:$0xff] %v3616_v55  ;;  %v3027_v3 = vld [vmem:[%s5764_s3] sm:$0x1] }
 0x463   : > { %3218 = vst [vmem:[%s3689_s8 + $0x10] sm:$0xff] %v3616_v55  ;;  %v3012_v8 = vmul.f32 %v3009_v17, %v3009_v17 }
 0x464   : > { %3219 = vst [vmem:[%s3689_s8 + $0x180] sm:$0xff] %v3616_v55 }
 0x465   : > { %3220 = vst [vmem:[%s3689_s8 + $0x188] sm:$0xff] %v3616_v55  ;;  %v3013_v54 = vsub.f32 %v3011_v25, %v3012_v8 }
 0x466   : > { %3221 = vst [vmem:[%s3689_s8 + $0x190] sm:$0xff] %v3616_v55 }
 0x467   : > { %v3015_v21 = vadd.f32 1e-05, %v3013_v54 }
 0x469   : > { %3572 = vrsqrt.f32 %v3015_v21  ;;  %vm3022_vm9 = vweird.f32 %v3015_v21 }
 0x46f   : > { %v3573_v6 = vpop.eup %3572 }
 0x470   : > { %v3017_v35 = vmul.f32 %v3573_v6, %v3015_v21  ;;  %vm3023_vm0 = vweird.f32 %v3573_v6 }
 0x471   : > { %vm3024_vm14 = vmor %vm3022_vm9, %vm3023_vm0 }
 0x472   : > { %v3018_v38 = vmul.f32 %v3573_v6, %v3017_v35 }
 0x474   : > { %v3019_v58 = vmul.f32 0.5, %v3018_v38 }
 0x476   : > { %v3020_v57 = vsub.f32 1.5, %v3019_v58 }
 0x478   : > { %v3021_v22 = vmul.f32 %v3573_v6, %v3020_v57 }
 0x47a   : > { %v3025_v14 = vsel %vm3024_vm14, %v3573_v6, %v3021_v22 }
 0x47b   : > { %v3026_v5 = vmul.f32 %v3025_v14, %v3014_v61 }
 0x47d   : > { %v3028_v13 = vmul.f32 %v3026_v5, %v3009_v17  ;;  %v5472_v15 = vperm.slane %v3026_v5, 0 }
 0x47f   : > { %v3029_v10 = vsub.f32 %v3027_v3, %v3028_v13  ;;  %v3033_v40 = vmul.f32 %v5472_v15, %v4729_v0  ;;  %v3034_v19 = vmul.f32 %v5472_v15, %v4745_v27  ;;  %v3035_v51 = vmul.f32 %v5472_v15, %v4761_v28  ;;  %v5917_v13 = vld [vmem:[#allocation17_spill] sm:$0xff] }
 0x480   : > { %v3036_v43 = vmul.f32 %v5472_v15, %v4779_v31  ;;  %v3037_v62 = vmul.f32 %v5472_v15, %v4797_v23  ;;  %v3038_v55 = vmul.f32 %v5472_v15, %v4815_v46  ;;  %v3039_v17 = vmul.f32 %v5472_v15, %v4838_v33 }
 0x481   : > { %v5488_v25 = vperm.slane %v3029_v10, 0  ;;  %v3040_v0 = vmul.f32 %v5472_v15, %v4861_v29  ;;  %v3041_v27 = vmul.f32 %v5472_v15, %v4888_v12  ;;  %v3042_v28 = vmul.f32 %v5472_v15, %v4915_v30 }
 0x482   : > { %v3043_v31 = vmul.f32 %v5472_v15, %v4942_v37  ;;  %v3044_v23 = vmul.f32 %v5472_v15, %v4969_v20  ;;  %v3045_v33 = vmul.f32 %v5472_v15, %v4994_v60  ;;  %v3046_v46 = vmul.f32 %v5472_v15, %v5011_v2 }
 0x483   : > { %v3081_v29 = vadd.f32 %v5488_v25, %v3033_v40  ;;  %v3082_v8 = vadd.f32 %v5488_v25, %v3034_v19  ;;  %v3083_v12 = vadd.f32 %v5488_v25, %v3035_v51  ;;  %v3084_v30 = vadd.f32 %v5488_v25, %v3036_v43 }
 0x484   : > { %v3085_v54 = vadd.f32 %v5488_v25, %v3037_v62  ;;  %v3086_v37 = vadd.f32 %v5488_v25, %v3038_v55  ;;  %v3087_v20 = vadd.f32 %v5488_v25, %v3039_v17  ;;  %v3088_v60 = vadd.f32 %v5488_v25, %v3040_v0  ;;  %v5919_v17 = vld [vmem:[#allocation18_spill] sm:$0xff] }
 0x485   : > { %v3126_v21 = vmax.f32 %v3081_v29, 0.0  ;;  %v3127_v6 = vmax.f32 %v3082_v8, 0.0  ;;  %v3128_v2 = vmax.f32 %v3083_v12, 0.0  ;;  %v3129_v35 = vmax.f32 %v3084_v30, 0.0  ;;  %v5921_v29 = vld [vmem:[#allocation19_spill] sm:$0xff] }
 0x486   : > { %v3130_v38 = vmax.f32 %v3085_v54, 0.0  ;;  %v3131_v58 = vmax.f32 %v3086_v37, 0.0  ;;  %v3132_v57 = vmax.f32 %v3087_v20, 0.0  ;;  %v3133_v61 = vmax.f32 %v3088_v60, 0.0 }
 0x487   : > { %v3171_v14 = vsel %vm2760_vm2, %v3126_v21, 0.0  ;;  %v3172_v3 = vsel %vm2761_vm4, %v3127_v6, 0.0  ;;  %v3173_v10 = vsel %vm2762_vm6, %v3128_v2, 0.0  ;;  %v3174_v19 = vsel %vm2763_vm8, %v3129_v35, 0.0 }
 0x488   : > { %3222 = vst [vmem:[%s3689_s8 + $0x18] sm:$0xff] %v3171_v14  ;;  %v3175_v43 = vsel %vm2764_vm10, %v3130_v38, 0.0  ;;  %v3176_v55 = vsel %vm2765_vm12, %v3131_v58, 0.0  ;;  %v3177_v0 = vsel %vm2766_vm15, %v3132_v57, 0.0  ;;  %v3178_v8 = vsel %vm2767_vm3, %v3133_v61, 0.0  ;;  %v5933_v57 = vld [vmem:[#allocation25_spill] sm:$0xff] }
 0x489   : > { %3223 = vst [vmem:[%s3689_s8 + $0x20] sm:$0xff] %v3172_v3  ;;  %v3089_v12 = vadd.f32 %v5488_v25, %v3041_v27  ;;  %v3090_v30 = vadd.f32 %v5488_v25, %v3042_v28  ;;  %v3091_v54 = vadd.f32 %v5488_v25, %v3043_v31  ;;  %v3092_v37 = vadd.f32 %v5488_v25, %v3044_v23 }
 0x48a   : > { %3224 = vst [vmem:[%s3689_s8 + $0x28] sm:$0xff] %v3173_v10  ;;  %v3093_v20 = vadd.f32 %v5488_v25, %v3045_v33  ;;  %v3094_v60 = vadd.f32 %v5488_v25, %v3046_v46  ;;  %v3047_v21 = vmul.f32 %v5472_v15, %v5028_v16  ;;  %v3048_v6 = vmul.f32 %v5472_v15, %v5044_v36  ;;  %v5929_v16 = vld [vmem:[#allocation23_spill] sm:$0xff]  ;;  %v5931_v36 = vld [vmem:[#allocation24_spill] sm:$0xff] }
 0x48b   : > { %3225 = vst [vmem:[%s3689_s8 + $0x30] sm:$0xff] %v3174_v19  ;;  %v3134_v27 = vmax.f32 %v3089_v12, 0.0  ;;  %v3135_v28 = vmax.f32 %v3090_v30, 0.0  ;;  %v3136_v2 = vmax.f32 %v3091_v54, 0.0  ;;  %v3137_v31 = vmax.f32 %v3092_v37, 0.0 }
 0x48c   : > { %3226 = vst [vmem:[%s3689_s8 + $0x38] sm:$0xff] %v3175_v43  ;;  %v3138_v23 = vmax.f32 %v3093_v20, 0.0  ;;  %v3139_v35 = vmax.f32 %v3094_v60, 0.0  ;;  %v3095_v33 = vadd.f32 %v5488_v25, %v3047_v21  ;;  %v3096_v46 = vadd.f32 %v5488_v25, %v3048_v6 }
 0x48d   : > { %3227 = vst [vmem:[%s3689_s8 + $0x40] sm:$0xff] %v3176_v55  ;;  %v3179_v38 = vsel %vm2768_vm11, %v3134_v27, 0.0  ;;  %v3180_v58 = vsel %vm2769_vm1, %v3135_v28, 0.0  ;;  %v3181_v61 = vsel %vm2770_vm13, %v3136_v2, 0.0  ;;  %v3182_v14 = vsel %vm2771_vm7, %v3137_v31, 0.0 }
 0x48e   : > { %3228 = vst [vmem:[%s3689_s8 + $0x48] sm:$0xff] %v3177_v0  ;;  %v3183_v3 = vsel %vm2772_vm5, %v3138_v23, 0.0  ;;  %vm5918_vm2 = vcmp.eq.s32.totalorder %v5917_v13, 1  ;;  %v3140_v40 = vmax.f32 %v3095_v33, 0.0  ;;  %v3141_v19 = vmax.f32 %v3096_v46, 0.0  ;;  %v5927_v33 = vld [vmem:[#allocation22_spill] sm:$0xff] }
 0x48f   : > { %v3184_v10 = vsel %vm5918_vm2, %v3139_v35, 0.0  ;;  %3229 = vst [vmem:[%s3689_s8 + $0x50] sm:$0xff] %v3178_v8  ;;  %v3049_v51 = vmul.f32 %v5472_v15, %v5056_v24  ;;  %v3050_v43 = vmul.f32 %v5472_v15, %v5068_v1  ;;  %v3051_v62 = vmul.f32 %v5472_v15, %v5080_v41 }
 0x490   : > { %v3052_v55 = vmul.f32 %v5472_v15, %v5092_v39  ;;  %3230 = vst [vmem:[%s3689_s8 + $0x58] sm:$0xff] %v3179_v38  ;;  %vm5920_vm4 = vcmp.eq.s32.totalorder %v5919_v17, 1  ;;  %vm5922_vm6 = vcmp.eq.s32.totalorder %v5921_v29, 1  ;;  %v3053_v24 = vmul.f32 %v5472_v15, %v5104_v7 }
 0x491   : > { %v3185_v0 = vsel %vm5920_vm4, %v3140_v40, 0.0  ;;  %v3186_v8 = vsel %vm5922_vm6, %v3141_v19, 0.0  ;;  %v3054_v1 = vmul.f32 %v5472_v15, %v5116_v56  ;;  %3231 = vst [vmem:[%s3689_s8 + $0x60] sm:$0xff] %v3180_v58  ;;  %v3097_v41 = vadd.f32 %v5488_v25, %v3049_v51  ;;  %v5935_v40 = vld [vmem:[#allocation26_spill] sm:$0xff]  ;;  %v5937_v51 = vld [vmem:[#allocation27_spill] sm:$0xff] }
 0x492   : > { %v3098_v39 = vadd.f32 %v5488_v25, %v3050_v43  ;;  %v3099_v12 = vadd.f32 %v5488_v25, %v3051_v62  ;;  %v3100_v30 = vadd.f32 %v5488_v25, %v3052_v55  ;;  %3232 = vst [vmem:[%s3689_s8 + $0x68] sm:$0xff] %v3181_v61  ;;  %v3101_v54 = vadd.f32 %v5488_v25, %v3053_v24 }
 0x493   : > { %v3102_v37 = vadd.f32 %v5488_v25, %v3054_v1  ;;  %v3055_v7 = vmul.f32 %v5472_v15, %v5128_v42  ;;  %v3056_v56 = vmul.f32 %v5472_v15, %v5140_v63  ;;  %3233 = vst [vmem:[%s3689_s8 + $0x70] sm:$0xff] %v3182_v14  ;;  %v3142_v20 = vmax.f32 %v3097_v41, 0.0  ;;  %v5923_v42 = vld [vmem:[#allocation20_spill] sm:$0xff]  ;;  %v5925_v63 = vld [vmem:[#allocation21_spill] sm:$0xff] }
 0x494   : > { %v3143_v60 = vmax.f32 %v3098_v39, 0.0  ;;  %v3144_v21 = vmax.f32 %v3099_v12, 0.0  ;;  %v3145_v6 = vmax.f32 %v3100_v30, 0.0  ;;  %3234 = vst [vmem:[%s3689_s8 + $0x78] sm:$0xff] %v3183_v3  ;;  %v3146_v27 = vmax.f32 %v3101_v54, 0.0 }
 0x495   : > { %v3147_v28 = vmax.f32 %v3102_v37, 0.0  ;;  %v3103_v2 = vadd.f32 %v5488_v25, %v3055_v7  ;;  %v3104_v31 = vadd.f32 %v5488_v25, %v3056_v56  ;;  %3235 = vst [vmem:[%s3689_s8 + $0x80] sm:$0xff] %v3184_v10  ;;  %vm5924_vm8 = vcmp.eq.s32.totalorder %v5923_v42, 1  ;;  %v5941_v37 = vld [vmem:[#allocation29_spill] sm:$0xff]  ;;  %v5943_v7 = vld [vmem:[#allocation30_spill] sm:$0xff] }
 0x496   : > { %v3187_v23 = vsel %vm5924_vm8, %v3142_v20, 0.0  ;;  %vm5926_vm10 = vcmp.eq.s32.totalorder %v5925_v63, 1  ;;  %vm5928_vm12 = vcmp.eq.s32.totalorder %v5927_v33, 1  ;;  %vm5930_vm15 = vcmp.eq.s32.totalorder %v5929_v16, 1  ;;  %3236 = vst [vmem:[%s3689_s8 + $0x88] sm:$0xff] %v3185_v0  ;;  %v5945_v20 = vld [vmem:[#allocation31_spill] sm:$0xff] }
 0x497   : > { %v3188_v35 = vsel %vm5926_vm10, %v3143_v60, 0.0  ;;  %v3189_v46 = vsel %vm5928_vm12, %v3144_v21, 0.0  ;;  %v3190_v38 = vsel %vm5930_vm15, %v3145_v6, 0.0  ;;  %vm5932_vm3 = vcmp.eq.s32.totalorder %v5931_v36, 1  ;;  %3237 = vst [vmem:[%s3689_s8 + $0x90] sm:$0xff] %v3186_v8  ;;  %v5947_v21 = vld [vmem:[#allocation32_spill] sm:$0xff] }
 0x498   : > { %v3191_v58 = vsel %vm5932_vm3, %v3146_v27, 0.0  ;;  %vm5934_vm11 = vcmp.eq.s32.totalorder %v5933_v57, 1  ;;  %v3148_v22 = vmax.f32 %v3103_v2, 0.0  ;;  %v3149_v14 = vmax.f32 %v3104_v31, 0.0  ;;  %3238 = vst [vmem:[%s3689_s8 + $0x98] sm:$0xff] %v3187_v23  ;;  %v5949_v63 = vld [vmem:[#allocation33_spill] sm:$0xff] }
 0x499   : > { %v3192_v61 = vsel %vm5934_vm11, %v3147_v28, 0.0  ;;  %v3057_v5 = vmul.f32 %v5472_v15, %v5152_v32  ;;  %v3058_v3 = vmul.f32 %v5472_v15, %v5164_v47  ;;  %v3059_v13 = vmul.f32 %v5472_v15, %v5175_v9  ;;  %3239 = vst [vmem:[%s3689_s8 + $0xa0] sm:$0xff] %v3188_v35 }
 0x49a   : > { %v3060_v10 = vmul.f32 %v5472_v15, %v5186_v34  ;;  %vm5936_vm1 = vcmp.eq.s32.totalorder %v5935_v40, 1  ;;  %vm5938_vm13 = vcmp.eq.s32.totalorder %v5937_v51, 1  ;;  %v3061_v32 = vmul.f32 %v5472_v15, %v5194_v45  ;;  %3240 = vst [vmem:[%s3689_s8 + $0xa8] sm:$0xff] %v3189_v46 }
 0x49b   : > { %v3193_v19 = vsel %vm5936_vm1, %v3148_v22, 0.0  ;;  %v3194_v43 = vsel %vm5938_vm13, %v3149_v14, 0.0  ;;  %v3062_v47 = vmul.f32 %v5472_v15, %v5202_v26  ;;  %v3105_v9 = vadd.f32 %v5488_v25, %v3057_v5  ;;  %3241 = vst [vmem:[%s3689_s8 + $0xb0] sm:$0xff] %v3190_v38  ;;  %v5952_v38 = vld [vmem:[#allocation43_spill] sm:$0xff] }
 0x49c   : > { %v3106_v34 = vadd.f32 %v5488_v25, %v3058_v3  ;;  %v3107_v62 = vadd.f32 %v5488_v25, %v3059_v13  ;;  %v3108_v55 = vadd.f32 %v5488_v25, %v3060_v10  ;;  %v3109_v17 = vadd.f32 %v5488_v25, %v3061_v32  ;;  %3242 = vst [vmem:[%s3689_s8 + $0xb8] sm:$0xff] %v3191_v58  ;;  %v5953_v58 = vld [vmem:[#allocation34_spill] sm:$0xff] }
 0x49d   : > { %v3110_v0 = vadd.f32 %v5488_v25, %v3062_v47  ;;  %v3063_v45 = vmul.f32 %v5472_v15, %v5210_v48  ;;  %v3064_v26 = vmul.f32 %v5472_v15, %v5218_v18  ;;  %v3150_v29 = vmax.f32 %v3105_v9, 0.0  ;;  %3243 = vst [vmem:[%s3689_s8 + $0xc0] sm:$0xff] %v3192_v61  ;;  %v5939_v48 = vld [vmem:[#allocation28_spill] sm:$0xff] }
 0x49e   : > { %v3151_v8 = vmax.f32 %v3106_v34, 0.0  ;;  %v3152_v24 = vmax.f32 %v3107_v62, 0.0  ;;  %v3153_v1 = vmax.f32 %v3108_v55, 0.0  ;;  %v3154_v41 = vmax.f32 %v3109_v17, 0.0  ;;  %3244 = vst [vmem:[%s3689_s8 + $0xc8] sm:$0xff] %v3193_v19  ;;  %v5957_v19 = vld [vmem:[#allocation36_spill] sm:$0xff] }
 0x49f   : > { %v3155_v39 = vmax.f32 %v3110_v0, 0.0  ;;  %v3111_v12 = vadd.f32 %v5488_v25, %v3063_v45  ;;  %v3112_v30 = vadd.f32 %v5488_v25, %v3064_v26  ;;  %vm5940_vm7 = vcmp.eq.s32.totalorder %v5939_v48, 1  ;;  %3245 = vst [vmem:[%s3689_s8 + $0xd0] sm:$0xff] %v3194_v43  ;;  %v5959_v43 = vld [vmem:[#allocation37_spill] sm:$0xff]  ;;  %v5962_v55 = vld [vmem:[#allocation47_spill] sm:$0xff] }
 0x4a0   : > { %v3195_v54 = vsel %vm5940_vm7, %v3150_v29, 0.0  ;;  %vm5942_vm5 = vcmp.eq.s32.totalorder %v5941_v37, 1  ;;  %vm5944_vm14 = vcmp.eq.s32.totalorder %v5943_v7, 1  ;;  %vm5946_vm9 = vcmp.eq.s32.totalorder %v5945_v20, 1  ;;  %v5961_v34 = vld [vmem:[#allocation45_spill] sm:$0xff]  ;;  %v5964_v26 = vld [vmem:[#allocation51_spill] sm:$0xff] }
 0x4a1   : > { %v3196_v18 = vsel %vm5942_vm5, %v3151_v8, 0.0  ;;  %v3197_v56 = vsel %vm5944_vm14, %v3152_v24, 0.0  ;;  %v3198_v60 = vsel %vm5946_vm9, %v3153_v1, 0.0  ;;  %vm5948_vm0 = vcmp.eq.s32.totalorder %v5947_v21, 1  ;;  %3246 = vst [vmem:[%s3689_s8 + $0xd8] sm:$0xff] %v3195_v54  ;;  %v5963_v0 = vld [vmem:[#allocation49_spill] sm:$0xff] }
 0x4a2   : > { %v3199_v6 = vsel %vm5948_vm0, %v3154_v41, 0.0  ;;  %v3156_v27 = vmax.f32 %v3111_v12, 0.0  ;;  %v3157_v28 = vmax.f32 %v3112_v30, 0.0  ;;  %v3065_v2 = vmul.f32 %v5472_v15, %v5226_v50  ;;  %3247 = vst [vmem:[%s3689_s8 + $0xe0] sm:$0xff] %v3196_v18  ;;  %v5965_v8 = vld [vmem:[#allocation38_spill] sm:$0xff]  ;;  %v5967_v1 = vld [vmem:[#allocation39_spill] sm:$0xff] }
 0x4a3   : > { %v3066_v31 = vmul.f32 %v5472_v15, %v5234_v52  ;;  %v3067_v42 = vmul.f32 %v5472_v15, %v5242_v49  ;;  %v3068_v23 = vmul.f32 %v5472_v15, %v5250_v11  ;;  %vm5950_vm2 = vcmp.eq.s32.totalorder %v5949_v63, 1  ;;  %3248 = vst [vmem:[%s3689_s8 + $0xe8] sm:$0xff] %v3197_v56  ;;  %v5969_v12 = vld [vmem:[#allocation53_spill] sm:$0xff]  ;;  %v5970_v7 = vld [vmem:[#allocation40_spill] sm:$0xff]  ;;  %v5978_v63 = vld [vmem:[#allocation46_spill] sm:$0xff] }
 0x4a4   : > { %v3200_v35 = vsel %vm5950_vm2, %v3155_v39, 0.0  ;;  %vm5951_vm4 = vcmp.eq.s32.totalorder %v5204_v44, 1  ;;  %v3069_v50 = vmul.f32 %v5472_v15, %v5258_v4  ;;  %v3070_v52 = vmul.f32 %v5472_v15, %v5266_v53  ;;  %3249 = vst [vmem:[%s3689_s8 + $0xf0] sm:$0xff] %v3198_v60 }
 0x4a5   : > { %v3201_v33 = vsel %vm5951_vm4, %v3156_v27, 0.0  ;;  %v3113_v49 = vadd.f32 %v5488_v25, %v3065_v2  ;;  %v3114_v11 = vadd.f32 %v5488_v25, %v3066_v31  ;;  %v3115_v46 = vadd.f32 %v5488_v25, %v3067_v42  ;;  %3250 = vst [vmem:[%s3689_s8 + $0xf8] sm:$0xff] %v3199_v6  ;;  %v5976_v42 = vld [vmem:[#allocation44_spill] sm:$0xff] }
 0x4a6   : > { %v3116_v16 = vadd.f32 %v5488_v25, %v3068_v23  ;;  %v3117_v44 = vadd.f32 %v5488_v25, %v3069_v50  ;;  %v3118_v4 = vadd.f32 %v5488_v25, %v3070_v52  ;;  %v3071_v53 = vmul.f32 %v5472_v15, %v5274_v59  ;;  %3251 = vst [vmem:[%s3689_s8 + $0x100] sm:$0xff] %v3200_v35  ;;  %v5955_v59 = vld [vmem:[#allocation35_spill] sm:$0xff]  ;;  %v5982_v52 = vld [vmem:[#allocation50_spill] sm:$0xff] }
 0x4a7   : > { %v3072_v36 = vmul.f32 %v5472_v15, %v5952_v38  ;;  %vm5954_vm6 = vcmp.eq.s32.totalorder %v5953_v58, 1  ;;  %v3158_v61 = vmax.f32 %v3113_v49, 0.0  ;;  %v3159_v22 = vmax.f32 %v3114_v11, 0.0  ;;  %3252 = vst [vmem:[%s3689_s8 + $0x108] sm:$0xff] %v3201_v33  ;;  %v5980_v33 = vld [vmem:[#allocation48_spill] sm:$0xff] }
 0x4a8   : > { %v3202_v57 = vsel %vm5954_vm6, %v3157_v28, 0.0  ;;  %v3160_v14 = vmax.f32 %v3115_v46, 0.0  ;;  %v3161_v5 = vmax.f32 %v3116_v16, 0.0  ;;  %v3162_v3 = vmax.f32 %v3117_v44, 0.0  ;;  %v5974_v28 = vld [vmem:[#allocation42_spill] sm:$0xff]  ;;  %v5984_v11 = vld [vmem:[#allocation52_spill] sm:$0xff] }
 0x4a9   : > { %v3119_v13 = vadd.f32 %v5488_v25, %v3071_v53  ;;  %v3120_v10 = vadd.f32 %v5488_v25, %v3072_v36  ;;  %vm5956_vm8 = vcmp.eq.s32.totalorder %v5955_v59, 1  ;;  %vm5958_vm10 = vcmp.eq.s32.totalorder %v5957_v19, 1  ;;  %3253 = vst [vmem:[%s3689_s8 + $0x110] sm:$0xff] %v3202_v57 }
 0x4aa   : > { %v3203_v40 = vsel %vm5956_vm8, %v3158_v61, 0.0  ;;  %v3204_v51 = vsel %vm5958_vm10, %v3159_v22, 0.0  ;;  %vm5960_vm12 = vcmp.eq.s32.totalorder %v5959_v43, 1  ;;  %v3163_v47 = vmax.f32 %v3118_v4, 0.0 }
 0x4ab   : > { %v3205_v32 = vsel %vm5960_vm12, %v3160_v14, 0.0  ;;  %v3164_v9 = vmax.f32 %v3119_v13, 0.0  ;;  %v3073_v62 = vmul.f32 %v5472_v15, %v5961_v34  ;;  %v3074_v17 = vmul.f32 %v5472_v15, %v5962_v55  ;;  %3254 = vst [vmem:[%s3689_s8 + $0x118] sm:$0xff] %v3203_v40 }
 0x4ac   : > { %v3075_v45 = vmul.f32 %v5472_v15, %v5963_v0  ;;  %v3076_v29 = vmul.f32 %v5472_v15, %v5964_v26  ;;  %vm5966_vm15 = vcmp.eq.s32.totalorder %v5965_v8, 1  ;;  %vm5968_vm3 = vcmp.eq.s32.totalorder %v5967_v1, 1  ;;  %3255 = vst [vmem:[%s3689_s8 + $0x120] sm:$0xff] %v3204_v51 }
 0x4ad   : > { %v3206_v24 = vsel %vm5966_vm15, %v3161_v5, 0.0  ;;  %v3207_v41 = vsel %vm5968_vm3, %v3162_v3, 0.0  ;;  %v3165_v39 = vmax.f32 %v3120_v10, 0.0  ;;  %v3077_v30 = vmul.f32 %v5472_v15, %v5969_v12  ;;  %3256 = vst [vmem:[%s3689_s8 + $0x128] sm:$0xff] %v3205_v32  ;;  %v5972_v15 = vld [vmem:[#allocation41_spill] sm:$0xff] }
 0x4ae   : > { %v3121_v48 = vadd.f32 %v5488_v25, %v3073_v62  ;;  %v3122_v54 = vadd.f32 %v5488_v25, %v3074_v17  ;;  %v3123_v37 = vadd.f32 %v5488_v25, %v3075_v45  ;;  %v3124_v18 = vadd.f32 %v5488_v25, %v3076_v29  ;;  %3257 = vst [vmem:[%s3689_s8 + $0x130] sm:$0xff] %v3206_v24 }
 0x4af   : > { %vm5971_vm11 = vcmp.eq.s32.totalorder %v5970_v7, 1  ;;  %v3125_v20 = vadd.f32 %v5488_v25, %v3077_v30  ;;  %vm5973_vm1 = vcmp.eq.s32.totalorder %v5972_v15, 1  ;;  %3258 = vst [vmem:[%s3689_s8 + $0x138] sm:$0xff] %v3207_v41  ;;  %vm5975_vm13 = vcmp.eq.s32.totalorder %v5974_v28, 1 }
 0x4b0   : > { %v3208_v56 = vsel %vm5971_vm11, %v3163_v47, 0.0  ;;  %v3209_v60 = vsel %vm5973_vm1, %v3164_v9, 0.0  ;;  %v3166_v21 = vmax.f32 %v3121_v48, 0.0  ;;  %v3167_v6 = vmax.f32 %v3122_v54, 0.0 }
 0x4b1   : > { %v3168_v27 = vmax.f32 %v3123_v37, 0.0  ;;  %v3210_v2 = vsel %vm5975_vm13, %v3165_v39, 0.0  ;;  %v3169_v31 = vmax.f32 %v3124_v18, 0.0  ;;  %3259 = vst [vmem:[%s3689_s8 + $0x140] sm:$0xff] %v3208_v56  ;;  %vm5977_vm7 = vcmp.eq.s32.totalorder %v5976_v42, 1 }
 0x4b2   : > { %v3211_v25 = vsel %vm5977_vm7, %v3166_v21, 0.0  ;;  %v3170_v23 = vmax.f32 %v3125_v20, 0.0  ;;  %3260 = vst [vmem:[%s3689_s8 + $0x148] sm:$0xff] %v3209_v60  ;;  %vm5979_vm5 = vcmp.eq.s32.totalorder %v5978_v63, 1  ;;  %vm5981_vm14 = vcmp.eq.s32.totalorder %v5980_v33, 1 }
 0x4b3   : > { %v3212_v35 = vsel %vm5979_vm5, %v3167_v6, 0.0  ;;  %3261 = vst [vmem:[%s3689_s8 + $0x150] sm:$0xff] %v3210_v2  ;;  %v3213_v50 = vsel %vm5981_vm14, %v3168_v27, 0.0  ;;  %vm5983_vm9 = vcmp.eq.s32.totalorder %v5982_v52, 1  ;;  %vm5985_vm0 = vcmp.eq.s32.totalorder %v5984_v11, 1 }
 0x4b4   : > { %3262 = vst [vmem:[%s3689_s8 + $0x158] sm:$0xff] %v3211_v25  ;;  %v3214_v49 = vsel %vm5983_vm9, %v3169_v31, 0.0  ;;  %v3215_v46 = vsel %vm5985_vm0, %v3170_v23, 0.0 }
 0x4b5   : > { %3263 = vst [vmem:[%s3689_s8 + $0x160] sm:$0xff] %v3212_v35 }
 0x4b6   : > { %3264 = vst [vmem:[%s3689_s8 + $0x168] sm:$0xff] %v3213_v50 }
 0x4b7   : > { %3265 = vst [vmem:[%s3689_s8 + $0x170] sm:$0xff] %v3214_v49 }
 0x4b8   : > { %3266 = vst [vmem:[%s3689_s8 + $0x178] sm:$0xff] %v3215_v46 }
 0x4b9 PF: > { %s15_s22 = sadd.s32 1, %s3612_s22   ;;  %s5986_s18 = smov %s3604_s20 }
 0x4ba   : > { %p12_p12 = scmp.ge.s32.totalorder %s15_s22, 6   ;;  %s5987_s19 = smov %s3608_s21 }
 0x4bb   : > { %s5988_s20 = smov %s5991_s23  ;;  %s5989_s21 = smov %s5995_s24 }
 0x4bc   :  { %14 = sbr.rel (!%p12_p12) target bundleno = 3 (0x3), region = 90 }

</bundles_post_ra>
